<compile_context>
chip_gen: v7x
topology: tpu7x:2x2x1
jax: 0.10.0
libtpu: 0.0.40
codegen_flags: <defaults>
</compile_context>

<pallas_src>
import functools

import jax
import jax.numpy as jnp
from jax.experimental import pallas as pl
from jax.experimental.pallas import tpu as pltpu


# ----------------------------------------------------------------------------
# Small helpers
# ----------------------------------------------------------------------------

def _silu(x):
    # Exact SiLU (review: avoid approx reciprocal to keep parity with reference).
    return x / (1.0 + jnp.exp(-x))


def _cdiv(a, b):
    return -(-a // b)


def _row_tile(n, target=512):
    """Row tile (multiple of 8) for flattened (N, D) dense kernels."""
    if n >= target:
        return target
    return max(8, _cdiv(n, 8) * 8)


def _pad_rows(x2d, tile):
    n = x2d.shape[0]
    npad = _cdiv(n, tile) * tile
    if npad != n:
        x2d = jnp.pad(x2d, ((0, npad - n), (0, 0)))
    return x2d, n


def _lane_tile(L, target=512):
    """L (lane-axis) tile for the cross-attention grid."""
    if L <= target or L % 128 != 0:
        return L
    for t in range(target, 127, -128):
        if L % t == 0:
            return t
    return L


def _const_spec(shape):
    """BlockSpec for resident weights/biases: constant index_map, single-buffered."""
    zeros = (0,) * len(shape)
    idx = lambda *args: zeros
    try:
        return pl.BlockSpec(shape, idx, pipeline_mode=pl.Buffered(1))
    except Exception:                     # older jax without pipeline_mode
        return pl.BlockSpec(shape, idx)


def _cparams(sems, need_bytes):
    # Explicit scoped-VMEM limit: default is only 16/32 MiB; keep <= 56 MiB so
    # the same kernels also fit inside v7x's 64 MiB physical VMEM.
    limit = int(min(max(int(need_bytes) + (8 << 20), 32 << 20), 56 << 20))
    return pltpu.CompilerParams(dimension_semantics=tuple(sems),
                                vmem_limit_bytes=limit)


# ----------------------------------------------------------------------------
# Pallas kernels
# ----------------------------------------------------------------------------

def _norm_linear_kernel(x_ref, g_ref, w_ref, b_ref, o_ref, *, eps):
    # out = RMSNorm(x) @ W + b     (W resident bf16, f32 accumulation)
    x = x_ref[...].astype(jnp.float32)
    var = jnp.mean(x * x, axis=-1, keepdims=True)
    xn = (x * jax.lax.rsqrt(var + eps) * g_ref[...]).astype(jnp.bfloat16)
    acc = jnp.dot(xn, w_ref[...], preferred_element_type=jnp.float32)
    o_ref[...] = (acc + b_ref[...]).astype(o_ref.dtype)


def pallas_norm_linear(x2d, gamma, w, b, eps, out_dtype=None):
    N, D = x2d.shape
    Dout = w.shape[1]
    out_dtype = out_dtype or x2d.dtype
    tile = _row_tile(N)
    xp, n = _pad_rows(x2d, tile)
    Np = xp.shape[0]
    o_item = jnp.dtype(out_dtype).itemsize
    need = 2 * tile * (D * 4 + Dout * o_item) + D * Dout * 2 + (D + Dout) * 4
    out = pl.pallas_call(
        functools.partial(_norm_linear_kernel, eps=eps),
        out_shape=jax.ShapeDtypeStruct((Np, Dout), out_dtype),
        grid=(Np // tile,),
        in_specs=[pl.BlockSpec((tile, D), lambda i: (i, 0)),
                  _const_spec((1, D)),
                  _const_spec((D, Dout)),
                  _const_spec((1, Dout))],
        out_specs=pl.BlockSpec((tile, Dout), lambda i: (i, 0)),
        compiler_params=_cparams(("parallel",), need),
    )(xp, gamma.reshape(1, D), w, b.reshape(1, Dout))
    return out[:n] if Np != n else out


def _norm_linear_t_kernel(x_ref, g_ref, wt_ref, bt_ref, o_ref, *, eps):
    # out[0] = (RMSNorm(x) @ W + b)^T, computed directly in transposed layout:
    #   (Dout, L) = dot_general(W^T (Dout, D), xn (L, D)) contracting on D.
    x = x_ref[0].astype(jnp.float32)                              # (L, D)
    var = jnp.mean(x * x, axis=-1, keepdims=True)
    xn = (x * jax.lax.rsqrt(var + eps) * g_ref[...]).astype(jnp.bfloat16)
    acc = jax.lax.dot_general(wt_ref[...], xn, (((1,), (1,)), ((), ())),
                              preferred_element_type=jnp.float32)  # (Dout, L)
    o_ref[0] = (acc + bt_ref[...]).astype(o_ref.dtype)


def pallas_norm_linear_t(x3d, gamma, w_t, b, eps, out_dtype=jnp.bfloat16):
    # x3d: (R, L, D) -> (R, Dout, L); one MSA row per grid step.
    R, L, D = x3d.shape
    Dout = w_t.shape[0]
    need = 2 * (L * D * 4 + Dout * L * 2) + Dout * D * 2 + L * D * 4
    return pl.pallas_call(
        functools.partial(_norm_linear_t_kernel, eps=eps),
        out_shape=jax.ShapeDtypeStruct((R, Dout, L), out_dtype),
        grid=(R,),
        in_specs=[pl.BlockSpec((1, L, D), lambda r: (r, 0, 0)),
                  _const_spec((1, D)),
                  _const_spec((Dout, D)),
                  _const_spec((Dout, 1))],
        out_specs=pl.BlockSpec((1, Dout, L), lambda r: (r, 0, 0)),
        compiler_params=_cparams(("parallel",), need),
    )(x3d, gamma.reshape(1, D), w_t, b.reshape(Dout, 1))


def _linear_residual_kernel(x_ref, r_ref, w_ref, b_ref, o_ref):
    # out = r + x @ W + b
    acc = jnp.dot(x_ref[...].astype(jnp.bfloat16), w_ref[...],
                  preferred_element_type=jnp.float32)
    o_ref[...] = (acc + b_ref[...] + r_ref[...].astype(jnp.float32)).astype(o_ref.dtype)


def pallas_linear_residual(x2d, resid2d, w, b):
    N, Din = x2d.shape
    Dout = w.shape[1]
    tile = _row_tile(N)
    xp, n = _pad_rows(x2d, tile)
    rp, _ = _pad_rows(resid2d, tile)
    Np = xp.shape[0]
    x_item = jnp.dtype(x2d.dtype).itemsize
    need = 2 * tile * (Din * x_item + 2 * Dout * 4) + Din * Dout * 2 + Dout * 4
    out = pl.pallas_call(
        _linear_residual_kernel,
        out_shape=jax.ShapeDtypeStruct((Np, Dout), resid2d.dtype),
        grid=(Np // tile,),
        in_specs=[pl.BlockSpec((tile, Din), lambda i: (i, 0)),
                  pl.BlockSpec((tile, Dout), lambda i: (i, 0)),
                  _const_spec((Din, Dout)),
                  _const_spec((1, Dout))],
        out_specs=pl.BlockSpec((tile, Dout), lambda i: (i, 0)),
        compiler_params=_cparams(("parallel",), need),
    )(xp, rp, w, b.reshape(1, Dout))
    return out[:n] if Np != n else out


def _self_attn_kernel(qkv_ref, o_ref, *, nq, nkv, dh, scale):
    # Rt MSA rows at once; GQA K/V sharing in-kernel; scores via batched
    # dot_general (no explicit K transpose); per-head store-as-you-go.
    Dq = nq * dh
    Dkv = nkv * dh
    rep = nq // nkv
    for g in range(nkv):
        k_g = qkv_ref[:, :, Dq + g * dh: Dq + (g + 1) * dh]                 # (Rt,L,dh) bf16
        v_g = qkv_ref[:, :, Dq + Dkv + g * dh: Dq + Dkv + (g + 1) * dh]     # (Rt,L,dh) bf16
        for r in range(rep):
            h = g * rep + r
            q_h = qkv_ref[:, :, h * dh:(h + 1) * dh]                        # (Rt,L,dh) bf16
            s = jax.lax.dot_general(q_h, k_g, (((2,), (2,)), ((0,), (0,))),
                                    preferred_element_type=jnp.float32) * scale
            m = jnp.max(s, axis=-1, keepdims=True)
            p = jnp.exp(s - m)
            p = p / jnp.sum(p, axis=-1, keepdims=True)
            o_h = jax.lax.dot_general(p.astype(jnp.bfloat16), v_g,
                                      (((2,), (1,)), ((0,), (0,))),
                                      preferred_element_type=jnp.float32)   # (Rt,L,dh)
            o_ref[:, :, h * dh:(h + 1) * dh] = o_h.astype(o_ref.dtype)


def pallas_self_attention_core(qkv3d, nq, nkv, dh, scale):
    R, L, Dtot = qkv3d.shape
    Dq = nq * dh
    # Fatten the grid (8-16 rows/step) but cap so the (Rt, L, L) f32 score tile
    # stays <= ~8 MiB.  TODO(synk): flash-style L-tiling for very long L.
    rt = max(1, min(R, 16, (8 << 20) // max(1, L * L * 4)))
    Rp = _cdiv(R, rt) * rt
    qkv_p = jnp.pad(qkv3d, ((0, Rp - R), (0, 0), (0, 0))) if Rp != R else qkv3d
    itm = jnp.dtype(qkv3d.dtype).itemsize
    need = 2 * rt * L * (Dtot + Dq) * itm + rt * L * L * 4 + rt * L * Dq * 4
    out = pl.pallas_call(
        functools.partial(_self_attn_kernel, nq=nq, nkv=nkv, dh=dh, scale=scale),
        out_shape=jax.ShapeDtypeStruct((Rp, L, Dq), qkv3d.dtype),
        grid=(Rp // rt,),
        in_specs=[pl.BlockSpec((rt, L, Dtot), lambda r: (r, 0, 0))],
        out_specs=pl.BlockSpec((rt, L, Dq), lambda r: (r, 0, 0)),
        compiler_params=_cparams(("parallel",), need),
    )(qkv_p)
    return out[:R] if Rp != R else out


def _cross_attn_kernel(q_ref, kv_ref, o_ref, *, nq, nkv, dh, scale):
    # Transposed layout: q_ref (1, Dq, Lt), kv_ref (1, S, 2*Dkv, Lt).
    # Scores are (S, Lt): lanes fully dense, softmax reduces over the S/sublane
    # axis.  K/V are sliced from the ref per GQA group and stay bf16 in VMEM.
    rep = nq // nkv
    Dkv = nkv * dh
    for g in range(nkv):
        k_g = kv_ref[0, :, g * dh:(g + 1) * dh, :].astype(jnp.float32)            # (S,dh,Lt)
        v_g = kv_ref[0, :, Dkv + g * dh:Dkv + (g + 1) * dh, :].astype(jnp.float32)
        for r in range(rep):
            h = g * rep + r
            q_h = q_ref[0, h * dh:(h + 1) * dh, :].astype(jnp.float32) * scale    # (dh,Lt)
            s = jnp.sum(k_g * q_h[None, :, :], axis=1)                            # (S,Lt)
            m = jnp.max(s, axis=0, keepdims=True)                                 # (1,Lt)
            p = jnp.exp(s - m)
            p = p / jnp.sum(p, axis=0, keepdims=True)
            o_h = jnp.sum(p[:, None, :] * v_g, axis=0)                            # (dh,Lt)
            o_ref[0, h * dh:(h + 1) * dh, :] = o_h.astype(o_ref.dtype)


def pallas_cross_attention_core(q_t, kv_t, nq, nkv, dh, scale):
    # q_t: (B, Dq, L) bf16; kv_t: (B, S, 2*Dkv, L) bf16 -> (B, Dq, L) bf16.
    B, Dq, L = q_t.shape
    _, S, Dkv2, _ = kv_t.shape
    lt = _lane_tile(L)
    need = 2 * lt * (Dq * 2 + S * Dkv2 * 2 + Dq * 2) + S * lt * 4 * 4
    return pl.pallas_call(
        functools.partial(_cross_attn_kernel, nq=nq, nkv=nkv, dh=dh, scale=scale),
        out_shape=jax.ShapeDtypeStruct((B, Dq, L), q_t.dtype),
        grid=(B, L // lt),
        in_specs=[pl.BlockSpec((1, Dq, lt), lambda b, l: (b, 0, l)),
                  pl.BlockSpec((1, S, Dkv2, lt), lambda b, l: (b, 0, 0, l))],
        out_specs=pl.BlockSpec((1, Dq, lt), lambda b, l: (b, 0, l)),
        compiler_params=_cparams(("parallel", "parallel"), need),
    )(q_t, kv_t)


def _mlp_residual_norm_kernel(x_ref, w1_ref, b1_ref, w2_ref, b2_ref, g_ref, o_ref,
                              *, eps):
    # out = RMSNorm(MLP(x) + x)
    x = x_ref[...].astype(jnp.float32)
    h = jnp.dot(x.astype(jnp.bfloat16), w1_ref[...],
                preferred_element_type=jnp.float32) + b1_ref[...]
    h = _silu(h)
    y = jnp.dot(h.astype(jnp.bfloat16), w2_ref[...],
                preferred_element_type=jnp.float32) + b2_ref[...]
    y = y + x
    var = jnp.mean(y * y, axis=-1, keepdims=True)
    o_ref[...] = (y * jax.lax.rsqrt(var + eps) * g_ref[...]).astype(o_ref.dtype)


def pallas_mlp_residual_norm(x2d, w1, b1, w2, b2, gamma, eps):
    N, D = x2d.shape
    H = w1.shape[1]
    tile = _row_tile(N, target=256)      # smaller tile: fits v5e's 16 MiB scoped VMEM
    xp, n = _pad_rows(x2d, tile)
    Np = xp.shape[0]
    need = 2 * tile * (2 * D * 4) + tile * H * 4 + (D * H + H * D) * 2 + (H + 2 * D) * 4
    out = pl.pallas_call(
        functools.partial(_mlp_residual_norm_kernel, eps=eps),
        out_shape=jax.ShapeDtypeStruct((Np, D), x2d.dtype),
        grid=(Np // tile,),
        in_specs=[pl.BlockSpec((tile, D), lambda i: (i, 0)),
                  _const_spec((D, H)),
                  _const_spec((1, H)),
                  _const_spec((H, D)),
                  _const_spec((1, D)),
                  _const_spec((1, D))],
        out_specs=pl.BlockSpec((tile, D), lambda i: (i, 0)),
        compiler_params=_cparams(("parallel",), need),
    )(xp, w1, b1.reshape(1, H), w2, b2.reshape(1, D), gamma.reshape(1, D))
    return out[:n] if Np != n else out


def _convhydra_residual_norm_kernel(x_ref, w_in_ref, b_in_ref, cw_ref, cb_ref,
                                    w_out_ref, b_out_ref, g_ref, o_ref,
                                    *, E, d_conv, eps):
    # out = RMSNorm(ConvHydra(x) + x) for one batch element (main MSA row).
    x = x_ref[0].astype(jnp.float32)                              # (L, D)
    L = x.shape[0]
    xz = jnp.dot(x.astype(jnp.bfloat16), w_in_ref[...],
                 preferred_element_type=jnp.float32) + b_in_ref[...]   # (L, 2E)
    u = xz[:, :E]
    z = xz[:, E:]
    cw = cw_ref[...].astype(jnp.float32)                          # (d_conv, E)
    # Causal depthwise conv along L via XLU sublane rolls + masking:
    #   out[l] = sum_t cw[t] * u[l - (d_conv - 1 - t)]   (zero left padding)
    row = jax.lax.broadcasted_iota(jnp.int32, (L, E), 0)
    acc = u * cw[d_conv - 1:d_conv, :]                            # t = d_conv-1, shift 0
    for t in range(d_conv - 1):
        shift = d_conv - 1 - t
        shifted = pltpu.roll(u, shift=shift, axis=0)
        shifted = jnp.where(row >= shift, shifted, 0.0)
        acc = acc + shifted * cw[t:t + 1, :]
    acc = acc + cb_ref[...]
    y = _silu(acc) * _silu(z)                                     # SiLU conv path * SiLU gate
    out = jnp.dot(y.astype(jnp.bfloat16), w_out_ref[...],
                  preferred_element_type=jnp.float32) + b_out_ref[...]  # (L, D)
    out = out + x                                                 # residual
    var = jnp.mean(out * out, axis=-1, keepdims=True)
    o_ref[0] = (out * jax.lax.rsqrt(var + eps) * g_ref[...]).astype(o_ref.dtype)


def pallas_convhydra_residual_norm(x, p, gamma, eps, d_conv):
    # x: (B, L, D)
    # TODO(synk): add an L-tile axis with a (d_conv-1)-row halo carried in VMEM
    #             scratch to restore per-core pipelining on v7x for very long L.
    B, L, D = x.shape
    E = p['conv_w'].shape[1]
    need = (2 * 2 * L * D * 4 + D * 2 * E * 2 + E * D * 2
            + 3 * L * 2 * E * 4 + (2 * E + E + 2 * D) * 4)
    return pl.pallas_call(
        functools.partial(_convhydra_residual_norm_kernel, E=E, d_conv=d_conv, eps=eps),
        out_shape=jax.ShapeDtypeStruct((B, L, D), x.dtype),
        grid=(B,),
        in_specs=[pl.BlockSpec((1, L, D), lambda b: (b, 0, 0)),
                  _const_spec((D, 2 * E)),
                  _const_spec((1, 2 * E)),
                  _const_spec((d_conv, E)),
                  _const_spec((1, E)),
                  _const_spec((E, D)),
                  _const_spec((1, D)),
                  _const_spec((1, D))],
        out_specs=pl.BlockSpec((1, L, D), lambda b: (b, 0, 0)),
        compiler_params=_cparams(("parallel",), need),
    )(x, p['w_in'], p['b_in'].reshape(1, 2 * E),
      p['conv_w'], p['conv_b'].reshape(1, E),
      p['w_out'], p['b_out'].reshape(1, D),
      gamma.reshape(1, D))


# ----------------------------------------------------------------------------
# Module-level forward (glue in plain JAX, hot paths in Pallas)
# ----------------------------------------------------------------------------

def msa_cross_attention(x, p, cfg):
    # x: (B, S, L, D) -> (B, L, D): main-row (index 0) queries attend over rows.
    B, S, L, D = x.shape
    nq, nkv, dh = cfg['n_query'], cfg['n_kv'], cfg['d_attn']
    assert nq % nkv == 0, "GQA requires n_query % n_kv == 0"
    eps = cfg['norm_eps']
    Dq, Dkv = nq * dh, nkv * dh
    x_main = x[:, 0]                                               # residual, (B, L, D)

    # Fused RMSNorm + transposed K/V projection over all rows: (B*S, 2*Dkv, L) bf16.
    kv_t = pallas_norm_linear_t(x.reshape(B * S, L, D), p['norm_g'],
                                p['wkv_t'], p['bkv'], eps)
    kv_t = kv_t.reshape(B, S, 2 * Dkv, L)

    # Fused RMSNorm + transposed Q projection on the main row only: (B, Dq, L) bf16.
    q_t = pallas_norm_linear_t(x_main, p['norm_g'], p['wq_t'], p['bq'], eps)

    attn_t = pallas_cross_attention_core(q_t, kv_t, nq, nkv, dh, 1.0 / (dh ** 0.5))

    # Layout plumbing on the smallest tensor only, then fused out-proj + residual.
    attn = jnp.swapaxes(attn_t, 1, 2).reshape(B * L, Dq)
    out = pallas_linear_residual(attn, x_main.reshape(B * L, D), p['wo'], p['bo'])
    return out.reshape(B, L, D)


def msa_self_attention(x, p, cfg):
    # x: (B, S, L, D) -> (B, S, L, D): per-row self attention along L.
    B, S, L, D = x.shape
    nq, nkv, dh = cfg['n_query'], cfg['n_kv'], cfg['d_attn']
    assert nq % nkv == 0, "GQA requires n_query % n_kv == 0"
    eps = cfg['norm_eps']
    Dq, Dkv = nq * dh, nkv * dh
    Dtot = Dq + 2 * Dkv

    # Fused RMSNorm + QKV projection (pre-concatenated bf16 weight, bf16 output).
    qkv = pallas_norm_linear(x.reshape(-1, D), p['norm_g'], p['wqkv'], p['bqkv'],
                             eps, out_dtype=jnp.bfloat16)
    qkv = qkv.reshape(B * S, L, Dtot)

    attn = pallas_self_attention_core(qkv, nq, nkv, dh, 1.0 / (dh ** 0.5))  # (B*S, L, Dq) bf16

    out = pallas_linear_residual(attn.reshape(-1, Dq), x.reshape(-1, D),
                                 p['wo'], p['bo'])
    return out.reshape(B, S, L, D)


def block_forward(x, p, cfg):
    B, S, L, D = x.shape
    # x_main = msa_ca(x)
    x_main = msa_cross_attention(x, p['ca'], cfg)                  # (B, L, D)
    # x_out_main = norm1(convhydra(x_main) + x_main)   (fused Pallas kernel)
    x_out_main = pallas_convhydra_residual_norm(
        x_main, p['ch'], p['norm1_g'], cfg['norm_eps'], cfg['d_conv'])
    # x[:, 0, :, :] = x_out_main
    x = x.at[:, 0].set(x_out_main)
    # x_out = msa_sa(x)
    x_out = msa_self_attention(x, p['sa'], cfg)                    # (B, S, L, D)
    # return norm2(mlp(x_out) + x_out)   (fused Pallas kernel)
    y = pallas_mlp_residual_norm(
        x_out.reshape(-1, D), p['mlp']['w1'], p['mlp']['b1'],
        p['mlp']['w2'], p['mlp']['b2'], p['norm2_g'], cfg['norm_eps'])
    return y.reshape(B, S, L, D)


def model_forward(tokens, params, cfg, classification=False):
    x = jnp.take(params['embed'], tokens, axis=0)                  # (B, S, L, D) f32
    if classification:
        # Matches the PyTorch reference: x[0, 0, 0] = self.cls (batch 0 only).
        x = x.at[0, 0, 0].set(params['cls'])
    for bp in params['blocks']:
        x = block_forward(x, bp, cfg)
    return x


# ----------------------------------------------------------------------------
# Deterministic parameter init (weights pre-cast to bf16, pre-concatenated)
# ----------------------------------------------------------------------------

def _w(key, shape, scale=0.05):
    return jax.random.normal(key, shape, jnp.float32) * scale


def init_attention(key, D, nq, nkv, dh, cross):
    ks = jax.random.split(key, 4)
    Dq, Dkv = nq * dh, nkv * dh
    wq = _w(ks[0], (D, Dq))
    wk = _w(ks[1], (D, Dkv))
    wv = _w(ks[2], (D, Dkv))
    p = dict(
        norm_g=jnp.ones((D,), jnp.float32),
        wo=_w(ks[3], (Dq, D)).astype(jnp.bfloat16),
        bo=jnp.zeros((D,), jnp.float32),
        bq=jnp.zeros((Dq,), jnp.float32),
        bkv=jnp.zeros((2 * Dkv,), jnp.float32),
    )
    if cross:
        # Transposed projections for the lane-dense cross-attention layout.
        p['wq_t'] = wq.T.astype(jnp.bfloat16)                                  # (Dq, D)
        p['wkv_t'] = jnp.concatenate([wk, wv], axis=1).T.astype(jnp.bfloat16)  # (2Dkv, D)
    else:
        p['wqkv'] = jnp.concatenate([wq, wk, wv], axis=1).astype(jnp.bfloat16)
        p['bqkv'] = jnp.concatenate([p['bq'], p['bkv']], axis=0)
    return p


def init_convhydra(key, D, expand, d_conv):
    E = expand * D
    ks = jax.random.split(key, 3)
    return dict(
        w_in=_w(ks[0], (D, 2 * E)).astype(jnp.bfloat16),
        b_in=jnp.zeros((2 * E,), jnp.float32),
        conv_w=_w(ks[1], (d_conv, E)), conv_b=jnp.zeros((E,), jnp.float32),
        w_out=_w(ks[2], (E, D)).astype(jnp.bfloat16),
        b_out=jnp.zeros((D,), jnp.float32),
    )


def init_block(key, cfg):
    D = cfg['d_model']
    H = cfg['mlp_expand'] * D
    ks = jax.random.split(key, 5)
    return dict(
        ca=init_attention(ks[0], D, cfg['n_query'], cfg['n_kv'], cfg['d_attn'], cross=True),
        sa=init_attention(ks[1], D, cfg['n_query'], cfg['n_kv'], cfg['d_attn'], cross=False),
        ch=init_convhydra(ks[2], D, cfg['expand'], cfg['d_conv']),
        mlp=dict(w1=_w(ks[3], (D, H)).astype(jnp.bfloat16),
                 b1=jnp.zeros((H,), jnp.float32),
                 w2=_w(ks[4], (H, D)).astype(jnp.bfloat16),
                 b2=jnp.zeros((D,), jnp.float32)),
        norm1_g=jnp.ones((D,), jnp.float32),
        norm2_g=jnp.ones((D,), jnp.float32),
    )


def init_model(key, cfg):
    kemb, kcls, kblocks = jax.random.split(key, 3)
    blocks = [init_block(k, cfg)
              for k in jax.random.split(kblocks, cfg['n_layers'])]
    return dict(
        embed=_w(kemb, (cfg['vocab_size'], cfg['d_model']), scale=0.5),
        cls=jax.random.normal(kcls, (cfg['d_model'],), jnp.float32),
        blocks=blocks,
    )


# ----------------------------------------------------------------------------

if __name__ == "__main__":
    cfg = dict(
        n_layers=2, vocab_size=32, d_model=32,
        n_query=4, n_kv=2, d_attn=8,
        n_channels=4, kernel_size=3,   # see TODO(synk) in ConvHydra note
        expand=2, d_conv=4, mlp_expand=4,
        act='silu', norm_eps=1e-6, dropout_p=0.0,
    )
    B, S, L = 2, 4, 16   # batch, n_seqs (MSA rows), seq_len

    key = jax.random.PRNGKey(0)
    kparam, ktok = jax.random.split(key)
    params = init_model(kparam, cfg)
    tokens = jax.random.randint(ktok, (B, S, L), 0, cfg['vocab_size'], dtype=jnp.int32)

    fwd = jax.jit(functools.partial(model_forward, cfg=cfg, classification=False))
    out = fwd(tokens, params)
    out = jax.block_until_ready(out)
    assert out.shape == (B, S, L, cfg['d_model'])
    assert bool(jnp.all(jnp.isfinite(out)))
    print("KERNEL_OK")
</pallas_src>

<mosaic_0001>
module attributes {stable_mosaic.version = 11 : i64} {
  func.func @_linear_residual_kernel(%arg0: i32, %arg1: memref<32x32xbf16, #tpu.memory_space<vmem>>, %arg2: memref<32x32xf32, #tpu.memory_space<vmem>>, %arg3: memref<32x32xbf16, #tpu.memory_space<vmem>>, %arg4: memref<1x32xf32, #tpu.memory_space<vmem>>, %arg5: memref<32x32xf32, #tpu.memory_space<vmem>>) attributes {dimension_semantics = [#tpu.dimension_semantics<parallel>], iteration_bounds = array<i64: 1>, scalar_prefetch = 0 : i64, scratch_operands = 0 : i64, tpu.core_type = #tpu.core_type<tc>, window_params = [{transform_indices = @transform_0, window_bounds = array<i64: 32, 32>}, {transform_indices = @transform_1, window_bounds = array<i64: 32, 32>}, {pipeline_mode = #tpu.pipeline_mode<synchronous>, transform_indices = @transform_2, window_bounds = array<i64: 32, 32>}, {pipeline_mode = #tpu.pipeline_mode<synchronous>, transform_indices = @transform_3, window_bounds = array<i64: 1, 32>}, {transform_indices = @transform_4, window_bounds = array<i64: 32, 32>}]} {
    %c0 = arith.constant 0 : index
    %c0_0 = arith.constant 0 : index
    %0 = vector.load %arg1[%c0, %c0_0] : memref<32x32xbf16, #tpu.memory_space<vmem>>, vector<32x32xbf16>
    %c0_1 = arith.constant 0 : index
    %c0_2 = arith.constant 0 : index
    %1 = vector.load %arg3[%c0_1, %c0_2] : memref<32x32xbf16, #tpu.memory_space<vmem>>, vector<32x32xbf16>
    %cst = arith.constant dense<0.000000e+00> : vector<32x32xf32>
    %2 = tpu.matmul %0, %1, %cst {dimension_numbers = #tpu.dot_dimension_numbers<[1], [0], [0], [1], [0, 0, 1, 1], [], []>} : vector<32x32xbf16>, vector<32x32xbf16>, vector<32x32xf32> -> vector<32x32xf32>
    %c0_3 = arith.constant 0 : index
    %c0_4 = arith.constant 0 : index
    %3 = vector.load %arg4[%c0_3, %c0_4] : memref<1x32xf32, #tpu.memory_space<vmem>>, vector<1x32xf32>
    %4 = vector.broadcast %3 : vector<1x32xf32> to vector<32x32xf32>
    %5 = arith.addf %2, %4 : vector<32x32xf32>
    %c0_5 = arith.constant 0 : index
    %c0_6 = arith.constant 0 : index
    %6 = vector.load %arg2[%c0_5, %c0_6] : memref<32x32xf32, #tpu.memory_space<vmem>>, vector<32x32xf32>
    %7 = arith.addf %5, %6 : vector<32x32xf32>
    %c0_7 = arith.constant 0 : index
    %c0_8 = arith.constant 0 : index
    %8 = vector.load %arg5[%c0_7, %c0_8] : memref<32x32xf32, #tpu.memory_space<vmem>>, vector<32x32xf32>
    tpu.vector_store %arg5[%c0_7, %c0_8], %7 {strides = array<i32>} : memref<32x32xf32, #tpu.memory_space<vmem>>, vector<32x32xf32>,
    return
  }
  func.func @transform_0(%arg0: i32) -> (i32, i32) {
    %c0_i32 = arith.constant 0 : i32
    %c0_i32_0 = arith.constant 0 : i32
    return %arg0, %c0_i32 : i32, i32
  }
  func.func @transform_1(%arg0: i32) -> (i32, i32) {
    %c0_i32 = arith.constant 0 : i32
    %c0_i32_0 = arith.constant 0 : i32
    return %arg0, %c0_i32 : i32, i32
  }
  func.func @transform_2(%arg0: i32) -> (i32, i32) {
    %c0_i32 = arith.constant 0 : i32
    %c0_i32_0 = arith.constant 0 : i32
    %c0_i32_1 = arith.constant 0 : i32
    return %c0_i32, %c0_i32_0 : i32, i32
  }
  func.func @transform_3(%arg0: i32) -> (i32, i32) {
    %c0_i32 = arith.constant 0 : i32
    %c0_i32_0 = arith.constant 0 : i32
    %c0_i32_1 = arith.constant 0 : i32
    return %c0_i32, %c0_i32_0 : i32, i32
  }
  func.func @transform_4(%arg0: i32) -> (i32, i32) {
    %c0_i32 = arith.constant 0 : i32
    %c0_i32_0 = arith.constant 0 : i32
    return %arg0, %c0_i32 : i32, i32
  }
}

module attributes {stable_mosaic.version = 11 : i64} {
  func.func @_norm_linear_t_kernel(%arg0: i32, %arg1: memref<1x16x32xf32, #tpu.memory_space<vmem>>, %arg2: memref<1x32xf32, #tpu.memory_space<vmem>>, %arg3: memref<32x32xbf16, #tpu.memory_space<vmem>>, %arg4: memref<32x1xf32, #tpu.memory_space<vmem>>, %arg5: memref<1x32x16xbf16, #tpu.memory_space<vmem>>) attributes {dimension_semantics = [#tpu.dimension_semantics<parallel>], iteration_bounds = array<i64: 8>, scalar_prefetch = 0 : i64, scratch_operands = 0 : i64, tpu.core_type = #tpu.core_type<tc>, window_params = [{transform_indices = @transform_0, window_bounds = array<i64: 1, 16, 32>}, {pipeline_mode = #tpu.pipeline_mode<synchronous>, transform_indices = @transform_1, window_bounds = array<i64: 1, 32>}, {pipeline_mode = #tpu.pipeline_mode<synchronous>, transform_indices = @transform_2, window_bounds = array<i64: 32, 32>}, {pipeline_mode = #tpu.pipeline_mode<synchronous>, transform_indices = @transform_3, window_bounds = array<i64: 32, 1>}, {transform_indices = @transform_4, window_bounds = array<i64: 1, 32, 16>}]} {
    %c0 = arith.constant 0 : index
    %c0_0 = arith.constant 0 : index
    %c0_1 = arith.constant 0 : index
    %0 = vector.load %arg1[%c0, %c0_0, %c0_1] : memref<1x16x32xf32, #tpu.memory_space<vmem>>, vector<1x16x32xf32>
    %1 = vector.shape_cast %0 : vector<1x16x32xf32> to vector<16x32xf32>
    %2 = arith.mulf %1, %1 : vector<16x32xf32>
    %cst = arith.constant dense<0.000000e+00> : vector<16xf32>
    %3 = vector.multi_reduction <add>, %2, %cst [1] : vector<16x32xf32> to vector<16xf32>
    %4 = vector.shape_cast %3 : vector<16xf32> to vector<16x1xf32>
    %cst_2 = arith.constant 3.200000e+01 : f32
    %5 = vector.broadcast %cst_2 : f32 to vector<16x1xf32>
    %6 = arith.divf %4, %5 : vector<16x1xf32>
    %cst_3 = arith.constant 9.99999997E-7 : f32
    %7 = vector.broadcast %cst_3 : f32 to vector<16x1xf32>
    %8 = arith.addf %6, %7 : vector<16x1xf32>
    %9 = math.rsqrt %8 : vector<16x1xf32>
    %10 = vector.broadcast %9 : vector<16x1xf32> to vector<16x32xf32>
    %11 = arith.mulf %1, %10 : vector<16x32xf32>
    %c0_4 = arith.constant 0 : index
    %c0_5 = arith.constant 0 : index
    %12 = vector.load %arg2[%c0_4, %c0_5] : memref<1x32xf32, #tpu.memory_space<vmem>>, vector<1x32xf32>
    %13 = vector.broadcast %12 : vector<1x32xf32> to vector<16x32xf32>
    %14 = arith.mulf %11, %13 : vector<16x32xf32>
    %15 = arith.truncf %14 : vector<16x32xf32> to vector<16x32xbf16>
    %c0_6 = arith.constant 0 : index
    %c0_7 = arith.constant 0 : index
    %16 = vector.load %arg3[%c0_6, %c0_7] : memref<32x32xbf16, #tpu.memory_space<vmem>>, vector<32x32xbf16>
    %cst_8 = arith.constant dense<0.000000e+00> : vector<32x16xf32>
    %17 = tpu.matmul %16, %15, %cst_8 {dimension_numbers = #tpu.dot_dimension_numbers<[1], [1], [0], [0], [0, 0, 1, 0], [], []>} : vector<32x32xbf16>, vector<16x32xbf16>, vector<32x16xf32> -> vector<32x16xf32>
    %c0_9 = arith.constant 0 : index
    %c0_10 = arith.constant 0 : index
    %18 = vector.load %arg4[%c0_9, %c0_10] : memref<32x1xf32, #tpu.memory_space<vmem>>, vector<32x1xf32>
    %19 = vector.broadcast %18 : vector<32x1xf32> to vector<32x16xf32>
    %20 = arith.addf %17, %19 : vector<32x16xf32>
    %21 = arith.truncf %20 : vector<32x16xf32> to vector<32x16xbf16>
    %c0_11 = arith.constant 0 : index
    %c0_12 = arith.constant 0 : index
    %c0_13 = arith.constant 0 : index
    %22 = vector.load %arg5[%c0_11, %c0_12, %c0_13] : memref<1x32x16xbf16, #tpu.memory_space<vmem>>, vector<1x32x16xbf16>
    %23 = vector.shape_cast %22 : vector<1x32x16xbf16> to vector<32x16xbf16>
    %24 = vector.shape_cast %21 : vector<32x16xbf16> to vector<1x32x16xbf16>
    tpu.vector_store %arg5[%c0_11, %c0_12, %c0_13], %24 {strides = array<i32>} : memref<1x32x16xbf16, #tpu.memory_space<vmem>>, vector<1x32x16xbf16>,
    return
  }
  func.func @transform_0(%arg0: i32) -> (i32, i32, i32) {
    %c0_i32 = arith.constant 0 : i32
    %c0_i32_0 = arith.constant 0 : i32
    %c0_i32_1 = arith.constant 0 : i32
    return %arg0, %c0_i32, %c0_i32_0 : i32, i32, i32
  }
  func.func @transform_1(%arg0: i32) -> (i32, i32) {
    %c0_i32 = arith.constant 0 : i32
    %c0_i32_0 = arith.constant 0 : i32
    %c0_i32_1 = arith.constant 0 : i32
    return %c0_i32, %c0_i32_0 : i32, i32
  }
  func.func @transform_2(%arg0: i32) -> (i32, i32) {
    %c0_i32 = arith.constant 0 : i32
    %c0_i32_0 = arith.constant 0 : i32
    %c0_i32_1 = arith.constant 0 : i32
    return %c0_i32, %c0_i32_0 : i32, i32
  }
  func.func @transform_3(%arg0: i32) -> (i32, i32) {
    %c0_i32 = arith.constant 0 : i32
    %c0_i32_0 = arith.constant 0 : i32
    %c0_i32_1 = arith.constant 0 : i32
    return %c0_i32, %c0_i32_0 : i32, i32
  }
  func.func @transform_4(%arg0: i32) -> (i32, i32, i32) {
    %c0_i32 = arith.constant 0 : i32
    %c0_i32_0 = arith.constant 0 : i32
    %c0_i32_1 = arith.constant 0 : i32
    return %arg0, %c0_i32, %c0_i32_0 : i32, i32, i32
  }
}

module attributes {stable_mosaic.version = 11 : i64} {
  func.func @_cross_attn_kernel(%arg0: i32, %arg1: i32, %arg2: memref<1x32x16xbf16, #tpu.memory_space<vmem>>, %arg3: memref<1x4x32x16xbf16, #tpu.memory_space<vmem>>, %arg4: memref<1x32x16xbf16, #tpu.memory_space<vmem>>) attributes {dimension_semantics = [#tpu.dimension_semantics<parallel>, #tpu.dimension_semantics<parallel>], iteration_bounds = array<i64: 2, 1>, scalar_prefetch = 0 : i64, scratch_operands = 0 : i64, tpu.core_type = #tpu.core_type<tc>, window_params = [{transform_indices = @transform_0, window_bounds = array<i64: 1, 32, 16>}, {transform_indices = @transform_1, window_bounds = array<i64: 1, 4, 32, 16>}, {transform_indices = @transform_2, window_bounds = array<i64: 1, 32, 16>}]} {
    %c0 = arith.constant 0 : index
    %c0_0 = arith.constant 0 : index
    %c0_1 = arith.constant 0 : index
    %c0_2 = arith.constant 0 : index
    %0 = vector.load %arg3[%c0, %c0_0, %c0_1, %c0_2] : memref<1x4x32x16xbf16, #tpu.memory_space<vmem>>, vector<1x4x8x16xbf16>
    %1 = vector.shape_cast %0 : vector<1x4x8x16xbf16> to vector<4x8x16xbf16>
    %2 = arith.extf %1 : vector<4x8x16xbf16> to vector<4x8x16xf32>
    %c0_3 = arith.constant 0 : index
    %c0_4 = arith.constant 0 : index
    %c16 = arith.constant 16 : index
    %c0_5 = arith.constant 0 : index
    %3 = vector.load %arg3[%c0_3, %c0_4, %c16, %c0_5] : memref<1x4x32x16xbf16, #tpu.memory_space<vmem>>, vector<1x4x8x16xbf16>
    %4 = vector.shape_cast %3 : vector<1x4x8x16xbf16> to vector<4x8x16xbf16>
    %5 = arith.extf %4 : vector<4x8x16xbf16> to vector<4x8x16xf32>
    %c0_6 = arith.constant 0 : index
    %c0_7 = arith.constant 0 : index
    %c0_8 = arith.constant 0 : index
    %6 = vector.load %arg2[%c0_6, %c0_7, %c0_8] : memref<1x32x16xbf16, #tpu.memory_space<vmem>>, vector<1x8x16xbf16>
    %7 = vector.shape_cast %6 : vector<1x8x16xbf16> to vector<8x16xbf16>
    %8 = arith.extf %7 : vector<8x16xbf16> to vector<8x16xf32>
    %cst = arith.constant 0.353553385 : f32
    %9 = vector.broadcast %cst : f32 to vector<8x16xf32>
    %10 = arith.mulf %8, %9 : vector<8x16xf32>
    %11 = vector.shape_cast %10 : vector<8x16xf32> to vector<1x8x16xf32>
    %12 = vector.broadcast %11 : vector<1x8x16xf32> to vector<4x8x16xf32>
    %13 = arith.mulf %2, %12 : vector<4x8x16xf32>
    %cst_9 = arith.constant dense<0.000000e+00> : vector<4x16xf32>
    %14 = vector.multi_reduction <add>, %13, %cst_9 [1] : vector<4x8x16xf32> to vector<4x16xf32>
    %cst_10 = arith.constant dense<0xFF800000> : vector<16xf32>
    %15 = vector.multi_reduction <maximumf>, %14, %cst_10 [0] : vector<4x16xf32> to vector<16xf32>
    %16 = vector.shape_cast %15 : vector<16xf32> to vector<1x16xf32>
    %17 = vector.broadcast %16 : vector<1x16xf32> to vector<4x16xf32>
    %18 = arith.subf %14, %17 : vector<4x16xf32>
    %19 = math.exp %18 : vector<4x16xf32>
    %cst_11 = arith.constant dense<0.000000e+00> : vector<16xf32>
    %20 = vector.multi_reduction <add>, %19, %cst_11 [0] : vector<4x16xf32> to vector<16xf32>
    %21 = vector.shape_cast %20 : vector<16xf32> to vector<1x16xf32>
    %22 = vector.broadcast %21 : vector<1x16xf32> to vector<4x16xf32>
    %23 = arith.divf %19, %22 : vector<4x16xf32>
    %24 = vector.shape_cast %23 : vector<4x16xf32> to vector<4x1x16xf32>
    %25 = vector.broadcast %24 : vector<4x1x16xf32> to vector<4x8x16xf32>
    %26 = arith.mulf %25, %5 : vector<4x8x16xf32>
    %cst_12 = arith.constant dense<0.000000e+00> : vector<8x16xf32>
    %27 = vector.multi_reduction <add>, %26, %cst_12 [0] : vector<4x8x16xf32> to vector<8x16xf32>
    %28 = arith.truncf %27 : vector<8x16xf32> to vector<8x16xbf16>
    %c0_13 = arith.constant 0 : index
    %c0_14 = arith.constant 0 : index
    %c0_15 = arith.constant 0 : index
    %29 = vector.load %arg4[%c0_13, %c0_14, %c0_15] : memref<1x32x16xbf16, #tpu.memory_space<vmem>>, vector<1x8x16xbf16>
    %30 = vector.shape_cast %29 : vector<1x8x16xbf16> to vector<8x16xbf16>
    %31 = vector.shape_cast %28 : vector<8x16xbf16> to vector<1x8x16xbf16>
    tpu.vector_store %arg4[%c0_13, %c0_14, %c0_15], %31 {strides = array<i32>} : memref<1x32x16xbf16, #tpu.memory_space<vmem>>, vector<1x8x16xbf16>,
    %c0_16 = arith.constant 0 : index
    %c8 = arith.constant 8 : index
    %c0_17 = arith.constant 0 : index
    %32 = vector.load %arg2[%c0_16, %c8, %c0_17] : memref<1x32x16xbf16, #tpu.memory_space<vmem>>, vector<1x8x16xbf16>
    %33 = vector.shape_cast %32 : vector<1x8x16xbf16> to vector<8x16xbf16>
    %34 = arith.extf %33 : vector<8x16xbf16> to vector<8x16xf32>
    %cst_18 = arith.constant 0.353553385 : f32
    %35 = vector.broadcast %cst_18 : f32 to vector<8x16xf32>
    %36 = arith.mulf %34, %35 : vector<8x16xf32>
    %37 = vector.shape_cast %36 : vector<8x16xf32> to vector<1x8x16xf32>
    %38 = vector.broadcast %37 : vector<1x8x16xf32> to vector<4x8x16xf32>
    %39 = arith.mulf %2, %38 : vector<4x8x16xf32>
    %cst_19 = arith.constant dense<0.000000e+00> : vector<4x16xf32>
    %40 = vector.multi_reduction <add>, %39, %cst_19 [1] : vector<4x8x16xf32> to vector<4x16xf32>
    %cst_20 = arith.constant dense<0xFF800000> : vector<16xf32>
    %41 = vector.multi_reduction <maximumf>, %40, %cst_20 [0] : vector<4x16xf32> to vector<16xf32>
    %42 = vector.shape_cast %41 : vector<16xf32> to vector<1x16xf32>
    %43 = vector.broadcast %42 : vector<1x16xf32> to vector<4x16xf32>
    %44 = arith.subf %40, %43 : vector<4x16xf32>
    %45 = math.exp %44 : vector<4x16xf32>
    %cst_21 = arith.constant dense<0.000000e+00> : vector<16xf32>
    %46 = vector.multi_reduction <add>, %45, %cst_21 [0] : vector<4x16xf32> to vector<16xf32>
    %47 = vector.shape_cast %46 : vector<16xf32> to vector<1x16xf32>
    %48 = vector.broadcast %47 : vector<1x16xf32> to vector<4x16xf32>
    %49 = arith.divf %45, %48 : vector<4x16xf32>
    %50 = vector.shape_cast %49 : vector<4x16xf32> to vector<4x1x16xf32>
    %51 = vector.broadcast %50 : vector<4x1x16xf32> to vector<4x8x16xf32>
    %52 = arith.mulf %51, %5 : vector<4x8x16xf32>
    %cst_22 = arith.constant dense<0.000000e+00> : vector<8x16xf32>
    %53 = vector.multi_reduction <add>, %52, %cst_22 [0] : vector<4x8x16xf32> to vector<8x16xf32>
    %54 = arith.truncf %53 : vector<8x16xf32> to vector<8x16xbf16>
    %c0_23 = arith.constant 0 : index
    %c8_24 = arith.constant 8 : index
    %c0_25 = arith.constant 0 : index
    %55 = vector.load %arg4[%c0_23, %c8_24, %c0_25] : memref<1x32x16xbf16, #tpu.memory_space<vmem>>, vector<1x8x16xbf16>
    %56 = vector.shape_cast %55 : vector<1x8x16xbf16> to vector<8x16xbf16>
    %57 = vector.shape_cast %54 : vector<8x16xbf16> to vector<1x8x16xbf16>
    tpu.vector_store %arg4[%c0_23, %c8_24, %c0_25], %57 {strides = array<i32>} : memref<1x32x16xbf16, #tpu.memory_space<vmem>>, vector<1x8x16xbf16>,
    %c0_26 = arith.constant 0 : index
    %c0_27 = arith.constant 0 : index
    %c8_28 = arith.constant 8 : index
    %c0_29 = arith.constant 0 : index
    %58 = vector.load %arg3[%c0_26, %c0_27, %c8_28, %c0_29] : memref<1x4x32x16xbf16, #tpu.memory_space<vmem>>, vector<1x4x8x16xbf16>
    %59 = vector.shape_cast %58 : vector<1x4x8x16xbf16> to vector<4x8x16xbf16>
    %60 = arith.extf %59 : vector<4x8x16xbf16> to vector<4x8x16xf32>
    %c0_30 = arith.constant 0 : index
    %c0_31 = arith.constant 0 : index
    %c24 = arith.constant 24 : index
    %c0_32 = arith.constant 0 : index
    %61 = vector.load %arg3[%c0_30, %c0_31, %c24, %c0_32] : memref<1x4x32x16xbf16, #tpu.memory_space<vmem>>, vector<1x4x8x16xbf16>
    %62 = vector.shape_cast %61 : vector<1x4x8x16xbf16> to vector<4x8x16xbf16>
    %63 = arith.extf %62 : vector<4x8x16xbf16> to vector<4x8x16xf32>
    %c0_33 = arith.constant 0 : index
    %c16_34 = arith.constant 16 : index
    %c0_35 = arith.constant 0 : index
    %64 = vector.load %arg2[%c0_33, %c16_34, %c0_35] : memref<1x32x16xbf16, #tpu.memory_space<vmem>>, vector<1x8x16xbf16>
    %65 = vector.shape_cast %64 : vector<1x8x16xbf16> to vector<8x16xbf16>
    %66 = arith.extf %65 : vector<8x16xbf16> to vector<8x16xf32>
    %cst_36 = arith.constant 0.353553385 : f32
    %67 = vector.broadcast %cst_36 : f32 to vector<8x16xf32>
    %68 = arith.mulf %66, %67 : vector<8x16xf32>
    %69 = vector.shape_cast %68 : vector<8x16xf32> to vector<1x8x16xf32>
    %70 = vector.broadcast %69 : vector<1x8x16xf32> to vector<4x8x16xf32>
    %71 = arith.mulf %60, %70 : vector<4x8x16xf32>
    %cst_37 = arith.constant dense<0.000000e+00> : vector<4x16xf32>
    %72 = vector.multi_reduction <add>, %71, %cst_37 [1] : vector<4x8x16xf32> to vector<4x16xf32>
    %cst_38 = arith.constant dense<0xFF800000> : vector<16xf32>
    %73 = vector.multi_reduction <maximumf>, %72, %cst_38 [0] : vector<4x16xf32> to vector<16xf32>
    %74 = vector.shape_cast %73 : vector<16xf32> to vector<1x16xf32>
    %75 = vector.broadcast %74 : vector<1x16xf32> to vector<4x16xf32>
    %76 = arith.subf %72, %75 : vector<4x16xf32>
    %77 = math.exp %76 : vector<4x16xf32>
    %cst_39 = arith.constant dense<0.000000e+00> : vector<16xf32>
    %78 = vector.multi_reduction <add>, %77, %cst_39 [0] : vector<4x16xf32> to vector<16xf32>
    %79 = vector.shape_cast %78 : vector<16xf32> to vector<1x16xf32>
    %80 = vector.broadcast %79 : vector<1x16xf32> to vector<4x16xf32>
    %81 = arith.divf %77, %80 : vector<4x16xf32>
    %82 = vector.shape_cast %81 : vector<4x16xf32> to vector<4x1x16xf32>
    %83 = vector.broadcast %82 : vector<4x1x16xf32> to vector<4x8x16xf32>
    %84 = arith.mulf %83, %63 : vector<4x8x16xf32>
    %cst_40 = arith.constant dense<0.000000e+00> : vector<8x16xf32>
    %85 = vector.multi_reduction <add>, %84, %cst_40 [0] : vector<4x8x16xf32> to vector<8x16xf32>
    %86 = arith.truncf %85 : vector<8x16xf32> to vector<8x16xbf16>
    %c0_41 = arith.constant 0 : index
    %c16_42 = arith.constant 16 : index
    %c0_43 = arith.constant 0 : index
    %87 = vector.load %arg4[%c0_41, %c16_42, %c0_43] : memref<1x32x16xbf16, #tpu.memory_space<vmem>>, vector<1x8x16xbf16>
    %88 = vector.shape_cast %87 : vector<1x8x16xbf16> to vector<8x16xbf16>
    %89 = vector.shape_cast %86 : vector<8x16xbf16> to vector<1x8x16xbf16>
    tpu.vector_store %arg4[%c0_41, %c16_42, %c0_43], %89 {strides = array<i32>} : memref<1x32x16xbf16, #tpu.memory_space<vmem>>, vector<1x8x16xbf16>,
    %c0_44 = arith.constant 0 : index
    %c24_45 = arith.constant 24 : index
    %c0_46 = arith.constant 0 : index
    %90 = vector.load %arg2[%c0_44, %c24_45, %c0_46] : memref<1x32x16xbf16, #tpu.memory_space<vmem>>, vector<1x8x16xbf16>
    %91 = vector.shape_cast %90 : vector<1x8x16xbf16> to vector<8x16xbf16>
    %92 = arith.extf %91 : vector<8x16xbf16> to vector<8x16xf32>
    %cst_47 = arith.constant 0.353553385 : f32
    %93 = vector.broadcast %cst_47 : f32 to vector<8x16xf32>
    %94 = arith.mulf %92, %93 : vector<8x16xf32>
    %95 = vector.shape_cast %94 : vector<8x16xf32> to vector<1x8x16xf32>
    %96 = vector.broadcast %95 : vector<1x8x16xf32> to vector<4x8x16xf32>
    %97 = arith.mulf %60, %96 : vector<4x8x16xf32>
    %cst_48 = arith.constant dense<0.000000e+00> : vector<4x16xf32>
    %98 = vector.multi_reduction <add>, %97, %cst_48 [1] : vector<4x8x16xf32> to vector<4x16xf32>
    %cst_49 = arith.constant dense<0xFF800000> : vector<16xf32>
    %99 = vector.multi_reduction <maximumf>, %98, %cst_49 [0] : vector<4x16xf32> to vector<16xf32>
    %100 = vector.shape_cast %99 : vector<16xf32> to vector<1x16xf32>
    %101 = vector.broadcast %100 : vector<1x16xf32> to vector<4x16xf32>
    %102 = arith.subf %98, %101 : vector<4x16xf32>
    %103 = math.exp %102 : vector<4x16xf32>
    %cst_50 = arith.constant dense<0.000000e+00> : vector<16xf32>
    %104 = vector.multi_reduction <add>, %103, %cst_50 [0] : vector<4x16xf32> to vector<16xf32>
    %105 = vector.shape_cast %104 : vector<16xf32> to vector<1x16xf32>
    %106 = vector.broadcast %105 : vector<1x16xf32> to vector<4x16xf32>
    %107 = arith.divf %103, %106 : vector<4x16xf32>
    %108 = vector.shape_cast %107 : vector<4x16xf32> to vector<4x1x16xf32>
    %109 = vector.broadcast %108 : vector<4x1x16xf32> to vector<4x8x16xf32>
    %110 = arith.mulf %109, %63 : vector<4x8x16xf32>
    %cst_51 = arith.constant dense<0.000000e+00> : vector<8x16xf32>
    %111 = vector.multi_reduction <add>, %110, %cst_51 [0] : vector<4x8x16xf32> to vector<8x16xf32>
    %112 = arith.truncf %111 : vector<8x16xf32> to vector<8x16xbf16>
    %c0_52 = arith.constant 0 : index
    %c24_53 = arith.constant 24 : index
    %c0_54 = arith.constant 0 : index
    %113 = vector.load %arg4[%c0_52, %c24_53, %c0_54] : memref<1x32x16xbf16, #tpu.memory_space<vmem>>, vector<1x8x16xbf16>
    %114 = vector.shape_cast %113 : vector<1x8x16xbf16> to vector<8x16xbf16>
    %115 = vector.shape_cast %112 : vector<8x16xbf16> to vector<1x8x16xbf16>
    tpu.vector_store %arg4[%c0_52, %c24_53, %c0_54], %115 {strides = array<i32>} : memref<1x32x16xbf16, #tpu.memory_space<vmem>>, vector<1x8x16xbf16>,
    return
  }
  func.func @transform_0(%arg0: i32, %arg1: i32) -> (i32, i32, i32) {
    %c0_i32 = arith.constant 0 : i32
    %c0_i32_0 = arith.constant 0 : i32
    return %arg0, %c0_i32, %arg1 : i32, i32, i32
  }
  func.func @transform_1(%arg0: i32, %arg1: i32) -> (i32, i32, i32, i32) {
    %c0_i32 = arith.constant 0 : i32
    %c0_i32_0 = arith.constant 0 : i32
    %c0_i32_1 = arith.constant 0 : i32
    return %arg0, %c0_i32, %c0_i32_0, %arg1 : i32, i32, i32, i32
  }
  func.func @transform_2(%arg0: i32, %arg1: i32) -> (i32, i32, i32) {
    %c0_i32 = arith.constant 0 : i32
    %c0_i32_0 = arith.constant 0 : i32
    return %arg0, %c0_i32, %arg1 : i32, i32, i32
  }
}

module attributes {stable_mosaic.version = 11 : i64} {
  func.func @_norm_linear_t_kernel(%arg0: i32, %arg1: memref<1x16x32xf32, #tpu.memory_space<vmem>>, %arg2: memref<1x32xf32, #tpu.memory_space<vmem>>, %arg3: memref<32x32xbf16, #tpu.memory_space<vmem>>, %arg4: memref<32x1xf32, #tpu.memory_space<vmem>>, %arg5: memref<1x32x16xbf16, #tpu.memory_space<vmem>>) attributes {dimension_semantics = [#tpu.dimension_semantics<parallel>], iteration_bounds = array<i64: 2>, scalar_prefetch = 0 : i64, scratch_operands = 0 : i64, tpu.core_type = #tpu.core_type<tc>, window_params = [{transform_indices = @transform_0, window_bounds = array<i64: 1, 16, 32>}, {pipeline_mode = #tpu.pipeline_mode<synchronous>, transform_indices = @transform_1, window_bounds = array<i64: 1, 32>}, {pipeline_mode = #tpu.pipeline_mode<synchronous>, transform_indices = @transform_2, window_bounds = array<i64: 32, 32>}, {pipeline_mode = #tpu.pipeline_mode<synchronous>, transform_indices = @transform_3, window_bounds = array<i64: 32, 1>}, {transform_indices = @transform_4, window_bounds = array<i64: 1, 32, 16>}]} {
    %c0 = arith.constant 0 : index
    %c0_0 = arith.constant 0 : index
    %c0_1 = arith.constant 0 : index
    %0 = vector.load %arg1[%c0, %c0_0, %c0_1] : memref<1x16x32xf32, #tpu.memory_space<vmem>>, vector<1x16x32xf32>
    %1 = vector.shape_cast %0 : vector<1x16x32xf32> to vector<16x32xf32>
    %2 = arith.mulf %1, %1 : vector<16x32xf32>
    %cst = arith.constant dense<0.000000e+00> : vector<16xf32>
    %3 = vector.multi_reduction <add>, %2, %cst [1] : vector<16x32xf32> to vector<16xf32>
    %4 = vector.shape_cast %3 : vector<16xf32> to vector<16x1xf32>
    %cst_2 = arith.constant 3.200000e+01 : f32
    %5 = vector.broadcast %cst_2 : f32 to vector<16x1xf32>
    %6 = arith.divf %4, %5 : vector<16x1xf32>
    %cst_3 = arith.constant 9.99999997E-7 : f32
    %7 = vector.broadcast %cst_3 : f32 to vector<16x1xf32>
    %8 = arith.addf %6, %7 : vector<16x1xf32>
    %9 = math.rsqrt %8 : vector<16x1xf32>
    %10 = vector.broadcast %9 : vector<16x1xf32> to vector<16x32xf32>
    %11 = arith.mulf %1, %10 : vector<16x32xf32>
    %c0_4 = arith.constant 0 : index
    %c0_5 = arith.constant 0 : index
    %12 = vector.load %arg2[%c0_4, %c0_5] : memref<1x32xf32, #tpu.memory_space<vmem>>, vector<1x32xf32>
    %13 = vector.broadcast %12 : vector<1x32xf32> to vector<16x32xf32>
    %14 = arith.mulf %11, %13 : vector<16x32xf32>
    %15 = arith.truncf %14 : vector<16x32xf32> to vector<16x32xbf16>
    %c0_6 = arith.constant 0 : index
    %c0_7 = arith.constant 0 : index
    %16 = vector.load %arg3[%c0_6, %c0_7] : memref<32x32xbf16, #tpu.memory_space<vmem>>, vector<32x32xbf16>
    %cst_8 = arith.constant dense<0.000000e+00> : vector<32x16xf32>
    %17 = tpu.matmul %16, %15, %cst_8 {dimension_numbers = #tpu.dot_dimension_numbers<[1], [1], [0], [0], [0, 0, 1, 0], [], []>} : vector<32x32xbf16>, vector<16x32xbf16>, vector<32x16xf32> -> vector<32x16xf32>
    %c0_9 = arith.constant 0 : index
    %c0_10 = arith.constant 0 : index
    %18 = vector.load %arg4[%c0_9, %c0_10] : memref<32x1xf32, #tpu.memory_space<vmem>>, vector<32x1xf32>
    %19 = vector.broadcast %18 : vector<32x1xf32> to vector<32x16xf32>
    %20 = arith.addf %17, %19 : vector<32x16xf32>
    %21 = arith.truncf %20 : vector<32x16xf32> to vector<32x16xbf16>
    %c0_11 = arith.constant 0 : index
    %c0_12 = arith.constant 0 : index
    %c0_13 = arith.constant 0 : index
    %22 = vector.load %arg5[%c0_11, %c0_12, %c0_13] : memref<1x32x16xbf16, #tpu.memory_space<vmem>>, vector<1x32x16xbf16>
    %23 = vector.shape_cast %22 : vector<1x32x16xbf16> to vector<32x16xbf16>
    %24 = vector.shape_cast %21 : vector<32x16xbf16> to vector<1x32x16xbf16>
    tpu.vector_store %arg5[%c0_11, %c0_12, %c0_13], %24 {strides = array<i32>} : memref<1x32x16xbf16, #tpu.memory_space<vmem>>, vector<1x32x16xbf16>,
    return
  }
  func.func @transform_0(%arg0: i32) -> (i32, i32, i32) {
    %c0_i32 = arith.constant 0 : i32
    %c0_i32_0 = arith.constant 0 : i32
    %c0_i32_1 = arith.constant 0 : i32
    return %arg0, %c0_i32, %c0_i32_0 : i32, i32, i32
  }
  func.func @transform_1(%arg0: i32) -> (i32, i32) {
    %c0_i32 = arith.constant 0 : i32
    %c0_i32_0 = arith.constant 0 : i32
    %c0_i32_1 = arith.constant 0 : i32
    return %c0_i32, %c0_i32_0 : i32, i32
  }
  func.func @transform_2(%arg0: i32) -> (i32, i32) {
    %c0_i32 = arith.constant 0 : i32
    %c0_i32_0 = arith.constant 0 : i32
    %c0_i32_1 = arith.constant 0 : i32
    return %c0_i32, %c0_i32_0 : i32, i32
  }
  func.func @transform_3(%arg0: i32) -> (i32, i32) {
    %c0_i32 = arith.constant 0 : i32
    %c0_i32_0 = arith.constant 0 : i32
    %c0_i32_1 = arith.constant 0 : i32
    return %c0_i32, %c0_i32_0 : i32, i32
  }
  func.func @transform_4(%arg0: i32) -> (i32, i32, i32) {
    %c0_i32 = arith.constant 0 : i32
    %c0_i32_0 = arith.constant 0 : i32
    %c0_i32_1 = arith.constant 0 : i32
    return %arg0, %c0_i32, %c0_i32_0 : i32, i32, i32
  }
}

module attributes {stable_mosaic.version = 11 : i64} {
  func.func @_convhydra_residual_norm_kernel(%arg0: i32, %arg1: memref<1x16x32xf32, #tpu.memory_space<vmem>>, %arg2: memref<32x128xbf16, #tpu.memory_space<vmem>>, %arg3: memref<1x128xf32, #tpu.memory_space<vmem>>, %arg4: memref<4x64xf32, #tpu.memory_space<vmem>>, %arg5: memref<1x64xf32, #tpu.memory_space<vmem>>, %arg6: memref<64x32xbf16, #tpu.memory_space<vmem>>, %arg7: memref<1x32xf32, #tpu.memory_space<vmem>>, %arg8: memref<1x32xf32, #tpu.memory_space<vmem>>, %arg9: memref<1x16x32xf32, #tpu.memory_space<vmem>>) attributes {dimension_semantics = [#tpu.dimension_semantics<parallel>], iteration_bounds = array<i64: 2>, scalar_prefetch = 0 : i64, scratch_operands = 0 : i64, tpu.core_type = #tpu.core_type<tc>, window_params = [{transform_indices = @transform_0, window_bounds = array<i64: 1, 16, 32>}, {pipeline_mode = #tpu.pipeline_mode<synchronous>, transform_indices = @transform_1, window_bounds = array<i64: 32, 128>}, {pipeline_mode = #tpu.pipeline_mode<synchronous>, transform_indices = @transform_2, window_bounds = array<i64: 1, 128>}, {pipeline_mode = #tpu.pipeline_mode<synchronous>, transform_indices = @transform_3, window_bounds = array<i64: 4, 64>}, {pipeline_mode = #tpu.pipeline_mode<synchronous>, transform_indices = @transform_4, window_bounds = array<i64: 1, 64>}, {pipeline_mode = #tpu.pipeline_mode<synchronous>, transform_indices = @transform_5, window_bounds = array<i64: 64, 32>}, {pipeline_mode = #tpu.pipeline_mode<synchronous>, transform_indices = @transform_6, window_bounds = array<i64: 1, 32>}, {pipeline_mode = #tpu.pipeline_mode<synchronous>, transform_indices = @transform_7, window_bounds = array<i64: 1, 32>}, {transform_indices = @transform_8, window_bounds = array<i64: 1, 16, 32>}]} {
    %c0 = arith.constant 0 : index
    %c0_0 = arith.constant 0 : index
    %c0_1 = arith.constant 0 : index
    %0 = vector.load %arg1[%c0, %c0_0, %c0_1] : memref<1x16x32xf32, #tpu.memory_space<vmem>>, vector<1x16x32xf32>
    %1 = vector.shape_cast %0 : vector<1x16x32xf32> to vector<16x32xf32>
    %2 = arith.truncf %1 : vector<16x32xf32> to vector<16x32xbf16>
    %c0_2 = arith.constant 0 : index
    %c0_3 = arith.constant 0 : index
    %3 = vector.load %arg2[%c0_2, %c0_3] : memref<32x128xbf16, #tpu.memory_space<vmem>>, vector<32x128xbf16>
    %cst = arith.constant dense<0.000000e+00> : vector<16x128xf32>
    %4 = tpu.matmul %2, %3, %cst {dimension_numbers = #tpu.dot_dimension_numbers<[1], [0], [0], [1], [0, 0, 1, 1], [], []>} : vector<16x32xbf16>, vector<32x128xbf16>, vector<16x128xf32> -> vector<16x128xf32>
    %c0_4 = arith.constant 0 : index
    %c0_5 = arith.constant 0 : index
    %5 = vector.load %arg3[%c0_4, %c0_5] : memref<1x128xf32, #tpu.memory_space<vmem>>, vector<1x128xf32>
    %6 = vector.broadcast %5 : vector<1x128xf32> to vector<16x128xf32>
    %7 = arith.addf %4, %6 : vector<16x128xf32>
    %8 = vector.extract_strided_slice %7 {offsets = [0, 0], sizes = [16, 64], strides = [1, 1]} : vector<16x128xf32> to vector<16x64xf32>
    %9 = vector.extract_strided_slice %7 {offsets = [0, 64], sizes = [16, 64], strides = [1, 1]} : vector<16x128xf32> to vector<16x64xf32>
    %c0_6 = arith.constant 0 : index
    %c0_7 = arith.constant 0 : index
    %10 = vector.load %arg4[%c0_6, %c0_7] : memref<4x64xf32, #tpu.memory_space<vmem>>, vector<4x64xf32>
    %11 = tpu.iota {dimensions = array<i32: 0>} : vector<16x64xi32>
    %12 = vector.extract_strided_slice %10 {offsets = [3, 0], sizes = [1, 64], strides = [1, 1]} : vector<4x64xf32> to vector<1x64xf32>
    %13 = vector.broadcast %12 : vector<1x64xf32> to vector<16x64xf32>
    %14 = arith.mulf %8, %13 : vector<16x64xf32>
    %c3_i32 = arith.constant 3 : i32
    %15 = tpu.dynamic_rotate %8 by %c3_i32 dim 0 : vector<16x64xf32>, i32 -> vector<16x64xf32>
    %c3_i32_8 = arith.constant 3 : i32
    %16 = vector.broadcast %c3_i32_8 : i32 to vector<16x64xi32>
    %17 = arith.cmpi sge, %11, %16 : vector<16x64xi32>
    %cst_9 = arith.constant 0.000000e+00 : f32
    %18 = vector.broadcast %cst_9 : f32 to vector<16x64xf32>
    %19 = arith.select %17, %15, %18 : vector<16x64xi1>, vector<16x64xf32>
    %20 = vector.extract_strided_slice %10 {offsets = [0, 0], sizes = [1, 64], strides = [1, 1]} : vector<4x64xf32> to vector<1x64xf32>
    %21 = vector.broadcast %20 : vector<1x64xf32> to vector<16x64xf32>
    %22 = arith.mulf %19, %21 : vector<16x64xf32>
    %23 = arith.addf %14, %22 : vector<16x64xf32>
    %c2_i32 = arith.constant 2 : i32
    %24 = tpu.dynamic_rotate %8 by %c2_i32 dim 0 : vector<16x64xf32>, i32 -> vector<16x64xf32>
    %c2_i32_10 = arith.constant 2 : i32
    %25 = vector.broadcast %c2_i32_10 : i32 to vector<16x64xi32>
    %26 = arith.cmpi sge, %11, %25 : vector<16x64xi32>
    %cst_11 = arith.constant 0.000000e+00 : f32
    %27 = vector.broadcast %cst_11 : f32 to vector<16x64xf32>
    %28 = arith.select %26, %24, %27 : vector<16x64xi1>, vector<16x64xf32>
    %29 = vector.extract_strided_slice %10 {offsets = [1, 0], sizes = [1, 64], strides = [1, 1]} : vector<4x64xf32> to vector<1x64xf32>
    %30 = vector.broadcast %29 : vector<1x64xf32> to vector<16x64xf32>
    %31 = arith.mulf %28, %30 : vector<16x64xf32>
    %32 = arith.addf %23, %31 : vector<16x64xf32>
    %c1_i32 = arith.constant 1 : i32
    %33 = tpu.dynamic_rotate %8 by %c1_i32 dim 0 : vector<16x64xf32>, i32 -> vector<16x64xf32>
    %c1_i32_12 = arith.constant 1 : i32
    %34 = vector.broadcast %c1_i32_12 : i32 to vector<16x64xi32>
    %35 = arith.cmpi sge, %11, %34 : vector<16x64xi32>
    %cst_13 = arith.constant 0.000000e+00 : f32
    %36 = vector.broadcast %cst_13 : f32 to vector<16x64xf32>
    %37 = arith.select %35, %33, %36 : vector<16x64xi1>, vector<16x64xf32>
    %38 = vector.extract_strided_slice %10 {offsets = [2, 0], sizes = [1, 64], strides = [1, 1]} : vector<4x64xf32> to vector<1x64xf32>
    %39 = vector.broadcast %38 : vector<1x64xf32> to vector<16x64xf32>
    %40 = arith.mulf %37, %39 : vector<16x64xf32>
    %41 = arith.addf %32, %40 : vector<16x64xf32>
    %c0_14 = arith.constant 0 : index
    %c0_15 = arith.constant 0 : index
    %42 = vector.load %arg5[%c0_14, %c0_15] : memref<1x64xf32, #tpu.memory_space<vmem>>, vector<1x64xf32>
    %43 = vector.broadcast %42 : vector<1x64xf32> to vector<16x64xf32>
    %44 = arith.addf %41, %43 : vector<16x64xf32>
    %cst_16 = arith.constant 0.000000e+00 : f32
    %45 = vector.broadcast %cst_16 : f32 to vector<16x64xf32>
    %46 = arith.subf %45, %44 : vector<16x64xf32>
    %47 = math.exp %46 : vector<16x64xf32>
    %cst_17 = arith.constant 1.000000e+00 : f32
    %48 = vector.broadcast %cst_17 : f32 to vector<16x64xf32>
    %49 = arith.addf %48, %47 : vector<16x64xf32>
    %50 = arith.divf %44, %49 : vector<16x64xf32>
    %cst_18 = arith.constant 0.000000e+00 : f32
    %51 = vector.broadcast %cst_18 : f32 to vector<16x64xf32>
    %52 = arith.subf %51, %9 : vector<16x64xf32>
    %53 = math.exp %52 : vector<16x64xf32>
    %cst_19 = arith.constant 1.000000e+00 : f32
    %54 = vector.broadcast %cst_19 : f32 to vector<16x64xf32>
    %55 = arith.addf %54, %53 : vector<16x64xf32>
    %56 = arith.divf %9, %55 : vector<16x64xf32>
    %57 = arith.mulf %50, %56 : vector<16x64xf32>
    %58 = arith.truncf %57 : vector<16x64xf32> to vector<16x64xbf16>
    %c0_20 = arith.constant 0 : index
    %c0_21 = arith.constant 0 : index
    %59 = vector.load %arg6[%c0_20, %c0_21] : memref<64x32xbf16, #tpu.memory_space<vmem>>, vector<64x32xbf16>
    %cst_22 = arith.constant dense<0.000000e+00> : vector<16x32xf32>
    %60 = tpu.matmul %58, %59, %cst_22 {dimension_numbers = #tpu.dot_dimension_numbers<[1], [0], [0], [1], [0, 0, 1, 1], [], []>} : vector<16x64xbf16>, vector<64x32xbf16>, vector<16x32xf32> -> vector<16x32xf32>
    %c0_23 = arith.constant 0 : index
    %c0_24 = arith.constant 0 : index
    %61 = vector.load %arg7[%c0_23, %c0_24] : memref<1x32xf32, #tpu.memory_space<vmem>>, vector<1x32xf32>
    %62 = vector.broadcast %61 : vector<1x32xf32> to vector<16x32xf32>
    %63 = arith.addf %60, %62 : vector<16x32xf32>
    %64 = arith.addf %63, %1 : vector<16x32xf32>
    %65 = arith.mulf %64, %64 : vector<16x32xf32>
    %cst_25 = arith.constant dense<0.000000e+00> : vector<16xf32>
    %66 = vector.multi_reduction <add>, %65, %cst_25 [1] : vector<16x32xf32> to vector<16xf32>
    %67 = vector.shape_cast %66 : vector<16xf32> to vector<16x1xf32>
    %cst_26 = arith.constant 3.200000e+01 : f32
    %68 = vector.broadcast %cst_26 : f32 to vector<16x1xf32>
    %69 = arith.divf %67, %68 : vector<16x1xf32>
    %cst_27 = arith.constant 9.99999997E-7 : f32
    %70 = vector.broadcast %cst_27 : f32 to vector<16x1xf32>
    %71 = arith.addf %69, %70 : vector<16x1xf32>
    %72 = math.rsqrt %71 : vector<16x1xf32>
    %73 = vector.broadcast %72 : vector<16x1xf32> to vector<16x32xf32>
    %74 = arith.mulf %64, %73 : vector<16x32xf32>
    %c0_28 = arith.constant 0 : index
    %c0_29 = arith.constant 0 : index
    %75 = vector.load %arg8[%c0_28, %c0_29] : memref<1x32xf32, #tpu.memory_space<vmem>>, vector<1x32xf32>
    %76 = vector.broadcast %75 : vector<1x32xf32> to vector<16x32xf32>
    %77 = arith.mulf %74, %76 : vector<16x32xf32>
    %c0_30 = arith.constant 0 : index
    %c0_31 = arith.constant 0 : index
    %c0_32 = arith.constant 0 : index
    %78 = vector.load %arg9[%c0_30, %c0_31, %c0_32] : memref<1x16x32xf32, #tpu.memory_space<vmem>>, vector<1x16x32xf32>
    %79 = vector.shape_cast %78 : vector<1x16x32xf32> to vector<16x32xf32>
    %80 = vector.shape_cast %77 : vector<16x32xf32> to vector<1x16x32xf32>
    tpu.vector_store %arg9[%c0_30, %c0_31, %c0_32], %80 {strides = array<i32>} : memref<1x16x32xf32, #tpu.memory_space<vmem>>, vector<1x16x32xf32>,
    return
  }
  func.func @transform_0(%arg0: i32) -> (i32, i32, i32) {
    %c0_i32 = arith.constant 0 : i32
    %c0_i32_0 = arith.constant 0 : i32
    %c0_i32_1 = arith.constant 0 : i32
    return %arg0, %c0_i32, %c0_i32_0 : i32, i32, i32
  }
  func.func @transform_1(%arg0: i32) -> (i32, i32) {
    %c0_i32 = arith.constant 0 : i32
    %c0_i32_0 = arith.constant 0 : i32
    %c0_i32_1 = arith.constant 0 : i32
    return %c0_i32, %c0_i32_0 : i32, i32
  }
  func.func @transform_2(%arg0: i32) -> (i32, i32) {
    %c0_i32 = arith.constant 0 : i32
    %c0_i32_0 = arith.constant 0 : i32
    %c0_i32_1 = arith.constant 0 : i32
    return %c0_i32, %c0_i32_0 : i32, i32
  }
  func.func @transform_3(%arg0: i32) -> (i32, i32) {
    %c0_i32 = arith.constant 0 : i32
    %c0_i32_0 = arith.constant 0 : i32
    %c0_i32_1 = arith.constant 0 : i32
    return %c0_i32, %c0_i32_0 : i32, i32
  }
  func.func @transform_4(%arg0: i32) -> (i32, i32) {
    %c0_i32 = arith.constant 0 : i32
    %c0_i32_0 = arith.constant 0 : i32
    %c0_i32_1 = arith.constant 0 : i32
    return %c0_i32, %c0_i32_0 : i32, i32
  }
  func.func @transform_5(%arg0: i32) -> (i32, i32) {
    %c0_i32 = arith.constant 0 : i32
    %c0_i32_0 = arith.constant 0 : i32
    %c0_i32_1 = arith.constant 0 : i32
    return %c0_i32, %c0_i32_0 : i32, i32
  }
  func.func @transform_6(%arg0: i32) -> (i32, i32) {
    %c0_i32 = arith.constant 0 : i32
    %c0_i32_0 = arith.constant 0 : i32
    %c0_i32_1 = arith.constant 0 : i32
    return %c0_i32, %c0_i32_0 : i32, i32
  }
  func.func @transform_7(%arg0: i32) -> (i32, i32) {
    %c0_i32 = arith.constant 0 : i32
    %c0_i32_0 = arith.constant 0 : i32
    %c0_i32_1 = arith.constant 0 : i32
    return %c0_i32, %c0_i32_0 : i32, i32
  }
  func.func @transform_8(%arg0: i32) -> (i32, i32, i32) {
    %c0_i32 = arith.constant 0 : i32
    %c0_i32_0 = arith.constant 0 : i32
    %c0_i32_1 = arith.constant 0 : i32
    return %arg0, %c0_i32, %c0_i32_0 : i32, i32, i32
  }
}

module attributes {stable_mosaic.version = 11 : i64} {
  func.func @_self_attn_kernel(%arg0: i32, %arg1: memref<8x16x64xbf16, #tpu.memory_space<vmem>>, %arg2: memref<8x16x32xbf16, #tpu.memory_space<vmem>>) attributes {dimension_semantics = [#tpu.dimension_semantics<parallel>], iteration_bounds = array<i64: 1>, scalar_prefetch = 0 : i64, scratch_operands = 0 : i64, tpu.core_type = #tpu.core_type<tc>, window_params = [{transform_indices = @transform_0, window_bounds = array<i64: 8, 16, 64>}, {transform_indices = @transform_1, window_bounds = array<i64: 8, 16, 32>}]} {
    %c0 = arith.constant 0 : index
    %c0_0 = arith.constant 0 : index
    %c32 = arith.constant 32 : index
    %0 = vector.load %arg1[%c0, %c0_0, %c32] : memref<8x16x64xbf16, #tpu.memory_space<vmem>>, vector<8x16x8xbf16>
    %c0_1 = arith.constant 0 : index
    %c0_2 = arith.constant 0 : index
    %c48 = arith.constant 48 : index
    %1 = vector.load %arg1[%c0_1, %c0_2, %c48] : memref<8x16x64xbf16, #tpu.memory_space<vmem>>, vector<8x16x8xbf16>
    %c0_3 = arith.constant 0 : index
    %c0_4 = arith.constant 0 : index
    %c0_5 = arith.constant 0 : index
    %2 = vector.load %arg1[%c0_3, %c0_4, %c0_5] : memref<8x16x64xbf16, #tpu.memory_space<vmem>>, vector<8x16x8xbf16>
    %cst = arith.constant dense<0.000000e+00> : vector<8x16x16xf32>
    %3 = tpu.matmul %2, %0, %cst {dimension_numbers = #tpu.dot_dimension_numbers<[2], [2], [1], [1], [0, 0, 0, 1, 1, 1], [0], [0]>} : vector<8x16x8xbf16>, vector<8x16x8xbf16>, vector<8x16x16xf32> -> vector<8x16x16xf32>
    %cst_6 = arith.constant 0.353553385 : f32
    %4 = vector.broadcast %cst_6 : f32 to vector<8x16x16xf32>
    %5 = arith.mulf %3, %4 : vector<8x16x16xf32>
    %cst_7 = arith.constant dense<0xFF800000> : vector<8x16xf32>
    %6 = vector.multi_reduction <maximumf>, %5, %cst_7 [2] : vector<8x16x16xf32> to vector<8x16xf32>
    %7 = vector.shape_cast %6 : vector<8x16xf32> to vector<8x16x1xf32>
    %8 = vector.broadcast %7 : vector<8x16x1xf32> to vector<8x16x16xf32>
    %9 = arith.subf %5, %8 : vector<8x16x16xf32>
    %10 = math.exp %9 : vector<8x16x16xf32>
    %cst_8 = arith.constant dense<0.000000e+00> : vector<8x16xf32>
    %11 = vector.multi_reduction <add>, %10, %cst_8 [2] : vector<8x16x16xf32> to vector<8x16xf32>
    %12 = vector.shape_cast %11 : vector<8x16xf32> to vector<8x16x1xf32>
    %13 = vector.broadcast %12 : vector<8x16x1xf32> to vector<8x16x16xf32>
    %14 = arith.divf %10, %13 : vector<8x16x16xf32>
    %15 = arith.truncf %14 : vector<8x16x16xf32> to vector<8x16x16xbf16>
    %cst_9 = arith.constant dense<0.000000e+00> : vector<8x16x8xf32>
    %16 = tpu.matmul %15, %1, %cst_9 {dimension_numbers = #tpu.dot_dimension_numbers<[2], [1], [1], [2], [0, 0, 0, 1, 1, 2], [0], [0]>} : vector<8x16x16xbf16>, vector<8x16x8xbf16>, vector<8x16x8xf32> -> vector<8x16x8xf32>
    %17 = arith.truncf %16 : vector<8x16x8xf32> to vector<8x16x8xbf16>
    %c0_10 = arith.constant 0 : index
    %c0_11 = arith.constant 0 : index
    %c0_12 = arith.constant 0 : index
    %18 = vector.load %arg2[%c0_10, %c0_11, %c0_12] : memref<8x16x32xbf16, #tpu.memory_space<vmem>>, vector<8x16x8xbf16>
    tpu.vector_store %arg2[%c0_10, %c0_11, %c0_12], %17 {strides = array<i32>} : memref<8x16x32xbf16, #tpu.memory_space<vmem>>, vector<8x16x8xbf16>,
    %c0_13 = arith.constant 0 : index
    %c0_14 = arith.constant 0 : index
    %c8 = arith.constant 8 : index
    %19 = vector.load %arg1[%c0_13, %c0_14, %c8] : memref<8x16x64xbf16, #tpu.memory_space<vmem>>, vector<8x16x8xbf16>
    %cst_15 = arith.constant dense<0.000000e+00> : vector<8x16x16xf32>
    %20 = tpu.matmul %19, %0, %cst_15 {dimension_numbers = #tpu.dot_dimension_numbers<[2], [2], [1], [1], [0, 0, 0, 1, 1, 1], [0], [0]>} : vector<8x16x8xbf16>, vector<8x16x8xbf16>, vector<8x16x16xf32> -> vector<8x16x16xf32>
    %cst_16 = arith.constant 0.353553385 : f32
    %21 = vector.broadcast %cst_16 : f32 to vector<8x16x16xf32>
    %22 = arith.mulf %20, %21 : vector<8x16x16xf32>
    %cst_17 = arith.constant dense<0xFF800000> : vector<8x16xf32>
    %23 = vector.multi_reduction <maximumf>, %22, %cst_17 [2] : vector<8x16x16xf32> to vector<8x16xf32>
    %24 = vector.shape_cast %23 : vector<8x16xf32> to vector<8x16x1xf32>
    %25 = vector.broadcast %24 : vector<8x16x1xf32> to vector<8x16x16xf32>
    %26 = arith.subf %22, %25 : vector<8x16x16xf32>
    %27 = math.exp %26 : vector<8x16x16xf32>
    %cst_18 = arith.constant dense<0.000000e+00> : vector<8x16xf32>
    %28 = vector.multi_reduction <add>, %27, %cst_18 [2] : vector<8x16x16xf32> to vector<8x16xf32>
    %29 = vector.shape_cast %28 : vector<8x16xf32> to vector<8x16x1xf32>
    %30 = vector.broadcast %29 : vector<8x16x1xf32> to vector<8x16x16xf32>
    %31 = arith.divf %27, %30 : vector<8x16x16xf32>
    %32 = arith.truncf %31 : vector<8x16x16xf32> to vector<8x16x16xbf16>
    %cst_19 = arith.constant dense<0.000000e+00> : vector<8x16x8xf32>
    %33 = tpu.matmul %32, %1, %cst_19 {dimension_numbers = #tpu.dot_dimension_numbers<[2], [1], [1], [2], [0, 0, 0, 1, 1, 2], [0], [0]>} : vector<8x16x16xbf16>, vector<8x16x8xbf16>, vector<8x16x8xf32> -> vector<8x16x8xf32>
    %34 = arith.truncf %33 : vector<8x16x8xf32> to vector<8x16x8xbf16>
    %c0_20 = arith.constant 0 : index
    %c0_21 = arith.constant 0 : index
    %c8_22 = arith.constant 8 : index
    %35 = vector.load %arg2[%c0_20, %c0_21, %c8_22] : memref<8x16x32xbf16, #tpu.memory_space<vmem>>, vector<8x16x8xbf16>
    tpu.vector_store %arg2[%c0_20, %c0_21, %c8_22], %34 {strides = array<i32>} : memref<8x16x32xbf16, #tpu.memory_space<vmem>>, vector<8x16x8xbf16>,
    %c0_23 = arith.constant 0 : index
    %c0_24 = arith.constant 0 : index
    %c40 = arith.constant 40 : index
    %36 = vector.load %arg1[%c0_23, %c0_24, %c40] : memref<8x16x64xbf16, #tpu.memory_space<vmem>>, vector<8x16x8xbf16>
    %c0_25 = arith.constant 0 : index
    %c0_26 = arith.constant 0 : index
    %c56 = arith.constant 56 : index
    %37 = vector.load %arg1[%c0_25, %c0_26, %c56] : memref<8x16x64xbf16, #tpu.memory_space<vmem>>, vector<8x16x8xbf16>
    %c0_27 = arith.constant 0 : index
    %c0_28 = arith.constant 0 : index
    %c16 = arith.constant 16 : index
    %38 = vector.load %arg1[%c0_27, %c0_28, %c16] : memref<8x16x64xbf16, #tpu.memory_space<vmem>>, vector<8x16x8xbf16>
    %cst_29 = arith.constant dense<0.000000e+00> : vector<8x16x16xf32>
    %39 = tpu.matmul %38, %36, %cst_29 {dimension_numbers = #tpu.dot_dimension_numbers<[2], [2], [1], [1], [0, 0, 0, 1, 1, 1], [0], [0]>} : vector<8x16x8xbf16>, vector<8x16x8xbf16>, vector<8x16x16xf32> -> vector<8x16x16xf32>
    %cst_30 = arith.constant 0.353553385 : f32
    %40 = vector.broadcast %cst_30 : f32 to vector<8x16x16xf32>
    %41 = arith.mulf %39, %40 : vector<8x16x16xf32>
    %cst_31 = arith.constant dense<0xFF800000> : vector<8x16xf32>
    %42 = vector.multi_reduction <maximumf>, %41, %cst_31 [2] : vector<8x16x16xf32> to vector<8x16xf32>
    %43 = vector.shape_cast %42 : vector<8x16xf32> to vector<8x16x1xf32>
    %44 = vector.broadcast %43 : vector<8x16x1xf32> to vector<8x16x16xf32>
    %45 = arith.subf %41, %44 : vector<8x16x16xf32>
    %46 = math.exp %45 : vector<8x16x16xf32>
    %cst_32 = arith.constant dense<0.000000e+00> : vector<8x16xf32>
    %47 = vector.multi_reduction <add>, %46, %cst_32 [2] : vector<8x16x16xf32> to vector<8x16xf32>
    %48 = vector.shape_cast %47 : vector<8x16xf32> to vector<8x16x1xf32>
    %49 = vector.broadcast %48 : vector<8x16x1xf32> to vector<8x16x16xf32>
    %50 = arith.divf %46, %49 : vector<8x16x16xf32>
    %51 = arith.truncf %50 : vector<8x16x16xf32> to vector<8x16x16xbf16>
    %cst_33 = arith.constant dense<0.000000e+00> : vector<8x16x8xf32>
    %52 = tpu.matmul %51, %37, %cst_33 {dimension_numbers = #tpu.dot_dimension_numbers<[2], [1], [1], [2], [0, 0, 0, 1, 1, 2], [0], [0]>} : vector<8x16x16xbf16>, vector<8x16x8xbf16>, vector<8x16x8xf32> -> vector<8x16x8xf32>
    %53 = arith.truncf %52 : vector<8x16x8xf32> to vector<8x16x8xbf16>
    %c0_34 = arith.constant 0 : index
    %c0_35 = arith.constant 0 : index
    %c16_36 = arith.constant 16 : index
    %54 = vector.load %arg2[%c0_34, %c0_35, %c16_36] : memref<8x16x32xbf16, #tpu.memory_space<vmem>>, vector<8x16x8xbf16>
    tpu.vector_store %arg2[%c0_34, %c0_35, %c16_36], %53 {strides = array<i32>} : memref<8x16x32xbf16, #tpu.memory_space<vmem>>, vector<8x16x8xbf16>,
    %c0_37 = arith.constant 0 : index
    %c0_38 = arith.constant 0 : index
    %c24 = arith.constant 24 : index
    %55 = vector.load %arg1[%c0_37, %c0_38, %c24] : memref<8x16x64xbf16, #tpu.memory_space<vmem>>, vector<8x16x8xbf16>
    %cst_39 = arith.constant dense<0.000000e+00> : vector<8x16x16xf32>
    %56 = tpu.matmul %55, %36, %cst_39 {dimension_numbers = #tpu.dot_dimension_numbers<[2], [2], [1], [1], [0, 0, 0, 1, 1, 1], [0], [0]>} : vector<8x16x8xbf16>, vector<8x16x8xbf16>, vector<8x16x16xf32> -> vector<8x16x16xf32>
    %cst_40 = arith.constant 0.353553385 : f32
    %57 = vector.broadcast %cst_40 : f32 to vector<8x16x16xf32>
    %58 = arith.mulf %56, %57 : vector<8x16x16xf32>
    %cst_41 = arith.constant dense<0xFF800000> : vector<8x16xf32>
    %59 = vector.multi_reduction <maximumf>, %58, %cst_41 [2] : vector<8x16x16xf32> to vector<8x16xf32>
    %60 = vector.shape_cast %59 : vector<8x16xf32> to vector<8x16x1xf32>
    %61 = vector.broadcast %60 : vector<8x16x1xf32> to vector<8x16x16xf32>
    %62 = arith.subf %58, %61 : vector<8x16x16xf32>
    %63 = math.exp %62 : vector<8x16x16xf32>
    %cst_42 = arith.constant dense<0.000000e+00> : vector<8x16xf32>
    %64 = vector.multi_reduction <add>, %63, %cst_42 [2] : vector<8x16x16xf32> to vector<8x16xf32>
    %65 = vector.shape_cast %64 : vector<8x16xf32> to vector<8x16x1xf32>
    %66 = vector.broadcast %65 : vector<8x16x1xf32> to vector<8x16x16xf32>
    %67 = arith.divf %63, %66 : vector<8x16x16xf32>
    %68 = arith.truncf %67 : vector<8x16x16xf32> to vector<8x16x16xbf16>
    %cst_43 = arith.constant dense<0.000000e+00> : vector<8x16x8xf32>
    %69 = tpu.matmul %68, %37, %cst_43 {dimension_numbers = #tpu.dot_dimension_numbers<[2], [1], [1], [2], [0, 0, 0, 1, 1, 2], [0], [0]>} : vector<8x16x16xbf16>, vector<8x16x8xbf16>, vector<8x16x8xf32> -> vector<8x16x8xf32>
    %70 = arith.truncf %69 : vector<8x16x8xf32> to vector<8x16x8xbf16>
    %c0_44 = arith.constant 0 : index
    %c0_45 = arith.constant 0 : index
    %c24_46 = arith.constant 24 : index
    %71 = vector.load %arg2[%c0_44, %c0_45, %c24_46] : memref<8x16x32xbf16, #tpu.memory_space<vmem>>, vector<8x16x8xbf16>
    tpu.vector_store %arg2[%c0_44, %c0_45, %c24_46], %70 {strides = array<i32>} : memref<8x16x32xbf16, #tpu.memory_space<vmem>>, vector<8x16x8xbf16>,
    return
  }
  func.func @transform_0(%arg0: i32) -> (i32, i32, i32) {
    %c0_i32 = arith.constant 0 : i32
    %c0_i32_0 = arith.constant 0 : i32
    %c0_i32_1 = arith.constant 0 : i32
    return %arg0, %c0_i32, %c0_i32_0 : i32, i32, i32
  }
  func.func @transform_1(%arg0: i32) -> (i32, i32, i32) {
    %c0_i32 = arith.constant 0 : i32
    %c0_i32_0 = arith.constant 0 : i32
    %c0_i32_1 = arith.constant 0 : i32
    return %arg0, %c0_i32, %c0_i32_0 : i32, i32, i32
  }
}

module attributes {stable_mosaic.version = 11 : i64} {
  func.func @_linear_residual_kernel(%arg0: i32, %arg1: memref<128x32xbf16, #tpu.memory_space<vmem>>, %arg2: memref<128x32xf32, #tpu.memory_space<vmem>>, %arg3: memref<32x32xbf16, #tpu.memory_space<vmem>>, %arg4: memref<1x32xf32, #tpu.memory_space<vmem>>, %arg5: memref<128x32xf32, #tpu.memory_space<vmem>>) attributes {dimension_semantics = [#tpu.dimension_semantics<parallel>], iteration_bounds = array<i64: 1>, scalar_prefetch = 0 : i64, scratch_operands = 0 : i64, tpu.core_type = #tpu.core_type<tc>, window_params = [{transform_indices = @transform_0, window_bounds = array<i64: 128, 32>}, {transform_indices = @transform_1, window_bounds = array<i64: 128, 32>}, {pipeline_mode = #tpu.pipeline_mode<synchronous>, transform_indices = @transform_2, window_bounds = array<i64: 32, 32>}, {pipeline_mode = #tpu.pipeline_mode<synchronous>, transform_indices = @transform_3, window_bounds = array<i64: 1, 32>}, {transform_indices = @transform_4, window_bounds = array<i64: 128, 32>}]} {
    %c0 = arith.constant 0 : index
    %c0_0 = arith.constant 0 : index
    %0 = vector.load %arg1[%c0, %c0_0] : memref<128x32xbf16, #tpu.memory_space<vmem>>, vector<128x32xbf16>
    %c0_1 = arith.constant 0 : index
    %c0_2 = arith.constant 0 : index
    %1 = vector.load %arg3[%c0_1, %c0_2] : memref<32x32xbf16, #tpu.memory_space<vmem>>, vector<32x32xbf16>
    %cst = arith.constant dense<0.000000e+00> : vector<128x32xf32>
    %2 = tpu.matmul %0, %1, %cst {dimension_numbers = #tpu.dot_dimension_numbers<[1], [0], [0], [1], [0, 0, 1, 1], [], []>} : vector<128x32xbf16>, vector<32x32xbf16>, vector<128x32xf32> -> vector<128x32xf32>
    %c0_3 = arith.constant 0 : index
    %c0_4 = arith.constant 0 : index
    %3 = vector.load %arg4[%c0_3, %c0_4] : memref<1x32xf32, #tpu.memory_space<vmem>>, vector<1x32xf32>
    %4 = vector.broadcast %3 : vector<1x32xf32> to vector<128x32xf32>
    %5 = arith.addf %2, %4 : vector<128x32xf32>
    %c0_5 = arith.constant 0 : index
    %c0_6 = arith.constant 0 : index
    %6 = vector.load %arg2[%c0_5, %c0_6] : memref<128x32xf32, #tpu.memory_space<vmem>>, vector<128x32xf32>
    %7 = arith.addf %5, %6 : vector<128x32xf32>
    %c0_7 = arith.constant 0 : index
    %c0_8 = arith.constant 0 : index
    %8 = vector.load %arg5[%c0_7, %c0_8] : memref<128x32xf32, #tpu.memory_space<vmem>>, vector<128x32xf32>
    tpu.vector_store %arg5[%c0_7, %c0_8], %7 {strides = array<i32>} : memref<128x32xf32, #tpu.memory_space<vmem>>, vector<128x32xf32>,
    return
  }
  func.func @transform_0(%arg0: i32) -> (i32, i32) {
    %c0_i32 = arith.constant 0 : i32
    %c0_i32_0 = arith.constant 0 : i32
    return %arg0, %c0_i32 : i32, i32
  }
  func.func @transform_1(%arg0: i32) -> (i32, i32) {
    %c0_i32 = arith.constant 0 : i32
    %c0_i32_0 = arith.constant 0 : i32
    return %arg0, %c0_i32 : i32, i32
  }
  func.func @transform_2(%arg0: i32) -> (i32, i32) {
    %c0_i32 = arith.constant 0 : i32
    %c0_i32_0 = arith.constant 0 : i32
    %c0_i32_1 = arith.constant 0 : i32
    return %c0_i32, %c0_i32_0 : i32, i32
  }
  func.func @transform_3(%arg0: i32) -> (i32, i32) {
    %c0_i32 = arith.constant 0 : i32
    %c0_i32_0 = arith.constant 0 : i32
    %c0_i32_1 = arith.constant 0 : i32
    return %c0_i32, %c0_i32_0 : i32, i32
  }
  func.func @transform_4(%arg0: i32) -> (i32, i32) {
    %c0_i32 = arith.constant 0 : i32
    %c0_i32_0 = arith.constant 0 : i32
    return %arg0, %c0_i32 : i32, i32
  }
}

module attributes {stable_mosaic.version = 11 : i64} {
  func.func @_norm_linear_kernel(%arg0: i32, %arg1: memref<128x32xf32, #tpu.memory_space<vmem>>, %arg2: memref<1x32xf32, #tpu.memory_space<vmem>>, %arg3: memref<32x64xbf16, #tpu.memory_space<vmem>>, %arg4: memref<1x64xf32, #tpu.memory_space<vmem>>, %arg5: memref<128x64xbf16, #tpu.memory_space<vmem>>) attributes {dimension_semantics = [#tpu.dimension_semantics<parallel>], iteration_bounds = array<i64: 1>, scalar_prefetch = 0 : i64, scratch_operands = 0 : i64, tpu.core_type = #tpu.core_type<tc>, window_params = [{transform_indices = @transform_0, window_bounds = array<i64: 128, 32>}, {pipeline_mode = #tpu.pipeline_mode<synchronous>, transform_indices = @transform_1, window_bounds = array<i64: 1, 32>}, {pipeline_mode = #tpu.pipeline_mode<synchronous>, transform_indices = @transform_2, window_bounds = array<i64: 32, 64>}, {pipeline_mode = #tpu.pipeline_mode<synchronous>, transform_indices = @transform_3, window_bounds = array<i64: 1, 64>}, {transform_indices = @transform_4, window_bounds = array<i64: 128, 64>}]} {
    %c0 = arith.constant 0 : index
    %c0_0 = arith.constant 0 : index
    %0 = vector.load %arg1[%c0, %c0_0] : memref<128x32xf32, #tpu.memory_space<vmem>>, vector<128x32xf32>
    %1 = arith.mulf %0, %0 : vector<128x32xf32>
    %cst = arith.constant dense<0.000000e+00> : vector<128xf32>
    %2 = vector.multi_reduction <add>, %1, %cst [1] : vector<128x32xf32> to vector<128xf32>
    %3 = vector.shape_cast %2 : vector<128xf32> to vector<128x1xf32>
    %cst_1 = arith.constant 3.200000e+01 : f32
    %4 = vector.broadcast %cst_1 : f32 to vector<128x1xf32>
    %5 = arith.divf %3, %4 : vector<128x1xf32>
    %cst_2 = arith.constant 9.99999997E-7 : f32
    %6 = vector.broadcast %cst_2 : f32 to vector<128x1xf32>
    %7 = arith.addf %5, %6 : vector<128x1xf32>
    %8 = math.rsqrt %7 : vector<128x1xf32>
    %9 = vector.broadcast %8 : vector<128x1xf32> to vector<128x32xf32>
    %10 = arith.mulf %0, %9 : vector<128x32xf32>
    %c0_3 = arith.constant 0 : index
    %c0_4 = arith.constant 0 : index
    %11 = vector.load %arg2[%c0_3, %c0_4] : memref<1x32xf32, #tpu.memory_space<vmem>>, vector<1x32xf32>
    %12 = vector.broadcast %11 : vector<1x32xf32> to vector<128x32xf32>
    %13 = arith.mulf %10, %12 : vector<128x32xf32>
    %14 = arith.truncf %13 : vector<128x32xf32> to vector<128x32xbf16>
    %c0_5 = arith.constant 0 : index
    %c0_6 = arith.constant 0 : index
    %15 = vector.load %arg3[%c0_5, %c0_6] : memref<32x64xbf16, #tpu.memory_space<vmem>>, vector<32x64xbf16>
    %cst_7 = arith.constant dense<0.000000e+00> : vector<128x64xf32>
    %16 = tpu.matmul %14, %15, %cst_7 {dimension_numbers = #tpu.dot_dimension_numbers<[1], [0], [0], [1], [0, 0, 1, 1], [], []>} : vector<128x32xbf16>, vector<32x64xbf16>, vector<128x64xf32> -> vector<128x64xf32>
    %c0_8 = arith.constant 0 : index
    %c0_9 = arith.constant 0 : index
    %17 = vector.load %arg4[%c0_8, %c0_9] : memref<1x64xf32, #tpu.memory_space<vmem>>, vector<1x64xf32>
    %18 = vector.broadcast %17 : vector<1x64xf32> to vector<128x64xf32>
    %19 = arith.addf %16, %18 : vector<128x64xf32>
    %20 = arith.truncf %19 : vector<128x64xf32> to vector<128x64xbf16>
    %c0_10 = arith.constant 0 : index
    %c0_11 = arith.constant 0 : index
    %21 = vector.load %arg5[%c0_10, %c0_11] : memref<128x64xbf16, #tpu.memory_space<vmem>>, vector<128x64xbf16>
    tpu.vector_store %arg5[%c0_10, %c0_11], %20 {strides = array<i32>} : memref<128x64xbf16, #tpu.memory_space<vmem>>, vector<128x64xbf16>,
    return
  }
  func.func @transform_0(%arg0: i32) -> (i32, i32) {
    %c0_i32 = arith.constant 0 : i32
    %c0_i32_0 = arith.constant 0 : i32
    return %arg0, %c0_i32 : i32, i32
  }
  func.func @transform_1(%arg0: i32) -> (i32, i32) {
    %c0_i32 = arith.constant 0 : i32
    %c0_i32_0 = arith.constant 0 : i32
    %c0_i32_1 = arith.constant 0 : i32
    return %c0_i32, %c0_i32_0 : i32, i32
  }
  func.func @transform_2(%arg0: i32) -> (i32, i32) {
    %c0_i32 = arith.constant 0 : i32
    %c0_i32_0 = arith.constant 0 : i32
    %c0_i32_1 = arith.constant 0 : i32
    return %c0_i32, %c0_i32_0 : i32, i32
  }
  func.func @transform_3(%arg0: i32) -> (i32, i32) {
    %c0_i32 = arith.constant 0 : i32
    %c0_i32_0 = arith.constant 0 : i32
    %c0_i32_1 = arith.constant 0 : i32
    return %c0_i32, %c0_i32_0 : i32, i32
  }
  func.func @transform_4(%arg0: i32) -> (i32, i32) {
    %c0_i32 = arith.constant 0 : i32
    %c0_i32_0 = arith.constant 0 : i32
    return %arg0, %c0_i32 : i32, i32
  }
}

module attributes {stable_mosaic.version = 11 : i64} {
  func.func @_mlp_residual_norm_kernel(%arg0: i32, %arg1: memref<128x32xf32, #tpu.memory_space<vmem>>, %arg2: memref<32x128xbf16, #tpu.memory_space<vmem>>, %arg3: memref<1x128xf32, #tpu.memory_space<vmem>>, %arg4: memref<128x32xbf16, #tpu.memory_space<vmem>>, %arg5: memref<1x32xf32, #tpu.memory_space<vmem>>, %arg6: memref<1x32xf32, #tpu.memory_space<vmem>>, %arg7: memref<128x32xf32, #tpu.memory_space<vmem>>) attributes {dimension_semantics = [#tpu.dimension_semantics<parallel>], iteration_bounds = array<i64: 1>, scalar_prefetch = 0 : i64, scratch_operands = 0 : i64, tpu.core_type = #tpu.core_type<tc>, window_params = [{transform_indices = @transform_0, window_bounds = array<i64: 128, 32>}, {pipeline_mode = #tpu.pipeline_mode<synchronous>, transform_indices = @transform_1, window_bounds = array<i64: 32, 128>}, {pipeline_mode = #tpu.pipeline_mode<synchronous>, transform_indices = @transform_2, window_bounds = array<i64: 1, 128>}, {pipeline_mode = #tpu.pipeline_mode<synchronous>, transform_indices = @transform_3, window_bounds = array<i64: 128, 32>}, {pipeline_mode = #tpu.pipeline_mode<synchronous>, transform_indices = @transform_4, window_bounds = array<i64: 1, 32>}, {pipeline_mode = #tpu.pipeline_mode<synchronous>, transform_indices = @transform_5, window_bounds = array<i64: 1, 32>}, {transform_indices = @transform_6, window_bounds = array<i64: 128, 32>}]} {
    %c0 = arith.constant 0 : index
    %c0_0 = arith.constant 0 : index
    %0 = vector.load %arg1[%c0, %c0_0] : memref<128x32xf32, #tpu.memory_space<vmem>>, vector<128x32xf32>
    %1 = arith.truncf %0 : vector<128x32xf32> to vector<128x32xbf16>
    %c0_1 = arith.constant 0 : index
    %c0_2 = arith.constant 0 : index
    %2 = vector.load %arg2[%c0_1, %c0_2] : memref<32x128xbf16, #tpu.memory_space<vmem>>, vector<32x128xbf16>
    %cst = arith.constant dense<0.000000e+00> : vector<128x128xf32>
    %3 = tpu.matmul %1, %2, %cst {dimension_numbers = #tpu.dot_dimension_numbers<[1], [0], [0], [1], [0, 0, 1, 1], [], []>} : vector<128x32xbf16>, vector<32x128xbf16>, vector<128x128xf32> -> vector<128x128xf32>
    %c0_3 = arith.constant 0 : index
    %c0_4 = arith.constant 0 : index
    %4 = vector.load %arg3[%c0_3, %c0_4] : memref<1x128xf32, #tpu.memory_space<vmem>>, vector<1x128xf32>
    %5 = vector.broadcast %4 : vector<1x128xf32> to vector<128x128xf32>
    %6 = arith.addf %3, %5 : vector<128x128xf32>
    %cst_5 = arith.constant 0.000000e+00 : f32
    %7 = vector.broadcast %cst_5 : f32 to vector<128x128xf32>
    %8 = arith.subf %7, %6 : vector<128x128xf32>
    %9 = math.exp %8 : vector<128x128xf32>
    %cst_6 = arith.constant 1.000000e+00 : f32
    %10 = vector.broadcast %cst_6 : f32 to vector<128x128xf32>
    %11 = arith.addf %10, %9 : vector<128x128xf32>
    %12 = arith.divf %6, %11 : vector<128x128xf32>
    %13 = arith.truncf %12 : vector<128x128xf32> to vector<128x128xbf16>
    %c0_7 = arith.constant 0 : index
    %c0_8 = arith.constant 0 : index
    %14 = vector.load %arg4[%c0_7, %c0_8] : memref<128x32xbf16, #tpu.memory_space<vmem>>, vector<128x32xbf16>
    %cst_9 = arith.constant dense<0.000000e+00> : vector<128x32xf32>
    %15 = tpu.matmul %13, %14, %cst_9 {dimension_numbers = #tpu.dot_dimension_numbers<[1], [0], [0], [1], [0, 0, 1, 1], [], []>} : vector<128x128xbf16>, vector<128x32xbf16>, vector<128x32xf32> -> vector<128x32xf32>
    %c0_10 = arith.constant 0 : index
    %c0_11 = arith.constant 0 : index
    %16 = vector.load %arg5[%c0_10, %c0_11] : memref<1x32xf32, #tpu.memory_space<vmem>>, vector<1x32xf32>
    %17 = vector.broadcast %16 : vector<1x32xf32> to vector<128x32xf32>
    %18 = arith.addf %15, %17 : vector<128x32xf32>
    %19 = arith.addf %18, %0 : vector<128x32xf32>
    %20 = arith.mulf %19, %19 : vector<128x32xf32>
    %cst_12 = arith.constant dense<0.000000e+00> : vector<128xf32>
    %21 = vector.multi_reduction <add>, %20, %cst_12 [1] : vector<128x32xf32> to vector<128xf32>
    %22 = vector.shape_cast %21 : vector<128xf32> to vector<128x1xf32>
    %cst_13 = arith.constant 3.200000e+01 : f32
    %23 = vector.broadcast %cst_13 : f32 to vector<128x1xf32>
    %24 = arith.divf %22, %23 : vector<128x1xf32>
    %cst_14 = arith.constant 9.99999997E-7 : f32
    %25 = vector.broadcast %cst_14 : f32 to vector<128x1xf32>
    %26 = arith.addf %24, %25 : vector<128x1xf32>
    %27 = math.rsqrt %26 : vector<128x1xf32>
    %28 = vector.broadcast %27 : vector<128x1xf32> to vector<128x32xf32>
    %29 = arith.mulf %19, %28 : vector<128x32xf32>
    %c0_15 = arith.constant 0 : index
    %c0_16 = arith.constant 0 : index
    %30 = vector.load %arg6[%c0_15, %c0_16] : memref<1x32xf32, #tpu.memory_space<vmem>>, vector<1x32xf32>
    %31 = vector.broadcast %30 : vector<1x32xf32> to vector<128x32xf32>
    %32 = arith.mulf %29, %31 : vector<128x32xf32>
    %c0_17 = arith.constant 0 : index
    %c0_18 = arith.constant 0 : index
    %33 = vector.load %arg7[%c0_17, %c0_18] : memref<128x32xf32, #tpu.memory_space<vmem>>, vector<128x32xf32>
    tpu.vector_store %arg7[%c0_17, %c0_18], %32 {strides = array<i32>} : memref<128x32xf32, #tpu.memory_space<vmem>>, vector<128x32xf32>,
    return
  }
  func.func @transform_0(%arg0: i32) -> (i32, i32) {
    %c0_i32 = arith.constant 0 : i32
    %c0_i32_0 = arith.constant 0 : i32
    return %arg0, %c0_i32 : i32, i32
  }
  func.func @transform_1(%arg0: i32) -> (i32, i32) {
    %c0_i32 = arith.constant 0 : i32
    %c0_i32_0 = arith.constant 0 : i32
    %c0_i32_1 = arith.constant 0 : i32
    return %c0_i32, %c0_i32_0 : i32, i32
  }
  func.func @transform_2(%arg0: i32) -> (i32, i32) {
    %c0_i32 = arith.constant 0 : i32
    %c0_i32_0 = arith.constant 0 : i32
    %c0_i32_1 = arith.constant 0 : i32
    return %c0_i32, %c0_i32_0 : i32, i32
  }
  func.func @transform_3(%arg0: i32) -> (i32, i32) {
    %c0_i32 = arith.constant 0 : i32
    %c0_i32_0 = arith.constant 0 : i32
    %c0_i32_1 = arith.constant 0 : i32
    return %c0_i32, %c0_i32_0 : i32, i32
  }
  func.func @transform_4(%arg0: i32) -> (i32, i32) {
    %c0_i32 = arith.constant 0 : i32
    %c0_i32_0 = arith.constant 0 : i32
    %c0_i32_1 = arith.constant 0 : i32
    return %c0_i32, %c0_i32_0 : i32, i32
  }
  func.func @transform_5(%arg0: i32) -> (i32, i32) {
    %c0_i32 = arith.constant 0 : i32
    %c0_i32_0 = arith.constant 0 : i32
    %c0_i32_1 = arith.constant 0 : i32
    return %c0_i32, %c0_i32_0 : i32, i32
  }
  func.func @transform_6(%arg0: i32) -> (i32, i32) {
    %c0_i32 = arith.constant 0 : i32
    %c0_i32_0 = arith.constant 0 : i32
    return %arg0, %c0_i32 : i32, i32
  }
}

module attributes {stable_mosaic.version = 11 : i64} {
  func.func @_mlp_residual_norm_kernel(%arg0: i32, %arg1: memref<128x32xf32, #tpu.memory_space<vmem>>, %arg2: memref<32x128xbf16, #tpu.memory_space<vmem>>, %arg3: memref<1x128xf32, #tpu.memory_space<vmem>>, %arg4: memref<128x32xbf16, #tpu.memory_space<vmem>>, %arg5: memref<1x32xf32, #tpu.memory_space<vmem>>, %arg6: memref<1x32xf32, #tpu.memory_space<vmem>>, %arg7: memref<128x32xf32, #tpu.memory_space<vmem>>) attributes {dimension_semantics = [#tpu.dimension_semantics<parallel>], iteration_bounds = array<i64: 1>, scalar_prefetch = 0 : i64, scratch_operands = 0 : i64, tpu.core_type = #tpu.core_type<tc>, window_params = [{transform_indices = @transform_0, window_bounds = array<i64: 128, 32>}, {pipeline_mode = #tpu.pipeline_mode<synchronous>, transform_indices = @transform_1, window_bounds = array<i64: 32, 128>}, {pipeline_mode = #tpu.pipeline_mode<synchronous>, transform_indices = @transform_2, window_bounds = array<i64: 1, 128>}, {pipeline_mode = #tpu.pipeline_mode<synchronous>, transform_indices = @transform_3, window_bounds = array<i64: 128, 32>}, {pipeline_mode = #tpu.pipeline_mode<synchronous>, transform_indices = @transform_4, window_bounds = array<i64: 1, 32>}, {pipeline_mode = #tpu.pipeline_mode<synchronous>, transform_indices = @transform_5, window_bounds = array<i64: 1, 32>}, {transform_indices = @transform_6, window_bounds = array<i64: 128, 32>}]} {
    %c0 = arith.constant 0 : index
    %c0_0 = arith.constant 0 : index
    %0 = vector.load %arg1[%c0, %c0_0] : memref<128x32xf32, #tpu.memory_space<vmem>>, vector<128x32xf32>
    %1 = arith.truncf %0 : vector<128x32xf32> to vector<128x32xbf16>
    %c0_1 = arith.constant 0 : index
    %c0_2 = arith.constant 0 : index
    %2 = vector.load %arg2[%c0_1, %c0_2] : memref<32x128xbf16, #tpu.memory_space<vmem>>, vector<32x128xbf16>
    %cst = arith.constant dense<0.000000e+00> : vector<128x128xf32>
    %3 = tpu.matmul %1, %2, %cst {dimension_numbers = #tpu.dot_dimension_numbers<[1], [0], [0], [1], [0, 0, 1, 1], [], []>} : vector<128x32xbf16>, vector<32x128xbf16>, vector<128x128xf32> -> vector<128x128xf32>
    %c0_3 = arith.constant 0 : index
    %c0_4 = arith.constant 0 : index
    %4 = vector.load %arg3[%c0_3, %c0_4] : memref<1x128xf32, #tpu.memory_space<vmem>>, vector<1x128xf32>
    %5 = vector.broadcast %4 : vector<1x128xf32> to vector<128x128xf32>
    %6 = arith.addf %3, %5 : vector<128x128xf32>
    %cst_5 = arith.constant 0.000000e+00 : f32
    %7 = vector.broadcast %cst_5 : f32 to vector<128x128xf32>
    %8 = arith.subf %7, %6 : vector<128x128xf32>
    %9 = math.exp %8 : vector<128x128xf32>
    %cst_6 = arith.constant 1.000000e+00 : f32
    %10 = vector.broadcast %cst_6 : f32 to vector<128x128xf32>
    %11 = arith.addf %10, %9 : vector<128x128xf32>
    %12 = arith.divf %6, %11 : vector<128x128xf32>
    %13 = arith.truncf %12 : vector<128x128xf32> to vector<128x128xbf16>
    %c0_7 = arith.constant 0 : index
    %c0_8 = arith.constant 0 : index
    %14 = vector.load %arg4[%c0_7, %c0_8] : memref<128x32xbf16, #tpu.memory_space<vmem>>, vector<128x32xbf16>
    %cst_9 = arith.constant dense<0.000000e+00> : vector<128x32xf32>
    %15 = tpu.matmul %13, %14, %cst_9 {dimension_numbers = #tpu.dot_dimension_numbers<[1], [0], [0], [1], [0, 0, 1, 1], [], []>} : vector<128x128xbf16>, vector<128x32xbf16>, vector<128x32xf32> -> vector<128x32xf32>
    %c0_10 = arith.constant 0 : index
    %c0_11 = arith.constant 0 : index
    %16 = vector.load %arg5[%c0_10, %c0_11] : memref<1x32xf32, #tpu.memory_space<vmem>>, vector<1x32xf32>
    %17 = vector.broadcast %16 : vector<1x32xf32> to vector<128x32xf32>
    %18 = arith.addf %15, %17 : vector<128x32xf32>
    %19 = arith.addf %18, %0 : vector<128x32xf32>
    %20 = arith.mulf %19, %19 : vector<128x32xf32>
    %cst_12 = arith.constant dense<0.000000e+00> : vector<128xf32>
    %21 = vector.multi_reduction <add>, %20, %cst_12 [1] : vector<128x32xf32> to vector<128xf32>
    %22 = vector.shape_cast %21 : vector<128xf32> to vector<128x1xf32>
    %cst_13 = arith.constant 3.200000e+01 : f32
    %23 = vector.broadcast %cst_13 : f32 to vector<128x1xf32>
    %24 = arith.divf %22, %23 : vector<128x1xf32>
    %cst_14 = arith.constant 9.99999997E-7 : f32
    %25 = vector.broadcast %cst_14 : f32 to vector<128x1xf32>
    %26 = arith.addf %24, %25 : vector<128x1xf32>
    %27 = math.rsqrt %26 : vector<128x1xf32>
    %28 = vector.broadcast %27 : vector<128x1xf32> to vector<128x32xf32>
    %29 = arith.mulf %19, %28 : vector<128x32xf32>
    %c0_15 = arith.constant 0 : index
    %c0_16 = arith.constant 0 : index
    %30 = vector.load %arg6[%c0_15, %c0_16] : memref<1x32xf32, #tpu.memory_space<vmem>>, vector<1x32xf32>
    %31 = vector.broadcast %30 : vector<1x32xf32> to vector<128x32xf32>
    %32 = arith.mulf %29, %31 : vector<128x32xf32>
    %c0_17 = arith.constant 0 : index
    %c0_18 = arith.constant 0 : index
    %33 = vector.load %arg7[%c0_17, %c0_18] : memref<128x32xf32, #tpu.memory_space<vmem>>, vector<128x32xf32>
    tpu.vector_store %arg7[%c0_17, %c0_18], %32 {strides = array<i32>} : memref<128x32xf32, #tpu.memory_space<vmem>>, vector<128x32xf32>,
    return
  }
  func.func @transform_0(%arg0: i32) -> (i32, i32) {
    %c0_i32 = arith.constant 0 : i32
    %c0_i32_0 = arith.constant 0 : i32
    return %arg0, %c0_i32 : i32, i32
  }
  func.func @transform_1(%arg0: i32) -> (i32, i32) {
    %c0_i32 = arith.constant 0 : i32
    %c0_i32_0 = arith.constant 0 : i32
    %c0_i32_1 = arith.constant 0 : i32
    return %c0_i32, %c0_i32_0 : i32, i32
  }
  func.func @transform_2(%arg0: i32) -> (i32, i32) {
    %c0_i32 = arith.constant 0 : i32
    %c0_i32_0 = arith.constant 0 : i32
    %c0_i32_1 = arith.constant 0 : i32
    return %c0_i32, %c0_i32_0 : i32, i32
  }
  func.func @transform_3(%arg0: i32) -> (i32, i32) {
    %c0_i32 = arith.constant 0 : i32
    %c0_i32_0 = arith.constant 0 : i32
    %c0_i32_1 = arith.constant 0 : i32
    return %c0_i32, %c0_i32_0 : i32, i32
  }
  func.func @transform_4(%arg0: i32) -> (i32, i32) {
    %c0_i32 = arith.constant 0 : i32
    %c0_i32_0 = arith.constant 0 : i32
    %c0_i32_1 = arith.constant 0 : i32
    return %c0_i32, %c0_i32_0 : i32, i32
  }
  func.func @transform_5(%arg0: i32) -> (i32, i32) {
    %c0_i32 = arith.constant 0 : i32
    %c0_i32_0 = arith.constant 0 : i32
    %c0_i32_1 = arith.constant 0 : i32
    return %c0_i32, %c0_i32_0 : i32, i32
  }
  func.func @transform_6(%arg0: i32) -> (i32, i32) {
    %c0_i32 = arith.constant 0 : i32
    %c0_i32_0 = arith.constant 0 : i32
    return %arg0, %c0_i32 : i32, i32
  }
}

</mosaic_0001>

<bundles_post_ra>
// kernel: model_forward.18
= control target key start
LH: loop header
LB: loop body
LE: loop exit
PB: predicated region body
PF: predicated region fallthrough
CT: control target
= control target key end

     0   :  { %s488_s15 = smov 0   ;;  %s539_s0 = inlined_call_operand.vmem [shape: f32[8,16,32], index: 0, kind: input, shape index: {}]   ;;  %s540_s1 = inlined_call_operand.vmem [shape: f32[1,32], index: 1, kind: input, shape index: {}]   ;;  %s541_s2 = inlined_call_operand.vmem [shape: bf16[32,32], index: 2, kind: input, shape index: {}]   ;;  %s542_s3 = inlined_call_operand.vmem [shape: f32[32,1], index: 3, kind: input, shape index: {}]   ;;  %s543_s4 = inlined_call_operand.vmem [shape: bf16[8,32,16], index: 4, kind: output, shape index: {}]  }
   0x1 LB: > { %s401_s16 = sadd.s32 4294967295, %s460_s15   ;;  %p405_p0 = scmp.ge.s32.totalorder %s460_s15, 1  ;;  %s460_s15 = sphi %s488_s15, %s14_s15  }
   0x2   : > { %p162_p1 = scmp.lt.s32.totalorder %s460_s15, 9 }
   0x4   : > { %p163_p2 = pnand %p405_p0, %p162_p1 }
   0x5   : > { %p188_p3 = scmp.lt.s32.totalorder (!%p163_p2), %s401_s16, 7  ;;  %vm203_vm0 = vcmask (!%p163_p2), 261120   ;;  %v448_v6 = vld [vmem:[%s541_s2] sm:$0xff] (!%p163_p2)   ;;  %v462_v8 = vmov (!%p163_p2), 0   ;;  %v235_v9 = vld [vmem:[%s542_s3 + $0x10] sm:$0xff] (!%p163_p2)  ;;  %v234_v10 = vld [vmem:[%s542_s3 + $0x8] sm:$0xff] (!%p163_p2) }
   0x6   : > { %166 = sbr.rel (%p163_p2) target bundleno = 415 (0x19f), region = 36  ;;  %432 = vmatprep.mubr.msk.bf16.mxu0 (!%p163_p2), %vm203_vm0, %v448_v6  ;;  %v233_v7 = vld [vmem:[%s542_s3] sm:$0xff] (!%p163_p2)  ;;  %446 = vset.pattern.permute.xlu1 (!%p163_p2), %v462_v8  ;;  %v236_v11 = vld [vmem:[%s542_s3 + $0x18] sm:$0xff] (!%p163_p2)  ;;  %v449_v27 = vld [vmem:[%s541_s2 + $0x8] sm:$0xff] (!%p163_p2)   ;;  %vm341_vm1 = vcmask (!%p163_p2), 125952  }
   0x7   : > { %447 = vset.pattern.permute.xlu0 (!%p163_p2), %v462_v8  ;;  %239 = vperm.xlu1 (!%p163_p2), %446, %v233_v7   ;;  %v410_v21 = vld [vmem:[%s540_s1] ss:$0 sm:$0xff] (!%p163_p2) }
   0xb   : > { %244 = vperm.xlu1 (!%p163_p2), %446, %v234_v10  }
   0xd   : > { %s545_s16 = smov (!%p188_p3, %s401_s16), 7 }
   0xe   : > { %s421_s17 = sshll.u32 %s545_s16, 4 }
   0xf   : > { %s192_s20 = scalar_lea.vmem %s539_s0, %s421_s17  ;;  %254 = vperm.xlu1 %446, %v236_v11   ;;  %s197_s11 = scalar_lea.vmem %s543_s4, %s421_s17 }
  0x10   : > { %v199_v0 = vld [vmem:[%s192_s20] sm:$0xff]  ;;  %v200_v1 = vld [vmem:[%s192_s20 + $0x8] sm:$0xff] }
  0x11   : > { %v201_v2 = vmul.f32 %v199_v0, %v199_v0  ;;  %v202_v3 = vmul.f32 %v200_v1, %v200_v1 }
  0x13   : > { %v204_v4 = vsel %vm203_vm0, %v201_v2, 0.0  ;;  %v207_v5 = vsel %vm203_vm0, %v202_v3, 0.0 }
  0x14   : > { %205 = vadd.xlane.f32.xlu0 %v204_v4 }
  0x18   : > { %208 = vadd.xlane.f32.xlu0 %v207_v5 }
  0x2e   : > { %249 = vperm.xlu0 %447, %v235_v9  }
  0x86   : > { %v240_v28 = vpop.permute.xlu1 %239 }
  0x8a   : > { %v245_v29 = vpop.permute.xlu1 %244 }
  0x8e   : > { %v255_v34 = vpop.permute.xlu1 %254 }
  0xa1   : > { %v206_v12 = vpop.xlane.xlu0 %205 }
  0xa2   : > { %v211_v13 = vmul.f32 0.03125, %v206_v12 }
  0xa4   : > { %v213_v14 = vadd.f32 1e-06, %v211_v13 }
  0xa5   : > { %v209_v15 = vpop.xlane.xlu0 %208 }
  0xa6   : > { %450 = vrsqrt.f32 %v213_v14  ;;  %v212_v16 = vmul.f32 0.03125, %v209_v15 }
  0xa8   : > { %v214_v17 = vadd.f32 1e-06, %v212_v16 }
  0xaa   : > { %452 = vrsqrt.f32 %v214_v17 }
  0xad   : > { %v250_v30 = vpop.permute.xlu0 %249 }
  0xb0   : > { %v451_v18 = vpop.eup %450 }
  0xb1   : > { %v217_v19 = vmul.f32 %v451_v18, %v199_v0 }
  0xb3   : > { %v226_v23 = vmul.f32 %v410_v21, %v217_v19 }
  0xb4   : > { %v453_v20 = vpop.eup %452 }
  0xb5   : > { %v218_v22 = vmul.f32 %v453_v20, %v200_v1 }
  0xb7   : > { %v227_v24 = vmul.f32 %v410_v21, %v218_v22 }
  0xb9   : > { %v228_v25 = vpack.c.bf16 %v227_v24, %v226_v23 }
  0xbb   : > { %436 = vmatprep.subr.msk.bf16.mxu0 %vm203_vm0, %v228_v25  ;;  %v274_v26 = vsel %vm203_vm0, %v228_v25, 0 }
  0xbc   : > { %431 = vmatpush3.bf16.xpose.msra.mxu0 %v274_v26 }
  0xc3   : > { %433 = vmatmul.mubr.msk.bf16.vlgmr.msra.gmra.mrb[0].mxu0 %vm203_vm0, %v449_v27 }
 0x196   : > { %v434_v31 = vpop.f32.mrb[0].mxu0 }
 0x197   : > { %v319_v32 = vadd.f32 %v434_v31, %v250_v30  ;;  %v310_v33 = vpop.f32.mrb[1].mxu0 }
 0x198   : > { %v311_v35 = vadd.f32 %v310_v33, %v240_v28  ;;  %v435_v36 = vpop.f32.mrb[2].mxu0 }
 0x199   : > { %v425_v37 = vpack.c.bf16 %v319_v32, %v319_v32  ;;  %v322_v38 = vadd.f32 %v435_v36, %v255_v34  ;;  %v313_v39 = vpop.f32.mrb[3].mxu0 }
 0x19a   : > { %v423_v40 = vpack.c.bf16 %v311_v35, %v311_v35  ;;  %v314_v41 = vadd.f32 %v313_v39, %v245_v29 }
 0x19b   : > { %344 = vst.msk [vmem:[%s197_s11 + $0x8] sm:$0xf] %vm341_vm1, %v425_v37  ;;  %v426_v42 = vpack.c.bf16 %v322_v38, %v322_v38 }
 0x19c   : > { %342 = vst.msk [vmem:[%s197_s11] sm:$0xf] %vm341_vm1, %v423_v40  ;;  %v424_v43 = vpack.c.bf16 %v314_v41, %v314_v41 }
 0x19d   : > { %345 = vst.msk [vmem:[%s197_s11 + $0xc] sm:$0xf] %vm341_vm1, %v426_v42 }
 0x19e   : > { %343 = vst.msk [vmem:[%s197_s11 + $0x4] sm:$0xf] %vm341_vm1, %v424_v43 }
 0x19f PF: > { %s14_s15 = sadd.s32 1, %s460_s15  }
 0x1a0   : > { %p11_p4 = scmp.ge.s32.totalorder %s14_s15, 10  }
 0x1a2   :  { %13 = sbr.rel (!%p11_p4) target bundleno = 1 (0x1), region = 66 }

// kernel: model_forward.21
= control target key start
LH: loop header
LB: loop body
LE: loop exit
PB: predicated region body
PF: predicated region fallthrough
CT: control target
= control target key end

     0   :  { %vm55_vm0 = vcmask 261120   ;;  %s220_s2 = inlined_call_operand.vmem [shape: bf16[32,32], index: 2, kind: input, shape index: {}]   ;;  %s221_s0 = inlined_call_operand.vmem [shape: bf16[32,32], index: 0, kind: input, shape index: {}]   ;;  %s222_s3 = inlined_call_operand.vmem [shape: f32[1,32], index: 3, kind: input, shape index: {}]   ;;  %s223_s1 = inlined_call_operand.vmem [shape: f32[32,32], index: 1, kind: input, shape index: {}]   ;;  %s224_s4 = inlined_call_operand.vmem [shape: f32[32,32], index: 4, kind: output, shape index: {}]  }
   0x1   :  { %v146_v0 = vld [vmem:[%s220_s2] sm:$0xff]   ;;  %v147_v1 = vld [vmem:[%s220_s2 + $0x8] sm:$0xff]   ;;  %v113_v6 = vld [vmem:[%s223_s1 + $0x10] sm:$0xff] }
   0x2   :  { %138 = vmatprep.subr.bf16.mxu0 %v146_v0  ;;  %v148_v2 = vld [vmem:[%s221_s0] sm:$0xff]   ;;  %v149_v3 = vld [vmem:[%s221_s0 + $0x8] sm:$0xff]   ;;  %v114_v12 = vld [vmem:[%s223_s1 + $0x18] sm:$0xff] }
   0x3   :  { %139 = vmatpush3.bf16.msra.mxu0 %v146_v0  ;;  %142 = vmatprep.mubr.msk.bf16.mxu0 %vm55_vm0, %v148_v2  ;;  %v127_v4 = vld [vmem:[%s222_s3] ss:$0 sm:$0xff]  ;;  %v112_v16 = vld [vmem:[%s223_s1 + $0x8] sm:$0xff] }
   0x4   :  { %140 = vmatprep.subr.bf16.mxu0 %v147_v1  ;;  %v111_v9 = vld [vmem:[%s223_s1] sm:$0xff] }
   0x7   :  { %141 = vmatpush3.bf16.msra.mxu0 %v147_v1 }
   0xa   :  { %143 = vmatmul.mubr.msk.bf16.vlgmr.msra.gmra.mrb[0].mxu0 %vm55_vm0, %v149_v3 }
  0xdd   :  { %v144_v5 = vpop.f32.mrb[0].mxu0 }
  0xde   :  { %v105_v7 = vadd.f32 %v144_v5, %v127_v4  ;;  %v96_v8 = vpop.f32.mrb[1].mxu0 }
  0xdf   :  { %v97_v10 = vadd.f32 %v127_v4, %v96_v8  ;;  %v145_v11 = vpop.f32.mrb[2].mxu0 }
  0xe0   :  { %v117_v13 = vadd.f32 %v113_v6, %v105_v7  ;;  %v108_v14 = vadd.f32 %v145_v11, %v127_v4  ;;  %v99_v15 = vpop.f32.mrb[3].mxu0 }
  0xe1   :  { %v115_v17 = vadd.f32 %v111_v9, %v97_v10  ;;  %v100_v18 = vadd.f32 %v127_v4, %v99_v15 }
  0xe2   :  { %121 = vst.msk [vmem:[%s224_s4 + $0x10] sm:$0xff] %vm55_vm0, %v117_v13  ;;  %v118_v19 = vadd.f32 %v114_v12, %v108_v14 }
  0xe3   :  { %119 = vst.msk [vmem:[%s224_s4] sm:$0xff] %vm55_vm0, %v115_v17  ;;  %v116_v20 = vadd.f32 %v112_v16, %v100_v18 }
  0xe4   :  { %122 = vst.msk [vmem:[%s224_s4 + $0x18] sm:$0xff] %vm55_vm0, %v118_v19 }
  0xe5   :  { %120 = vst.msk [vmem:[%s224_s4 + $0x8] sm:$0xff] %vm55_vm0, %v116_v20 }

// kernel: model_forward.20
= control target key start
LH: loop header
LB: loop body
LE: loop exit
PB: predicated region body
PF: predicated region fallthrough
CT: control target
= control target key end

     0   :  { %s903_s9 = smov 0   ;;  %s905_s10 = smov 0   ;;  %s1176_s0 = inlined_call_operand.vmem [shape: bf16[2,32,16], index: 0, kind: input, shape index: {}]   ;;  %s1177_s1 = inlined_call_operand.vmem [shape: bf16[2,4,32,16], index: 1, kind: input, shape index: {}]   ;;  %s1178_s2 = inlined_call_operand.vmem [shape: bf16[2,32,16], index: 2, kind: output, shape index: {}]  }
   0x1   :  { %s907_s11 = smov 0  }
   0x2 LB: > { %s24_s12 = sadd.s32 1, %s882_s10  ;;  %p788_p0 = scmp.ge.s32.totalorder %s886_s11, 1  ;;  %s886_s11 = sphi %s907_s11, %s12_s11   ;;  %s882_s10 = sphi %s905_s10, %s1180_s10   ;;  %s878_s9 = sphi %s903_s9, %s1179_s9  }
   0x3   : > { %p26_p1 = scmp.ge.s32.totalorder %s24_s12, 2  ;;  %p146_p2 = scmp.lt.s32.totalorder %s886_s11, 3 }
   0x5   : > { %s1182_s12 = smov (%p26_p1, %s24_s12), 0  ;;  %p147_p3 = pnand %p788_p0, %p146_p2 }
   0x6   : > { %p182_p4 = scmp.lt.s32.totalorder (!%p147_p3), %s878_s9, 1  ;;  %v299_v4 = vlaneseq (!%p147_p3)  ;;  %vm229_vm0 = vcmask (!%p147_p3), 130048   ;;  %vm282_vm1 = vcmask (!%p147_p3), 1041409   ;;  %vm285_vm2 = vcmask (!%p147_p3), 1042434  }
   0x7   : > { %150 = sbr.rel (%p147_p3) target bundleno = 149 (0x95), region = 28  ;;  %vm288_vm3 = vcmask (!%p147_p3), 1043459   ;;  %vm291_vm4 = vcmask (!%p147_p3), 125952  }
   0x8   : > { %v953_v14 = vshrl.u32 (!%p147_p3), %v299_v4, 7 }
   0xe   : > { %s1184_s9 = smov (!%p182_p4, %s878_s9), 1 }
   0xf   : > { %s797_s13 = sshll.u32 %s1184_s9, 4  ;;  %s798_s14 = sshll.u32 %s1184_s9, 6 }
  0x10   : > { %s189_s17 = scalar_lea.vmem %s1176_s0, %s797_s13  ;;  %s933_s20 = scalar_lea.vmem %s1177_s1, %s798_s14 }
  0x11   : > { %v936_v0 = vld [vmem:[%s933_s20] sm:$0xff]   ;;  %v939_v1 = vld [vmem:[%s933_s20 + $0x10] sm:$0xff]   ;;  %v951_v12 = vld [vmem:[%s189_s17 + $0x8] sm:$0xff]   ;;  %s1122_s23 = scalar_lea.vmem %s1178_s2, %s797_s13 }
  0x12   : > { %v942_v2 = vld [vmem:[%s933_s20 + $0x20] sm:$0xff]   ;;  %v945_v3 = vld [vmem:[%s933_s20 + $0x30] sm:$0xff]   ;;  %v210_v5 = vunpack.c.l.bf16 %v936_v0  ;;  %v211_v6 = vunpack.c.l.bf16 %v939_v1  ;;  %v451_v16 = vunpack.c.h.bf16 %v936_v0  ;;  %v452_v17 = vunpack.c.h.bf16 %v939_v1 }
  0x13   : > { %v222_v7 = vld [vmem:[%s189_s17] sm:$0xff]   ;;  %v212_v8 = vunpack.c.l.bf16 %v942_v2  ;;  %v213_v9 = vunpack.c.l.bf16 %v945_v3  ;;  %v453_v18 = vunpack.c.h.bf16 %v942_v2  ;;  %v464_v19 = vunpack.c.l.bf16 %v951_v12 }
  0x14   : > { %v223_v10 = vunpack.c.l.bf16 %v222_v7  ;;  %v338_v11 = vunpack.c.h.bf16 %v222_v7  ;;  %v574_v20 = vunpack.c.h.bf16 %v951_v12 }
  0x16   : > { %v224_v13 = vmul.f32 0.35355338, %v223_v10  ;;  %v339_v15 = vmul.f32 0.35355338, %v338_v11 }
  0x18   : > { %v225_v21 = vmul.f32 %v224_v13, %v210_v5  ;;  %v226_v22 = vmul.f32 %v224_v13, %v211_v6  ;;  %v227_v23 = vmul.f32 %v224_v13, %v212_v8  ;;  %v228_v24 = vmul.f32 %v224_v13, %v213_v9 }
  0x19   : > { %v340_v25 = vmul.f32 %v339_v15, %v210_v5  ;;  %v341_v26 = vmul.f32 %v339_v15, %v211_v6  ;;  %v342_v27 = vmul.f32 %v339_v15, %v212_v8  ;;  %v343_v28 = vmul.f32 %v339_v15, %v213_v9 }
  0x1a   : > { %v230_v29 = vsel %vm229_vm0, %v225_v21, 0.0  ;;  %v237_v30 = vsel %vm229_vm0, %v226_v22, 0.0  ;;  %v244_v31 = vsel %vm229_vm0, %v227_v23, 0.0  ;;  %v251_v32 = vsel %vm229_vm0, %v228_v24, 0.0 }
  0x1b   : > { %v231_v33 = vrot.slane %v230_v29, 4  ;;  %v238_v34 = vrot.slane %v237_v30, 4  ;;  %v245_v35 = vrot.slane %v244_v31, 4  ;;  %v252_v36 = vrot.slane %v251_v32, 4 }
  0x1c   : > { %v344_v37 = vsel %vm229_vm0, %v340_v25, 0.0  ;;  %v351_v38 = vsel %vm229_vm0, %v341_v26, 0.0  ;;  %v358_v39 = vsel %vm229_vm0, %v342_v27, 0.0  ;;  %v365_v40 = vsel %vm229_vm0, %v343_v28, 0.0 }
  0x1d   : > { %v232_v41 = vadd.f32 %v231_v33, %v230_v29  ;;  %v239_v42 = vadd.f32 %v238_v34, %v237_v30  ;;  %v246_v43 = vadd.f32 %v245_v35, %v244_v31  ;;  %v253_v44 = vadd.f32 %v252_v36, %v251_v32 }
  0x1e   : > { %v345_v45 = vrot.slane %v344_v37, 4  ;;  %v352_v46 = vrot.slane %v351_v38, 4  ;;  %v359_v47 = vrot.slane %v358_v39, 4  ;;  %v366_v48 = vrot.slane %v365_v40, 4 }
  0x1f   : > { %v233_v49 = vrot.slane %v232_v41, 2  ;;  %v240_v50 = vrot.slane %v239_v42, 2  ;;  %v247_v51 = vrot.slane %v246_v43, 2  ;;  %v254_v52 = vrot.slane %v253_v44, 2 }
  0x20   : > { %v346_v53 = vadd.f32 %v345_v45, %v344_v37  ;;  %v353_v54 = vadd.f32 %v352_v46, %v351_v38  ;;  %v360_v55 = vadd.f32 %v359_v47, %v358_v39  ;;  %v367_v56 = vadd.f32 %v366_v48, %v365_v40 }
  0x21   : > { %v234_v57 = vadd.f32 %v233_v49, %v232_v41  ;;  %v241_v58 = vadd.f32 %v240_v50, %v239_v42  ;;  %v248_v59 = vadd.f32 %v247_v51, %v246_v43  ;;  %v255_v60 = vadd.f32 %v254_v52, %v253_v44 }
  0x22   : > { %v347_v61 = vrot.slane %v346_v53, 2  ;;  %v354_v62 = vrot.slane %v353_v54, 2  ;;  %v361_v63 = vrot.slane %v360_v55, 2  ;;  %v368_v4 = vrot.slane %v367_v56, 2 }
  0x23   : > { %v235_v5 = vrot.slane %v234_v57, 1  ;;  %v242_v6 = vrot.slane %v241_v58, 1  ;;  %v249_v7 = vrot.slane %v248_v59, 1  ;;  %v256_v8 = vrot.slane %v255_v60, 1 }
  0x24   : > { %v348_v9 = vadd.f32 %v347_v61, %v346_v53  ;;  %v355_v10 = vadd.f32 %v354_v62, %v353_v54  ;;  %v362_v11 = vadd.f32 %v361_v63, %v360_v55  ;;  %v369_v13 = vadd.f32 %v368_v4, %v367_v56 }
  0x25   : > { %v236_v15 = vadd.f32 %v235_v5, %v234_v57  ;;  %v243_v21 = vadd.f32 %v242_v6, %v241_v58  ;;  %v250_v22 = vadd.f32 %v249_v7, %v248_v59  ;;  %v257_v23 = vadd.f32 %v256_v8, %v255_v60 }
  0x26   : > { %v349_v24 = vrot.slane %v348_v9, 1  ;;  %v356_v25 = vrot.slane %v355_v10, 1  ;;  %v363_v26 = vrot.slane %v362_v11, 1  ;;  %v370_v27 = vrot.slane %v369_v13, 1 }
  0x27   : > { %v258_v28 = vsel %vm229_vm0, %v236_v15, -inf  ;;  %v259_v29 = vsel %vm229_vm0, %v243_v21, -inf  ;;  %v260_v30 = vsel %vm229_vm0, %v250_v22, -inf  ;;  %v261_v31 = vsel %vm229_vm0, %v257_v23, -inf }
  0x28   : > { %v262_v32 = vmax.f32 %v258_v28, %v259_v29  ;;  %v263_v33 = vmax.f32 %v260_v30, %v261_v31  ;;  %v350_v34 = vadd.f32 %v349_v24, %v348_v9  ;;  %v357_v35 = vadd.f32 %v356_v25, %v355_v10 }
  0x29   : > { %v364_v36 = vadd.f32 %v363_v26, %v362_v11  ;;  %v371_v37 = vadd.f32 %v370_v27, %v369_v13  ;;  %v454_v38 = vunpack.c.h.bf16 %v945_v3  ;;  %v465_v39 = vmul.f32 0.35355338, %v464_v19 }
  0x2a   : > { %v264_v40 = vmax.f32 %v262_v32, %v263_v33  ;;  %v372_v41 = vsel %vm229_vm0, %v350_v34, -inf  ;;  %v373_v42 = vsel %vm229_vm0, %v357_v35, -inf  ;;  %v575_v43 = vmul.f32 0.35355338, %v574_v20 }
  0x2b   : > { %v374_v44 = vsel %vm229_vm0, %v364_v36, -inf  ;;  %v375_v45 = vsel %vm229_vm0, %v371_v37, -inf  ;;  %v376_v46 = vmax.f32 %v372_v41, %v373_v42  ;;  %v466_v47 = vmul.f32 %v465_v39, %v451_v16 }
  0x2c   : > { %v265_v3 = vsub.f32 %v236_v15, %v264_v40  ;;  %v266_v48 = vsub.f32 %v243_v21, %v264_v40  ;;  %v267_v49 = vsub.f32 %v250_v22, %v264_v40  ;;  %v268_v19 = vsub.f32 %v257_v23, %v264_v40 }
  0x2d   : > { %v377_v50 = vmax.f32 %v374_v44, %v375_v45  ;;  %v467_v51 = vmul.f32 %v465_v39, %v452_v17  ;;  %v468_v12 = vmul.f32 %v465_v39, %v453_v18  ;;  %v469_v20 = vmul.f32 %v465_v39, %v454_v38 }
  0x2e   : > { %v269_v52 = vmul.f32 1.442695, %v265_v3  ;;  %v271_v53 = vmul.f32 1.442695, %v266_v48  ;;  %v273_v54 = vmul.f32 1.442695, %v267_v49  ;;  %v576_v55 = vmul.f32 %v575_v43, %v451_v16 }
  0x2f   : > { %v275_v56 = vmul.f32 1.442695, %v268_v19  ;;  %v378_v57 = vmax.f32 %v376_v46, %v377_v50  ;;  %v470_v58 = vsel %vm229_vm0, %v466_v47, 0.0  ;;  %v477_v59 = vsel %vm229_vm0, %v467_v51, 0.0 }
  0x30   : > { %824 = vpow2.f32 %v269_v52  ;;  %v471_v60 = vrot.slane %v470_v58, 4  ;;  %v478_v61 = vrot.slane %v477_v59, 4  ;;  %v484_v62 = vsel %vm229_vm0, %v468_v12, 0.0 }
  0x31   : > { %826 = vpow2.f32 %v271_v53  ;;  %v379_v63 = vsub.f32 %v350_v34, %v378_v57  ;;  %v380_v4 = vsub.f32 %v357_v35, %v378_v57  ;;  %v381_v5 = vsub.f32 %v364_v36, %v378_v57 }
  0x32   : > { %828 = vpow2.f32 %v273_v54  ;;  %v382_v6 = vsub.f32 %v371_v37, %v378_v57  ;;  %v472_v7 = vadd.f32 %v471_v60, %v470_v58  ;;  %v479_v0 = vadd.f32 %v478_v61, %v477_v59 }
  0x33   : > { %830 = vpow2.f32 %v275_v56  ;;  %v383_v16 = vmul.f32 1.442695, %v379_v63  ;;  %v385_v8 = vmul.f32 1.442695, %v380_v4  ;;  %v387_v9 = vmul.f32 1.442695, %v381_v5 }
  0x34   : > { %v389_v10 = vmul.f32 1.442695, %v382_v6  ;;  %v473_v11 = vrot.slane %v472_v7, 2  ;;  %v480_v13 = vrot.slane %v479_v0, 2  ;;  %v485_v15 = vrot.slane %v484_v62, 4 }
  0x35   : > { %832 = vpow2.f32 %v383_v16  ;;  %v491_v21 = vsel %vm229_vm0, %v469_v20, 0.0  ;;  %v577_v22 = vmul.f32 %v575_v43, %v452_v17  ;;  %v578_v23 = vmul.f32 %v575_v43, %v453_v18 }
  0x36   : > { %834 = vpow2.f32 %v385_v8  ;;  %v474_v24 = vadd.f32 %v473_v11, %v472_v7  ;;  %v481_v25 = vadd.f32 %v480_v13, %v479_v0  ;;  %v486_v26 = vadd.f32 %v485_v15, %v484_v62 }
  0x37   : > { %836 = vpow2.f32 %v387_v9  ;;  %v492_v27 = vrot.slane %v491_v21, 4  ;;  %v579_v28 = vmul.f32 %v575_v43, %v454_v38  ;;  %v580_v29 = vsel %vm229_vm0, %v576_v55, 0.0 }
  0x38   : > { %838 = vpow2.f32 %v389_v10  ;;  %v475_v30 = vrot.slane %v474_v24, 1  ;;  %v482_v31 = vrot.slane %v481_v25, 1  ;;  %v487_v32 = vrot.slane %v486_v26, 2 }
  0x39   : > { %v493_v33 = vadd.f32 %v492_v27, %v491_v21  ;;  %v581_v1 = vrot.slane %v580_v29, 4  ;;  %v587_v17 = vsel %vm229_vm0, %v577_v22, 0.0  ;;  %v594_v2 = vsel %vm229_vm0, %v578_v23, 0.0 }
  0x3a   : > { %v1000_v18 = vpop.eup %824  ;;  %v1002_v34 = vadd.f32 %v475_v30, %v474_v24  ;;  %v1004_v35 = vadd.f32 %v482_v31, %v481_v25  ;;  %v488_v36 = vadd.f32 %v487_v32, %v486_v26  ;;  %v588_v37 = vrot.slane %v587_v17, 4 }
  0x3b   : > { %v1006_v38 = vpop.eup %826  ;;  %v494_v39 = vrot.slane %v493_v33, 2  ;;  %v582_v40 = vadd.f32 %v581_v1, %v580_v29  ;;  %v595_v41 = vrot.slane %v594_v2, 4  ;;  %v601_v42 = vsel %vm229_vm0, %v579_v28, 0.0 }
  0x3c   : > { %v1009_v43 = vpop.eup %828  ;;  %v281_v44 = vrot.slane %v1006_v38, 7  ;;  %v489_v45 = vrot.slane %v488_v36, 1  ;;  %v498_v46 = vsel %vm229_vm0, %v1002_v34, -inf  ;;  %v499_v47 = vsel %vm229_vm0, %v1004_v35, -inf }
  0x3d   : > { %v1016_v3 = vpop.eup %830  ;;  %v284_v48 = vrot.slane %v1009_v43, 6  ;;  %v495_v49 = vadd.f32 %v494_v39, %v493_v33  ;;  %v502_v19 = vmax.f32 %v498_v46, %v499_v47  ;;  %v583_v50 = vrot.slane %v582_v40, 2 }
  0x3e   : > { %v283_v51 = vsel %vm282_vm1, %v281_v44, %v1000_v18  ;;  %v287_v12 = vrot.slane %v1016_v3, 5  ;;  %v490_v20 = vadd.f32 %v489_v45, %v488_v36  ;;  %v589_v52 = vadd.f32 %v588_v37, %v587_v17 }
  0x3f   : > { %v1022_v53 = vpop.eup %832  ;;  %v286_v54 = vsel %vm285_vm2, %v284_v48, %v283_v51  ;;  %v496_v55 = vrot.slane %v495_v49, 1  ;;  %v584_v56 = vadd.f32 %v583_v50, %v582_v40  ;;  %v596_v57 = vadd.f32 %v595_v41, %v594_v2 }
  0x40   : > { %v1025_v58 = vpop.eup %834  ;;  %v289_v59 = vsel %vm288_vm3, %v287_v12, %v286_v54  ;;  %v500_v60 = vsel %vm229_vm0, %v490_v20, -inf  ;;  %v590_v61 = vrot.slane %v589_v52, 2  ;;  %v602_v62 = vrot.slane %v601_v42, 4 }
  0x41   : > { %v1029_v63 = vpop.eup %836  ;;  %v292_v4 = vsel %vm291_vm4, %v289_v59, 0.0  ;;  %v395_v5 = vrot.slane %v1025_v58, 7  ;;  %v497_v6 = vadd.f32 %v496_v55, %v495_v49  ;;  %v585_v7 = vrot.slane %v584_v56, 1 }
  0x42   : > { %v1033_v0 = vpop.eup %838  ;;  %v293_v16 = vrot.slane %v292_v4, 4  ;;  %v397_v8 = vrot.slane %v1029_v63, 6  ;;  %v591_v9 = vadd.f32 %v590_v61, %v589_v52  ;;  %v597_v10 = vrot.slane %v596_v57, 2 }
  0x43   : > { %v396_v11 = vsel %vm282_vm1, %v395_v5, %v1022_v53  ;;  %v399_v13 = vrot.slane %v1033_v0, 5  ;;  %v501_v15 = vsel %vm229_vm0, %v497_v6, -inf  ;;  %v586_v21 = vadd.f32 %v585_v7, %v584_v56 }
  0x44   : > { %v294_v22 = vadd.f32 %v293_v16, %v292_v4  ;;  %v398_v23 = vsel %vm285_vm2, %v397_v8, %v396_v11  ;;  %v503_v24 = vmax.f32 %v500_v60, %v501_v15  ;;  %v592_v25 = vrot.slane %v591_v9, 1  ;;  %v1055_v16 = vld [vmem:[%s933_s20 + $0x8] sm:$0xff]   ;;  %v1058_v8 = vld [vmem:[%s933_s20 + $0x18] sm:$0xff]  }
  0x45   : > { %v1042_v26 = vsub.s32 0, %v953_v14  ;;  %v400_v27 = vsel %vm288_vm3, %v399_v13, %v398_v23  ;;  %v598_v28 = vadd.f32 %v597_v10, %v596_v57  ;;  %v603_v29 = vadd.f32 %v602_v62, %v601_v42  ;;  %v1068_v23 = vld [vmem:[%s933_s20 + $0x38] sm:$0xff]  }
  0x46   : > { %v295_v30 = vrot.slane %v294_v22, 2  ;;  %v402_v31 = vsel %vm291_vm4, %v400_v27, 0.0  ;;  %v504_v32 = vmax.f32 %v502_v19, %v503_v24  ;;  %v593_v33 = vadd.f32 %v592_v25, %v591_v9  ;;  %v1061_v9 = vld [vmem:[%s933_s20 + $0x28] sm:$0xff]  }
  0x47   : > { %v403_v1 = vrot.slane %v402_v31, 4  ;;  %v599_v17 = vrot.slane %v598_v28, 1  ;;  %v604_v2 = vrot.slane %v603_v29, 2  ;;  %v608_v36 = vsel %vm229_vm0, %v586_v21, -inf }
  0x48   : > { %v296_v37 = vadd.f32 %v295_v30, %v294_v22  ;;  %v505_v39 = vsub.f32 %v1002_v34, %v504_v32  ;;  %v506_v14 = vsub.f32 %v1004_v35, %v504_v32  ;;  %v507_v40 = vsub.f32 %v490_v20, %v504_v32 }
  0x49   : > { %v404_v41 = vadd.f32 %v403_v1, %v402_v31  ;;  %v508_v44 = vsub.f32 %v497_v6, %v504_v32  ;;  %v600_v45 = vadd.f32 %v599_v17, %v598_v28  ;;  %v605_v42 = vadd.f32 %v604_v2, %v603_v29 }
  0x4a   : > { %v297_v46 = vrot.slane %v296_v37, 1  ;;  %v509_v47 = vmul.f32 1.442695, %v505_v39  ;;  %v511_v48 = vmul.f32 1.442695, %v506_v14  ;;  %v609_v49 = vsel %vm229_vm0, %v593_v33, -inf }
  0x4b   : > { %v405_v19 = vrot.slane %v404_v41, 2  ;;  %v513_v50 = vmul.f32 1.442695, %v507_v40  ;;  %v515_v51 = vmul.f32 1.442695, %v508_v44  ;;  %v606_v12 = vrot.slane %v605_v42, 1 }
  0x4c   : > { %v298_v52 = vadd.f32 %v297_v46, %v296_v37  ;;  %840 = vpow2.f32 %v509_v47  ;;  %v610_v35 = vsel %vm229_vm0, %v600_v45, -inf  ;;  %v612_v55 = vmax.f32 %v608_v36, %v609_v49 }
  0x4d   : > { %v406_v54 = vadd.f32 %v405_v19, %v404_v41  ;;  %842 = vpow2.f32 %v511_v48  ;;  %v607_v34 = vadd.f32 %v606_v12, %v605_v42  ;;  %v218_v24 = vunpack.c.l.bf16 %v1055_v16 }
  0x4e   : > { %v302_v20 = vrot.slane %v298_v52, %v1042_v26  ;;  %844 = vpow2.f32 %v513_v50  ;;  %v219_v29 = vunpack.c.l.bf16 %v1058_v8  ;;  %v220_v30 = vunpack.c.l.bf16 %v1061_v9 }
  0x4f   : > { %v407_v56 = vrot.slane %v406_v54, 1  ;;  %846 = vpow2.f32 %v515_v51  ;;  %v611_v57 = vsel %vm229_vm0, %v607_v34, -inf }
  0x50   : > { %848 = vrcp.f32 %v302_v20  ;;  %v613_v59 = vmax.f32 %v610_v35, %v611_v57 }
  0x51   : > { %v408_v60 = vadd.f32 %v407_v56, %v406_v54 }
  0x52   : > { %v614_v61 = vmax.f32 %v612_v55, %v613_v59 }
  0x53   : > { %v412_v62 = vrot.slane %v408_v60, %v1042_v26 }
  0x54   : > { %v615_v4 = vsub.f32 %v586_v21, %v614_v61  ;;  %v616_v5 = vsub.f32 %v593_v33, %v614_v61  ;;  %v617_v6 = vsub.f32 %v600_v45, %v614_v61  ;;  %v618_v7 = vsub.f32 %v607_v34, %v614_v61 }
  0x55   : > { %850 = vrcp.f32 %v412_v62  ;;  %v221_v33 = vunpack.c.l.bf16 %v1068_v23 }
  0x56   : > { %v1063_v10 = vpop.eup %840  ;;  %v619_v11 = vmul.f32 1.442695, %v615_v4  ;;  %v621_v13 = vmul.f32 1.442695, %v616_v5  ;;  %v623_v15 = vmul.f32 1.442695, %v617_v6 }
  0x57   : > { %v1065_v22 = vpop.eup %842  ;;  %v625_v27 = vmul.f32 1.442695, %v618_v7 }
  0x58   : > { %v1070_v21 = vpop.eup %844  ;;  %v521_v25 = vrot.slane %v1065_v22, 7  ;;  %852 = vpow2.f32 %v619_v11 }
  0x59   : > { %v1074_v28 = vpop.eup %846  ;;  %v523_v31 = vrot.slane %v1070_v21, 6  ;;  %854 = vpow2.f32 %v621_v13 }
  0x5a   : > { %v849_v32 = vpop.eup %848  ;;  %v522_v1 = vsel %vm282_vm1, %v521_v25, %v1063_v10  ;;  %v525_v17 = vrot.slane %v1074_v28, 5  ;;  %856 = vpow2.f32 %v623_v15 }
  0x5b   : > { %v304_v2 = vmul.f32 %v849_v32, %v1000_v18  ;;  %v305_v36 = vmul.f32 %v849_v32, %v1006_v38  ;;  %v306_v37 = vmul.f32 %v849_v32, %v1009_v43  ;;  %v307_v39 = vmul.f32 %v849_v32, %v1016_v3 }
  0x5c   : > { %v524_v14 = vsel %vm285_vm2, %v523_v31, %v522_v1  ;;  %858 = vpow2.f32 %v625_v27 }
  0x5d   : > { %v311_v40 = vrot.slane %v304_v2, %v1042_v26  ;;  %v315_v41 = vrot.slane %v305_v36, %v1042_v26  ;;  %v319_v44 = vrot.slane %v306_v37, %v1042_v26  ;;  %v323_v45 = vrot.slane %v307_v39, %v1042_v26 }
  0x5e   : > { %v526_v42 = vsel %vm288_vm3, %v525_v17, %v524_v14 }
  0x5f   : > { %v851_v18 = vpop.eup %850  ;;  %v324_v46 = vmul.f32 %v311_v40, %v218_v24  ;;  %v325_v38 = vmul.f32 %v315_v41, %v219_v29  ;;  %v326_v47 = vmul.f32 %v319_v44, %v220_v30  ;;  %v327_v43 = vmul.f32 %v323_v45, %v221_v33 }
  0x60   : > { %v414_v3 = vmul.f32 %v851_v18, %v1022_v53  ;;  %v415_v48 = vmul.f32 %v851_v18, %v1025_v58  ;;  %v416_v49 = vmul.f32 %v851_v18, %v1029_v63  ;;  %v417_v19 = vmul.f32 %v851_v18, %v1033_v0 }
  0x61   : > { %v328_v50 = vsel %vm229_vm0, %v324_v46, 0.0  ;;  %v329_v51 = vsel %vm229_vm0, %v325_v38, 0.0  ;;  %v331_v12 = vsel %vm229_vm0, %v326_v47, 0.0  ;;  %v333_v63 = vsel %vm229_vm0, %v327_v43, 0.0 }
  0x62   : > { %v1100_v52 = vpop.eup %852  ;;  %v330_v54 = vadd.f32 %v329_v51, %v328_v50  ;;  %v421_v34 = vrot.slane %v414_v3, %v1042_v26  ;;  %v425_v35 = vrot.slane %v415_v48, %v1042_v26  ;;  %v429_v53 = vrot.slane %v416_v49, %v1042_v26 }
  0x63   : > { %v1105_v58 = vpop.eup %854  ;;  %v433_v0 = vrot.slane %v417_v19, %v1042_v26  ;;  %v528_v20 = vsel %vm291_vm4, %v526_v42, 0.0  ;;  %v459_v3 = vunpack.c.h.bf16 %v1055_v16  ;;  %v460_v48 = vunpack.c.h.bf16 %v1058_v8 }
  0x64   : > { %v1110_v55 = vpop.eup %856  ;;  %v332_v56 = vadd.f32 %v331_v12, %v330_v54  ;;  %v434_v57 = vmul.f32 %v421_v34, %v218_v24  ;;  %v435_v59 = vmul.f32 %v425_v35, %v219_v29  ;;  %v436_v60 = vmul.f32 %v429_v53, %v220_v30 }
  0x65   : > { %v437_v61 = vmul.f32 %v433_v0, %v221_v33  ;;  %v529_v62 = vrot.slane %v528_v20, 4  ;;  %v631_v4 = vrot.slane %v1105_v58, 7  ;;  %v633_v5 = vrot.slane %v1110_v55, 6 }
  0x66   : > { %v859_v6 = vpop.eup %858  ;;  %v334_v7 = vadd.f32 %v333_v63, %v332_v56  ;;  %v438_v11 = vsel %vm229_vm0, %v434_v57, 0.0  ;;  %v439_v13 = vsel %vm229_vm0, %v435_v59, 0.0  ;;  %v441_v15 = vsel %vm229_vm0, %v436_v60, 0.0 }
  0x67   : > { %v440_v24 = vadd.f32 %v439_v13, %v438_v11  ;;  %v530_v25 = vadd.f32 %v529_v62, %v528_v20  ;;  %v632_v27 = vsel %vm282_vm1, %v631_v4, %v1100_v52  ;;  %v443_v30 = vsel %vm229_vm0, %v437_v61, 0.0 }
  0x68   : > { %v335_v29 = vpack.c.bf16 %v334_v7, %v334_v7  ;;  %v634_v31 = vsel %vm285_vm2, %v633_v5, %v632_v27  ;;  %v635_v32 = vrot.slane %v859_v6, 5  ;;  %v461_v49 = vunpack.c.h.bf16 %v1061_v9 }
  0x69   : > { %v442_v33 = vadd.f32 %v441_v15, %v440_v24  ;;  %v531_v1 = vrot.slane %v530_v25, 2  ;;  %v462_v19 = vunpack.c.h.bf16 %v1068_v23 }
  0x6a   : > { %336 = vst.msk [vmem:[%s1122_s23] sm:$0xf] %vm291_vm4, %v335_v29  ;;  %v636_v17 = vsel %vm288_vm3, %v635_v32, %v634_v31 }
  0x6b   : > { %v444_v2 = vadd.f32 %v443_v30, %v442_v33  ;;  %v532_v36 = vadd.f32 %v531_v1, %v530_v25  ;;  %v638_v37 = vsel %vm291_vm4, %v636_v17, 0.0 }
  0x6c   : > { %v639_v39 = vrot.slane %v638_v37, 4 }
  0x6d   : > { %v445_v14 = vpack.c.bf16 %v444_v2, %v444_v2  ;;  %v533_v40 = vrot.slane %v532_v36, 1 }
  0x6e   : > { %v640_v41 = vadd.f32 %v639_v39, %v638_v37 }
  0x6f   : > { %446 = vst.msk [vmem:[%s1122_s23 + $0x4] sm:$0xf] %vm291_vm4, %v445_v14  ;;  %v534_v44 = vadd.f32 %v533_v40, %v532_v36 }
  0x70   : > { %v641_v45 = vrot.slane %v640_v41, 2 }
  0x71   : > { %v538_v42 = vrot.slane %v534_v44, %v1042_v26 }
  0x72   : > { %v642_v18 = vadd.f32 %v641_v45, %v640_v41 }
  0x73   : > { %860 = vrcp.f32 %v538_v42 }
  0x74   : > { %v643_v46 = vrot.slane %v642_v18, 1 }
  0x76   : > { %v644_v38 = vadd.f32 %v643_v46, %v642_v18 }
  0x78   : > { %v648_v47 = vrot.slane %v644_v38, %v1042_v26 }
  0x7a   : > { %862 = vrcp.f32 %v648_v47 }
  0x7d   : > { %v861_v43 = vpop.eup %860 }
  0x7e   : > { %v540_v50 = vmul.f32 %v861_v43, %v1063_v10  ;;  %v541_v51 = vmul.f32 %v861_v43, %v1065_v22  ;;  %v542_v12 = vmul.f32 %v861_v43, %v1070_v21  ;;  %v543_v54 = vmul.f32 %v861_v43, %v1074_v28 }
  0x80   : > { %v547_v34 = vrot.slane %v540_v50, %v1042_v26  ;;  %v551_v35 = vrot.slane %v541_v51, %v1042_v26  ;;  %v555_v16 = vrot.slane %v542_v12, %v1042_v26  ;;  %v559_v8 = vrot.slane %v543_v54, %v1042_v26 }
  0x82   : > { %v560_v53 = vmul.f32 %v547_v34, %v459_v3  ;;  %v561_v9 = vmul.f32 %v551_v35, %v460_v48  ;;  %v562_v63 = vmul.f32 %v555_v16, %v461_v49  ;;  %v563_v23 = vmul.f32 %v559_v8, %v462_v19 }
  0x84   : > { %v863_v0 = vpop.eup %862  ;;  %v564_v10 = vsel %vm229_vm0, %v560_v53, 0.0  ;;  %v565_v22 = vsel %vm229_vm0, %v561_v9, 0.0  ;;  %v567_v21 = vsel %vm229_vm0, %v562_v63, 0.0  ;;  %v569_v59 = vsel %vm229_vm0, %v563_v23, 0.0 }
  0x85   : > { %v566_v28 = vadd.f32 %v565_v22, %v564_v10  ;;  %v650_v20 = vmul.f32 %v863_v0, %v1100_v52  ;;  %v651_v56 = vmul.f32 %v863_v0, %v1105_v58  ;;  %v652_v57 = vmul.f32 %v863_v0, %v1110_v55 }
  0x86   : > { %v653_v60 = vmul.f32 %v863_v0, %v859_v6 }
  0x87   : > { %v568_v61 = vadd.f32 %v567_v21, %v566_v28  ;;  %v657_v62 = vrot.slane %v650_v20, %v1042_v26  ;;  %v661_v4 = vrot.slane %v651_v56, %v1042_v26  ;;  %v665_v5 = vrot.slane %v652_v57, %v1042_v26 }
  0x88   : > { %v669_v7 = vrot.slane %v653_v60, %v1042_v26 }
  0x89   : > { %v570_v11 = vadd.f32 %v569_v59, %v568_v61  ;;  %v670_v52 = vmul.f32 %v657_v62, %v459_v3  ;;  %v671_v13 = vmul.f32 %v661_v4, %v460_v48  ;;  %v672_v58 = vmul.f32 %v665_v5, %v461_v49 }
  0x8a   : > { %v673_v15 = vmul.f32 %v669_v7, %v462_v19 }
  0x8b   : > { %v571_v55 = vpack.c.bf16 %v570_v11, %v570_v11  ;;  %v674_v24 = vsel %vm229_vm0, %v670_v52, 0.0  ;;  %v675_v6 = vsel %vm229_vm0, %v671_v13, 0.0  ;;  %v677_v25 = vsel %vm229_vm0, %v672_v58, 0.0 }
  0x8c   : > { %v676_v27 = vadd.f32 %v675_v6, %v674_v24  ;;  %v679_v29 = vsel %vm229_vm0, %v673_v15, 0.0 }
  0x8d   : > { %572 = vst.msk [vmem:[%s1122_s23 + $0x8] sm:$0xf] %vm291_vm4, %v571_v55 }
  0x8e   : > { %v678_v30 = vadd.f32 %v677_v25, %v676_v27 }
  0x90   : > { %v680_v26 = vadd.f32 %v679_v29, %v678_v30 }
  0x92   : > { %v681_v31 = vpack.c.bf16 %v680_v26, %v680_v26 }
  0x94   : > { %682 = vst.msk [vmem:[%s1122_s23 + $0xc] sm:$0xf] %vm291_vm4, %v681_v31 }
  0x95 PF: > { %s12_s11 = sadd.s32 1, %s886_s11   ;;  %s1179_s9 = smov %s882_s10 }
  0x96   : > { %p9_p5 = scmp.ge.s32.totalorder %s12_s11, 4   ;;  %s1180_s10 = smov %s1182_s12 }
  0x98   :  { %11 = sbr.rel (!%p9_p5) target bundleno = 2 (0x2), region = 61 }

// kernel: model_forward.19
= control target key start
LH: loop header
LB: loop body
LE: loop exit
PB: predicated region body
PF: predicated region fallthrough
CT: control target
= control target key end

     0   :  { %s488_s15 = smov 0   ;;  %s539_s0 = inlined_call_operand.vmem [shape: f32[2,16,32], index: 0, kind: input, shape index: {}]   ;;  %s540_s1 = inlined_call_operand.vmem [shape: f32[1,32], index: 1, kind: input, shape index: {}]   ;;  %s541_s2 = inlined_call_operand.vmem [shape: bf16[32,32], index: 2, kind: input, shape index: {}]   ;;  %s542_s3 = inlined_call_operand.vmem [shape: f32[32,1], index: 3, kind: input, shape index: {}]   ;;  %s543_s4 = inlined_call_operand.vmem [shape: bf16[2,32,16], index: 4, kind: output, shape index: {}]  }
   0x1 LB: > { %s401_s16 = sadd.s32 4294967295, %s460_s15   ;;  %p405_p0 = scmp.ge.s32.totalorder %s460_s15, 1  ;;  %s460_s15 = sphi %s488_s15, %s14_s15  }
   0x2   : > { %p162_p1 = scmp.lt.s32.totalorder %s460_s15, 3 }
   0x4   : > { %p163_p2 = pnand %p405_p0, %p162_p1 }
   0x5   : > { %p188_p3 = scmp.lt.s32.totalorder (!%p163_p2), %s401_s16, 1  ;;  %vm203_vm0 = vcmask (!%p163_p2), 261120   ;;  %v448_v6 = vld [vmem:[%s541_s2] sm:$0xff] (!%p163_p2)   ;;  %v462_v8 = vmov (!%p163_p2), 0   ;;  %v235_v9 = vld [vmem:[%s542_s3 + $0x10] sm:$0xff] (!%p163_p2)  ;;  %v234_v10 = vld [vmem:[%s542_s3 + $0x8] sm:$0xff] (!%p163_p2) }
   0x6   : > { %166 = sbr.rel (%p163_p2) target bundleno = 415 (0x19f), region = 36  ;;  %432 = vmatprep.mubr.msk.bf16.mxu0 (!%p163_p2), %vm203_vm0, %v448_v6  ;;  %v233_v7 = vld [vmem:[%s542_s3] sm:$0xff] (!%p163_p2)  ;;  %446 = vset.pattern.permute.xlu1 (!%p163_p2), %v462_v8  ;;  %v236_v11 = vld [vmem:[%s542_s3 + $0x18] sm:$0xff] (!%p163_p2)  ;;  %v449_v27 = vld [vmem:[%s541_s2 + $0x8] sm:$0xff] (!%p163_p2)   ;;  %vm341_vm1 = vcmask (!%p163_p2), 125952  }
   0x7   : > { %447 = vset.pattern.permute.xlu0 (!%p163_p2), %v462_v8  ;;  %239 = vperm.xlu1 (!%p163_p2), %446, %v233_v7   ;;  %v410_v21 = vld [vmem:[%s540_s1] ss:$0 sm:$0xff] (!%p163_p2) }
   0xb   : > { %244 = vperm.xlu1 (!%p163_p2), %446, %v234_v10  }
   0xd   : > { %s545_s16 = smov (!%p188_p3, %s401_s16), 1 }
   0xe   : > { %s421_s17 = sshll.u32 %s545_s16, 4 }
   0xf   : > { %s192_s20 = scalar_lea.vmem %s539_s0, %s421_s17  ;;  %254 = vperm.xlu1 %446, %v236_v11   ;;  %s197_s11 = scalar_lea.vmem %s543_s4, %s421_s17 }
  0x10   : > { %v199_v0 = vld [vmem:[%s192_s20] sm:$0xff]  ;;  %v200_v1 = vld [vmem:[%s192_s20 + $0x8] sm:$0xff] }
  0x11   : > { %v201_v2 = vmul.f32 %v199_v0, %v199_v0  ;;  %v202_v3 = vmul.f32 %v200_v1, %v200_v1 }
  0x13   : > { %v204_v4 = vsel %vm203_vm0, %v201_v2, 0.0  ;;  %v207_v5 = vsel %vm203_vm0, %v202_v3, 0.0 }
  0x14   : > { %205 = vadd.xlane.f32.xlu0 %v204_v4 }
  0x18   : > { %208 = vadd.xlane.f32.xlu0 %v207_v5 }
  0x2e   : > { %249 = vperm.xlu0 %447, %v235_v9  }
  0x86   : > { %v240_v28 = vpop.permute.xlu1 %239 }
  0x8a   : > { %v245_v29 = vpop.permute.xlu1 %244 }
  0x8e   : > { %v255_v34 = vpop.permute.xlu1 %254 }
  0xa1   : > { %v206_v12 = vpop.xlane.xlu0 %205 }
  0xa2   : > { %v211_v13 = vmul.f32 0.03125, %v206_v12 }
  0xa4   : > { %v213_v14 = vadd.f32 1e-06, %v211_v13 }
  0xa5   : > { %v209_v15 = vpop.xlane.xlu0 %208 }
  0xa6   : > { %450 = vrsqrt.f32 %v213_v14  ;;  %v212_v16 = vmul.f32 0.03125, %v209_v15 }
  0xa8   : > { %v214_v17 = vadd.f32 1e-06, %v212_v16 }
  0xaa   : > { %452 = vrsqrt.f32 %v214_v17 }
  0xad   : > { %v250_v30 = vpop.permute.xlu0 %249 }
  0xb0   : > { %v451_v18 = vpop.eup %450 }
  0xb1   : > { %v217_v19 = vmul.f32 %v451_v18, %v199_v0 }
  0xb3   : > { %v226_v23 = vmul.f32 %v410_v21, %v217_v19 }
  0xb4   : > { %v453_v20 = vpop.eup %452 }
  0xb5   : > { %v218_v22 = vmul.f32 %v453_v20, %v200_v1 }
  0xb7   : > { %v227_v24 = vmul.f32 %v410_v21, %v218_v22 }
  0xb9   : > { %v228_v25 = vpack.c.bf16 %v227_v24, %v226_v23 }
  0xbb   : > { %436 = vmatprep.subr.msk.bf16.mxu0 %vm203_vm0, %v228_v25  ;;  %v274_v26 = vsel %vm203_vm0, %v228_v25, 0 }
  0xbc   : > { %431 = vmatpush3.bf16.xpose.msra.mxu0 %v274_v26 }
  0xc3   : > { %433 = vmatmul.mubr.msk.bf16.vlgmr.msra.gmra.mrb[0].mxu0 %vm203_vm0, %v449_v27 }
 0x196   : > { %v434_v31 = vpop.f32.mrb[0].mxu0 }
 0x197   : > { %v319_v32 = vadd.f32 %v434_v31, %v250_v30  ;;  %v310_v33 = vpop.f32.mrb[1].mxu0 }
 0x198   : > { %v311_v35 = vadd.f32 %v310_v33, %v240_v28  ;;  %v435_v36 = vpop.f32.mrb[2].mxu0 }
 0x199   : > { %v425_v37 = vpack.c.bf16 %v319_v32, %v319_v32  ;;  %v322_v38 = vadd.f32 %v435_v36, %v255_v34  ;;  %v313_v39 = vpop.f32.mrb[3].mxu0 }
 0x19a   : > { %v423_v40 = vpack.c.bf16 %v311_v35, %v311_v35  ;;  %v314_v41 = vadd.f32 %v313_v39, %v245_v29 }
 0x19b   : > { %344 = vst.msk [vmem:[%s197_s11 + $0x8] sm:$0xf] %vm341_vm1, %v425_v37  ;;  %v426_v42 = vpack.c.bf16 %v322_v38, %v322_v38 }
 0x19c   : > { %342 = vst.msk [vmem:[%s197_s11] sm:$0xf] %vm341_vm1, %v423_v40  ;;  %v424_v43 = vpack.c.bf16 %v314_v41, %v314_v41 }
 0x19d   : > { %345 = vst.msk [vmem:[%s197_s11 + $0xc] sm:$0xf] %vm341_vm1, %v426_v42 }
 0x19e   : > { %343 = vst.msk [vmem:[%s197_s11 + $0x4] sm:$0xf] %vm341_vm1, %v424_v43 }
 0x19f PF: > { %s14_s15 = sadd.s32 1, %s460_s15  }
 0x1a0   : > { %p11_p4 = scmp.ge.s32.totalorder %s14_s15, 4  }
 0x1a2   :  { %13 = sbr.rel (!%p11_p4) target bundleno = 1 (0x1), region = 66 }

// kernel: model_forward.22
= control target key start
LH: loop header
LB: loop body
LE: loop exit
PB: predicated region body
PF: predicated region fallthrough
CT: control target
= control target key end

     0   :  { %s798_s27 = smov 0   ;;  %s893_s0 = inlined_call_operand.vmem [shape: f32[2,16,32], index: 0, kind: input, shape index: {}]   ;;  %s894_s1 = inlined_call_operand.vmem [shape: bf16[32,128], index: 1, kind: input, shape index: {}]   ;;  %s895_s2 = inlined_call_operand.vmem [shape: f32[1,128], index: 2, kind: input, shape index: {}]   ;;  %s896_s3 = inlined_call_operand.vmem [shape: f32[4,64], index: 3, kind: input, shape index: {}]   ;;  %s897_s4 = inlined_call_operand.vmem [shape: f32[1,64], index: 4, kind: input, shape index: {}]   ;;  %s898_s5 = inlined_call_operand.vmem [shape: bf16[64,32], index: 5, kind: input, shape index: {}]   ;;  %s899_s6 = inlined_call_operand.vmem [shape: f32[1,32], index: 6, kind: input, shape index: {}]   ;;  %s900_s7 = inlined_call_operand.vmem [shape: f32[1,32], index: 7, kind: input, shape index: {}]   ;;  %s901_s8 = inlined_call_operand.vmem [shape: f32[2,16,32], index: 8, kind: output, shape index: {}]  }
   0x1 LB: > { %s652_s28 = sadd.s32 4294967295, %s748_s27   ;;  %p656_p0 = scmp.ge.s32.totalorder %s748_s27, 1  ;;  %s748_s27 = sphi %s798_s27, %s18_s27  }
   0x2   : > { %p262_p1 = scmp.lt.s32.totalorder %s748_s27, 3 }
   0x4   : > { %p263_p2 = pnand %p656_p0, %p262_p1 }
   0x5   : > { %v716_v0 = vld [vmem:[%s894_s1] sm:$0xff] (!%p263_p2)   ;;  %v750_v1 = vmov (!%p263_p2), 0.0   ;;  %v717_v2 = vld [vmem:[%s894_s1 + $0x8] sm:$0xff] (!%p263_p2)   ;;  %vm751_vm0 = vmmov (!%p263_p2), 0   ;;  %p296_p3 = scmp.lt.s32.totalorder (!%p263_p2), %s652_s28, 1  ;;  %vm333_vm1 = vcmask (!%p263_p2), 261120   ;;  %v379_v8 = vlaneseq (!%p263_p2) }
   0x6   : > { %266 = sbr.rel (%p263_p2) target bundleno = 771 (0x303), region = 52  ;;  %685 = vmatprep.subr.bf16.mxu0 (!%p263_p2), %v750_v1  ;;  %693 = vmatprep.subr.bf16.mxu1 (!%p263_p2), %v750_v1  ;;  %v718_v6 = vld [vmem:[%s898_s5] sm:$0xff] (!%p263_p2)   ;;  %v719_v7 = vld [vmem:[%s898_s5 + $0x8] sm:$0xff] (!%p263_p2)   ;;  %v720_v63 = vld [vmem:[%s898_s5 + $0x10] sm:$0xff] (!%p263_p2)   ;;  %s752_s29 = smov (!%p263_p2), 64   ;;  %vm522_vm8 = vcmask (!%p263_p2), 523264  }
   0x7   : > { %686 = vmatpush3.bf16.msra.mxu0 (!%p263_p2), %v716_v0  ;;  %689 = vmatprep.mubr.msk.bf16.mxu0 (!%p263_p2), %vm751_vm0, %v750_v1  ;;  %v380_v9 = vshrl.u32 (!%p263_p2), %v379_v8, 7  ;;  %v661_v11 = vld [vmem:[%s895_s2] ss:$0 sm:$0xff] (!%p263_p2)  ;;  %v721_v0 = vld [vmem:[%s898_s5 + $0x18] sm:$0xff] (!%p263_p2)  }
   0x8   : > { %687 = vmatprep.subr.bf16.mxu0 (!%p263_p2), %v750_v1  ;;  %701 = vmatprep.mubr.msk.bf16.mxu1 (!%p263_p2), %vm751_vm0, %v750_v1  ;;  %v378_v12 = vld [vmem:[%s896_s3] sm:$0xf] (!%p263_p2) }
   0x9   : > { %694 = vmatpush3.bf16.msra.mxu1 (!%p263_p2), %v718_v6  ;;  %v384_v10 = vsub.s32 (!%p263_p2), 3, %v380_v9  ;;  %v399_v13 = vsub.s32 (!%p263_p2), 0, %v380_v9  ;;  %v416_v14 = vsub.s32 (!%p263_p2), 1, %v380_v9  ;;  %vm390_vm2 = vcmp.lt.s32.totalorder (!%p263_p2), %v380_v9, 3  ;;  %v665_v8 = vld [vmem:[%s897_s4] ss:$0 sm:$0xff] (!%p263_p2) }
   0xa   : > { %695 = vmatprep.subr.bf16.mxu1 (!%p263_p2), %v750_v1  ;;  %vm407_vm3 = vcmp.lt.s32.totalorder (!%p263_p2), %v380_v9, 2  ;;  %v433_v21 = vsub.s32 (!%p263_p2), 2, %v380_v9  ;;  %vm393_vm4 = vcmp.ge.s32.totalorder (!%p263_p2), %v380_v9, 3  ;;  %vm410_vm5 = vcmp.ge.s32.totalorder (!%p263_p2), %v380_v9, 2 }
   0xb   : > { %688 = vmatpush3.bf16.msra.mxu0 (!%p263_p2), %v717_v2  ;;  %v385_v18 = vrot.slane (!%p263_p2), %v378_v12, %v384_v10  ;;  %v400_v20 = vrot.slane (!%p263_p2), %v378_v12, %v399_v13  ;;  %v417_v25 = vrot.slane (!%p263_p2), %v378_v12, %v416_v14  ;;  %vm424_vm6 = vcmp.lt.s32.totalorder (!%p263_p2), %v380_v9, 1 }
   0xc   : > { %vm427_vm7 = vcmp.ge.s32.totalorder (!%p263_p2), %v380_v9, 1  ;;  %v434_v32 = vrot.slane (!%p263_p2), %v378_v12, %v433_v21 }
   0xd   : > { %s903_s28 = smov (!%p296_p3, %s652_s28), 1  ;;  %696 = vmatpush3.bf16.msra.mxu1 %v719_v7 }
   0xe   : > { %s675_s11 = sshll.u32 %s903_s28, 4  ;;  %697 = vmatprep.subr.bf16.mxu1 %v750_v1 }
   0xf   : > { %s300_s14 = scalar_lea.vmem %s893_s0, %s675_s11  ;;  %s305_s17 = scalar_lea.vmem %s901_s8, %s675_s11 }
  0x10   : > { %v825_v3 = vld [vmem:[%s300_s14] sm:$0xff]  ;;  %v827_v4 = vld [vmem:[%s300_s14 + $0x8] sm:$0xff] }
  0x11   : > { %v309_v5 = vpack.c.bf16 %v827_v4, %v825_v3  ;;  %698 = vmatpush3.bf16.msra.mxu1 %v720_v63 }
  0x12   : > { %699 = vmatprep.subr.bf16.mxu1 %v750_v1 }
  0x13   : > { %690 = vmatmul.mubr.msk.bf16.vlgmr.msra.gmra.mrb[0].mxu0 %vm333_vm1, %v309_v5 }
  0x15   : > { %700 = vmatpush3.bf16.msra.mxu1 %v721_v0 }
  0xe6   : > { %v371_v15 = vpop.f32.mrb[0].mxu0 }
  0xe7   : > { %v846_v16 = vadd.f32 %v661_v11, %v371_v15  ;;  %v691_v17 = vpop.f32.mrb[1].mxu0 }
  0xe8   : > { %v374_v19 = vpop.f32.mrb[2].mxu0 }
  0xe9   : > { %v375_v22 = vadd.f32 %v661_v11, %v374_v19  ;;  %v692_v23 = vpop.f32.mrb[3].mxu0  ;;  %v460_v24 = vsub.f32 0.0, %v846_v16  ;;  %v388_v26 = vrot.slane %v846_v16, 5  ;;  %v405_v27 = vrot.slane %v846_v16, 6 }
  0xea   : > { %v422_v33 = vrot.slane %v846_v16, 7  ;;  %v386_v42 = vmul.f32 %v385_v18, %v846_v16 }
  0xeb   : > { %v389_v28 = vrot.slane %v375_v22, 5  ;;  %v461_v29 = vsub.f32 0.0, %v375_v22  ;;  %v462_v30 = vmul.f32 1.442695, %v460_v24  ;;  %v406_v31 = vrot.slane %v375_v22, 6 }
  0xec   : > { %v423_v34 = vrot.slane %v375_v22, 7  ;;  %v387_v44 = vmul.f32 %v385_v18, %v375_v22 }
  0xed   : > { %722 = vpow2.f32 %v462_v30  ;;  %v464_v35 = vmul.f32 1.442695, %v461_v29  ;;  %v392_v36 = vsel %vm390_vm2, %v389_v28, %v388_v26  ;;  %v409_v37 = vsel %vm407_vm3, %v406_v31, %v405_v27 }
  0xee   : > { %v395_v38 = vsel %vm393_vm4, %v392_v36, 0.0  ;;  %v412_v39 = vsel %vm410_vm5, %v409_v37, 0.0  ;;  %v426_v40 = vsel %vm424_vm6, %v423_v34, %v422_v33  ;;  %v391_v41 = vsel %vm390_vm2, %v388_v26, %v389_v28 }
  0xef   : > { %724 = vpow2.f32 %v464_v35  ;;  %v401_v43 = vmul.f32 %v400_v20, %v395_v38  ;;  %v429_v45 = vsel %vm427_vm7, %v426_v40, 0.0  ;;  %v402_v46 = vmul.f32 %v400_v20, %v391_v41 }
  0xf0   : > { %v408_v47 = vsel %vm407_vm3, %v405_v27, %v406_v31  ;;  %v425_v48 = vsel %vm424_vm6, %v422_v33, %v423_v34  ;;  %v418_v50 = vmul.f32 %v417_v25, %v412_v39  ;;  %v435_v54 = vmul.f32 %v434_v32, %v429_v45  ;;  %v666_v27 = vld [vmem:[%s899_s6] ss:$0 sm:$0xff] }
  0xf1   : > { %v403_v49 = vadd.f32 %v401_v43, %v386_v42  ;;  %v404_v51 = vadd.f32 %v402_v46, %v387_v44  ;;  %v419_v52 = vmul.f32 %v417_v25, %v408_v47  ;;  %v436_v56 = vmul.f32 %v434_v32, %v425_v48 }
  0xf3   : > { %v420_v53 = vadd.f32 %v418_v50, %v403_v49  ;;  %v421_v55 = vadd.f32 %v419_v52, %v404_v51 }
  0xf5   : > { %v437_v57 = vadd.f32 %v435_v54, %v420_v53  ;;  %v438_v58 = vadd.f32 %v436_v56, %v421_v55 }
  0xf7   : > { %v723_v59 = vpop.eup %722  ;;  %v446_v9 = vadd.f32 %v665_v8, %v437_v57  ;;  %v447_v10 = vadd.f32 %v665_v8, %v438_v58 }
  0xf8   : > { %v466_v60 = vadd.f32 1.0, %v723_v59 }
  0xf9   : > { %v725_v61 = vpop.eup %724  ;;  %v448_v1 = vsub.f32 0.0, %v446_v9  ;;  %v449_v11 = vsub.f32 0.0, %v447_v10 }
  0xfa   : > { %726 = vrcp.f32 %v466_v60  ;;  %v467_v62 = vadd.f32 1.0, %v725_v61 }
  0xfb   : > { %v450_v12 = vmul.f32 1.442695, %v448_v1  ;;  %v452_v13 = vmul.f32 1.442695, %v449_v11 }
  0xfc   : > { %728 = vrcp.f32 %v467_v62 }
  0xfd   : > { %730 = vpow2.f32 %v450_v12 }
  0xfe   : > { %732 = vpow2.f32 %v452_v13 }
 0x104   : > { %v727_v2 = vpop.eup %726 }
 0x105   : > { %v469_v5 = vmul.f32 %v727_v2, %v846_v16 }
 0x106   : > { %v729_v6 = vpop.eup %728 }
 0x107   : > { %474 = vrot.lane.b32.xlu0 %v469_v5, %s752_s29  ;;  %v471_v7 = vmul.f32 %v729_v6, %v375_v22  ;;  %v731_v14 = vpop.eup %730 }
 0x108   : > { %v733_v15 = vpop.eup %732  ;;  %v454_v16 = vadd.f32 1.0, %v731_v14 }
 0x109   : > { %v455_v17 = vadd.f32 1.0, %v733_v15 }
 0x10a   : > { %734 = vrcp.f32 %v454_v16 }
 0x10b   : > { %476 = vrot.lane.b32.xlu0 %v471_v7, %s752_s29  ;;  %736 = vrcp.f32 %v455_v17 }
 0x114   : > { %v735_v18 = vpop.eup %734 }
 0x115   : > { %v737_v19 = vpop.eup %736  ;;  %v457_v21 = vmul.f32 %v735_v18, %v446_v9 }
 0x116   : > { %v459_v22 = vmul.f32 %v737_v19, %v447_v10 }
 0x179   : > { %v475_v20 = vpop.permute.xlu0 %474 }
 0x17a   : > { %v480_v24 = vmul.f32 %v475_v20, %v457_v21 }
 0x17d   : > { %v477_v23 = vpop.permute.xlu0 %476 }
 0x17e   : > { %v481_v25 = vmul.f32 %v477_v23, %v459_v22 }
 0x180   : > { %v482_v26 = vpack.c.bf16 %v481_v25, %v480_v24 }
 0x182   : > { %702 = vmatmul.mubr.msk.bf16.vlgmr.msra.gmra.mrb[0].mxu1 %vm522_vm8, %v482_v26 }
 0x255   : > { %v560_v28 = vpop.f32.mrb[0].mxu1 }
 0x256   : > { %v561_v29 = vadd.f32 %v666_v27, %v560_v28  ;;  %v703_v30 = vpop.f32.mrb[1].mxu1 }
 0x257   : > { %v563_v31 = vpop.f32.mrb[2].mxu1 }
 0x258   : > { %v567_v32 = vadd.f32 %v561_v29, %v825_v3  ;;  %v564_v33 = vadd.f32 %v666_v27, %v563_v31  ;;  %v704_v34 = vpop.f32.mrb[3].mxu1 }
 0x25a   : > { %v568_v35 = vadd.f32 %v564_v33, %v827_v4  ;;  %v569_v36 = vmul.f32 %v567_v32, %v567_v32  ;;  %v672_v4 = vld [vmem:[%s900_s7] ss:$0 sm:$0xff] }
 0x25c   : > { %v571_v37 = vsel %vm333_vm1, %v569_v36, 0.0  ;;  %v570_v38 = vmul.f32 %v568_v35, %v568_v35 }
 0x25d   : > { %572 = vadd.xlane.f32.xlu1 %v571_v37 }
 0x25e   : > { %v574_v39 = vsel %vm333_vm1, %v570_v38, 0.0 }
 0x261   : > { %575 = vadd.xlane.f32.xlu1 %v574_v39 }
 0x2ea   : > { %v573_v40 = vpop.xlane.xlu1 %572 }
 0x2eb   : > { %v578_v41 = vmul.f32 0.03125, %v573_v40 }
 0x2ed   : > { %v580_v42 = vadd.f32 1e-06, %v578_v41 }
 0x2ee   : > { %v576_v43 = vpop.xlane.xlu1 %575 }
 0x2ef   : > { %738 = vrsqrt.f32 %v580_v42  ;;  %v579_v44 = vmul.f32 0.03125, %v576_v43 }
 0x2f1   : > { %v581_v3 = vadd.f32 1e-06, %v579_v44 }
 0x2f3   : > { %740 = vrsqrt.f32 %v581_v3 }
 0x2f9   : > { %v739_v45 = vpop.eup %738 }
 0x2fa   : > { %v584_v46 = vmul.f32 %v739_v45, %v567_v32 }
 0x2fc   : > { %v593_v47 = vmul.f32 %v672_v4, %v584_v46 }
 0x2fd   : > { %v741_v48 = vpop.eup %740 }
 0x2fe   : > { %595 = vst.msk [vmem:[%s305_s17] sm:$0xff] %vm333_vm1, %v593_v47  ;;  %v585_v49 = vmul.f32 %v741_v48, %v568_v35 }
 0x300   : > { %v594_v50 = vmul.f32 %v672_v4, %v585_v49 }
 0x302   : > { %596 = vst.msk [vmem:[%s305_s17 + $0x8] sm:$0xff] %vm333_vm1, %v594_v50 }
 0x303 PF: > { %s18_s27 = sadd.s32 1, %s748_s27  }
 0x304   : > { %p15_p4 = scmp.ge.s32.totalorder %s18_s27, 4  }
 0x306   :  { %17 = sbr.rel (!%p15_p4) target bundleno = 1 (0x1), region = 82 }

// kernel: model_forward.25
= control target key start
LH: loop header
LB: loop body
LE: loop exit
PB: predicated region body
PF: predicated region fallthrough
CT: control target
= control target key end

     0   :  { %vm97_vm0 = vcmask 261120   ;;  %s530_s2 = inlined_call_operand.vmem [shape: bf16[32,32], index: 2, kind: input, shape index: {}]   ;;  %s531_s0 = inlined_call_operand.vmem [shape: bf16[128,32], index: 0, kind: input, shape index: {}]   ;;  %s532_s3 = inlined_call_operand.vmem [shape: f32[1,32], index: 3, kind: input, shape index: {}]   ;;  %s533_s1 = inlined_call_operand.vmem [shape: f32[128,32], index: 1, kind: input, shape index: {}]   ;;  %s534_s4 = inlined_call_operand.vmem [shape: f32[128,32], index: 4, kind: output, shape index: {}]  }
   0x1   :  { %v324_v0 = vld [vmem:[%s530_s2] sm:$0xff]   ;;  %v325_v1 = vld [vmem:[%s530_s2 + $0x8] sm:$0xff]   ;;  %v330_v6 = vld [vmem:[%s531_s0 + $0x10] sm:$0xff]  }
   0x2   :  { %300 = vmatprep.subr.bf16.mxu0 %v324_v0  ;;  %320 = vmatprep.subr.bf16.mxu1 %v324_v0  ;;  %v326_v2 = vld [vmem:[%s531_s0] sm:$0xff]   ;;  %v328_v4 = vld [vmem:[%s531_s0 + $0x8] sm:$0xff]   ;;  %v331_v7 = vld [vmem:[%s531_s0 + $0x30] sm:$0xff]  }
   0x3   :  { %301 = vmatpush3.bf16.msra.mxu0 %v324_v0  ;;  %322 = vmatpush3.bf16.msra.mxu1 %v324_v0  ;;  %v327_v3 = vld [vmem:[%s531_s0 + $0x20] sm:$0xff]   ;;  %v329_v5 = vld [vmem:[%s531_s0 + $0x28] sm:$0xff]   ;;  %v332_v8 = vld [vmem:[%s531_s0 + $0x18] sm:$0xff]  }
   0x4   :  { %302 = vmatprep.subr.bf16.mxu0 %v325_v1  ;;  %321 = vmatprep.subr.bf16.mxu1 %v325_v1  ;;  %v333_v9 = vld [vmem:[%s531_s0 + $0x38] sm:$0xff]   ;;  %v400_v10 = vld [vmem:[%s532_s3] ss:$0 sm:$0xff]  ;;  %v221_v12 = vld [vmem:[%s533_s1 + $0x10] sm:$0xff] }
   0x5   :  { %304 = vmatprep.mubr.msk.bf16.mxu0 %vm97_vm0, %v326_v2  ;;  %312 = vmatprep.mubr.msk.bf16.mxu1 %vm97_vm0, %v327_v3  ;;  %v229_v14 = vld [vmem:[%s533_s1 + $0x50] sm:$0xff]  ;;  %v219_v18 = vld [vmem:[%s533_s1] sm:$0xff]  ;;  %v222_v24 = vld [vmem:[%s533_s1 + $0x18] sm:$0xff] }
   0x6   :  { %v227_v20 = vld [vmem:[%s533_s1 + $0x40] sm:$0xff]  ;;  %v230_v26 = vld [vmem:[%s533_s1 + $0x58] sm:$0xff]  ;;  %v220_v32 = vld [vmem:[%s533_s1 + $0x8] sm:$0xff] }
   0x7   :  { %303 = vmatpush3.bf16.msra.mxu0 %v325_v1  ;;  %323 = vmatpush3.bf16.msra.mxu1 %v325_v1  ;;  %v228_v34 = vld [vmem:[%s533_s1 + $0x48] sm:$0xff]  ;;  %v225_v44 = vld [vmem:[%s533_s1 + $0x30] sm:$0xff]  ;;  %v223_v50 = vld [vmem:[%s533_s1 + $0x20] sm:$0xff] }
   0x8   :  { %v233_v46 = vld [vmem:[%s533_s1 + $0x70] sm:$0xff]  ;;  %v231_v52 = vld [vmem:[%s533_s1 + $0x60] sm:$0xff]  ;;  %v226_v56 = vld [vmem:[%s533_s1 + $0x38] sm:$0xff] }
   0x9   :  { %v234_v58 = vld [vmem:[%s533_s1 + $0x78] sm:$0xff]  ;;  %v224_v0 = vld [vmem:[%s533_s1 + $0x28] sm:$0xff] }
   0xa   :  { %305 = vmatmul.mubr.msk.bf16.vlgmr.msra.gmra.mrb[0].mxu0 %vm97_vm0, %v328_v4  ;;  %313 = vmatmul.mubr.msk.bf16.vlgmr.msra.gmra.mrb[0].mxu1 %vm97_vm0, %v329_v5  ;;  %v232_v2 = vld [vmem:[%s533_s1 + $0x68] sm:$0xff] }
   0xb   :  { %308 = vmatprep.mubr.msk.bf16.mxu0 %vm97_vm0, %v330_v6  ;;  %316 = vmatprep.mubr.msk.bf16.mxu1 %vm97_vm0, %v331_v7 }
  0x12   :  { %309 = vmatmul.mubr.msk.bf16.gmra.mrb[4].mxu0 %vm97_vm0, %v332_v8  ;;  %317 = vmatmul.mubr.msk.bf16.gmra.mrb[4].mxu1 %vm97_vm0, %v333_v9 }
  0xdd   :  { %v306_v11 = vpop.f32.mrb[0].mxu0  ;;  %v314_v13 = vpop.f32.mrb[0].mxu1 }
  0xde   :  { %v165_v15 = vadd.f32 %v306_v11, %v400_v10  ;;  %v197_v16 = vadd.f32 %v314_v13, %v400_v10  ;;  %v156_v17 = vpop.f32.mrb[1].mxu0  ;;  %v188_v19 = vpop.f32.mrb[1].mxu1 }
  0xdf   :  { %v157_v21 = vadd.f32 %v400_v10, %v156_v17  ;;  %v189_v22 = vadd.f32 %v400_v10, %v188_v19  ;;  %v307_v23 = vpop.f32.mrb[2].mxu0  ;;  %v315_v25 = vpop.f32.mrb[2].mxu1 }
  0xe0   :  { %v237_v27 = vadd.f32 %v221_v12, %v165_v15  ;;  %v245_v28 = vadd.f32 %v229_v14, %v197_v16  ;;  %v168_v29 = vadd.f32 %v307_v23, %v400_v10  ;;  %v200_v30 = vadd.f32 %v315_v25, %v400_v10  ;;  %v159_v31 = vpop.f32.mrb[3].mxu0  ;;  %v191_v33 = vpop.f32.mrb[3].mxu1 }
  0xe1   :  { %v235_v35 = vadd.f32 %v219_v18, %v157_v21  ;;  %v243_v36 = vadd.f32 %v227_v20, %v189_v22  ;;  %v160_v37 = vadd.f32 %v400_v10, %v159_v31  ;;  %v192_v38 = vadd.f32 %v400_v10, %v191_v33 }
  0xe2   :  { %253 = vst.msk [vmem:[%s534_s4 + $0x10] sm:$0xff] %vm97_vm0, %v237_v27  ;;  %261 = vst.msk [vmem:[%s534_s4 + $0x50] sm:$0xff] %vm97_vm0, %v245_v28  ;;  %v238_v39 = vadd.f32 %v222_v24, %v168_v29  ;;  %v246_v40 = vadd.f32 %v230_v26, %v200_v30 }
  0xe3   :  { %251 = vst.msk [vmem:[%s534_s4] sm:$0xff] %vm97_vm0, %v235_v35  ;;  %259 = vst.msk [vmem:[%s534_s4 + $0x40] sm:$0xff] %vm97_vm0, %v243_v36  ;;  %v236_v41 = vadd.f32 %v220_v32, %v160_v37  ;;  %v244_v42 = vadd.f32 %v228_v34, %v192_v38 }
  0xe4   :  { %254 = vst.msk [vmem:[%s534_s4 + $0x18] sm:$0xff] %vm97_vm0, %v238_v39  ;;  %262 = vst.msk [vmem:[%s534_s4 + $0x58] sm:$0xff] %vm97_vm0, %v246_v40 }
  0xe5   :  { %252 = vst.msk [vmem:[%s534_s4 + $0x8] sm:$0xff] %vm97_vm0, %v236_v41  ;;  %260 = vst.msk [vmem:[%s534_s4 + $0x48] sm:$0xff] %vm97_vm0, %v244_v42  ;;  %v310_v43 = vpop.f32.mrb[4].mxu0  ;;  %v318_v45 = vpop.f32.mrb[4].mxu1 }
  0xe6   :  { %v181_v47 = vadd.f32 %v310_v43, %v400_v10  ;;  %v213_v48 = vadd.f32 %v318_v45, %v400_v10  ;;  %v172_v49 = vpop.f32.mrb[5].mxu0  ;;  %v204_v51 = vpop.f32.mrb[5].mxu1 }
  0xe7   :  { %v173_v53 = vadd.f32 %v400_v10, %v172_v49  ;;  %v205_v54 = vadd.f32 %v400_v10, %v204_v51  ;;  %v311_v55 = vpop.f32.mrb[6].mxu0  ;;  %v319_v57 = vpop.f32.mrb[6].mxu1 }
  0xe8   :  { %v241_v59 = vadd.f32 %v225_v44, %v181_v47  ;;  %v249_v60 = vadd.f32 %v233_v46, %v213_v48  ;;  %v184_v61 = vadd.f32 %v311_v55, %v400_v10  ;;  %v216_v62 = vadd.f32 %v319_v57, %v400_v10  ;;  %v175_v63 = vpop.f32.mrb[7].mxu0  ;;  %v207_v1 = vpop.f32.mrb[7].mxu1 }
  0xe9   :  { %v239_v3 = vadd.f32 %v223_v50, %v173_v53  ;;  %v247_v4 = vadd.f32 %v231_v52, %v205_v54  ;;  %v176_v5 = vadd.f32 %v400_v10, %v175_v63  ;;  %v208_v6 = vadd.f32 %v400_v10, %v207_v1 }
  0xea   :  { %257 = vst.msk [vmem:[%s534_s4 + $0x30] sm:$0xff] %vm97_vm0, %v241_v59  ;;  %265 = vst.msk [vmem:[%s534_s4 + $0x70] sm:$0xff] %vm97_vm0, %v249_v60  ;;  %v242_v7 = vadd.f32 %v226_v56, %v184_v61  ;;  %v250_v8 = vadd.f32 %v234_v58, %v216_v62 }
  0xeb   :  { %255 = vst.msk [vmem:[%s534_s4 + $0x20] sm:$0xff] %vm97_vm0, %v239_v3  ;;  %263 = vst.msk [vmem:[%s534_s4 + $0x60] sm:$0xff] %vm97_vm0, %v247_v4  ;;  %v240_v9 = vadd.f32 %v224_v0, %v176_v5  ;;  %v248_v10 = vadd.f32 %v232_v2, %v208_v6 }
  0xec   :  { %258 = vst.msk [vmem:[%s534_s4 + $0x38] sm:$0xff] %vm97_vm0, %v242_v7  ;;  %266 = vst.msk [vmem:[%s534_s4 + $0x78] sm:$0xff] %vm97_vm0, %v250_v8 }
  0xed   :  { %256 = vst.msk [vmem:[%s534_s4 + $0x28] sm:$0xff] %vm97_vm0, %v240_v9  ;;  %264 = vst.msk [vmem:[%s534_s4 + $0x68] sm:$0xff] %vm97_vm0, %v248_v10 }

// kernel: model_forward.23
= control target key start
LH: loop header
LB: loop body
LE: loop exit
PB: predicated region body
PF: predicated region fallthrough
CT: control target
= control target key end

     0   :  { %vm50_vm0 = vcmask 261120   ;;  %vm403_vm1 = vcmask 519168   ;;  %s807_s0 = inlined_call_operand.vmem [shape: f32[128,32], index: 0, kind: input, shape index: {}]   ;;  %s808_s2 = inlined_call_operand.vmem [shape: bf16[32,64], index: 2, kind: input, shape index: {}]   ;;  %s809_s1 = inlined_call_operand.vmem [shape: f32[1,32], index: 1, kind: input, shape index: {}]   ;;  %s810_s3 = inlined_call_operand.vmem [shape: f32[1,64], index: 3, kind: input, shape index: {}]   ;;  %s811_s4 = inlined_call_operand.vmem [shape: bf16[128,64], index: 4, kind: output, shape index: {}]  }
   0x1   :  { %v564_v0 = vld [vmem:[%s807_s0 + $0x40] sm:$0xff]  ;;  %v574_v2 = vld [vmem:[%s807_s0 + $0x48] sm:$0xff]  ;;  %v592_v8 = vld [vmem:[%s807_s0 + $0x18] sm:$0xff] }
   0x2   :  { %v569_v1 = vld [vmem:[%s807_s0] sm:$0xff]  ;;  %v42_v3 = vmul.f32 %v564_v0, %v564_v0  ;;  %v43_v5 = vmul.f32 %v574_v2, %v574_v2  ;;  %v585_v6 = vld [vmem:[%s807_s0 + $0x8] sm:$0xff]  ;;  %v597_v9 = vld [vmem:[%s807_s0 + $0x10] sm:$0xff]  ;;  %v37_v14 = vmul.f32 %v592_v8, %v592_v8 }
   0x3   :  { %v34_v4 = vmul.f32 %v569_v1, %v569_v1  ;;  %v35_v7 = vmul.f32 %v585_v6, %v585_v6  ;;  %v36_v15 = vmul.f32 %v597_v9, %v597_v9  ;;  %v610_v16 = vld [vmem:[%s807_s0 + $0x58] sm:$0xff]  ;;  %v615_v17 = vld [vmem:[%s807_s0 + $0x50] sm:$0xff]  ;;  %v626_v22 = vld [vmem:[%s807_s0 + $0x28] sm:$0xff] }
   0x4   :  { %v75_v10 = vsel %vm50_vm0, %v42_v3, 0.0  ;;  %v78_v12 = vsel %vm50_vm0, %v43_v5, 0.0  ;;  %v60_v18 = vsel %vm50_vm0, %v37_v14, 0.0  ;;  %v45_v20 = vmul.f32 %v610_v16, %v610_v16  ;;  %v631_v23 = vld [vmem:[%s807_s0 + $0x20] sm:$0xff]  ;;  %v642_v28 = vld [vmem:[%s807_s0 + $0x68] sm:$0xff]  ;;  %v658_v34 = vld [vmem:[%s807_s0 + $0x38] sm:$0xff] }
   0x5   :  { %v51_v11 = vsel %vm50_vm0, %v34_v4, 0.0  ;;  %76 = vadd.xlane.f32.xlu1 %v75_v10  ;;  %v54_v13 = vsel %vm50_vm0, %v35_v7, 0.0  ;;  %v57_v19 = vsel %vm50_vm0, %v36_v15, 0.0  ;;  %v44_v21 = vmul.f32 %v615_v17, %v615_v17  ;;  %v647_v29 = vld [vmem:[%s807_s0 + $0x60] sm:$0xff]  ;;  %v663_v35 = vld [vmem:[%s807_s0 + $0x30] sm:$0xff]  ;;  %v674_v40 = vld [vmem:[%s807_s0 + $0x78] sm:$0xff] }
   0x6   :  { %52 = vadd.xlane.f32.xlu0 %v51_v11  ;;  %v84_v24 = vsel %vm50_vm0, %v45_v20, 0.0  ;;  %v39_v26 = vmul.f32 %v626_v22, %v626_v22  ;;  %v38_v27 = vmul.f32 %v631_v23, %v631_v23  ;;  %v47_v32 = vmul.f32 %v642_v28, %v642_v28  ;;  %v679_v41 = vld [vmem:[%s807_s0 + $0x70] sm:$0xff]  ;;  %v502_v48 = vld [vmem:[%s808_s2] sm:$0xff]   ;;  %v503_v49 = vld [vmem:[%s808_s2 + $0x8] sm:$0xff]  }
   0x7   :  { %v81_v25 = vsel %vm50_vm0, %v44_v21, 0.0  ;;  %v46_v33 = vmul.f32 %v647_v29, %v647_v29  ;;  %v41_v38 = vmul.f32 %v658_v34, %v658_v34  ;;  %v40_v39 = vmul.f32 %v663_v35, %v663_v35  ;;  %478 = vmatprep.subr.bf16.mxu0 %v502_v48  ;;  %498 = vmatprep.subr.bf16.mxu1 %v502_v48 }
   0x8   :  { %v66_v30 = vsel %vm50_vm0, %v39_v26, 0.0  ;;  %v63_v31 = vsel %vm50_vm0, %v38_v27, 0.0  ;;  %v90_v36 = vsel %vm50_vm0, %v47_v32, 0.0  ;;  %v49_v44 = vmul.f32 %v674_v40, %v674_v40  ;;  %479 = vmatpush3.bf16.msra.mxu0 %v502_v48  ;;  %500 = vmatpush3.bf16.msra.mxu1 %v502_v48 }
   0x9   :  { %79 = vadd.xlane.f32.xlu1 %v78_v12  ;;  %v87_v37 = vsel %vm50_vm0, %v46_v33, 0.0  ;;  %v72_v42 = vsel %vm50_vm0, %v41_v38, 0.0  ;;  %v69_v43 = vsel %vm50_vm0, %v40_v39, 0.0  ;;  %v48_v45 = vmul.f32 %v679_v41, %v679_v41  ;;  %480 = vmatprep.subr.bf16.mxu0 %v503_v49  ;;  %v700_v33 = vld [vmem:[%s809_s1] ss:$0 sm:$0xff] }
   0xa   :  { %55 = vadd.xlane.f32.xlu0 %v54_v13  ;;  %v96_v46 = vsel %vm50_vm0, %v49_v44, 0.0  ;;  %499 = vmatprep.subr.bf16.mxu1 %v503_v49 }
   0xb   :  { %v93_v47 = vsel %vm50_vm0, %v48_v45, 0.0 }
   0xc   :  { %481 = vmatpush3.bf16.msra.mxu0 %v503_v49  ;;  %501 = vmatpush3.bf16.msra.mxu1 %v503_v49 }
   0xd   :  { %61 = vadd.xlane.f32.xlu1 %v60_v18 }
   0xe   :  { %58 = vadd.xlane.f32.xlu0 %v57_v19 }
  0x11   :  { %85 = vadd.xlane.f32.xlu1 %v84_v24 }
  0x12   :  { %82 = vadd.xlane.f32.xlu0 %v81_v25 }
  0x15   :  { %67 = vadd.xlane.f32.xlu1 %v66_v30 }
  0x16   :  { %64 = vadd.xlane.f32.xlu0 %v63_v31 }
  0x19   :  { %91 = vadd.xlane.f32.xlu1 %v90_v36 }
  0x1a   :  { %88 = vadd.xlane.f32.xlu0 %v87_v37 }
  0x1d   :  { %73 = vadd.xlane.f32.xlu1 %v72_v42 }
  0x1e   :  { %70 = vadd.xlane.f32.xlu0 %v69_v43 }
  0x21   :  { %97 = vadd.xlane.f32.xlu1 %v96_v46 }
  0x22   :  { %94 = vadd.xlane.f32.xlu0 %v93_v47 }
  0x92   :  { %v77_v50 = vpop.xlane.xlu1 %76 }
  0x93   :  { %v53_v51 = vpop.xlane.xlu0 %52  ;;  %v108_v52 = vmul.f32 0.03125, %v77_v50 }
  0x94   :  { %v100_v53 = vmul.f32 0.03125, %v53_v51 }
  0x95   :  { %v124_v54 = vadd.f32 1e-06, %v108_v52 }
  0x96   :  { %v116_v55 = vadd.f32 1e-06, %v100_v53  ;;  %v80_v56 = vpop.xlane.xlu1 %79 }
  0x97   :  { %v56_v57 = vpop.xlane.xlu0 %55  ;;  %504 = vrsqrt.f32 %v124_v54  ;;  %v109_v58 = vmul.f32 0.03125, %v80_v56 }
  0x98   :  { %v101_v59 = vmul.f32 0.03125, %v56_v57  ;;  %506 = vrsqrt.f32 %v116_v55 }
  0x99   :  { %v125_v60 = vadd.f32 1e-06, %v109_v58 }
  0x9a   :  { %v117_v61 = vadd.f32 1e-06, %v101_v59  ;;  %v62_v62 = vpop.xlane.xlu1 %61 }
  0x9b   :  { %v59_v63 = vpop.xlane.xlu0 %58  ;;  %508 = vrsqrt.f32 %v125_v60  ;;  %v103_v3 = vmul.f32 0.03125, %v62_v62 }
  0x9c   :  { %v102_v4 = vmul.f32 0.03125, %v59_v63  ;;  %510 = vrsqrt.f32 %v117_v61 }
  0x9d   :  { %v119_v5 = vadd.f32 1e-06, %v103_v3 }
  0x9e   :  { %v118_v7 = vadd.f32 1e-06, %v102_v4  ;;  %v86_v10 = vpop.xlane.xlu1 %85 }
  0x9f   :  { %v83_v11 = vpop.xlane.xlu0 %82  ;;  %512 = vrsqrt.f32 %v119_v5  ;;  %v111_v12 = vmul.f32 0.03125, %v86_v10 }
  0xa0   :  { %v110_v13 = vmul.f32 0.03125, %v83_v11  ;;  %514 = vrsqrt.f32 %v118_v7 }
  0xa1   :  { %v505_v14 = vpop.eup %504  ;;  %v127_v15 = vadd.f32 1e-06, %v111_v12 }
  0xa2   :  { %v126_v18 = vadd.f32 1e-06, %v110_v13  ;;  %v507_v19 = vpop.eup %506  ;;  %v68_v20 = vpop.xlane.xlu1 %67  ;;  %v156_v26 = vmul.f32 %v505_v14, %v564_v0 }
  0xa3   :  { %v65_v21 = vpop.xlane.xlu0 %64  ;;  %516 = vrsqrt.f32 %v127_v15  ;;  %v105_v24 = vmul.f32 0.03125, %v68_v20  ;;  %v148_v32 = vmul.f32 %v507_v19, %v569_v1 }
  0xa4   :  { %v104_v25 = vmul.f32 0.03125, %v65_v21  ;;  %518 = vrsqrt.f32 %v126_v18  ;;  %v179_v44 = vmul.f32 %v700_v33, %v156_v26 }
  0xa5   :  { %v509_v27 = vpop.eup %508  ;;  %v121_v30 = vadd.f32 1e-06, %v105_v24  ;;  %v171_v48 = vmul.f32 %v700_v33, %v148_v32 }
  0xa6   :  { %v120_v31 = vadd.f32 1e-06, %v104_v25  ;;  %v511_v36 = vpop.eup %510  ;;  %v92_v37 = vpop.xlane.xlu1 %91  ;;  %v157_v39 = vmul.f32 %v509_v27, %v574_v2 }
  0xa7   :  { %v89_v38 = vpop.xlane.xlu0 %88  ;;  %520 = vrsqrt.f32 %v121_v30  ;;  %v113_v42 = vmul.f32 0.03125, %v92_v37  ;;  %v149_v0 = vmul.f32 %v511_v36, %v585_v6 }
  0xa8   :  { %v112_v43 = vmul.f32 0.03125, %v89_v38  ;;  %522 = vrsqrt.f32 %v120_v31  ;;  %v180_v1 = vmul.f32 %v700_v33, %v157_v39 }
  0xa9   :  { %v513_v45 = vpop.eup %512  ;;  %v129_v46 = vadd.f32 1e-06, %v113_v42  ;;  %v172_v49 = vmul.f32 %v700_v33, %v149_v0 }
  0xaa   :  { %v128_v47 = vadd.f32 1e-06, %v112_v43  ;;  %v515_v50 = vpop.eup %514  ;;  %v74_v51 = vpop.xlane.xlu1 %73  ;;  %v191_v52 = vpack.c.bf16 %v180_v1, %v179_v44  ;;  %v151_v53 = vmul.f32 %v513_v45, %v592_v8  ;;  %v425_v1 = vld [vmem:[%s810_s3] ss:$0 sm:$0xff] }
  0xab   :  { %v71_v2 = vpop.xlane.xlu0 %70  ;;  %524 = vrsqrt.f32 %v129_v46  ;;  %v107_v6 = vmul.f32 0.03125, %v74_v51  ;;  %v187_v55 = vpack.c.bf16 %v172_v49, %v171_v48  ;;  %v150_v56 = vmul.f32 %v515_v50, %v597_v9 }
  0xac   :  { %v106_v54 = vmul.f32 0.03125, %v71_v2  ;;  %526 = vrsqrt.f32 %v128_v47  ;;  %490 = vmatprep.mubr.msk.bf16.mxu1 %vm50_vm0, %v191_v52  ;;  %v174_v57 = vmul.f32 %v700_v33, %v151_v53 }
  0xad   :  { %v517_v58 = vpop.eup %516  ;;  %v123_v59 = vadd.f32 1e-06, %v107_v6  ;;  %482 = vmatprep.mubr.msk.bf16.mxu0 %vm50_vm0, %v187_v55  ;;  %v173_v8 = vmul.f32 %v700_v33, %v150_v56 }
  0xae   :  { %v122_v60 = vadd.f32 1e-06, %v106_v54  ;;  %v519_v61 = vpop.eup %518  ;;  %v98_v62 = vpop.xlane.xlu1 %97  ;;  %v159_v3 = vmul.f32 %v517_v58, %v610_v16 }
  0xaf   :  { %v95_v63 = vpop.xlane.xlu0 %94  ;;  %528 = vrsqrt.f32 %v123_v59  ;;  %v115_v4 = vmul.f32 0.03125, %v98_v62  ;;  %v158_v7 = vmul.f32 %v519_v61, %v615_v17  ;;  %v188_v9 = vpack.c.bf16 %v174_v57, %v173_v8 }
  0xb0   :  { %v114_v5 = vmul.f32 0.03125, %v95_v63  ;;  %530 = vrsqrt.f32 %v122_v60  ;;  %v182_v10 = vmul.f32 %v700_v33, %v159_v3 }
  0xb1   :  { %v521_v11 = vpop.eup %520  ;;  %v131_v12 = vadd.f32 1e-06, %v115_v4  ;;  %v181_v14 = vmul.f32 %v700_v33, %v158_v7  ;;  %483 = vmatmul.mubr.msk.bf16.vlgmr.msra.gmra.mrb[0].mxu0 %vm50_vm0, %v188_v9 }
  0xb2   :  { %v130_v13 = vadd.f32 1e-06, %v114_v5  ;;  %v523_v15 = vpop.eup %522  ;;  %v153_v18 = vmul.f32 %v521_v11, %v626_v22 }
  0xb3   :  { %532 = vrsqrt.f32 %v131_v12  ;;  %v192_v16 = vpack.c.bf16 %v182_v10, %v181_v14  ;;  %v152_v19 = vmul.f32 %v523_v15, %v631_v23 }
  0xb4   :  { %534 = vrsqrt.f32 %v130_v13  ;;  %v176_v17 = vmul.f32 %v700_v33, %v153_v18 }
  0xb5   :  { %v525_v20 = vpop.eup %524  ;;  %491 = vmatmul.mubr.msk.bf16.vlgmr.msra.gmra.mrb[0].mxu1 %vm50_vm0, %v192_v16  ;;  %v175_v21 = vmul.f32 %v700_v33, %v152_v19 }
  0xb6   :  { %v527_v24 = vpop.eup %526  ;;  %v161_v25 = vmul.f32 %v525_v20, %v642_v28 }
  0xb7   :  { %v189_v26 = vpack.c.bf16 %v176_v17, %v175_v21  ;;  %v160_v27 = vmul.f32 %v527_v24, %v647_v29 }
  0xb8   :  { %v184_v22 = vmul.f32 %v700_v33, %v161_v25 }
  0xb9   :  { %v529_v30 = vpop.eup %528  ;;  %486 = vmatprep.mubr.msk.bf16.mxu0 %vm50_vm0, %v189_v26  ;;  %v183_v23 = vmul.f32 %v700_v33, %v160_v27 }
  0xba   :  { %v531_v31 = vpop.eup %530  ;;  %v155_v32 = vmul.f32 %v529_v30, %v658_v34 }
  0xbb   :  { %v193_v36 = vpack.c.bf16 %v184_v22, %v183_v23  ;;  %v154_v37 = vmul.f32 %v531_v31, %v663_v35 }
  0xbc   :  { %v178_v38 = vmul.f32 %v700_v33, %v155_v32 }
  0xbd   :  { %v533_v39 = vpop.eup %532  ;;  %494 = vmatprep.mubr.msk.bf16.mxu1 %vm50_vm0, %v193_v36  ;;  %v177_v28 = vmul.f32 %v700_v33, %v154_v37 }
  0xbe   :  { %v535_v29 = vpop.eup %534  ;;  %v163_v42 = vmul.f32 %v533_v39, %v674_v40 }
  0xbf   :  { %v190_v43 = vpack.c.bf16 %v178_v38, %v177_v28  ;;  %v162_v0 = vmul.f32 %v535_v29, %v679_v41 }
  0xc0   :  { %v186_v44 = vmul.f32 %v700_v33, %v163_v42 }
  0xc1   :  { %487 = vmatmul.mubr.msk.bf16.gmra.mrb[4].mxu0 %vm50_vm0, %v190_v43  ;;  %v185_v34 = vmul.f32 %v700_v33, %v162_v0 }
  0xc3   :  { %v194_v35 = vpack.c.bf16 %v186_v44, %v185_v34 }
  0xc5   :  { %495 = vmatmul.mubr.msk.bf16.gmra.mrb[4].mxu1 %vm50_vm0, %v194_v35 }
 0x184   :  { %v484_v45 = vpop.f32.mrb[0].mxu0 }
 0x185   :  { %v285_v46 = vadd.f32 %v484_v45, %v425_v1  ;;  %v276_v47 = vpop.f32.mrb[1].mxu0 }
 0x186   :  { %v277_v40 = vadd.f32 %v425_v1, %v276_v47  ;;  %v485_v48 = vpop.f32.mrb[2].mxu0 }
 0x187   :  { %v454_v41 = vpack.c.bf16 %v285_v46, %v285_v46  ;;  %v288_v49 = vadd.f32 %v485_v48, %v425_v1  ;;  %v279_v50 = vpop.f32.mrb[3].mxu0 }
 0x188   :  { %v492_v51 = vpop.f32.mrb[0].mxu1  ;;  %v452_v2 = vpack.c.bf16 %v277_v40, %v277_v40  ;;  %v280_v52 = vadd.f32 %v425_v1, %v279_v50 }
 0x189   :  { %v317_v33 = vadd.f32 %v492_v51, %v425_v1  ;;  %v308_v53 = vpop.f32.mrb[1].mxu1  ;;  %406 = vst.msk [vmem:[%s811_s4 + $0x8] sm:$0xf] %vm403_vm1, %v454_v41  ;;  %v455_v6 = vpack.c.bf16 %v288_v49, %v288_v49 }
 0x18a   :  { %v309_v54 = vadd.f32 %v425_v1, %v308_v53  ;;  %v493_v55 = vpop.f32.mrb[2].mxu1  ;;  %404 = vst.msk [vmem:[%s811_s4] sm:$0xf] %vm403_vm1, %v452_v2  ;;  %v453_v56 = vpack.c.bf16 %v280_v52, %v280_v52 }
 0x18b   :  { %v462_v57 = vpack.c.bf16 %v317_v33, %v317_v33  ;;  %v320_v58 = vadd.f32 %v493_v55, %v425_v1  ;;  %v311_v59 = vpop.f32.mrb[3].mxu1  ;;  %407 = vst.msk [vmem:[%s811_s4 + $0xc] sm:$0xf] %vm403_vm1, %v455_v6 }
 0x18c   :  { %v460_v60 = vpack.c.bf16 %v309_v54, %v309_v54  ;;  %v312_v61 = vadd.f32 %v425_v1, %v311_v59  ;;  %405 = vst.msk [vmem:[%s811_s4 + $0x4] sm:$0xf] %vm403_vm1, %v453_v56 }
 0x18d   :  { %414 = vst.msk [vmem:[%s811_s4 + $0x28] sm:$0xf] %vm403_vm1, %v462_v57  ;;  %v463_v62 = vpack.c.bf16 %v320_v58, %v320_v58 }
 0x18e   :  { %412 = vst.msk [vmem:[%s811_s4 + $0x20] sm:$0xf] %vm403_vm1, %v460_v60  ;;  %v461_v63 = vpack.c.bf16 %v312_v61, %v312_v61 }
 0x18f   :  { %415 = vst.msk [vmem:[%s811_s4 + $0x2c] sm:$0xf] %vm403_vm1, %v463_v62 }
 0x190   :  { %413 = vst.msk [vmem:[%s811_s4 + $0x24] sm:$0xf] %vm403_vm1, %v461_v63 }
 0x194   :  { %v488_v8 = vpop.f32.mrb[4].mxu0 }
 0x195   :  { %v301_v3 = vadd.f32 %v488_v8, %v425_v1  ;;  %v292_v4 = vpop.f32.mrb[5].mxu0 }
 0x196   :  { %v293_v5 = vadd.f32 %v425_v1, %v292_v4  ;;  %v489_v7 = vpop.f32.mrb[6].mxu0 }
 0x197   :  { %v458_v9 = vpack.c.bf16 %v301_v3, %v301_v3  ;;  %v304_v10 = vadd.f32 %v489_v7, %v425_v1  ;;  %v295_v11 = vpop.f32.mrb[7].mxu0 }
 0x198   :  { %v456_v12 = vpack.c.bf16 %v293_v5, %v293_v5  ;;  %v296_v13 = vadd.f32 %v425_v1, %v295_v11  ;;  %v496_v14 = vpop.f32.mrb[4].mxu1 }
 0x199   :  { %410 = vst.msk [vmem:[%s811_s4 + $0x18] sm:$0xf] %vm403_vm1, %v458_v9  ;;  %v459_v15 = vpack.c.bf16 %v304_v10, %v304_v10  ;;  %v333_v18 = vadd.f32 %v496_v14, %v425_v1  ;;  %v324_v16 = vpop.f32.mrb[5].mxu1 }
 0x19a   :  { %408 = vst.msk [vmem:[%s811_s4 + $0x10] sm:$0xf] %vm403_vm1, %v456_v12  ;;  %v457_v19 = vpack.c.bf16 %v296_v13, %v296_v13  ;;  %v325_v17 = vadd.f32 %v425_v1, %v324_v16  ;;  %v497_v20 = vpop.f32.mrb[6].mxu1 }
 0x19b   :  { %411 = vst.msk [vmem:[%s811_s4 + $0x1c] sm:$0xf] %vm403_vm1, %v459_v15  ;;  %v466_v21 = vpack.c.bf16 %v333_v18, %v333_v18  ;;  %v336_v24 = vadd.f32 %v497_v20, %v425_v1  ;;  %v327_v25 = vpop.f32.mrb[7].mxu1 }
 0x19c   :  { %409 = vst.msk [vmem:[%s811_s4 + $0x14] sm:$0xf] %vm403_vm1, %v457_v19  ;;  %v464_v26 = vpack.c.bf16 %v325_v17, %v325_v17  ;;  %v328_v27 = vadd.f32 %v425_v1, %v327_v25 }
 0x19d   :  { %418 = vst.msk [vmem:[%s811_s4 + $0x38] sm:$0xf] %vm403_vm1, %v466_v21  ;;  %v467_v22 = vpack.c.bf16 %v336_v24, %v336_v24 }
 0x19e   :  { %416 = vst.msk [vmem:[%s811_s4 + $0x30] sm:$0xf] %vm403_vm1, %v464_v26  ;;  %v465_v30 = vpack.c.bf16 %v328_v27, %v328_v27 }
 0x19f   :  { %419 = vst.msk [vmem:[%s811_s4 + $0x3c] sm:$0xf] %vm403_vm1, %v467_v22 }
 0x1a0   :  { %417 = vst.msk [vmem:[%s811_s4 + $0x34] sm:$0xf] %vm403_vm1, %v465_v30 }

// kernel: model_forward.24
= control target key start
LH: loop header
LB: loop body
LE: loop exit
PB: predicated region body
PF: predicated region fallthrough
CT: control target
= control target key end

     0   :  { %v7135_v1 = vmov 0.0   ;;  %vm5488_vm0 = vmmov 0   ;;  %s5489_s10 = smov 96   ;;  %s5490_s23 = smov 80   ;;  %vm32_vm1 = vcmask 64512   ;;  %vm474_vm2 = vcmask 130048   ;;  %s7133_s0 = inlined_call_operand.vmem [shape: bf16[8,16,64], index: 0, kind: input, shape index: {}]   ;;  %s7134_s1 = inlined_call_operand.vmem [shape: bf16[8,16,32], index: 1, kind: output, shape index: {}]  }
   0x1   :  { %v5199_v0 = vld [vmem:[%s7133_s0] sm:$0xff]   ;;  %4803 = vmatprep.subr.bf16.mxu0 %v7135_v1  ;;  %4809 = vmatprep.subr.bf16.mxu1 %v7135_v1  ;;  %v5200_v2 = vld [vmem:[%s7133_s0 + $0x8] sm:$0xff]   ;;  %v5201_v3 = vld [vmem:[%s7133_s0 + $0x10] sm:$0xff]   ;;  %s5491_s26 = smov 120   ;;  %vm1099_vm3 = vcmask 60416   ;;  %s5492_s17 = smov 88  }
   0x2   :  { %4805 = vmatprep.mubr.msk.bf16.mxu0 %vm5488_vm0, %v7135_v1  ;;  %4811 = vmatprep.mubr.msk.bf16.mxu1 %vm5488_vm0, %v7135_v1  ;;  %v5202_v4 = vld [vmem:[%s7133_s0 + $0x18] sm:$0xff]   ;;  %v5530_v5 = vld [vmem:[%s7133_s0 + $0x20] sm:$0xff]   ;;  %v5535_v6 = vld [vmem:[%s7133_s0 + $0x28] sm:$0xff]   ;;  %s5493_s18 = smov 112   ;;  %s5494_s4 = smov 72   ;;  %vm2188_vm4 = vcmask 126016  }
   0x3   :  { %30 = vrot.lane.b32.xlu0 %v5199_v0, %s5489_s10  ;;  %139 = vrot.lane.b32.xlu1 %v5201_v3, %s5489_s10  ;;  %v5540_v7 = vld [vmem:[%s7133_s0 + $0x30] sm:$0xff]   ;;  %v5546_v8 = vld [vmem:[%s7133_s0 + $0x38] sm:$0xff]   ;;  %s5495_s7 = smov 104   ;;  %s5497_s22 = smov 16   ;;  %vm3341_vm5 = vcmask 191616   ;;  %vm4430_vm6 = vcmask 257216  }
   0x4   :  { %s5498_s27 = smov 24  }
   0x7   :  { %85 = vrot.lane.b32.xlu0 %v5200_v2, %s5489_s10  ;;  %193 = vrot.lane.b32.xlu1 %v5202_v4, %s5489_s10 }
   0xb   :  { %247 = vrot.lane.b32.xlu0 %v5530_v5, %s5489_s10  ;;  %301 = vrot.lane.b32.xlu1 %v5535_v6, %s5489_s10 }
   0xf   :  { %355 = vrot.lane.b32.xlu0 %v5540_v7, %s5489_s10  ;;  %409 = vrot.lane.b32.xlu1 %v5546_v8, %s5489_s10 }
  0x13   :  { %659 = vrot.lane.b32.xlu1 %v5199_v0, %s5490_s23  ;;  %706 = vrot.lane.b32.xlu0 %v5200_v2, %s5490_s23 }
  0x17   :  { %753 = vrot.lane.b32.xlu1 %v5201_v3, %s5490_s23 }
  0x1b   :  { %800 = vrot.lane.b32.xlu1 %v5202_v4, %s5490_s23 }
  0x75   :  { %v31_v9 = vpop.permute.xlu0 %30  ;;  %v140_v11 = vpop.permute.xlu1 %139 }
  0x76   :  { %v5556_v10 = vsel %vm32_vm1, %v31_v9, 0  ;;  %v5565_v14 = vsel %vm32_vm1, %v140_v11, 0 }
  0x77   :  { %4804 = vmatpush3.bf16.xpose.msra.mxu0 %v5556_v10 }
  0x78   :  { %4815 = vmatprep.subr.bf16.mxu0 %v7135_v1 }
  0x79   :  { %v86_v12 = vpop.permute.xlu0 %85  ;;  %v194_v15 = vpop.permute.xlu1 %193 }
  0x7a   :  { %v5561_v13 = vsel %vm32_vm1, %v86_v12, 0  ;;  %v5573_v16 = vsel %vm32_vm1, %v194_v15, 0 }
  0x7b   :  { %4810 = vmatpush3.bf16.xpose.msra.mxu1 %v5561_v13 }
  0x7c   :  { %4821 = vmatprep.subr.bf16.mxu1 %v7135_v1 }
  0x7d   :  { %v248_v17 = vpop.permute.xlu0 %247  ;;  %v302_v19 = vpop.permute.xlu1 %301 }
  0x7e   :  { %4806 = vmatmul.mubr.msk.bf16.vlgmr.msra.gmra.mrb[0].mxu0 %vm32_vm1, %v5199_v0  ;;  %v5581_v18 = vsel %vm32_vm1, %v248_v17, 0  ;;  %v5589_v20 = vsel %vm32_vm1, %v302_v19, 0 }
  0x7f   :  { %4816 = vmatpush3.bf16.xpose.msra.mxu0 %v5565_v14  ;;  %4817 = vmatprep.mubr.msk.bf16.mxu0 %vm5488_vm0, %v7135_v1 }
  0x80   :  { %4827 = vmatprep.subr.bf16.mxu0 %v7135_v1 }
  0x81   :  { %v356_v21 = vpop.permute.xlu0 %355  ;;  %v410_v23 = vpop.permute.xlu1 %409 }
  0x82   :  { %4812 = vmatmul.mubr.msk.bf16.vlgmr.msra.gmra.mrb[0].mxu1 %vm32_vm1, %v5200_v2  ;;  %v5597_v22 = vsel %vm32_vm1, %v356_v21, 0  ;;  %v5606_v24 = vsel %vm32_vm1, %v410_v23, 0 }
  0x83   :  { %4822 = vmatpush3.bf16.xpose.msra.mxu1 %v5573_v16  ;;  %4823 = vmatprep.mubr.msk.bf16.mxu1 %vm5488_vm0, %v7135_v1 }
  0x84   :  { %4833 = vmatprep.subr.bf16.mxu1 %v7135_v1 }
  0x85   :  { %v5623_v25 = vpop.permute.xlu1 %659  ;;  %v5625_v26 = vpop.permute.xlu0 %706 }
  0x86   :  { %4818 = vmatmul.mubr.msk.bf16.vlgmr.msra.gmra.mrb[4].mxu0 %vm32_vm1, %v5201_v3 }
  0x87   :  { %4828 = vmatpush3.bf16.xpose.msra.mxu0 %v5581_v18  ;;  %4829 = vmatprep.mubr.msk.bf16.mxu0 %vm5488_vm0, %v7135_v1 }
  0x88   :  { %4839 = vmatprep.subr.bf16.mxu0 %v7135_v1 }
  0x8a   :  { %4824 = vmatmul.mubr.msk.bf16.vlgmr.msra.gmra.mrb[4].mxu1 %vm32_vm1, %v5202_v4 }
  0x8b   :  { %4834 = vmatpush3.bf16.xpose.msra.mxu1 %v5589_v20  ;;  %4835 = vmatprep.mubr.msk.bf16.mxu1 %vm5488_vm0, %v7135_v1 }
  0x8c   :  { %4845 = vmatprep.subr.bf16.mxu1 %v7135_v1 }
  0x8e   :  { %4830 = vmatmul.mubr.msk.bf16.vlgmr.msra.gmra.mrb[8].mxu0 %vm32_vm1, %v5530_v5 }
  0x8f   :  { %4840 = vmatpush3.bf16.xpose.msra.mxu0 %v5597_v22  ;;  %4841 = vmatprep.mubr.msk.bf16.mxu0 %vm5488_vm0, %v7135_v1 }
  0x90   :  { %4851 = vmatprep.subr.bf16.mxu0 %v7135_v1 }
  0x92   :  { %4836 = vmatmul.mubr.msk.bf16.vlgmr.msra.gmra.mrb[8].mxu1 %vm32_vm1, %v5535_v6 }
  0x93   :  { %4846 = vmatpush3.bf16.xpose.msra.mxu1 %v5606_v24  ;;  %4847 = vmatprep.mubr.msk.bf16.mxu1 %vm5488_vm0, %v7135_v1 }
  0x94   :  { %4857 = vmatprep.subr.bf16.mxu1 %v7135_v1 }
  0x96   :  { %4842 = vmatmul.mubr.msk.bf16.vlgmr.msra.gmra.mrb[12].mxu0 %vm32_vm1, %v5540_v7 }
  0x97   :  { %4853 = vmatprep.mubr.msk.bf16.mxu0 %vm5488_vm0, %v7135_v1  ;;  %4852 = vmatpush3.bf16.msra.mxu0 %v5623_v25 }
  0x98   :  { %4863 = vmatprep.subr.bf16.mxu0 %v7135_v1 }
  0x9a   :  { %4848 = vmatmul.mubr.msk.bf16.vlgmr.msra.gmra.mrb[12].mxu1 %vm32_vm1, %v5546_v8 }
  0x9b   :  { %4859 = vmatprep.mubr.msk.bf16.mxu1 %vm5488_vm0, %v7135_v1  ;;  %4858 = vmatpush3.bf16.msra.mxu1 %v5625_v26 }
  0x9c   :  { %4869 = vmatprep.subr.bf16.mxu1 %v7135_v1 }
 0x151   :  { %v73_v27 = vpop.f32.mrb[0].mxu0 }
 0x152   :  { %v5631_v28 = vmul.f32 0.35355338, %v73_v27  ;;  %v4807_v29 = vpop.f32.mrb[1].mxu0 }
 0x153   :  { %v76_v30 = vpop.f32.mrb[2].mxu0 }
 0x154   :  { %v5633_v31 = vmul.f32 0.35355338, %v76_v30  ;;  %v4808_v32 = vpop.f32.mrb[3].mxu0  ;;  %v475_v33 = vsel %vm474_vm2, %v5631_v28, -inf }
 0x155   :  { %476 = vmax.xlane.f32.xlu0 %v475_v33  ;;  %v127_v34 = vpop.f32.mrb[0].mxu1 }
 0x156   :  { %v5637_v35 = vmul.f32 0.35355338, %v127_v34  ;;  %v4813_v36 = vpop.f32.mrb[1].mxu1  ;;  %v478_v37 = vsel %vm474_vm2, %v5633_v31, -inf }
 0x157   :  { %479 = vmax.xlane.f32.xlu1 %v478_v37  ;;  %v130_v38 = vpop.f32.mrb[2].mxu1 }
 0x158   :  { %v5641_v39 = vmul.f32 0.35355338, %v130_v38  ;;  %v4814_v40 = vpop.f32.mrb[3].mxu1  ;;  %v481_v41 = vsel %vm474_vm2, %v5637_v35, -inf }
 0x159   :  { %v181_v42 = vpop.f32.mrb[4].mxu0  ;;  %482 = vmax.xlane.f32.xlu0 %v481_v41 }
 0x15a   :  { %v5645_v43 = vmul.f32 0.35355338, %v181_v42  ;;  %v4819_v44 = vpop.f32.mrb[5].mxu0  ;;  %v484_v49 = vsel %vm474_vm2, %v5641_v39, -inf }
 0x15b   :  { %v184_v45 = vpop.f32.mrb[6].mxu0 }
 0x15c   :  { %v5647_v46 = vmul.f32 0.35355338, %v184_v45  ;;  %v4820_v47 = vpop.f32.mrb[7].mxu0  ;;  %v487_v48 = vsel %vm474_vm2, %v5645_v43, -inf }
 0x15d   :  { %488 = vmax.xlane.f32.xlu1 %v487_v48  ;;  %485 = vmax.xlane.f32.xlu0 %v484_v49  ;;  %v235_v50 = vpop.f32.mrb[4].mxu1  ;;  %v5699_v48 = vpop.permute.xlu1 %753 }
 0x15e   :  { %v5653_v51 = vmul.f32 0.35355338, %v235_v50  ;;  %v4825_v52 = vpop.f32.mrb[5].mxu1  ;;  %v490_v56 = vsel %vm474_vm2, %v5647_v46, -inf }
 0x15f   :  { %v238_v53 = vpop.f32.mrb[6].mxu1 }
 0x160   :  { %v5655_v54 = vmul.f32 0.35355338, %v238_v53  ;;  %v4826_v55 = vpop.f32.mrb[7].mxu1  ;;  %v493_v57 = vsel %vm474_vm2, %v5653_v51, -inf }
 0x161   :  { %491 = vmax.xlane.f32.xlu0 %v490_v56  ;;  %494 = vmax.xlane.f32.xlu1 %v493_v57  ;;  %v289_v58 = vpop.f32.mrb[8].mxu0  ;;  %v5701_v49 = vpop.permute.xlu1 %800 }
 0x162   :  { %v5661_v59 = vmul.f32 0.35355338, %v289_v58  ;;  %v4831_v60 = vpop.f32.mrb[9].mxu0  ;;  %v496_v0 = vsel %vm474_vm2, %v5655_v54, -inf }
 0x163   :  { %v292_v61 = vpop.f32.mrb[10].mxu0 }
 0x164   :  { %v5663_v62 = vmul.f32 0.35355338, %v292_v61  ;;  %v4832_v63 = vpop.f32.mrb[11].mxu0  ;;  %v499_v2 = vsel %vm474_vm2, %v5661_v59, -inf }
 0x165   :  { %497 = vmax.xlane.f32.xlu0 %v496_v0  ;;  %v343_v3 = vpop.f32.mrb[8].mxu1  ;;  %500 = vmax.xlane.f32.xlu1 %v499_v2 }
 0x166   :  { %v5669_v4 = vmul.f32 0.35355338, %v343_v3  ;;  %v4837_v9 = vpop.f32.mrb[9].mxu1  ;;  %v502_v19 = vsel %vm474_vm2, %v5663_v62, -inf }
 0x167   :  { %v346_v11 = vpop.f32.mrb[10].mxu1 }
 0x168   :  { %v5671_v12 = vmul.f32 0.35355338, %v346_v11  ;;  %v4838_v15 = vpop.f32.mrb[11].mxu1  ;;  %v505_v17 = vsel %vm474_vm2, %v5669_v4, -inf }
 0x169   :  { %506 = vmax.xlane.f32.xlu1 %v505_v17  ;;  %503 = vmax.xlane.f32.xlu0 %v502_v19  ;;  %v397_v21 = vpop.f32.mrb[12].mxu0 }
 0x16a   :  { %v5677_v23 = vmul.f32 0.35355338, %v397_v21  ;;  %v4843_v27 = vpop.f32.mrb[13].mxu0  ;;  %v508_v33 = vsel %vm474_vm2, %v5671_v12, -inf }
 0x16b   :  { %v400_v29 = vpop.f32.mrb[14].mxu0 }
 0x16c   :  { %v5679_v30 = vmul.f32 0.35355338, %v400_v29  ;;  %v4844_v32 = vpop.f32.mrb[15].mxu0  ;;  %v511_v34 = vsel %vm474_vm2, %v5677_v23, -inf }
 0x16d   :  { %v451_v36 = vpop.f32.mrb[12].mxu1  ;;  %509 = vmax.xlane.f32.xlu0 %v508_v33  ;;  %512 = vmax.xlane.f32.xlu1 %v511_v34 }
 0x16e   :  { %v5685_v37 = vmul.f32 0.35355338, %v451_v36  ;;  %v4849_v38 = vpop.f32.mrb[13].mxu1  ;;  %v514_v45 = vsel %vm474_vm2, %v5679_v30, -inf }
 0x16f   :  { %v454_v40 = vpop.f32.mrb[14].mxu1 }
 0x170   :  { %v5687_v41 = vmul.f32 0.35355338, %v454_v40  ;;  %v4850_v42 = vpop.f32.mrb[15].mxu1  ;;  %v517_v44 = vsel %vm474_vm2, %v5685_v37, -inf }
 0x171   :  { %518 = vmax.xlane.f32.xlu1 %v517_v44  ;;  %515 = vmax.xlane.f32.xlu0 %v514_v45 }
 0x172   :  { %v520_v47 = vsel %vm474_vm2, %v5687_v41, -inf }
 0x175   :  { %521 = vmax.xlane.f32.xlu0 %v520_v47 }
 0x182   :  { %894 = vrot.lane.b32.xlu1 %v5535_v6, %s5490_s23 }
 0x18b   :  { %847 = vrot.lane.b32.xlu0 %v5530_v5, %s5490_s23 }
 0x1e2   :  { %v477_v50 = vpop.xlane.xlu0 %476 }
 0x1e3   :  { %v523_v52 = vsub.f32 %v5631_v28, %v477_v50 }
 0x1e4   :  { %v480_v53 = vpop.xlane.xlu1 %479 }
 0x1e5   :  { %v539_v55 = vmul.f32 1.442695, %v523_v52  ;;  %v524_v56 = vsub.f32 %v5633_v31, %v480_v53 }
 0x1e6   :  { %v483_v57 = vpop.xlane.xlu0 %482 }
 0x1e7   :  { %5231 = vpow2.f32 %v539_v55  ;;  %v541_v58 = vmul.f32 1.442695, %v524_v56  ;;  %v525_v60 = vsub.f32 %v5637_v35, %v483_v57 }
 0x1e9   :  { %5233 = vpow2.f32 %v541_v58  ;;  %v543_v6 = vmul.f32 1.442695, %v525_v60 }
 0x1ea   :  { %v489_v61 = vpop.xlane.xlu1 %488  ;;  %v486_v5 = vpop.xlane.xlu0 %485 }
 0x1eb   :  { %5235 = vpow2.f32 %v543_v6  ;;  %v527_v63 = vsub.f32 %v5645_v43, %v489_v61  ;;  %v526_v0 = vsub.f32 %v5641_v39, %v486_v5 }
 0x1ed   :  { %v547_v2 = vmul.f32 1.442695, %v527_v63  ;;  %v545_v28 = vmul.f32 1.442695, %v526_v0 }
 0x1ee   :  { %v495_v3 = vpop.xlane.xlu1 %494  ;;  %v492_v9 = vpop.xlane.xlu0 %491 }
 0x1ef   :  { %5237 = vpow2.f32 %v547_v2  ;;  %v529_v31 = vsub.f32 %v5653_v51, %v495_v3  ;;  %v528_v11 = vsub.f32 %v5647_v46, %v492_v9 }
 0x1f0   :  { %5239 = vpow2.f32 %v545_v28 }
 0x1f1   :  { %v5710_v35 = vpop.eup %5231  ;;  %v551_v15 = vmul.f32 1.442695, %v529_v31  ;;  %v549_v17 = vmul.f32 1.442695, %v528_v11 }
 0x1f2   :  { %v501_v19 = vpop.xlane.xlu1 %500  ;;  %v498_v21 = vpop.xlane.xlu0 %497  ;;  %v571_v43 = vsel %vm474_vm2, %v5710_v35, 0.0 }
 0x1f3   :  { %v5714_v39 = vpop.eup %5233  ;;  %5241 = vpow2.f32 %v551_v15  ;;  %v531_v27 = vsub.f32 %v5661_v59, %v501_v19  ;;  %v530_v29 = vsub.f32 %v5655_v54, %v498_v21  ;;  %572 = vadd.xlane.f32.xlu1 %v571_v43 }
 0x1f4   :  { %5243 = vpow2.f32 %v549_v17  ;;  %v574_v46 = vsel %vm474_vm2, %v5714_v39, 0.0 }
 0x1f5   :  { %v5720_v51 = vpop.eup %5235  ;;  %v555_v32 = vmul.f32 1.442695, %v531_v27  ;;  %v553_v33 = vmul.f32 1.442695, %v530_v29  ;;  %575 = vadd.xlane.f32.xlu0 %v574_v46 }
 0x1f6   :  { %v507_v34 = vpop.xlane.xlu1 %506  ;;  %v504_v36 = vpop.xlane.xlu0 %503  ;;  %v577_v38 = vsel %vm474_vm2, %v5720_v51, 0.0 }
 0x1f7   :  { %5245 = vpow2.f32 %v555_v32  ;;  %v533_v59 = vsub.f32 %v5669_v4, %v507_v34  ;;  %v532_v54 = vsub.f32 %v5663_v62, %v504_v36  ;;  %578 = vadd.xlane.f32.xlu1 %v577_v38  ;;  %v5208_v38 = vld [vmem:[%s7133_s0 + $0x8] sm:$0xff]  }
 0x1f8   :  { %5247 = vpow2.f32 %v553_v33 }
 0x1f9   :  { %v5726_v40 = vpop.eup %5237  ;;  %v559_v42 = vmul.f32 1.442695, %v533_v59  ;;  %v557_v44 = vmul.f32 1.442695, %v532_v54  ;;  %v5210_v59 = vld [vmem:[%s7133_s0 + $0x18] sm:$0xff]   ;;  %v5212_v54 = vld [vmem:[%s7133_s0 + $0x28] sm:$0xff]  }
 0x1fa   :  { %v5728_v45 = vpop.eup %5239  ;;  %v513_v47 = vpop.xlane.xlu1 %512  ;;  %v583_v52 = vsel %vm474_vm2, %v5726_v40, 0.0 }
 0x1fb   :  { %v510_v50 = vpop.xlane.xlu0 %509  ;;  %5249 = vpow2.f32 %v559_v42  ;;  %v535_v53 = vsub.f32 %v5677_v23, %v513_v47  ;;  %584 = vadd.xlane.f32.xlu1 %v583_v52  ;;  %v580_v62 = vsel %vm474_vm2, %v5728_v45, 0.0  ;;  %v5214_v42 = vld [vmem:[%s7133_s0 + $0x38] sm:$0xff]   ;;  %v5213_v47 = vld [vmem:[%s7133_s0 + $0x30] sm:$0xff]  }
 0x1fc   :  { %v534_v4 = vsub.f32 %v5671_v12, %v510_v50  ;;  %5251 = vpow2.f32 %v557_v44  ;;  %581 = vadd.xlane.f32.xlu0 %v580_v62  ;;  %v5209_v44 = vld [vmem:[%s7133_s0 + $0x10] sm:$0xff]  }
 0x1fd   :  { %v5736_v55 = vpop.eup %5241  ;;  %v563_v56 = vmul.f32 1.442695, %v535_v53 }
 0x1fe   :  { %v561_v57 = vmul.f32 1.442695, %v534_v4  ;;  %v5738_v58 = vpop.eup %5243  ;;  %v519_v60 = vpop.xlane.xlu1 %518  ;;  %v589_v61 = vsel %vm474_vm2, %v5736_v55, 0.0 }
 0x1ff   :  { %v516_v6 = vpop.xlane.xlu0 %515  ;;  %5253 = vpow2.f32 %v563_v56  ;;  %v537_v12 = vsub.f32 %v5685_v37, %v519_v60  ;;  %590 = vadd.xlane.f32.xlu1 %v589_v61  ;;  %v586_v5 = vsel %vm474_vm2, %v5738_v58, 0.0 }
 0x200   :  { %v536_v23 = vsub.f32 %v5679_v30, %v516_v6  ;;  %5255 = vpow2.f32 %v561_v57  ;;  %587 = vadd.xlane.f32.xlu0 %v586_v5 }
 0x201   :  { %v5746_v63 = vpop.eup %5245  ;;  %v567_v0 = vmul.f32 1.442695, %v537_v12 }
 0x202   :  { %v565_v2 = vmul.f32 1.442695, %v536_v23  ;;  %v5748_v28 = vpop.eup %5247  ;;  %v595_v9 = vsel %vm474_vm2, %v5746_v63, 0.0  ;;  %v5811_v50 = vpop.permute.xlu1 %894 }
 0x203   :  { %v522_v3 = vpop.xlane.xlu0 %521  ;;  %5257 = vpow2.f32 %v567_v0  ;;  %596 = vadd.xlane.f32.xlu1 %v595_v9  ;;  %v592_v30 = vsel %vm474_vm2, %v5748_v28, 0.0 }
 0x204   :  { %v538_v37 = vsub.f32 %v5687_v41, %v522_v3  ;;  %5259 = vpow2.f32 %v565_v2  ;;  %593 = vadd.xlane.f32.xlu0 %v592_v30 }
 0x205   :  { %v5755_v31 = vpop.eup %5249 }
 0x206   :  { %v569_v11 = vmul.f32 1.442695, %v538_v37  ;;  %v5757_v15 = vpop.eup %5251  ;;  %v601_v17 = vsel %vm474_vm2, %v5755_v31, 0.0 }
 0x207   :  { %602 = vadd.xlane.f32.xlu1 %v601_v17  ;;  %v598_v19 = vsel %vm474_vm2, %v5757_v15, 0.0  ;;  %v5813_v52 = vpop.permute.xlu0 %847 }
 0x208   :  { %5261 = vpow2.f32 %v569_v11  ;;  %599 = vadd.xlane.f32.xlu0 %v598_v19 }
 0x209   :  { %v5763_v41 = vpop.eup %5253 }
 0x20a   :  { %v5765_v21 = vpop.eup %5255  ;;  %v607_v43 = vsel %vm474_vm2, %v5763_v41, 0.0 }
 0x20b   :  { %608 = vadd.xlane.f32.xlu1 %v607_v43  ;;  %v604_v27 = vsel %vm474_vm2, %v5765_v21, 0.0 }
 0x20c   :  { %605 = vadd.xlane.f32.xlu0 %v604_v27 }
 0x20d   :  { %v5771_v29 = vpop.eup %5257 }
 0x20e   :  { %v5773_v46 = vpop.eup %5259  ;;  %v613_v32 = vsel %vm474_vm2, %v5771_v29, 0.0 }
 0x20f   :  { %614 = vadd.xlane.f32.xlu1 %v613_v32  ;;  %v610_v33 = vsel %vm474_vm2, %v5773_v46, 0.0 }
 0x210   :  { %611 = vadd.xlane.f32.xlu0 %v610_v33 }
 0x212   :  { %v5779_v34 = vpop.eup %5261 }
 0x213   :  { %v616_v36 = vsel %vm474_vm2, %v5779_v34, 0.0 }
 0x214   :  { %617 = vadd.xlane.f32.xlu0 %v616_v36 }
 0x220   :  { %988 = vrot.lane.b32.xlu1 %v5546_v8, %s5490_s23  ;;  %v5207_v8 = vld [vmem:[%s7133_s0] sm:$0xff]  }
 0x224   :  { %1188 = vrot.lane.b32.xlu1 %v5208_v38, %s5491_s26 }
 0x228   :  { %1290 = vrot.lane.b32.xlu1 %v5210_v59, %s5491_s26 }
 0x22a   :  { %941 = vrot.lane.b32.xlu0 %v5540_v7, %s5490_s23  ;;  %v5211_v7 = vld [vmem:[%s7133_s0 + $0x20] sm:$0xff]  }
 0x22c   :  { %1392 = vrot.lane.b32.xlu1 %v5212_v54, %s5491_s26 }
 0x22e   :  { %1137 = vrot.lane.b32.xlu0 %v5207_v8, %s5491_s26 }
 0x230   :  { %1494 = vrot.lane.b32.xlu1 %v5214_v42, %s5491_s26 }
 0x232   :  { %1239 = vrot.lane.b32.xlu0 %v5209_v44, %s5491_s26 }
 0x236   :  { %1341 = vrot.lane.b32.xlu0 %v5211_v7, %s5491_s26 }
 0x23a   :  { %1443 = vrot.lane.b32.xlu0 %v5213_v47, %s5491_s26 }
 0x280   :  { %v573_v53 = vpop.xlane.xlu1 %572 }
 0x281   :  { %5263 = vrcp.f32 %v573_v53 }
 0x282   :  { %v576_v4 = vpop.xlane.xlu0 %575 }
 0x283   :  { %5265 = vrcp.f32 %v576_v4 }
 0x284   :  { %v579_v62 = vpop.xlane.xlu1 %578 }
 0x285   :  { %5267 = vrcp.f32 %v579_v62 }
 0x288   :  { %v585_v56 = vpop.xlane.xlu1 %584 }
 0x289   :  { %v582_v57 = vpop.xlane.xlu0 %581 }
 0x28a   :  { %5269 = vrcp.f32 %v582_v57 }
 0x28b   :  { %v5264_v60 = vpop.eup %5263  ;;  %5271 = vrcp.f32 %v585_v56 }
 0x28c   :  { %v591_v6 = vpop.xlane.xlu1 %590  ;;  %v620_v23 = vmul.f32 %v5264_v60, %v5710_v35 }
 0x28d   :  { %v5266_v61 = vpop.eup %5265  ;;  %v588_v12 = vpop.xlane.xlu0 %587 }
 0x28e   :  { %v622_v5 = vmul.f32 %v5266_v61, %v5714_v39  ;;  %5273 = vrcp.f32 %v588_v12 }
 0x28f   :  { %5275 = vrcp.f32 %v591_v6  ;;  %v5268_v9 = vpop.eup %5267 }
 0x290   :  { %v597_v0 = vpop.xlane.xlu1 %596  ;;  %v651_v2 = vpack.c.bf16 %v622_v5, %v620_v23  ;;  %v624_v35 = vmul.f32 %v5268_v9, %v5720_v51 }
 0x291   :  { %v594_v3 = vpop.xlane.xlu0 %593 }
 0x292   :  { %5277 = vrcp.f32 %v594_v3  ;;  %4854 = vmatmul.mubr.msk.bf16.vlgmr.msra.gmra.mrb[16].mxu0 %vm474_vm2, %v651_v2 }
 0x293   :  { %4864 = vmatpush3.bf16.msra.mxu0 %v5699_v48  ;;  %4865 = vmatprep.mubr.msk.bf16.mxu0 %vm5488_vm0, %v7135_v1  ;;  %5279 = vrcp.f32 %v597_v0 }
 0x294   :  { %v5270_v37 = vpop.eup %5269  ;;  %v603_v30 = vpop.xlane.xlu1 %602  ;;  %4875 = vmatprep.subr.bf16.mxu0 %v7135_v1 }
 0x295   :  { %v626_v39 = vmul.f32 %v5270_v37, %v5728_v45  ;;  %v600_v11 = vpop.xlane.xlu0 %599  ;;  %v5272_v17 = vpop.eup %5271 }
 0x296   :  { %5281 = vrcp.f32 %v600_v11  ;;  %v628_v32 = vmul.f32 %v5272_v17, %v5726_v40 }
 0x297   :  { %v652_v19 = vpack.c.bf16 %v626_v39, %v624_v35  ;;  %5283 = vrcp.f32 %v603_v30 }
 0x298   :  { %v5274_v43 = vpop.eup %5273  ;;  %v609_v27 = vpop.xlane.xlu1 %608 }
 0x299   :  { %v630_v33 = vmul.f32 %v5274_v43, %v5738_v58  ;;  %4860 = vmatmul.mubr.msk.bf16.vlgmr.msra.gmra.mrb[16].mxu1 %vm474_vm2, %v652_v19  ;;  %v606_v36 = vpop.xlane.xlu0 %605  ;;  %v5276_v38 = vpop.eup %5275 }
 0x29a   :  { %4870 = vmatpush3.bf16.msra.mxu1 %v5701_v49  ;;  %5285 = vrcp.f32 %v606_v36  ;;  %4871 = vmatprep.mubr.msk.bf16.mxu1 %vm5488_vm0, %v7135_v1  ;;  %v632_v59 = vmul.f32 %v5276_v38, %v5736_v55 }
 0x29b   :  { %v653_v51 = vpack.c.bf16 %v630_v33, %v628_v32  ;;  %4881 = vmatprep.subr.bf16.mxu1 %v7135_v1  ;;  %5287 = vrcp.f32 %v609_v27 }
 0x29c   :  { %v5278_v45 = vpop.eup %5277  ;;  %v615_v58 = vpop.xlane.xlu1 %614 }
 0x29d   :  { %v634_v40 = vmul.f32 %v5278_v45, %v5748_v28  ;;  %4866 = vmatmul.mubr.msk.bf16.vlgmr.msra.gmra.mrb[20].mxu0 %vm474_vm2, %v653_v51  ;;  %v612_v54 = vpop.xlane.xlu0 %611  ;;  %v5280_v8 = vpop.eup %5279 }
 0x29e   :  { %4876 = vmatpush3.bf16.msra.mxu0 %v5813_v52  ;;  %5289 = vrcp.f32 %v612_v54  ;;  %4877 = vmatprep.mubr.msk.bf16.mxu0 %vm5488_vm0, %v7135_v1  ;;  %v636_v55 = vmul.f32 %v5280_v8, %v5746_v63 }
 0x29f   :  { %v654_v42 = vpack.c.bf16 %v634_v40, %v632_v59  ;;  %4887 = vmatprep.subr.bf16.mxu0 %v7135_v1  ;;  %5291 = vrcp.f32 %v615_v58 }
 0x2a0   :  { %v5282_v44 = vpop.eup %5281  ;;  %v5853_v57 = vpop.permute.xlu1 %988 }
 0x2a1   :  { %v638_v28 = vmul.f32 %v5282_v44, %v5757_v15  ;;  %4872 = vmatmul.mubr.msk.bf16.vlgmr.msra.gmra.mrb[20].mxu1 %vm474_vm2, %v654_v42  ;;  %v618_v7 = vpop.xlane.xlu0 %617  ;;  %v5284_v47 = vpop.eup %5283 }
 0x2a2   :  { %4882 = vmatpush3.bf16.msra.mxu1 %v5811_v50  ;;  %5293 = vrcp.f32 %v618_v7  ;;  %4883 = vmatprep.mubr.msk.bf16.mxu1 %vm5488_vm0, %v7135_v1  ;;  %v640_v62 = vmul.f32 %v5284_v47, %v5755_v31 }
 0x2a3   :  { %v655_v53 = vpack.c.bf16 %v638_v28, %v636_v55  ;;  %4893 = vmatprep.subr.bf16.mxu1 %v7135_v1 }
 0x2a4   :  { %v5286_v4 = vpop.eup %5285 }
 0x2a5   :  { %v642_v63 = vmul.f32 %v5286_v4, %v5765_v21  ;;  %4878 = vmatmul.mubr.msk.bf16.vlgmr.msra.gmra.mrb[24].mxu0 %vm474_vm2, %v655_v53  ;;  %v5848_v15 = vpop.permute.xlu0 %941  ;;  %v5288_v56 = vpop.eup %5287 }
 0x2a6   :  { %4888 = vmatpush3.bf16.msra.mxu0 %v5848_v15  ;;  %4889 = vmatprep.mubr.msk.bf16.mxu0 %vm5488_vm0, %v7135_v1  ;;  %v644_v31 = vmul.f32 %v5288_v56, %v5763_v41 }
 0x2a7   :  { %v656_v60 = vpack.c.bf16 %v642_v63, %v640_v62  ;;  %4899 = vmatprep.subr.bf16.mxu0 %v7135_v1 }
 0x2a8   :  { %v5290_v6 = vpop.eup %5289 }
 0x2a9   :  { %v646_v21 = vmul.f32 %v5290_v6, %v5773_v46  ;;  %4884 = vmatmul.mubr.msk.bf16.vlgmr.msra.gmra.mrb[24].mxu1 %vm474_vm2, %v656_v60  ;;  %v5292_v61 = vpop.eup %5291  ;;  %v1189_v46 = vpop.permute.xlu1 %1188 }
 0x2aa   :  { %4894 = vmatpush3.bf16.msra.mxu1 %v5853_v57  ;;  %4895 = vmatprep.mubr.msk.bf16.mxu1 %vm5488_vm0, %v7135_v1  ;;  %v648_v5 = vmul.f32 %v5292_v61, %v5771_v29  ;;  %v1138_v29 = vpop.permute.xlu0 %1137 }
 0x2ab   :  { %v657_v12 = vpack.c.bf16 %v646_v21, %v644_v31  ;;  %4905 = vmatprep.subr.bf16.mxu1 %v7135_v1 }
 0x2ac   :  { %v5294_v23 = vpop.eup %5293 }
 0x2ad   :  { %v650_v0 = vmul.f32 %v5294_v23, %v5779_v34  ;;  %4890 = vmatmul.mubr.msk.bf16.vlgmr.msra.gmra.mrb[28].mxu0 %vm474_vm2, %v657_v12 }
 0x2ae   :  { %4901 = vmatprep.mubr.msk.bf16.mxu0 %vm5488_vm0, %v7135_v1 }
 0x2af   :  { %4900 = vmatpush3.bf16.xpose.msra.mxu0 %v5556_v10  ;;  %v658_v41 = vpack.c.bf16 %v650_v0, %v648_v5  ;;  %v1240_v10 = vpop.permute.xlu0 %1239 }
 0x2b0   :  { %4911 = vmatprep.subr.bf16.mxu0 %v7135_v1 }
 0x2b1   :  { %4896 = vmatmul.mubr.msk.bf16.vlgmr.msra.gmra.mrb[28].mxu1 %vm474_vm2, %v658_v41 }
 0x2b2   :  { %4907 = vmatprep.mubr.msk.bf16.mxu1 %vm5488_vm0, %v7135_v1 }
 0x2b3   :  { %4906 = vmatpush3.bf16.xpose.msra.mxu1 %v5561_v13  ;;  %v1291_v13 = vpop.permute.xlu1 %1290 }
 0x2b4   :  { %4917 = vmatprep.subr.bf16.mxu1 %v7135_v1 }
 0x2b6   :  { %4902 = vmatmul.mubr.msk.bf16.vlgmr.msra.gmra.mrb[32].mxu0 %vm32_vm1, %v1138_v29 }
 0x2b7   :  { %4912 = vmatpush3.bf16.xpose.msra.mxu0 %v5565_v14  ;;  %4913 = vmatprep.mubr.msk.bf16.mxu0 %vm5488_vm0, %v7135_v1  ;;  %v1342_v14 = vpop.permute.xlu0 %1341 }
 0x2b8   :  { %4923 = vmatprep.subr.bf16.mxu0 %v7135_v1 }
 0x2ba   :  { %4908 = vmatmul.mubr.msk.bf16.vlgmr.msra.gmra.mrb[32].mxu1 %vm32_vm1, %v1189_v46 }
 0x2bb   :  { %4918 = vmatpush3.bf16.xpose.msra.mxu1 %v5573_v16  ;;  %4919 = vmatprep.mubr.msk.bf16.mxu1 %vm5488_vm0, %v7135_v1  ;;  %v1393_v16 = vpop.permute.xlu1 %1392 }
 0x2bc   :  { %4929 = vmatprep.subr.bf16.mxu1 %v7135_v1 }
 0x2be   :  { %4914 = vmatmul.mubr.msk.bf16.vlgmr.msra.gmra.mrb[36].mxu0 %vm32_vm1, %v1240_v10 }
 0x2bf   :  { %4924 = vmatpush3.bf16.xpose.msra.mxu0 %v5581_v18  ;;  %4925 = vmatprep.mubr.msk.bf16.mxu0 %vm5488_vm0, %v7135_v1  ;;  %v1444_v18 = vpop.permute.xlu0 %1443 }
 0x2c0   :  { %4935 = vmatprep.subr.bf16.mxu0 %v7135_v1 }
 0x2c2   :  { %4920 = vmatmul.mubr.msk.bf16.vlgmr.msra.gmra.mrb[36].mxu1 %vm32_vm1, %v1291_v13 }
 0x2c3   :  { %4930 = vmatpush3.bf16.xpose.msra.mxu1 %v5589_v20  ;;  %4931 = vmatprep.mubr.msk.bf16.mxu1 %vm5488_vm0, %v7135_v1  ;;  %v1495_v20 = vpop.permute.xlu1 %1494 }
 0x2c4   :  { %4941 = vmatprep.subr.bf16.mxu1 %v7135_v1 }
 0x2c6   :  { %4926 = vmatmul.mubr.msk.bf16.vlgmr.msra.gmra.mrb[40].mxu0 %vm32_vm1, %v1342_v14 }
 0x2c7   :  { %4936 = vmatpush3.bf16.xpose.msra.mxu0 %v5597_v22  ;;  %4937 = vmatprep.mubr.msk.bf16.mxu0 %vm5488_vm0, %v7135_v1 }
 0x2c8   :  { %4947 = vmatprep.subr.bf16.mxu0 %v7135_v1 }
 0x2ca   :  { %4932 = vmatmul.mubr.msk.bf16.vlgmr.msra.gmra.mrb[40].mxu1 %vm32_vm1, %v1393_v16 }
 0x2cb   :  { %4942 = vmatpush3.bf16.xpose.msra.mxu1 %v5606_v24  ;;  %4943 = vmatprep.mubr.msk.bf16.mxu1 %vm5488_vm0, %v7135_v1 }
 0x2cc   :  { %4953 = vmatprep.subr.bf16.mxu1 %v7135_v1 }
 0x2ce   :  { %4938 = vmatmul.mubr.msk.bf16.vlgmr.msra.gmra.mrb[44].mxu0 %vm32_vm1, %v1444_v18 }
 0x2cf   :  { %4948 = vmatpush3.bf16.msra.mxu0 %v5623_v25  ;;  %4949 = vmatprep.mubr.msk.bf16.mxu0 %vm5488_vm0, %v7135_v1 }
 0x2d0   :  { %4959 = vmatprep.subr.bf16.mxu0 %v7135_v1 }
 0x2d2   :  { %4944 = vmatmul.mubr.msk.bf16.vlgmr.msra.gmra.mrb[44].mxu1 %vm32_vm1, %v1495_v20 }
 0x2d3   :  { %4954 = vmatpush3.bf16.msra.mxu1 %v5625_v26  ;;  %4955 = vmatprep.mubr.msk.bf16.mxu1 %vm5488_vm0, %v7135_v1 }
 0x2d4   :  { %4965 = vmatprep.subr.bf16.mxu1 %v7135_v1 }
 0x365   :  { %v699_v22 = vpop.f32.mrb[16].mxu0 }
 0x366   :  { %v4611_v24 = vpack.c.bf16 %v699_v22, %v699_v22  ;;  %v4855_v34 = vpop.f32.mrb[17].mxu0 }
 0x367   :  { %v702_v25 = vpop.f32.mrb[18].mxu0 }
 0x368   :  { %1100 = vst.msk [vmem:[%s7134_s1] sm:$0xf] %vm1099_vm3, %v4611_v24  ;;  %v4612_v2 = vpack.c.bf16 %v702_v25, %v702_v25  ;;  %v4856_v3 = vpop.f32.mrb[19].mxu0 }
 0x36a   :  { %1101 = vst.msk [vmem:[%s7134_s1 + $0x4] sm:$0xf] %vm1099_vm3, %v4612_v2 }
 0x36c   :  { %v746_v26 = vpop.f32.mrb[16].mxu1 }
 0x36d   :  { %v4613_v9 = vpack.c.bf16 %v746_v26, %v746_v26  ;;  %v4861_v37 = vpop.f32.mrb[17].mxu1 }
 0x36e   :  { %v749_v30 = vpop.f32.mrb[18].mxu1 }
 0x36f   :  { %1102 = vst.msk [vmem:[%s7134_s1 + $0x8] sm:$0xf] %vm1099_vm3, %v4613_v9  ;;  %v4614_v35 = vpack.c.bf16 %v749_v30, %v749_v30  ;;  %v4862_v39 = vpop.f32.mrb[19].mxu1 }
 0x370   :  { %v793_v11 = vpop.f32.mrb[20].mxu0 }
 0x371   :  { %1103 = vst.msk [vmem:[%s7134_s1 + $0xc] sm:$0xf] %vm1099_vm3, %v4614_v35  ;;  %v4615_v17 = vpack.c.bf16 %v793_v11, %v793_v11  ;;  %v4867_v19 = vpop.f32.mrb[21].mxu0 }
 0x372   :  { %v796_v43 = vpop.f32.mrb[22].mxu0 }
 0x373   :  { %1104 = vst.msk [vmem:[%s7134_s1 + $0x10] sm:$0xf] %vm1099_vm3, %v4615_v17  ;;  %v4616_v27 = vpack.c.bf16 %v796_v43, %v796_v43  ;;  %v4868_v32 = vpop.f32.mrb[23].mxu0 }
 0x374   :  { %v840_v33 = vpop.f32.mrb[20].mxu1 }
 0x375   :  { %1105 = vst.msk [vmem:[%s7134_s1 + $0x14] sm:$0xf] %vm1099_vm3, %v4616_v27  ;;  %v4617_v36 = vpack.c.bf16 %v840_v33, %v840_v33  ;;  %v4873_v38 = vpop.f32.mrb[21].mxu1 }
 0x376   :  { %v843_v51 = vpop.f32.mrb[22].mxu1 }
 0x377   :  { %1106 = vst.msk [vmem:[%s7134_s1 + $0x18] sm:$0xf] %vm1099_vm3, %v4617_v36  ;;  %v4618_v45 = vpack.c.bf16 %v843_v51, %v843_v51  ;;  %v4874_v59 = vpop.f32.mrb[23].mxu1 }
 0x378   :  { %v887_v40 = vpop.f32.mrb[24].mxu0 }
 0x379   :  { %1107 = vst.msk [vmem:[%s7134_s1 + $0x1c] sm:$0xf] %vm1099_vm3, %v4618_v45  ;;  %v4619_v58 = vpack.c.bf16 %v887_v40, %v887_v40  ;;  %v4879_v54 = vpop.f32.mrb[25].mxu0 }
 0x37a   :  { %v890_v8 = vpop.f32.mrb[26].mxu0 }
 0x37b   :  { %1108 = vst.msk [vmem:[%s7134_s1 + $0x20] sm:$0xf] %vm1099_vm3, %v4619_v58  ;;  %v4620_v42 = vpack.c.bf16 %v890_v8, %v890_v8  ;;  %v4880_v44 = vpop.f32.mrb[27].mxu0 }
 0x37c   :  { %v934_v55 = vpop.f32.mrb[24].mxu1 }
 0x37d   :  { %1109 = vst.msk [vmem:[%s7134_s1 + $0x24] sm:$0xf] %vm1099_vm3, %v4620_v42  ;;  %v4621_v28 = vpack.c.bf16 %v934_v55, %v934_v55  ;;  %v4885_v7 = vpop.f32.mrb[25].mxu1 }
 0x37e   :  { %v937_v47 = vpop.f32.mrb[26].mxu1 }
 0x37f   :  { %1110 = vst.msk [vmem:[%s7134_s1 + $0x28] sm:$0xf] %vm1099_vm3, %v4621_v28  ;;  %v4622_v53 = vpack.c.bf16 %v937_v47, %v937_v47  ;;  %v4886_v4 = vpop.f32.mrb[27].mxu1 }
 0x380   :  { %v981_v62 = vpop.f32.mrb[28].mxu0 }
 0x381   :  { %1111 = vst.msk [vmem:[%s7134_s1 + $0x2c] sm:$0xf] %vm1099_vm3, %v4622_v53  ;;  %v4623_v63 = vpack.c.bf16 %v981_v62, %v981_v62  ;;  %v4891_v56 = vpop.f32.mrb[29].mxu0 }
 0x382   :  { %v984_v60 = vpop.f32.mrb[30].mxu0 }
 0x383   :  { %1112 = vst.msk [vmem:[%s7134_s1 + $0x30] sm:$0xf] %vm1099_vm3, %v4623_v63  ;;  %v4624_v6 = vpack.c.bf16 %v984_v60, %v984_v60  ;;  %v4892_v31 = vpop.f32.mrb[31].mxu0 }
 0x384   :  { %v1028_v21 = vpop.f32.mrb[28].mxu1 }
 0x385   :  { %1113 = vst.msk [vmem:[%s7134_s1 + $0x34] sm:$0xf] %vm1099_vm3, %v4624_v6  ;;  %v4625_v61 = vpack.c.bf16 %v1028_v21, %v1028_v21  ;;  %v4897_v12 = vpop.f32.mrb[29].mxu1 }
 0x386   :  { %v1031_v23 = vpop.f32.mrb[30].mxu1 }
 0x387   :  { %1114 = vst.msk [vmem:[%s7134_s1 + $0x38] sm:$0xf] %vm1099_vm3, %v4625_v61  ;;  %v4626_v5 = vpack.c.bf16 %v1031_v23, %v1031_v23  ;;  %v4898_v0 = vpop.f32.mrb[31].mxu1 }
 0x389   :  { %1115 = vst.msk [vmem:[%s7134_s1 + $0x3c] sm:$0xf] %vm1099_vm3, %v4626_v5  ;;  %v1176_v41 = vpop.f32.mrb[32].mxu0 }
 0x38a   :  { %v5979_v29 = vmul.f32 0.35355338, %v1176_v41  ;;  %v4903_v46 = vpop.f32.mrb[33].mxu0 }
 0x38b   :  { %v1179_v10 = vpop.f32.mrb[34].mxu0 }
 0x38c   :  { %v5981_v13 = vmul.f32 0.35355338, %v1179_v10  ;;  %v4904_v14 = vpop.f32.mrb[35].mxu0  ;;  %v1556_v16 = vsel %vm474_vm2, %v5979_v29, -inf }
 0x38d   :  { %v1227_v18 = vpop.f32.mrb[32].mxu1  ;;  %1557 = vmax.xlane.f32.xlu0 %v1556_v16 }
 0x38e   :  { %v5985_v20 = vmul.f32 0.35355338, %v1227_v18  ;;  %v4909_v22 = vpop.f32.mrb[33].mxu1  ;;  %v1559_v24 = vsel %vm474_vm2, %v5981_v13, -inf }
 0x38f   :  { %v1230_v34 = vpop.f32.mrb[34].mxu1  ;;  %1560 = vmax.xlane.f32.xlu1 %v1559_v24  ;;  %v6046_v24 = vld [vmem:[%s7133_s0] sm:$0xff]  }
 0x390   :  { %v5989_v25 = vmul.f32 0.35355338, %v1230_v34  ;;  %v4910_v2 = vpop.f32.mrb[35].mxu1  ;;  %v1562_v3 = vsel %vm474_vm2, %v5985_v20, -inf }
 0x391   :  { %1563 = vmax.xlane.f32.xlu0 %v1562_v3  ;;  %v1278_v26 = vpop.f32.mrb[36].mxu0 }
 0x392   :  { %v5993_v9 = vmul.f32 0.35355338, %v1278_v26  ;;  %v4915_v37 = vpop.f32.mrb[37].mxu0  ;;  %v1565_v11 = vsel %vm474_vm2, %v5989_v25, -inf }
 0x393   :  { %v1281_v30 = vpop.f32.mrb[38].mxu0 }
 0x394   :  { %v5995_v35 = vmul.f32 0.35355338, %v1281_v30  ;;  %v4916_v39 = vpop.f32.mrb[39].mxu0  ;;  %v1568_v17 = vsel %vm474_vm2, %v5993_v9, -inf }
 0x395   :  { %v1329_v19 = vpop.f32.mrb[36].mxu1  ;;  %1566 = vmax.xlane.f32.xlu0 %v1565_v11  ;;  %1569 = vmax.xlane.f32.xlu1 %v1568_v17 }
 0x396   :  { %v6001_v43 = vmul.f32 0.35355338, %v1329_v19  ;;  %v4921_v27 = vpop.f32.mrb[37].mxu1  ;;  %v1571_v51 = vsel %vm474_vm2, %v5995_v35, -inf }
 0x397   :  { %v1332_v32 = vpop.f32.mrb[38].mxu1 }
 0x398   :  { %v6003_v33 = vmul.f32 0.35355338, %v1332_v32  ;;  %v4922_v36 = vpop.f32.mrb[39].mxu1  ;;  %v1574_v38 = vsel %vm474_vm2, %v6001_v43, -inf }
 0x399   :  { %1575 = vmax.xlane.f32.xlu1 %v1574_v38  ;;  %1572 = vmax.xlane.f32.xlu0 %v1571_v51  ;;  %v1380_v45 = vpop.f32.mrb[40].mxu0 }
 0x39a   :  { %v6009_v59 = vmul.f32 0.35355338, %v1380_v45  ;;  %v4927_v40 = vpop.f32.mrb[41].mxu0  ;;  %v1577_v42 = vsel %vm474_vm2, %v6003_v33, -inf }
 0x39b   :  { %v1383_v58 = vpop.f32.mrb[42].mxu0 }
 0x39c   :  { %v6011_v54 = vmul.f32 0.35355338, %v1383_v58  ;;  %v4928_v8 = vpop.f32.mrb[43].mxu0  ;;  %v1580_v44 = vsel %vm474_vm2, %v6009_v59, -inf }
 0x39d   :  { %v1431_v55 = vpop.f32.mrb[40].mxu1  ;;  %1578 = vmax.xlane.f32.xlu0 %v1577_v42  ;;  %1581 = vmax.xlane.f32.xlu1 %v1580_v44 }
 0x39e   :  { %v6017_v28 = vmul.f32 0.35355338, %v1431_v55  ;;  %v4933_v7 = vpop.f32.mrb[41].mxu1  ;;  %v1583_v63 = vsel %vm474_vm2, %v6011_v54, -inf }
 0x39f   :  { %v1434_v47 = vpop.f32.mrb[42].mxu1 }
 0x3a0   :  { %v6019_v53 = vmul.f32 0.35355338, %v1434_v47  ;;  %v4934_v4 = vpop.f32.mrb[43].mxu1  ;;  %v1586_v62 = vsel %vm474_vm2, %v6017_v28, -inf }
 0x3a1   :  { %1587 = vmax.xlane.f32.xlu1 %v1586_v62  ;;  %1584 = vmax.xlane.f32.xlu0 %v1583_v63  ;;  %v1482_v56 = vpop.f32.mrb[44].mxu0 }
 0x3a2   :  { %v6025_v60 = vmul.f32 0.35355338, %v1482_v56  ;;  %v4939_v6 = vpop.f32.mrb[45].mxu0  ;;  %v1589_v12 = vsel %vm474_vm2, %v6019_v53, -inf }
 0x3a3   :  { %v1485_v31 = vpop.f32.mrb[46].mxu0 }
 0x3a4   :  { %v6027_v21 = vmul.f32 0.35355338, %v1485_v31  ;;  %v4940_v61 = vpop.f32.mrb[47].mxu0  ;;  %v1592_v23 = vsel %vm474_vm2, %v6025_v60, -inf }
 0x3a5   :  { %v1533_v5 = vpop.f32.mrb[44].mxu1  ;;  %1590 = vmax.xlane.f32.xlu0 %v1589_v12  ;;  %1593 = vmax.xlane.f32.xlu1 %v1592_v23 }
 0x3a6   :  { %v6033_v0 = vmul.f32 0.35355338, %v1533_v5  ;;  %v4945_v41 = vpop.f32.mrb[45].mxu1  ;;  %v1595_v18 = vsel %vm474_vm2, %v6027_v21, -inf }
 0x3a7   :  { %v1536_v46 = vpop.f32.mrb[46].mxu1 }
 0x3a8   :  { %v6035_v10 = vmul.f32 0.35355338, %v1536_v46  ;;  %v4946_v14 = vpop.f32.mrb[47].mxu1  ;;  %v1598_v16 = vsel %vm474_vm2, %v6033_v0, -inf }
 0x3a9   :  { %1599 = vmax.xlane.f32.xlu1 %v1598_v16  ;;  %1596 = vmax.xlane.f32.xlu0 %v1595_v18 }
 0x3aa   :  { %v1601_v22 = vsel %vm474_vm2, %v6035_v10, -inf }
 0x3ad   :  { %1602 = vmax.xlane.f32.xlu0 %v1601_v22 }
 0x3ba   :  { %2228 = vrot.lane.b32.xlu1 %v6046_v24, %s5492_s17 }
 0x41a   :  { %v1558_v34 = vpop.xlane.xlu0 %1557 }
 0x41b   :  { %v1604_v2 = vsub.f32 %v5979_v29, %v1558_v34 }
 0x41c   :  { %v1561_v3 = vpop.xlane.xlu1 %1560 }
 0x41d   :  { %v1620_v26 = vmul.f32 1.442695, %v1604_v2  ;;  %v1605_v37 = vsub.f32 %v5981_v13, %v1561_v3 }
 0x41e   :  { %v1564_v30 = vpop.xlane.xlu0 %1563 }
 0x41f   :  { %5295 = vpow2.f32 %v1620_v26  ;;  %v1622_v39 = vmul.f32 1.442695, %v1605_v37  ;;  %v1606_v11 = vsub.f32 %v5985_v20, %v1564_v30 }
 0x421   :  { %5297 = vpow2.f32 %v1622_v39  ;;  %v1624_v17 = vmul.f32 1.442695, %v1606_v11 }
 0x422   :  { %v1570_v19 = vpop.xlane.xlu1 %1569  ;;  %v1567_v27 = vpop.xlane.xlu0 %1566 }
 0x423   :  { %5299 = vpow2.f32 %v1624_v17  ;;  %v1608_v32 = vsub.f32 %v5993_v9, %v1570_v19  ;;  %v1607_v36 = vsub.f32 %v5989_v25, %v1567_v27 }
 0x425   :  { %v1628_v38 = vmul.f32 1.442695, %v1608_v32  ;;  %v1626_v29 = vmul.f32 1.442695, %v1607_v36 }
 0x426   :  { %v1576_v51 = vpop.xlane.xlu1 %1575  ;;  %v1573_v45 = vpop.xlane.xlu0 %1572 }
 0x427   :  { %5301 = vpow2.f32 %v1628_v38  ;;  %v1610_v13 = vsub.f32 %v6001_v43, %v1576_v51  ;;  %v1609_v40 = vsub.f32 %v5995_v35, %v1573_v45 }
 0x428   :  { %5303 = vpow2.f32 %v1626_v29 }
 0x429   :  { %v6057_v20 = vpop.eup %5295  ;;  %v1632_v58 = vmul.f32 1.442695, %v1610_v13  ;;  %v1630_v8 = vmul.f32 1.442695, %v1609_v40 }
 0x42a   :  { %v1582_v42 = vpop.xlane.xlu1 %1581  ;;  %v1579_v44 = vpop.xlane.xlu0 %1578  ;;  %v1652_v9 = vsel %vm474_vm2, %v6057_v20, 0.0 }
 0x42b   :  { %v6061_v25 = vpop.eup %5297  ;;  %5305 = vpow2.f32 %v1632_v58  ;;  %v1612_v55 = vsub.f32 %v6009_v59, %v1582_v42  ;;  %v1611_v7 = vsub.f32 %v6003_v33, %v1579_v44  ;;  %1653 = vadd.xlane.f32.xlu1 %v1652_v9 }
 0x42c   :  { %5307 = vpow2.f32 %v1630_v8  ;;  %v1655_v35 = vsel %vm474_vm2, %v6061_v25, 0.0 }
 0x42d   :  { %v6067_v43 = vpop.eup %5299  ;;  %v1636_v47 = vmul.f32 1.442695, %v1612_v55  ;;  %v1634_v4 = vmul.f32 1.442695, %v1611_v7  ;;  %1656 = vadd.xlane.f32.xlu0 %v1655_v35  ;;  %v5216_v55 = vld [vmem:[%s7133_s0 + $0x8] sm:$0xff]   ;;  %v5218_v7 = vld [vmem:[%s7133_s0 + $0x18] sm:$0xff]  }
 0x42e   :  { %v1588_v62 = vpop.xlane.xlu1 %1587  ;;  %v1585_v63 = vpop.xlane.xlu0 %1584  ;;  %v1658_v56 = vsel %vm474_vm2, %v6067_v43, 0.0  ;;  %v5217_v35 = vld [vmem:[%s7133_s0 + $0x10] sm:$0xff]  }
 0x42f   :  { %5309 = vpow2.f32 %v1636_v47  ;;  %v1614_v59 = vsub.f32 %v6017_v28, %v1588_v62  ;;  %v1613_v33 = vsub.f32 %v6011_v54, %v1585_v63  ;;  %1659 = vadd.xlane.f32.xlu1 %v1658_v56  ;;  %v6145_v47 = vld [vmem:[%s7133_s0 + $0x28] sm:$0xff]   ;;  %v6159_v62 = vld [vmem:[%s7133_s0 + $0x38] sm:$0xff]   ;;  %v6169_v63 = vld [vmem:[%s7133_s0 + $0x30] sm:$0xff]  }
 0x430   :  { %5311 = vpow2.f32 %v1634_v4  ;;  %v6153_v4 = vld [vmem:[%s7133_s0 + $0x20] sm:$0xff]  }
 0x431   :  { %v6073_v6 = vpop.eup %5301  ;;  %v1640_v31 = vmul.f32 1.442695, %v1614_v59  ;;  %v1638_v61 = vmul.f32 1.442695, %v1613_v33 }
 0x432   :  { %v6075_v12 = vpop.eup %5303  ;;  %v1594_v23 = vpop.xlane.xlu1 %1593  ;;  %v1664_v41 = vsel %vm474_vm2, %v6073_v6, 0.0 }
 0x433   :  { %v1591_v5 = vpop.xlane.xlu0 %1590  ;;  %5313 = vpow2.f32 %v1640_v31  ;;  %v1616_v46 = vsub.f32 %v6025_v60, %v1594_v23  ;;  %1665 = vadd.xlane.f32.xlu1 %v1664_v41  ;;  %v1661_v54 = vsel %vm474_vm2, %v6075_v12, 0.0 }
 0x434   :  { %v1615_v28 = vsub.f32 %v6019_v53, %v1591_v5  ;;  %5315 = vpow2.f32 %v1638_v61  ;;  %1662 = vadd.xlane.f32.xlu0 %v1661_v54 }
 0x435   :  { %v6083_v14 = vpop.eup %5305  ;;  %v1644_v16 = vmul.f32 1.442695, %v1616_v46 }
 0x436   :  { %v1642_v18 = vmul.f32 1.442695, %v1615_v28  ;;  %v6085_v22 = vpop.eup %5307  ;;  %v1600_v34 = vpop.xlane.xlu1 %1599  ;;  %v1670_v3 = vsel %vm474_vm2, %v6083_v14, 0.0 }
 0x437   :  { %v1597_v2 = vpop.xlane.xlu0 %1596  ;;  %5317 = vpow2.f32 %v1644_v16  ;;  %v1618_v53 = vsub.f32 %v6033_v0, %v1600_v34  ;;  %1671 = vadd.xlane.f32.xlu1 %v1670_v3  ;;  %v1667_v26 = vsel %vm474_vm2, %v6085_v22, 0.0 }
 0x438   :  { %v1617_v60 = vsub.f32 %v6027_v21, %v1597_v2  ;;  %5319 = vpow2.f32 %v1642_v18  ;;  %1668 = vadd.xlane.f32.xlu0 %v1667_v26 }
 0x439   :  { %v6093_v37 = vpop.eup %5309  ;;  %v1648_v30 = vmul.f32 1.442695, %v1618_v53 }
 0x43a   :  { %v1646_v39 = vmul.f32 1.442695, %v1617_v60  ;;  %v6095_v11 = vpop.eup %5311  ;;  %v1676_v19 = vsel %vm474_vm2, %v6093_v37, 0.0  ;;  %v6180_v56 = vpop.permute.xlu1 %2228 }
 0x43b   :  { %v1603_v17 = vpop.xlane.xlu0 %1602  ;;  %5321 = vpow2.f32 %v1648_v30  ;;  %1677 = vadd.xlane.f32.xlu1 %v1676_v19  ;;  %v1673_v21 = vsel %vm474_vm2, %v6095_v11, 0.0 }
 0x43c   :  { %v1619_v0 = vsub.f32 %v6035_v10, %v1603_v17  ;;  %5323 = vpow2.f32 %v1646_v39  ;;  %1674 = vadd.xlane.f32.xlu0 %v1673_v21 }
 0x43d   :  { %v6102_v27 = vpop.eup %5313 }
 0x43e   :  { %v1650_v32 = vmul.f32 1.442695, %v1619_v0  ;;  %v6104_v36 = vpop.eup %5315  ;;  %v1682_v38 = vsel %vm474_vm2, %v6102_v27, 0.0 }
 0x43f   :  { %1683 = vadd.xlane.f32.xlu1 %v1682_v38  ;;  %v1679_v29 = vsel %vm474_vm2, %v6104_v36, 0.0 }
 0x440   :  { %5325 = vpow2.f32 %v1650_v32  ;;  %1680 = vadd.xlane.f32.xlu0 %v1679_v29 }
 0x441   :  { %v6110_v10 = vpop.eup %5317 }
 0x442   :  { %v6112_v51 = vpop.eup %5319  ;;  %v1688_v45 = vsel %vm474_vm2, %v6110_v10, 0.0 }
 0x443   :  { %1689 = vadd.xlane.f32.xlu1 %v1688_v45  ;;  %v1685_v13 = vsel %vm474_vm2, %v6112_v51, 0.0 }
 0x444   :  { %1686 = vadd.xlane.f32.xlu0 %v1685_v13 }
 0x445   :  { %v6118_v40 = vpop.eup %5321 }
 0x446   :  { %v6120_v58 = vpop.eup %5323  ;;  %v1694_v8 = vsel %vm474_vm2, %v6118_v40, 0.0 }
 0x447   :  { %1695 = vadd.xlane.f32.xlu1 %v1694_v8  ;;  %v1691_v42 = vsel %vm474_vm2, %v6120_v58, 0.0 }
 0x448   :  { %1692 = vadd.xlane.f32.xlu0 %v1691_v42 }
 0x44a   :  { %v6126_v44 = vpop.eup %5325 }
 0x44b   :  { %v1697_v9 = vsel %vm474_vm2, %v6126_v44, 0.0 }
 0x44c   :  { %1698 = vadd.xlane.f32.xlu0 %v1697_v9 }
 0x458   :  { %2226 = vrot.lane.b32.xlu1 %v6046_v24, %s5493_s18 }
 0x45c   :  { %2282 = vrot.lane.b32.xlu1 %v5216_v55, %s5493_s18 }
 0x460   :  { %2396 = vrot.lane.b32.xlu1 %v5218_v7, %s5492_s17 }
 0x462   :  { %2284 = vrot.lane.b32.xlu0 %v5216_v55, %s5492_s17 }
 0x464   :  { %2394 = vrot.lane.b32.xlu1 %v5218_v7, %s5493_s18 }
 0x466   :  { %2340 = vrot.lane.b32.xlu0 %v5217_v35, %s5492_s17 }
 0x468   :  { %2508 = vrot.lane.b32.xlu1 %v6145_v47, %s5492_s17 }
 0x46a   :  { %2338 = vrot.lane.b32.xlu0 %v5217_v35, %s5493_s18 }
 0x46c   :  { %2506 = vrot.lane.b32.xlu1 %v6145_v47, %s5493_s18 }
 0x46e   :  { %2452 = vrot.lane.b32.xlu0 %v6153_v4, %s5492_s17 }
 0x470   :  { %2620 = vrot.lane.b32.xlu1 %v6159_v62, %s5492_s17 }
 0x472   :  { %2450 = vrot.lane.b32.xlu0 %v6153_v4, %s5493_s18 }
 0x474   :  { %2618 = vrot.lane.b32.xlu1 %v6159_v62, %s5493_s18 }
 0x476   :  { %2564 = vrot.lane.b32.xlu0 %v6169_v63, %s5492_s17 }
 0x478   :  { %2869 = vrot.lane.b32.xlu1 %v6046_v24, %s5494_s4 }
 0x47a   :  { %2562 = vrot.lane.b32.xlu0 %v6169_v63, %s5493_s18 }
 0x47c   :  { %2963 = vrot.lane.b32.xlu1 %v5217_v35, %s5494_s4 }
 0x47e   :  { %2916 = vrot.lane.b32.xlu0 %v5216_v55, %s5494_s4 }
 0x480   :  { %3010 = vrot.lane.b32.xlu1 %v5218_v7, %s5494_s4 }
 0x4b8   :  { %v1654_v59 = vpop.xlane.xlu1 %1653 }
 0x4b9   :  { %5327 = vrcp.f32 %v1654_v59 }
 0x4ba   :  { %v1657_v33 = vpop.xlane.xlu0 %1656 }
 0x4bb   :  { %5329 = vrcp.f32 %v1657_v33 }
 0x4bc   :  { %v1660_v31 = vpop.xlane.xlu1 %1659 }
 0x4bd   :  { %5331 = vrcp.f32 %v1660_v31 }
 0x4c0   :  { %v1666_v61 = vpop.xlane.xlu1 %1665 }
 0x4c1   :  { %v1663_v23 = vpop.xlane.xlu0 %1662 }
 0x4c2   :  { %5333 = vrcp.f32 %v1663_v23 }
 0x4c3   :  { %v5328_v5 = vpop.eup %5327  ;;  %5335 = vrcp.f32 %v1666_v61 }
 0x4c4   :  { %v1672_v24 = vpop.xlane.xlu1 %1671  ;;  %v1701_v28 = vmul.f32 %v5328_v5, %v6057_v20 }
 0x4c5   :  { %v5330_v41 = vpop.eup %5329  ;;  %v1669_v46 = vpop.xlane.xlu0 %1668 }
 0x4c6   :  { %v1703_v54 = vmul.f32 %v5330_v41, %v6061_v25  ;;  %5337 = vrcp.f32 %v1669_v46 }
 0x4c7   :  { %5339 = vrcp.f32 %v1672_v24  ;;  %v5332_v2 = vpop.eup %5331 }
 0x4c8   :  { %v1678_v16 = vpop.xlane.xlu1 %1677  ;;  %v1732_v18 = vpack.c.bf16 %v1703_v54, %v1701_v28  ;;  %v1705_v20 = vmul.f32 %v5332_v2, %v6067_v43 }
 0x4c9   :  { %v1675_v34 = vpop.xlane.xlu0 %1674 }
 0x4ca   :  { %5341 = vrcp.f32 %v1675_v34  ;;  %4950 = vmatmul.mubr.msk.bf16.vlgmr.msra.gmra.mrb[48].mxu0 %vm474_vm2, %v1732_v18 }
 0x4cb   :  { %4960 = vmatpush3.bf16.msra.mxu0 %v5699_v48  ;;  %4961 = vmatprep.mubr.msk.bf16.mxu0 %vm5488_vm0, %v7135_v1  ;;  %5343 = vrcp.f32 %v1678_v16 }
 0x4cc   :  { %v5334_v3 = vpop.eup %5333  ;;  %v1684_v53 = vpop.xlane.xlu1 %1683  ;;  %4971 = vmatprep.subr.bf16.mxu0 %v7135_v1 }
 0x4cd   :  { %v1707_v25 = vmul.f32 %v5334_v3, %v6075_v12  ;;  %v1681_v60 = vpop.xlane.xlu0 %1680  ;;  %v5336_v26 = vpop.eup %5335 }
 0x4ce   :  { %5345 = vrcp.f32 %v1681_v60  ;;  %v1709_v48 = vmul.f32 %v5336_v26, %v6073_v6 }
 0x4cf   :  { %v1733_v30 = vpack.c.bf16 %v1707_v25, %v1705_v20  ;;  %5347 = vrcp.f32 %v1684_v53 }
 0x4d0   :  { %v5338_v39 = vpop.eup %5337  ;;  %v1690_v17 = vpop.xlane.xlu1 %1689 }
 0x4d1   :  { %v1711_v19 = vmul.f32 %v5338_v39, %v6085_v22  ;;  %4956 = vmatmul.mubr.msk.bf16.vlgmr.msra.gmra.mrb[48].mxu1 %vm474_vm2, %v1733_v30  ;;  %v1687_v0 = vpop.xlane.xlu0 %1686  ;;  %v5340_v21 = vpop.eup %5339 }
 0x4d2   :  { %4966 = vmatpush3.bf16.msra.mxu1 %v5701_v49  ;;  %5349 = vrcp.f32 %v1687_v0  ;;  %4967 = vmatprep.mubr.msk.bf16.mxu1 %vm5488_vm0, %v7135_v1  ;;  %v1713_v32 = vmul.f32 %v5340_v21, %v6083_v14 }
 0x4d3   :  { %v1734_v43 = vpack.c.bf16 %v1711_v19, %v1709_v48  ;;  %4977 = vmatprep.subr.bf16.mxu1 %v7135_v1  ;;  %5351 = vrcp.f32 %v1690_v17 }
 0x4d4   :  { %v5342_v12 = vpop.eup %5341  ;;  %v1696_v22 = vpop.xlane.xlu1 %1695 }
 0x4d5   :  { %v1715_v6 = vmul.f32 %v5342_v12, %v6095_v11  ;;  %4962 = vmatmul.mubr.msk.bf16.vlgmr.msra.gmra.mrb[52].mxu0 %vm474_vm2, %v1734_v43  ;;  %v1693_v38 = vpop.xlane.xlu0 %1692  ;;  %v5344_v29 = vpop.eup %5343 }
 0x4d6   :  { %4972 = vmatpush3.bf16.msra.mxu0 %v5813_v52  ;;  %5353 = vrcp.f32 %v1693_v38  ;;  %4973 = vmatprep.mubr.msk.bf16.mxu0 %vm5488_vm0, %v7135_v1  ;;  %v1717_v14 = vmul.f32 %v5344_v29, %v6093_v37 }
 0x4d7   :  { %v1735_v49 = vpack.c.bf16 %v1715_v6, %v1713_v32  ;;  %4983 = vmatprep.subr.bf16.mxu0 %v7135_v1  ;;  %5355 = vrcp.f32 %v1696_v22 }
 0x4d8   :  { %v5346_v45 = vpop.eup %5345  ;;  %v2227_v8 = vpop.permute.xlu1 %2226 }
 0x4d9   :  { %v1719_v11 = vmul.f32 %v5346_v45, %v6104_v36  ;;  %4968 = vmatmul.mubr.msk.bf16.vlgmr.msra.gmra.mrb[52].mxu1 %vm474_vm2, %v1735_v49  ;;  %v1699_v13 = vpop.xlane.xlu0 %1698  ;;  %v5348_v42 = vpop.eup %5347 }
 0x4da   :  { %4978 = vmatpush3.bf16.msra.mxu1 %v5811_v50  ;;  %5357 = vrcp.f32 %v1699_v13  ;;  %4979 = vmatprep.mubr.msk.bf16.mxu1 %vm5488_vm0, %v7135_v1  ;;  %v1721_v55 = vmul.f32 %v5348_v42, %v6102_v27 }
 0x4db   :  { %v1736_v52 = vpack.c.bf16 %v1719_v11, %v1717_v14  ;;  %4989 = vmatprep.subr.bf16.mxu1 %v7135_v1 }
 0x4dc   :  { %v5350_v9 = vpop.eup %5349  ;;  %v2283_v35 = vpop.permute.xlu1 %2282 }
 0x4dd   :  { %v1723_v37 = vmul.f32 %v5350_v9, %v6112_v51  ;;  %4974 = vmatmul.mubr.msk.bf16.vlgmr.msra.gmra.mrb[56].mxu0 %vm474_vm2, %v1736_v52  ;;  %v2285_v36 = vpop.permute.xlu0 %2284  ;;  %v5352_v7 = vpop.eup %5351 }
 0x4de   :  { %4984 = vmatpush3.bf16.msra.mxu0 %v5848_v15  ;;  %4985 = vmatprep.mubr.msk.bf16.mxu0 %vm5488_vm0, %v7135_v1  ;;  %v1725_v33 = vmul.f32 %v5352_v7, %v6110_v10  ;;  %v6237_v41 = vsel %vm32_vm1, %v2285_v36, 0 }
 0x4df   :  { %v1737_v50 = vpack.c.bf16 %v1723_v37, %v1721_v55  ;;  %4995 = vmatprep.subr.bf16.mxu0 %v7135_v1 }
 0x4e0   :  { %v5354_v59 = vpop.eup %5353  ;;  %v2397_v10 = vpop.permute.xlu1 %2396 }
 0x4e1   :  { %v1727_v27 = vmul.f32 %v5354_v59, %v6120_v58  ;;  %4980 = vmatmul.mubr.msk.bf16.vlgmr.msra.gmra.mrb[56].mxu1 %vm474_vm2, %v1737_v50  ;;  %v2341_v51 = vpop.permute.xlu0 %2340  ;;  %v5356_v31 = vpop.eup %5355  ;;  %v6231_v58 = vsel %vm32_vm1, %v6180_v56, 0  ;;  %v6253_v46 = vsel %vm32_vm1, %v2397_v10, 0 }
 0x4e2   :  { %4990 = vmatpush3.bf16.msra.mxu1 %v5853_v57  ;;  %4991 = vmatprep.mubr.msk.bf16.mxu1 %vm5488_vm0, %v7135_v1  ;;  %v1729_v23 = vmul.f32 %v5356_v31, %v6118_v40 }
 0x4e3   :  { %v1738_v15 = vpack.c.bf16 %v1727_v27, %v1725_v33  ;;  %5001 = vmatprep.subr.bf16.mxu1 %v7135_v1 }
 0x4e4   :  { %v5358_v61 = vpop.eup %5357  ;;  %v2395_v40 = vpop.permute.xlu1 %2394 }
 0x4e5   :  { %v1731_v5 = vmul.f32 %v5358_v61, %v6126_v44  ;;  %4986 = vmatmul.mubr.msk.bf16.vlgmr.msra.gmra.mrb[60].mxu0 %vm474_vm2, %v1738_v15  ;;  %v2339_v24 = vpop.permute.xlu0 %2338  ;;  %v6245_v44 = vsel %vm32_vm1, %v2341_v51, 0 }
 0x4e6   :  { %4997 = vmatprep.mubr.msk.bf16.mxu0 %vm5488_vm0, %v7135_v1 }
 0x4e7   :  { %4996 = vmatpush3.bf16.xpose.msra.mxu0 %v6231_v58  ;;  %v1739_v57 = vpack.c.bf16 %v1731_v5, %v1729_v23 }
 0x4e8   :  { %5007 = vmatprep.subr.bf16.mxu0 %v7135_v1  ;;  %v2509_v28 = vpop.permute.xlu1 %2508 }
 0x4e9   :  { %4992 = vmatmul.mubr.msk.bf16.vlgmr.msra.gmra.mrb[60].mxu1 %vm474_vm2, %v1739_v57  ;;  %v2453_v56 = vpop.permute.xlu0 %2452  ;;  %v6269_v34 = vsel %vm32_vm1, %v2509_v28, 0 }
 0x4ea   :  { %5003 = vmatprep.mubr.msk.bf16.mxu1 %vm5488_vm0, %v7135_v1  ;;  %v6261_v16 = vsel %vm32_vm1, %v2453_v56, 0 }
 0x4eb   :  { %5002 = vmatpush3.bf16.xpose.msra.mxu1 %v6237_v41 }
 0x4ec   :  { %5013 = vmatprep.subr.bf16.mxu1 %v7135_v1  ;;  %v2507_v18 = vpop.permute.xlu1 %2506 }
 0x4ed   :  { %v2451_v54 = vpop.permute.xlu0 %2450 }
 0x4ee   :  { %4998 = vmatmul.mubr.msk.bf16.vlgmr.msra.gmra.mrb[64].mxu0 %vm32_vm1, %v2227_v8 }
 0x4ef   :  { %5008 = vmatpush3.bf16.xpose.msra.mxu0 %v6245_v44  ;;  %5009 = vmatprep.mubr.msk.bf16.mxu0 %vm5488_vm0, %v7135_v1 }
 0x4f0   :  { %5019 = vmatprep.subr.bf16.mxu0 %v7135_v1  ;;  %v2621_v53 = vpop.permute.xlu1 %2620 }
 0x4f1   :  { %v2565_v2 = vpop.permute.xlu0 %2564  ;;  %v6285_v20 = vsel %vm32_vm1, %v2621_v53, 0 }
 0x4f2   :  { %5004 = vmatmul.mubr.msk.bf16.vlgmr.msra.gmra.mrb[64].mxu1 %vm32_vm1, %v2283_v35  ;;  %v6277_v3 = vsel %vm32_vm1, %v2565_v2, 0 }
 0x4f3   :  { %5014 = vmatpush3.bf16.xpose.msra.mxu1 %v6253_v46  ;;  %5015 = vmatprep.mubr.msk.bf16.mxu1 %vm5488_vm0, %v7135_v1 }
 0x4f4   :  { %5025 = vmatprep.subr.bf16.mxu1 %v7135_v1  ;;  %v2619_v60 = vpop.permute.xlu1 %2618 }
 0x4f5   :  { %v2563_v25 = vpop.permute.xlu0 %2562 }
 0x4f6   :  { %5010 = vmatmul.mubr.msk.bf16.vlgmr.msra.gmra.mrb[68].mxu0 %vm32_vm1, %v2339_v24 }
 0x4f7   :  { %5020 = vmatpush3.bf16.xpose.msra.mxu0 %v6261_v16  ;;  %5021 = vmatprep.mubr.msk.bf16.mxu0 %vm5488_vm0, %v7135_v1 }
 0x4f8   :  { %5031 = vmatprep.subr.bf16.mxu0 %v7135_v1  ;;  %v6299_v26 = vpop.permute.xlu1 %2869 }
 0x4f9   :  { %v6301_v30 = vpop.permute.xlu0 %2916 }
 0x4fa   :  { %5016 = vmatmul.mubr.msk.bf16.vlgmr.msra.gmra.mrb[68].mxu1 %vm32_vm1, %v2395_v40 }
 0x4fb   :  { %5026 = vmatpush3.bf16.xpose.msra.mxu1 %v6269_v34  ;;  %5027 = vmatprep.mubr.msk.bf16.mxu1 %vm5488_vm0, %v7135_v1 }
 0x4fc   :  { %5037 = vmatprep.subr.bf16.mxu1 %v7135_v1 }
 0x4fe   :  { %5022 = vmatmul.mubr.msk.bf16.vlgmr.msra.gmra.mrb[72].mxu0 %vm32_vm1, %v2451_v54 }
 0x4ff   :  { %5032 = vmatpush3.bf16.xpose.msra.mxu0 %v6277_v3  ;;  %5033 = vmatprep.mubr.msk.bf16.mxu0 %vm5488_vm0, %v7135_v1 }
 0x500   :  { %5043 = vmatprep.subr.bf16.mxu0 %v7135_v1 }
 0x502   :  { %5028 = vmatmul.mubr.msk.bf16.vlgmr.msra.gmra.mrb[72].mxu1 %vm32_vm1, %v2507_v18 }
 0x503   :  { %5038 = vmatpush3.bf16.xpose.msra.mxu1 %v6285_v20  ;;  %5039 = vmatprep.mubr.msk.bf16.mxu1 %vm5488_vm0, %v7135_v1 }
 0x504   :  { %5049 = vmatprep.subr.bf16.mxu1 %v7135_v1 }
 0x506   :  { %5034 = vmatmul.mubr.msk.bf16.vlgmr.msra.gmra.mrb[76].mxu0 %vm32_vm1, %v2563_v25 }
 0x507   :  { %5045 = vmatprep.mubr.msk.bf16.mxu0 %vm5488_vm0, %v7135_v1  ;;  %5044 = vmatpush3.bf16.msra.mxu0 %v6299_v26 }
 0x508   :  { %5055 = vmatprep.subr.bf16.mxu0 %v7135_v1 }
 0x50a   :  { %5040 = vmatmul.mubr.msk.bf16.vlgmr.msra.gmra.mrb[76].mxu1 %vm32_vm1, %v2619_v60 }
 0x50b   :  { %5051 = vmatprep.mubr.msk.bf16.mxu1 %vm5488_vm0, %v7135_v1  ;;  %5050 = vmatpush3.bf16.msra.mxu1 %v6301_v30 }
 0x50c   :  { %5061 = vmatprep.subr.bf16.mxu1 %v7135_v1 }
 0x59d   :  { %v6307_v39 = vpop.f32.mrb[48].mxu0 }
 0x59e   :  { %v4951_v17 = vpop.f32.mrb[49].mxu0 }
 0x59f   :  { %v6309_v48 = vpop.f32.mrb[50].mxu0 }
 0x5a0   :  { %v4952_v19 = vpop.f32.mrb[51].mxu0 }
 0x5a4   :  { %v6311_v0 = vpop.f32.mrb[48].mxu1 }
 0x5a5   :  { %v4957_v21 = vpop.f32.mrb[49].mxu1 }
 0x5a6   :  { %v6313_v43 = vpop.f32.mrb[50].mxu1 }
 0x5a7   :  { %v4958_v12 = vpop.f32.mrb[51].mxu1 }
 0x5a8   :  { %v6315_v32 = vpop.f32.mrb[52].mxu0 }
 0x5a9   :  { %v4963_v6 = vpop.f32.mrb[53].mxu0 }
 0x5aa   :  { %v6317_v22 = vpop.f32.mrb[54].mxu0 }
 0x5ab   :  { %v4964_v38 = vpop.f32.mrb[55].mxu0 }
 0x5ac   :  { %v6319_v29 = vpop.f32.mrb[52].mxu1 }
 0x5ad   :  { %v4969_v49 = vpop.f32.mrb[53].mxu1 }
 0x5ae   :  { %v6321_v45 = vpop.f32.mrb[54].mxu1 }
 0x5af   :  { %v4970_v14 = vpop.f32.mrb[55].mxu1 }
 0x5b0   :  { %v6323_v11 = vpop.f32.mrb[56].mxu0 }
 0x5b1   :  { %v4975_v13 = vpop.f32.mrb[57].mxu0 }
 0x5b2   :  { %v6325_v8 = vpop.f32.mrb[58].mxu0 }
 0x5b3   :  { %v4976_v42 = vpop.f32.mrb[59].mxu0 }
 0x5b4   :  { %v6327_v52 = vpop.f32.mrb[56].mxu1 }
 0x5b5   :  { %v4981_v9 = vpop.f32.mrb[57].mxu1 }
 0x5b6   :  { %v6329_v55 = vpop.f32.mrb[58].mxu1 }
 0x5b7   :  { %v4982_v37 = vpop.f32.mrb[59].mxu1 }
 0x5b8   :  { %v6331_v36 = vpop.f32.mrb[60].mxu0 }
 0x5b9   :  { %v4987_v7 = vpop.f32.mrb[61].mxu0 }
 0x5ba   :  { %v6333_v50 = vpop.f32.mrb[62].mxu0 }
 0x5bb   :  { %v4988_v35 = vpop.f32.mrb[63].mxu0 }
 0x5bc   :  { %v6335_v59 = vpop.f32.mrb[60].mxu1 }
 0x5bd   :  { %v4993_v33 = vpop.f32.mrb[61].mxu1 }
 0x5be   :  { %v6337_v27 = vpop.f32.mrb[62].mxu1 }
 0x5bf   :  { %v4994_v51 = vpop.f32.mrb[63].mxu1 }
 0x5c1   :  { %v2270_v31 = vpop.f32.mrb[64].mxu0 }
 0x5c2   :  { %v6339_v15 = vmul.f32 0.35355338, %v2270_v31  ;;  %v4999_v61 = vpop.f32.mrb[65].mxu0 }
 0x5c3   :  { %v2273_v23 = vpop.f32.mrb[66].mxu0 }
 0x5c4   :  { %v6341_v5 = vmul.f32 0.35355338, %v2273_v23  ;;  %v5000_v10 = vpop.f32.mrb[67].mxu0  ;;  %v2685_v57 = vsel %vm474_vm2, %v6339_v15, -inf }
 0x5c5   :  { %2686 = vmax.xlane.f32.xlu0 %v2685_v57  ;;  %v2326_v24 = vpop.f32.mrb[64].mxu1 }
 0x5c6   :  { %v6345_v40 = vmul.f32 0.35355338, %v2326_v24  ;;  %v5005_v56 = vpop.f32.mrb[65].mxu1  ;;  %v2688_v28 = vsel %vm474_vm2, %v6341_v5, -inf }
 0x5c7   :  { %2689 = vmax.xlane.f32.xlu1 %v2688_v28  ;;  %v2329_v54 = vpop.f32.mrb[66].mxu1 }
 0x5c8   :  { %v6349_v18 = vmul.f32 0.35355338, %v2329_v54  ;;  %v5006_v2 = vpop.f32.mrb[67].mxu1  ;;  %v2691_v53 = vsel %vm474_vm2, %v6345_v40, -inf }
 0x5c9   :  { %2692 = vmax.xlane.f32.xlu0 %v2691_v53  ;;  %v2382_v25 = vpop.f32.mrb[68].mxu0 }
 0x5ca   :  { %v6353_v60 = vmul.f32 0.35355338, %v2382_v25  ;;  %v5011_v17 = vpop.f32.mrb[69].mxu0  ;;  %v2694_v6 = vsel %vm474_vm2, %v6349_v18, -inf }
 0x5cb   :  { %v2385_v19 = vpop.f32.mrb[70].mxu0 }
 0x5cc   :  { %v6355_v21 = vmul.f32 0.35355338, %v2385_v19  ;;  %v5012_v12 = vpop.f32.mrb[71].mxu0  ;;  %v2697_v38 = vsel %vm474_vm2, %v6353_v60, -inf }
 0x5cd   :  { %2695 = vmax.xlane.f32.xlu0 %v2694_v6  ;;  %v2438_v49 = vpop.f32.mrb[68].mxu1  ;;  %2698 = vmax.xlane.f32.xlu1 %v2697_v38 }
 0x5ce   :  { %v6361_v14 = vmul.f32 0.35355338, %v2438_v49  ;;  %v5017_v13 = vpop.f32.mrb[69].mxu1  ;;  %v2700_v35 = vsel %vm474_vm2, %v6355_v21, -inf }
 0x5cf   :  { %v2441_v42 = vpop.f32.mrb[70].mxu1 }
 0x5d0   :  { %v6363_v9 = vmul.f32 0.35355338, %v2441_v42  ;;  %v5018_v37 = vpop.f32.mrb[71].mxu1  ;;  %v2703_v7 = vsel %vm474_vm2, %v6361_v14, -inf }
 0x5d1   :  { %2704 = vmax.xlane.f32.xlu1 %v2703_v7  ;;  %2701 = vmax.xlane.f32.xlu0 %v2700_v35  ;;  %v2494_v33 = vpop.f32.mrb[72].mxu0 }
 0x5d2   :  { %v6369_v51 = vmul.f32 0.35355338, %v2494_v33  ;;  %v5023_v31 = vpop.f32.mrb[73].mxu0  ;;  %v2706_v57 = vsel %vm474_vm2, %v6363_v9, -inf }
 0x5d3   :  { %v2497_v61 = vpop.f32.mrb[74].mxu0 }
 0x5d4   :  { %v6371_v23 = vmul.f32 0.35355338, %v2497_v61  ;;  %v5024_v10 = vpop.f32.mrb[75].mxu0  ;;  %v2709_v24 = vsel %vm474_vm2, %v6369_v51, -inf }
 0x5d5   :  { %v2550_v56 = vpop.f32.mrb[72].mxu1  ;;  %2707 = vmax.xlane.f32.xlu0 %v2706_v57  ;;  %2710 = vmax.xlane.f32.xlu1 %v2709_v24 }
 0x5d6   :  { %v6377_v28 = vmul.f32 0.35355338, %v2550_v56  ;;  %v5029_v54 = vpop.f32.mrb[73].mxu1  ;;  %v2712_v19 = vsel %vm474_vm2, %v6371_v23, -inf }
 0x5d7   :  { %v2553_v2 = vpop.f32.mrb[74].mxu1 }
 0x5d8   :  { %v6379_v53 = vmul.f32 0.35355338, %v2553_v2  ;;  %v5030_v25 = vpop.f32.mrb[75].mxu1  ;;  %v2715_v17 = vsel %vm474_vm2, %v6377_v28, -inf  ;;  %v6407_v2 = vpop.permute.xlu1 %2963 }
 0x5d9   :  { %2716 = vmax.xlane.f32.xlu1 %v2715_v17  ;;  %2713 = vmax.xlane.f32.xlu0 %v2712_v19  ;;  %v2606_v12 = vpop.f32.mrb[76].mxu0 }
 0x5da   :  { %v6385_v6 = vmul.f32 0.35355338, %v2606_v12  ;;  %v5035_v38 = vpop.f32.mrb[77].mxu0  ;;  %v2718_v37 = vsel %vm474_vm2, %v6379_v53, -inf }
 0x5db   :  { %v2609_v49 = vpop.f32.mrb[78].mxu0 }
 0x5dc   :  { %v6387_v13 = vmul.f32 0.35355338, %v2609_v49  ;;  %v5036_v42 = vpop.f32.mrb[79].mxu0  ;;  %v2721_v7 = vsel %vm474_vm2, %v6385_v6, -inf  ;;  %v6409_v25 = vpop.permute.xlu1 %3010 }
 0x5dd   :  { %v2662_v35 = vpop.f32.mrb[76].mxu1  ;;  %2719 = vmax.xlane.f32.xlu0 %v2718_v37  ;;  %2722 = vmax.xlane.f32.xlu1 %v2721_v7 }
 0x5de   :  { %v6393_v33 = vmul.f32 0.35355338, %v2662_v35  ;;  %v5041_v31 = vpop.f32.mrb[77].mxu1  ;;  %v2724_v56 = vsel %vm474_vm2, %v6387_v13, -inf }
 0x5df   :  { %v2665_v61 = vpop.f32.mrb[78].mxu1 }
 0x5e0   :  { %v6395_v10 = vmul.f32 0.35355338, %v2665_v61  ;;  %v5042_v57 = vpop.f32.mrb[79].mxu1  ;;  %v2727_v24 = vsel %vm474_vm2, %v6393_v33, -inf }
 0x5e1   :  { %2728 = vmax.xlane.f32.xlu1 %v2727_v24  ;;  %2725 = vmax.xlane.f32.xlu0 %v2724_v56 }
 0x5e2   :  { %v2730_v54 = vsel %vm474_vm2, %v6395_v10, -inf }
 0x5e5   :  { %2731 = vmax.xlane.f32.xlu0 %v2730_v54 }
 0x5f2   :  { %3104 = vrot.lane.b32.xlu1 %v6145_v47, %s5494_s4 }
 0x5fb   :  { %3057 = vrot.lane.b32.xlu0 %v6153_v4, %s5494_s4 }
 0x652   :  { %v2687_v17 = vpop.xlane.xlu0 %2686 }
 0x653   :  { %v2733_v19 = vsub.f32 %v6339_v15, %v2687_v17 }
 0x654   :  { %v2690_v12 = vpop.xlane.xlu1 %2689 }
 0x655   :  { %v2749_v38 = vmul.f32 1.442695, %v2733_v19  ;;  %v2734_v49 = vsub.f32 %v6341_v5, %v2690_v12 }
 0x656   :  { %v2693_v42 = vpop.xlane.xlu0 %2692 }
 0x657   :  { %5359 = vpow2.f32 %v2749_v38  ;;  %v2751_v37 = vmul.f32 1.442695, %v2734_v49  ;;  %v2735_v7 = vsub.f32 %v6345_v40, %v2693_v42 }
 0x659   :  { %5361 = vpow2.f32 %v2751_v37  ;;  %v2753_v47 = vmul.f32 1.442695, %v2735_v7 }
 0x65a   :  { %v2699_v35 = vpop.xlane.xlu1 %2698  ;;  %v2696_v4 = vpop.xlane.xlu0 %2695 }
 0x65b   :  { %5363 = vpow2.f32 %v2753_v47  ;;  %v2737_v31 = vsub.f32 %v6353_v60, %v2699_v35  ;;  %v2736_v61 = vsub.f32 %v6349_v18, %v2696_v4 }
 0x65d   :  { %v2757_v57 = vmul.f32 1.442695, %v2737_v31  ;;  %v2755_v15 = vmul.f32 1.442695, %v2736_v61 }
 0x65e   :  { %v2705_v24 = vpop.xlane.xlu1 %2704  ;;  %v2702_v56 = vpop.xlane.xlu0 %2701 }
 0x65f   :  { %5365 = vpow2.f32 %v2757_v57  ;;  %v2739_v5 = vsub.f32 %v6361_v14, %v2705_v24  ;;  %v2738_v54 = vsub.f32 %v6355_v21, %v2702_v56 }
 0x660   :  { %5367 = vpow2.f32 %v2755_v15 }
 0x661   :  { %v6418_v40 = vpop.eup %5359  ;;  %v2761_v17 = vmul.f32 1.442695, %v2739_v5  ;;  %v2759_v19 = vmul.f32 1.442695, %v2738_v54 }
 0x662   :  { %v2711_v12 = vpop.xlane.xlu1 %2710  ;;  %v2708_v38 = vpop.xlane.xlu0 %2707  ;;  %v2781_v60 = vsel %vm474_vm2, %v6418_v40, 0.0 }
 0x663   :  { %v6422_v18 = vpop.eup %5361  ;;  %5369 = vpow2.f32 %v2761_v17  ;;  %v2741_v49 = vsub.f32 %v6369_v51, %v2711_v12  ;;  %v2740_v42 = vsub.f32 %v6363_v9, %v2708_v38  ;;  %2782 = vadd.xlane.f32.xlu1 %v2781_v60 }
 0x664   :  { %5371 = vpow2.f32 %v2759_v19  ;;  %v2784_v21 = vsel %vm474_vm2, %v6422_v18, 0.0 }
 0x665   :  { %v6428_v14 = vpop.eup %5363  ;;  %v2765_v37 = vmul.f32 1.442695, %v2741_v49  ;;  %v2763_v7 = vmul.f32 1.442695, %v2740_v42  ;;  %2785 = vadd.xlane.f32.xlu0 %v2784_v21 }
 0x666   :  { %v2717_v47 = vpop.xlane.xlu1 %2716  ;;  %v2714_v35 = vpop.xlane.xlu0 %2713  ;;  %v2787_v4 = vsel %vm474_vm2, %v6428_v14, 0.0 }
 0x667   :  { %5373 = vpow2.f32 %v2765_v37  ;;  %v2743_v51 = vsub.f32 %v6377_v28, %v2717_v47  ;;  %v2742_v9 = vsub.f32 %v6371_v23, %v2714_v35  ;;  %2788 = vadd.xlane.f32.xlu1 %v2787_v4 }
 0x668   :  { %5375 = vpow2.f32 %v2763_v7 }
 0x669   :  { %v6434_v31 = vpop.eup %5365  ;;  %v2769_v61 = vmul.f32 1.442695, %v2743_v51  ;;  %v2767_v57 = vmul.f32 1.442695, %v2742_v9 }
 0x66a   :  { %v6436_v15 = vpop.eup %5367  ;;  %v2723_v24 = vpop.xlane.xlu1 %2722  ;;  %v2793_v5 = vsel %vm474_vm2, %v6434_v31, 0.0 }
 0x66b   :  { %v2720_v56 = vpop.xlane.xlu0 %2719  ;;  %5377 = vpow2.f32 %v2769_v61  ;;  %v2745_v54 = vsub.f32 %v6385_v6, %v2723_v24  ;;  %2794 = vadd.xlane.f32.xlu1 %v2793_v5  ;;  %v2790_v23 = vsel %vm474_vm2, %v6436_v15, 0.0 }
 0x66c   :  { %v2744_v28 = vsub.f32 %v6379_v53, %v2720_v56  ;;  %5379 = vpow2.f32 %v2767_v57  ;;  %2791 = vadd.xlane.f32.xlu0 %v2790_v23 }
 0x66d   :  { %v6444_v17 = vpop.eup %5369  ;;  %v2773_v19 = vmul.f32 1.442695, %v2745_v54 }
 0x66e   :  { %v2771_v12 = vmul.f32 1.442695, %v2744_v28  ;;  %v6446_v38 = vpop.eup %5371  ;;  %v2729_v60 = vpop.xlane.xlu1 %2728  ;;  %v2799_v42 = vsel %vm474_vm2, %v6444_v17, 0.0 }
 0x66f   :  { %v2726_v49 = vpop.xlane.xlu0 %2725  ;;  %5381 = vpow2.f32 %v2773_v19  ;;  %v2747_v53 = vsub.f32 %v6393_v33, %v2729_v60  ;;  %2800 = vadd.xlane.f32.xlu1 %v2799_v42  ;;  %v2796_v21 = vsel %vm474_vm2, %v6446_v38, 0.0 }
 0x670   :  { %v2746_v6 = vsub.f32 %v6387_v13, %v2726_v49  ;;  %5383 = vpow2.f32 %v2771_v12  ;;  %2797 = vadd.xlane.f32.xlu0 %v2796_v21  ;;  %v5228_v21 = vld [vmem:[%s7133_s0 + $0x28] sm:$0xff]  }
 0x671   :  { %v6454_v37 = vpop.eup %5373  ;;  %v2777_v7 = vmul.f32 1.442695, %v2747_v53  ;;  %v5224_v53 = vld [vmem:[%s7133_s0 + $0x8] sm:$0xff]  }
 0x672   :  { %v2775_v47 = vmul.f32 1.442695, %v2746_v6  ;;  %v6456_v35 = vpop.eup %5375  ;;  %v2805_v51 = vsel %vm474_vm2, %v6454_v37, 0.0  ;;  %v5226_v6 = vld [vmem:[%s7133_s0 + $0x18] sm:$0xff]  }
 0x673   :  { %v2732_v4 = vpop.xlane.xlu0 %2731  ;;  %5385 = vpow2.f32 %v2777_v7  ;;  %2806 = vadd.xlane.f32.xlu1 %v2805_v51  ;;  %v2802_v13 = vsel %vm474_vm2, %v6456_v35, 0.0  ;;  %v5230_v7 = vld [vmem:[%s7133_s0 + $0x38] sm:$0xff]   ;;  %v6519_v51 = vpop.permute.xlu1 %3104 }
 0x674   :  { %v2748_v33 = vsub.f32 %v6395_v10, %v2732_v4  ;;  %5387 = vpow2.f32 %v2775_v47  ;;  %2803 = vadd.xlane.f32.xlu0 %v2802_v13  ;;  %v5225_v47 = vld [vmem:[%s7133_s0 + $0x10] sm:$0xff]   ;;  %7141 = vst [vmem:[#allocation2_spill] sm:$0xff] %v6519_v51 }
 0x675   :  { %v6463_v9 = vpop.eup %5377  ;;  %v5229_v4 = vld [vmem:[%s7133_s0 + $0x30] sm:$0xff]  }
 0x676   :  { %v2779_v61 = vmul.f32 1.442695, %v2748_v33  ;;  %v6465_v57 = vpop.eup %5379  ;;  %v2811_v24 = vsel %vm474_vm2, %v6463_v9, 0.0 }
 0x677   :  { %2812 = vadd.xlane.f32.xlu1 %v2811_v24  ;;  %v2808_v56 = vsel %vm474_vm2, %v6465_v57, 0.0  ;;  %v6521_v33 = vpop.permute.xlu0 %3057 }
 0x678   :  { %5389 = vpow2.f32 %v2779_v61  ;;  %2809 = vadd.xlane.f32.xlu0 %v2808_v56  ;;  %7142 = vst [vmem:[#allocation3_spill] sm:$0xff] %v6521_v33 }
 0x679   :  { %v6471_v10 = vpop.eup %5381 }
 0x67a   :  { %v6473_v5 = vpop.eup %5383  ;;  %v2817_v54 = vsel %vm474_vm2, %v6471_v10, 0.0 }
 0x67b   :  { %2818 = vadd.xlane.f32.xlu1 %v2817_v54  ;;  %v2814_v28 = vsel %vm474_vm2, %v6473_v5, 0.0 }
 0x67c   :  { %2815 = vadd.xlane.f32.xlu0 %v2814_v28 }
 0x67d   :  { %v6479_v23 = vpop.eup %5385 }
 0x67e   :  { %v6481_v19 = vpop.eup %5387  ;;  %v2823_v12 = vsel %vm474_vm2, %v6479_v23, 0.0 }
 0x67f   :  { %2824 = vadd.xlane.f32.xlu1 %v2823_v12  ;;  %v2820_v60 = vsel %vm474_vm2, %v6481_v19, 0.0 }
 0x680   :  { %2821 = vadd.xlane.f32.xlu0 %v2820_v60 }
 0x682   :  { %v6487_v49 = vpop.eup %5389 }
 0x683   :  { %v2826_v42 = vsel %vm474_vm2, %v6487_v49, 0.0 }
 0x684   :  { %2827 = vadd.xlane.f32.xlu0 %v2826_v42 }
 0x690   :  { %3198 = vrot.lane.b32.xlu1 %v6159_v62, %s5494_s4  ;;  %v5223_v62 = vld [vmem:[%s7133_s0] sm:$0xff]  }
 0x694   :  { %3430 = vrot.lane.b32.xlu1 %v5224_v53, %s5495_s7 }
 0x698   :  { %3532 = vrot.lane.b32.xlu1 %v5226_v6, %s5495_s7 }
 0x69a   :  { %3151 = vrot.lane.b32.xlu0 %v6169_v63, %s5494_s4  ;;  %v5227_v63 = vld [vmem:[%s7133_s0 + $0x20] sm:$0xff]   ;;  %s5496_s0 = smov 8  }
 0x69c   :  { %3634 = vrot.lane.b32.xlu1 %v5228_v21, %s5495_s7 }
 0x69e   :  { %3379 = vrot.lane.b32.xlu0 %v5223_v62, %s5495_s7 }
 0x6a0   :  { %3736 = vrot.lane.b32.xlu1 %v5230_v7, %s5495_s7 }
 0x6a2   :  { %3481 = vrot.lane.b32.xlu0 %v5225_v47, %s5495_s7 }
 0x6a6   :  { %3583 = vrot.lane.b32.xlu0 %v5227_v63, %s5495_s7 }
 0x6aa   :  { %3685 = vrot.lane.b32.xlu0 %v5229_v4, %s5495_s7 }
 0x6f0   :  { %v2783_v13 = vpop.xlane.xlu1 %2782 }
 0x6f1   :  { %5391 = vrcp.f32 %v2783_v13 }
 0x6f2   :  { %v2786_v61 = vpop.xlane.xlu0 %2785 }
 0x6f3   :  { %5393 = vrcp.f32 %v2786_v61 }
 0x6f4   :  { %v2789_v24 = vpop.xlane.xlu1 %2788 }
 0x6f5   :  { %5395 = vrcp.f32 %v2789_v24 }
 0x6f8   :  { %v2795_v56 = vpop.xlane.xlu1 %2794 }
 0x6f9   :  { %v2792_v54 = vpop.xlane.xlu0 %2791 }
 0x6fa   :  { %5397 = vrcp.f32 %v2792_v54 }
 0x6fb   :  { %v5392_v28 = vpop.eup %5391  ;;  %5399 = vrcp.f32 %v2795_v56 }
 0x6fc   :  { %v2801_v12 = vpop.xlane.xlu1 %2800  ;;  %v2830_v53 = vmul.f32 %v5392_v28, %v6418_v40 }
 0x6fd   :  { %v5394_v60 = vpop.eup %5393  ;;  %v2798_v42 = vpop.xlane.xlu0 %2797 }
 0x6fe   :  { %v2832_v6 = vmul.f32 %v5394_v60, %v6422_v18  ;;  %5401 = vrcp.f32 %v2798_v42 }
 0x6ff   :  { %5403 = vrcp.f32 %v2801_v12  ;;  %v5396_v47 = vpop.eup %5395 }
 0x700   :  { %v2807_v21 = vpop.xlane.xlu1 %2806  ;;  %v2861_v62 = vpack.c.bf16 %v2832_v6, %v2830_v53  ;;  %v2834_v40 = vmul.f32 %v5396_v47, %v6428_v14 }
 0x701   :  { %v2804_v7 = vpop.xlane.xlu0 %2803 }
 0x702   :  { %5405 = vrcp.f32 %v2804_v7  ;;  %5046 = vmatmul.mubr.msk.bf16.vlgmr.msra.gmra.mrb[80].mxu0 %vm474_vm2, %v2861_v62 }
 0x703   :  { %5056 = vmatpush3.bf16.msra.mxu0 %v6407_v2  ;;  %5057 = vmatprep.mubr.msk.bf16.mxu0 %vm5488_vm0, %v7135_v1  ;;  %5407 = vrcp.f32 %v2807_v21 }
 0x704   :  { %v5398_v63 = vpop.eup %5397  ;;  %v2813_v4 = vpop.xlane.xlu1 %2812  ;;  %5067 = vmatprep.subr.bf16.mxu0 %v7135_v1 }
 0x705   :  { %v2836_v18 = vmul.f32 %v5398_v63, %v6436_v15  ;;  %v2810_v13 = vpop.xlane.xlu0 %2809  ;;  %v5400_v61 = vpop.eup %5399 }
 0x706   :  { %5409 = vrcp.f32 %v2810_v13  ;;  %v2838_v28 = vmul.f32 %v5400_v61, %v6434_v31 }
 0x707   :  { %v2862_v24 = vpack.c.bf16 %v2836_v18, %v2834_v40  ;;  %5411 = vrcp.f32 %v2813_v4 }
 0x708   :  { %v5402_v56 = vpop.eup %5401  ;;  %v2819_v54 = vpop.xlane.xlu1 %2818 }
 0x709   :  { %v2840_v12 = vmul.f32 %v5402_v56, %v6446_v38  ;;  %5052 = vmatmul.mubr.msk.bf16.vlgmr.msra.gmra.mrb[80].mxu1 %vm474_vm2, %v2862_v24  ;;  %v2816_v60 = vpop.xlane.xlu0 %2815  ;;  %v5404_v42 = vpop.eup %5403 }
 0x70a   :  { %5062 = vmatpush3.bf16.msra.mxu1 %v6409_v25  ;;  %5413 = vrcp.f32 %v2816_v60  ;;  %5063 = vmatprep.mubr.msk.bf16.mxu1 %vm5488_vm0, %v7135_v1  ;;  %v2842_v53 = vmul.f32 %v5404_v42, %v6444_v17 }
 0x70b   :  { %v2863_v14 = vpack.c.bf16 %v2840_v12, %v2838_v28  ;;  %5073 = vmatprep.subr.bf16.mxu1 %v7135_v1  ;;  %5415 = vrcp.f32 %v2819_v54 }
 0x70c   :  { %v5406_v15 = vpop.eup %5405  ;;  %v2825_v38 = vpop.xlane.xlu1 %2824 }
 0x70d   :  { %v2844_v31 = vmul.f32 %v5406_v15, %v6456_v35  ;;  %5058 = vmatmul.mubr.msk.bf16.vlgmr.msra.gmra.mrb[84].mxu0 %vm474_vm2, %v2863_v14  ;;  %v2822_v6 = vpop.xlane.xlu0 %2821  ;;  %v5408_v21 = vpop.eup %5407 }
 0x70e   :  { %5068 = vmatpush3.bf16.msra.mxu0 %v6521_v33  ;;  %5417 = vrcp.f32 %v2822_v6  ;;  %5069 = vmatprep.mubr.msk.bf16.mxu0 %vm5488_vm0, %v7135_v1  ;;  %v2846_v17 = vmul.f32 %v5408_v21, %v6454_v37 }
 0x70f   :  { %v2864_v62 = vpack.c.bf16 %v2844_v31, %v2842_v53  ;;  %5079 = vmatprep.subr.bf16.mxu0 %v7135_v1  ;;  %5419 = vrcp.f32 %v2825_v38 }
 0x710   :  { %v5410_v7 = vpop.eup %5409  ;;  %v6561_v61 = vpop.permute.xlu1 %3198 }
 0x711   :  { %v2848_v35 = vmul.f32 %v5410_v7, %v6465_v57  ;;  %5064 = vmatmul.mubr.msk.bf16.vlgmr.msra.gmra.mrb[84].mxu1 %vm474_vm2, %v2864_v62  ;;  %v2828_v47 = vpop.xlane.xlu0 %2827  ;;  %v5412_v63 = vpop.eup %5411  ;;  %7144 = vst [vmem:[#allocation5_spill] sm:$0xff] %v6561_v61 }
 0x712   :  { %5074 = vmatpush3.bf16.msra.mxu1 %v6519_v51  ;;  %5421 = vrcp.f32 %v2828_v47  ;;  %5075 = vmatprep.mubr.msk.bf16.mxu1 %vm5488_vm0, %v7135_v1  ;;  %v2850_v18 = vmul.f32 %v5412_v63, %v6463_v9 }
 0x713   :  { %v2865_v4 = vpack.c.bf16 %v2848_v35, %v2846_v17  ;;  %5085 = vmatprep.subr.bf16.mxu1 %v7135_v1 }
 0x714   :  { %v5414_v40 = vpop.eup %5413 }
 0x715   :  { %v2852_v37 = vmul.f32 %v5414_v40, %v6473_v5  ;;  %5070 = vmatmul.mubr.msk.bf16.vlgmr.msra.gmra.mrb[88].mxu0 %vm474_vm2, %v2865_v4  ;;  %v6556_v57 = vpop.permute.xlu0 %3151  ;;  %v5416_v13 = vpop.eup %5415 }
 0x716   :  { %7143 = vst [vmem:[#allocation4_spill] sm:$0xff] %v6556_v57  ;;  %5080 = vmatpush3.bf16.msra.mxu0 %v6556_v57  ;;  %5081 = vmatprep.mubr.msk.bf16.mxu0 %vm5488_vm0, %v7135_v1  ;;  %v2854_v9 = vmul.f32 %v5416_v13, %v6471_v10 }
 0x717   :  { %v2866_v24 = vpack.c.bf16 %v2852_v37, %v2850_v18  ;;  %5091 = vmatprep.subr.bf16.mxu0 %v7135_v1 }
 0x718   :  { %v5418_v56 = vpop.eup %5417 }
 0x719   :  { %v2856_v5 = vmul.f32 %v5418_v56, %v6481_v19  ;;  %5076 = vmatmul.mubr.msk.bf16.vlgmr.msra.gmra.mrb[88].mxu1 %vm474_vm2, %v2866_v24  ;;  %v5420_v54 = vpop.eup %5419  ;;  %v3431_v19 = vpop.permute.xlu1 %3430 }
 0x71a   :  { %5086 = vmatpush3.bf16.msra.mxu1 %v6561_v61  ;;  %5087 = vmatprep.mubr.msk.bf16.mxu1 %vm5488_vm0, %v7135_v1  ;;  %v2858_v60 = vmul.f32 %v5420_v54, %v6479_v23  ;;  %v3380_v23 = vpop.permute.xlu0 %3379 }
 0x71b   :  { %v2867_v28 = vpack.c.bf16 %v2856_v5, %v2854_v9  ;;  %5097 = vmatprep.subr.bf16.mxu1 %v7135_v1 }
 0x71c   :  { %v5422_v12 = vpop.eup %5421 }
 0x71d   :  { %v2860_v42 = vmul.f32 %v5422_v12, %v6487_v49  ;;  %5082 = vmatmul.mubr.msk.bf16.vlgmr.msra.gmra.mrb[92].mxu0 %vm474_vm2, %v2867_v28 }
 0x71e   :  { %5093 = vmatprep.mubr.msk.bf16.mxu0 %vm5488_vm0, %v7135_v1 }
 0x71f   :  { %5092 = vmatpush3.bf16.xpose.msra.mxu0 %v6231_v58  ;;  %v2868_v10 = vpack.c.bf16 %v2860_v42, %v2858_v60  ;;  %v3482_v58 = vpop.permute.xlu0 %3481 }
 0x720   :  { %5103 = vmatprep.subr.bf16.mxu0 %v7135_v1 }
 0x721   :  { %5088 = vmatmul.mubr.msk.bf16.vlgmr.msra.gmra.mrb[92].mxu1 %vm474_vm2, %v2868_v10 }
 0x722   :  { %5099 = vmatprep.mubr.msk.bf16.mxu1 %vm5488_vm0, %v7135_v1 }
 0x723   :  { %5098 = vmatpush3.bf16.xpose.msra.mxu1 %v6237_v41  ;;  %v3533_v41 = vpop.permute.xlu1 %3532 }
 0x724   :  { %5109 = vmatprep.subr.bf16.mxu1 %v7135_v1 }
 0x726   :  { %5094 = vmatmul.mubr.msk.bf16.vlgmr.msra.gmra.mrb[96].mxu0 %vm32_vm1, %v3380_v23 }
 0x727   :  { %5104 = vmatpush3.bf16.xpose.msra.mxu0 %v6245_v44  ;;  %5105 = vmatprep.mubr.msk.bf16.mxu0 %vm5488_vm0, %v7135_v1  ;;  %v3584_v44 = vpop.permute.xlu0 %3583 }
 0x728   :  { %5115 = vmatprep.subr.bf16.mxu0 %v7135_v1 }
 0x72a   :  { %5100 = vmatmul.mubr.msk.bf16.vlgmr.msra.gmra.mrb[96].mxu1 %vm32_vm1, %v3431_v19 }
 0x72b   :  { %5110 = vmatpush3.bf16.xpose.msra.mxu1 %v6253_v46  ;;  %5111 = vmatprep.mubr.msk.bf16.mxu1 %vm5488_vm0, %v7135_v1  ;;  %v3635_v46 = vpop.permute.xlu1 %3634 }
 0x72c   :  { %5121 = vmatprep.subr.bf16.mxu1 %v7135_v1 }
 0x72e   :  { %5106 = vmatmul.mubr.msk.bf16.vlgmr.msra.gmra.mrb[100].mxu0 %vm32_vm1, %v3482_v58 }
 0x72f   :  { %5116 = vmatpush3.bf16.xpose.msra.mxu0 %v6261_v16  ;;  %5117 = vmatprep.mubr.msk.bf16.mxu0 %vm5488_vm0, %v7135_v1  ;;  %v3686_v16 = vpop.permute.xlu0 %3685 }
 0x730   :  { %5127 = vmatprep.subr.bf16.mxu0 %v7135_v1 }
 0x732   :  { %5112 = vmatmul.mubr.msk.bf16.vlgmr.msra.gmra.mrb[100].mxu1 %vm32_vm1, %v3533_v41 }
 0x733   :  { %5122 = vmatpush3.bf16.xpose.msra.mxu1 %v6269_v34  ;;  %5123 = vmatprep.mubr.msk.bf16.mxu1 %vm5488_vm0, %v7135_v1  ;;  %v3737_v34 = vpop.permute.xlu1 %3736 }
 0x734   :  { %5133 = vmatprep.subr.bf16.mxu1 %v7135_v1 }
 0x736   :  { %5118 = vmatmul.mubr.msk.bf16.vlgmr.msra.gmra.mrb[104].mxu0 %vm32_vm1, %v3584_v44 }
 0x737   :  { %5128 = vmatpush3.bf16.xpose.msra.mxu0 %v6277_v3  ;;  %5129 = vmatprep.mubr.msk.bf16.mxu0 %vm5488_vm0, %v7135_v1 }
 0x738   :  { %5139 = vmatprep.subr.bf16.mxu0 %v7135_v1 }
 0x73a   :  { %5124 = vmatmul.mubr.msk.bf16.vlgmr.msra.gmra.mrb[104].mxu1 %vm32_vm1, %v3635_v46 }
 0x73b   :  { %5134 = vmatpush3.bf16.xpose.msra.mxu1 %v6285_v20  ;;  %5135 = vmatprep.mubr.msk.bf16.mxu1 %vm5488_vm0, %v7135_v1 }
 0x73c   :  { %5145 = vmatprep.subr.bf16.mxu1 %v7135_v1 }
 0x73e   :  { %5130 = vmatmul.mubr.msk.bf16.vlgmr.msra.gmra.mrb[108].mxu0 %vm32_vm1, %v3686_v16 }
 0x73f   :  { %5140 = vmatpush3.bf16.msra.mxu0 %v6299_v26  ;;  %5141 = vmatprep.mubr.msk.bf16.mxu0 %vm5488_vm0, %v7135_v1 }
 0x740   :  { %5151 = vmatprep.subr.bf16.mxu0 %v7135_v1 }
 0x742   :  { %5136 = vmatmul.mubr.msk.bf16.vlgmr.msra.gmra.mrb[108].mxu1 %vm32_vm1, %v3737_v34 }
 0x743   :  { %5146 = vmatpush3.bf16.msra.mxu1 %v6301_v30  ;;  %5147 = vmatprep.mubr.msk.bf16.mxu1 %vm5488_vm0, %v7135_v1 }
 0x744   :  { %5157 = vmatprep.subr.bf16.mxu1 %v7135_v1 }
 0x7d5   :  { %v6623_v3 = vpop.f32.mrb[80].mxu0 }
 0x7d6   :  { %v5047_v20 = vpop.f32.mrb[81].mxu0 }
 0x7d7   :  { %v6625_v49 = vpop.f32.mrb[82].mxu0 }
 0x7d8   :  { %v5048_v26 = vpop.f32.mrb[83].mxu0 }
 0x7dc   :  { %v6627_v14 = vpop.f32.mrb[80].mxu1 }
 0x7dd   :  { %v5053_v15 = vpop.f32.mrb[81].mxu1 }
 0x7de   :  { %v6629_v53 = vpop.f32.mrb[82].mxu1 }
 0x7df   :  { %v5054_v31 = vpop.f32.mrb[83].mxu1 }
 0x7e0   :  { %v6631_v38 = vpop.f32.mrb[84].mxu0 }
 0x7e1   :  { %v5059_v30 = vpop.f32.mrb[85].mxu0 }
 0x7e2   :  { %v6633_v6 = vpop.f32.mrb[86].mxu0 }
 0x7e3   :  { %v5060_v21 = vpop.f32.mrb[87].mxu0 }
 0x7e4   :  { %v6635_v62 = vpop.f32.mrb[84].mxu1 }
 0x7e5   :  { %v5065_v7 = vpop.f32.mrb[85].mxu1 }
 0x7e6   :  { %v6637_v17 = vpop.f32.mrb[86].mxu1 }
 0x7e7   :  { %v5066_v35 = vpop.f32.mrb[87].mxu1 }
 0x7e8   :  { %v6639_v47 = vpop.f32.mrb[88].mxu0 }
 0x7e9   :  { %v5071_v63 = vpop.f32.mrb[89].mxu0 }
 0x7ea   :  { %v6641_v4 = vpop.f32.mrb[90].mxu0 }
 0x7eb   :  { %v5072_v40 = vpop.f32.mrb[91].mxu0 }
 0x7ec   :  { %v6643_v18 = vpop.f32.mrb[88].mxu1 }
 0x7ed   :  { %v5077_v37 = vpop.f32.mrb[89].mxu1 }
 0x7ee   :  { %v6645_v13 = vpop.f32.mrb[90].mxu1 }
 0x7ef   :  { %v5078_v24 = vpop.f32.mrb[91].mxu1 }
 0x7f0   :  { %v6647_v56 = vpop.f32.mrb[92].mxu0 }
 0x7f1   :  { %v5083_v9 = vpop.f32.mrb[93].mxu0 }
 0x7f2   :  { %v6649_v5 = vpop.f32.mrb[94].mxu0 }
 0x7f3   :  { %v5084_v54 = vpop.f32.mrb[95].mxu0 }
 0x7f4   :  { %v6651_v28 = vpop.f32.mrb[92].mxu1 }
 0x7f5   :  { %v5089_v12 = vpop.f32.mrb[93].mxu1 }
 0x7f6   :  { %v6653_v60 = vpop.f32.mrb[94].mxu1 }
 0x7f7   :  { %v5090_v42 = vpop.f32.mrb[95].mxu1 }
 0x7f9   :  { %v3418_v10 = vpop.f32.mrb[96].mxu0 }
 0x7fa   :  { %v6655_v23 = vmul.f32 0.35355338, %v3418_v10  ;;  %v5095_v19 = vpop.f32.mrb[97].mxu0 }
 0x7fb   :  { %v3421_v58 = vpop.f32.mrb[98].mxu0 }
 0x7fc   :  { %v6657_v41 = vmul.f32 0.35355338, %v3421_v58  ;;  %v5096_v44 = vpop.f32.mrb[99].mxu0  ;;  %v3798_v46 = vsel %vm474_vm2, %v6655_v23, -inf }
 0x7fd   :  { %v3469_v16 = vpop.f32.mrb[96].mxu1  ;;  %3799 = vmax.xlane.f32.xlu0 %v3798_v46 }
 0x7fe   :  { %v6661_v34 = vmul.f32 0.35355338, %v3469_v16  ;;  %v5101_v20 = vpop.f32.mrb[97].mxu1  ;;  %v3801_v26 = vsel %vm474_vm2, %v6657_v41, -inf }
 0x7ff   :  { %v3472_v15 = vpop.f32.mrb[98].mxu1  ;;  %3802 = vmax.xlane.f32.xlu1 %v3801_v26 }
 0x800   :  { %v6665_v31 = vmul.f32 0.35355338, %v3472_v15  ;;  %v5102_v30 = vpop.f32.mrb[99].mxu1  ;;  %v3804_v21 = vsel %vm474_vm2, %v6661_v34, -inf }
 0x801   :  { %3805 = vmax.xlane.f32.xlu0 %v3804_v21  ;;  %v3520_v7 = vpop.f32.mrb[100].mxu0 }
 0x802   :  { %v6669_v35 = vmul.f32 0.35355338, %v3520_v7  ;;  %v5107_v63 = vpop.f32.mrb[101].mxu0  ;;  %v3807_v9 = vsel %vm474_vm2, %v6665_v31, -inf }
 0x803   :  { %v3523_v40 = vpop.f32.mrb[102].mxu0 }
 0x804   :  { %v6671_v37 = vmul.f32 0.35355338, %v3523_v40  ;;  %v5108_v24 = vpop.f32.mrb[103].mxu0  ;;  %v3810_v54 = vsel %vm474_vm2, %v6669_v35, -inf }
 0x805   :  { %v3571_v12 = vpop.f32.mrb[100].mxu1  ;;  %3808 = vmax.xlane.f32.xlu0 %v3807_v9  ;;  %3811 = vmax.xlane.f32.xlu1 %v3810_v54 }
 0x806   :  { %v6677_v42 = vmul.f32 0.35355338, %v3571_v12  ;;  %v5113_v10 = vpop.f32.mrb[101].mxu1  ;;  %v3813_v16 = vsel %vm474_vm2, %v6671_v37, -inf }
 0x807   :  { %v3574_v19 = vpop.f32.mrb[102].mxu1 }
 0x808   :  { %v6679_v58 = vmul.f32 0.35355338, %v3574_v19  ;;  %v5114_v44 = vpop.f32.mrb[103].mxu1  ;;  %v3816_v46 = vsel %vm474_vm2, %v6677_v42, -inf }
 0x809   :  { %3817 = vmax.xlane.f32.xlu1 %v3816_v46  ;;  %3814 = vmax.xlane.f32.xlu0 %v3813_v16  ;;  %v3622_v20 = vpop.f32.mrb[104].mxu0 }
 0x80a   :  { %v6685_v26 = vmul.f32 0.35355338, %v3622_v20  ;;  %v5119_v15 = vpop.f32.mrb[105].mxu0  ;;  %v3819_v63 = vsel %vm474_vm2, %v6679_v58, -inf }
 0x80b   :  { %v3625_v30 = vpop.f32.mrb[106].mxu0 }
 0x80c   :  { %v6687_v21 = vmul.f32 0.35355338, %v3625_v30  ;;  %v5120_v7 = vpop.f32.mrb[107].mxu0  ;;  %v3822_v40 = vsel %vm474_vm2, %v6685_v26, -inf }
 0x80d   :  { %v3673_v24 = vpop.f32.mrb[104].mxu1  ;;  %3820 = vmax.xlane.f32.xlu0 %v3819_v63  ;;  %3823 = vmax.xlane.f32.xlu1 %v3822_v40 }
 0x80e   :  { %v6693_v9 = vmul.f32 0.35355338, %v3673_v24  ;;  %v5125_v54 = vpop.f32.mrb[105].mxu1  ;;  %v3825_v46 = vsel %vm474_vm2, %v6687_v21, -inf }
 0x80f   :  { %v3676_v12 = vpop.f32.mrb[106].mxu1 }
 0x810   :  { %v6695_v10 = vmul.f32 0.35355338, %v3676_v12  ;;  %v5126_v19 = vpop.f32.mrb[107].mxu1  ;;  %v3828_v44 = vsel %vm474_vm2, %v6693_v9, -inf }
 0x811   :  { %3829 = vmax.xlane.f32.xlu1 %v3828_v44  ;;  %3826 = vmax.xlane.f32.xlu0 %v3825_v46  ;;  %v3724_v16 = vpop.f32.mrb[108].mxu0 }
 0x812   :  { %v6701_v20 = vmul.f32 0.35355338, %v3724_v16  ;;  %v5131_v15 = vpop.f32.mrb[109].mxu0  ;;  %v3831_v40 = vsel %vm474_vm2, %v6695_v10, -inf }
 0x813   :  { %v3727_v30 = vpop.f32.mrb[110].mxu0 }
 0x814   :  { %v6703_v7 = vmul.f32 0.35355338, %v3727_v30  ;;  %v5132_v63 = vpop.f32.mrb[111].mxu0  ;;  %v3834_v24 = vsel %vm474_vm2, %v6701_v20, -inf }
 0x815   :  { %v3775_v54 = vpop.f32.mrb[108].mxu1  ;;  %3832 = vmax.xlane.f32.xlu0 %v3831_v40  ;;  %3835 = vmax.xlane.f32.xlu1 %v3834_v24 }
 0x816   :  { %v6709_v12 = vmul.f32 0.35355338, %v3775_v54  ;;  %v5137_v19 = vpop.f32.mrb[109].mxu1  ;;  %v3837_v30 = vsel %vm474_vm2, %v6703_v7, -inf }
 0x817   :  { %v3778_v44 = vpop.f32.mrb[110].mxu1 }
 0x818   :  { %v6711_v46 = vmul.f32 0.35355338, %v3778_v44  ;;  %v5138_v16 = vpop.f32.mrb[111].mxu1  ;;  %v3840_v15 = vsel %vm474_vm2, %v6709_v12, -inf }
 0x819   :  { %3841 = vmax.xlane.f32.xlu1 %v3840_v15  ;;  %3838 = vmax.xlane.f32.xlu0 %v3837_v30 }
 0x81a   :  { %v3843_v63 = vsel %vm474_vm2, %v6711_v46, -inf }
 0x81d   :  { %3844 = vmax.xlane.f32.xlu0 %v3843_v63 }
 0x88a   :  { %v3800_v40 = vpop.xlane.xlu0 %3799 }
 0x88b   :  { %v3846_v24 = vsub.f32 %v6655_v23, %v3800_v40 }
 0x88c   :  { %v3803_v54 = vpop.xlane.xlu1 %3802 }
 0x88d   :  { %v3862_v19 = vmul.f32 1.442695, %v3846_v24  ;;  %v3847_v44 = vsub.f32 %v6657_v41, %v3803_v54 }
 0x88e   :  { %v3806_v16 = vpop.xlane.xlu0 %3805 }
 0x88f   :  { %5423 = vpow2.f32 %v3862_v19  ;;  %v3864_v1 = vmul.f32 1.442695, %v3847_v44  ;;  %v3848_v61 = vsub.f32 %v6661_v34, %v3806_v16 }
 0x891   :  { %5425 = vpow2.f32 %v3864_v1  ;;  %v3866_v57 = vmul.f32 1.442695, %v3848_v61 }
 0x892   :  { %v3812_v15 = vpop.xlane.xlu1 %3811  ;;  %v3809_v30 = vpop.xlane.xlu0 %3808 }
 0x893   :  { %5427 = vpow2.f32 %v3866_v57  ;;  %v3850_v51 = vsub.f32 %v6669_v35, %v3812_v15  ;;  %v3849_v63 = vsub.f32 %v6665_v31, %v3809_v30 }
 0x895   :  { %v3870_v33 = vmul.f32 1.442695, %v3850_v51  ;;  %v3868_v23 = vmul.f32 1.442695, %v3849_v63 }
 0x896   :  { %v3818_v40 = vpop.xlane.xlu1 %3817  ;;  %v3815_v24 = vpop.xlane.xlu0 %3814 }
 0x897   :  { %5429 = vpow2.f32 %v3870_v33  ;;  %v3852_v41 = vsub.f32 %v6677_v42, %v3818_v40  ;;  %v3851_v54 = vsub.f32 %v6671_v37, %v3815_v24 }
 0x898   :  { %5431 = vpow2.f32 %v3868_v23 }
 0x899   :  { %v6726_v34 = vpop.eup %5423  ;;  %v3874_v1 = vmul.f32 1.442695, %v3852_v41  ;;  %v3872_v61 = vmul.f32 1.442695, %v3851_v54 }
 0x89a   :  { %v3824_v19 = vpop.xlane.xlu1 %3823  ;;  %v3821_v57 = vpop.xlane.xlu0 %3820  ;;  %v3894_v35 = vsel %vm474_vm2, %v6726_v34, 0.0 }
 0x89b   :  { %v6730_v31 = vpop.eup %5425  ;;  %5433 = vpow2.f32 %v3874_v1  ;;  %v3854_v51 = vsub.f32 %v6685_v26, %v3824_v19  ;;  %v3853_v33 = vsub.f32 %v6679_v58, %v3821_v57  ;;  %3895 = vadd.xlane.f32.xlu1 %v3894_v35 }
 0x89c   :  { %5435 = vpow2.f32 %v3872_v61  ;;  %v3897_v37 = vsel %vm474_vm2, %v6730_v31, 0.0 }
 0x89d   :  { %v6736_v42 = vpop.eup %5427  ;;  %v3878_v44 = vmul.f32 1.442695, %v3854_v51  ;;  %v3876_v16 = vmul.f32 1.442695, %v3853_v33  ;;  %3898 = vadd.xlane.f32.xlu0 %v3897_v37 }
 0x89e   :  { %v3830_v15 = vpop.xlane.xlu1 %3829  ;;  %v3827_v30 = vpop.xlane.xlu0 %3826  ;;  %v3900_v63 = vsel %vm474_vm2, %v6736_v42, 0.0 }
 0x89f   :  { %5437 = vpow2.f32 %v3878_v44  ;;  %v3856_v26 = vsub.f32 %v6693_v9, %v3830_v15  ;;  %v3855_v58 = vsub.f32 %v6687_v21, %v3827_v30  ;;  %3901 = vadd.xlane.f32.xlu1 %v3900_v63 }
 0x8a0   :  { %5439 = vpow2.f32 %v3876_v16 }
 0x8a1   :  { %v6742_v23 = vpop.eup %5429  ;;  %v3882_v40 = vmul.f32 1.442695, %v3856_v26  ;;  %v3880_v24 = vmul.f32 1.442695, %v3855_v58 }
 0x8a2   :  { %v6744_v41 = vpop.eup %5431  ;;  %v3836_v54 = vpop.xlane.xlu1 %3835  ;;  %v3906_v61 = vsel %vm474_vm2, %v6742_v23, 0.0 }
 0x8a3   :  { %v3833_v1 = vpop.xlane.xlu0 %3832  ;;  %5441 = vpow2.f32 %v3882_v40  ;;  %v3858_v19 = vsub.f32 %v6701_v20, %v3836_v54  ;;  %3907 = vadd.xlane.f32.xlu1 %v3906_v61  ;;  %v3903_v21 = vsel %vm474_vm2, %v6744_v41, 0.0 }
 0x8a4   :  { %v3857_v9 = vsub.f32 %v6695_v10, %v3833_v1  ;;  %5443 = vpow2.f32 %v3880_v24  ;;  %3904 = vadd.xlane.f32.xlu0 %v3903_v21 }
 0x8a5   :  { %v6752_v57 = vpop.eup %5433  ;;  %v3886_v35 = vmul.f32 1.442695, %v3858_v19 }
 0x8a6   :  { %v3884_v51 = vmul.f32 1.442695, %v3857_v9  ;;  %v6754_v33 = vpop.eup %5435  ;;  %v3842_v37 = vpop.xlane.xlu1 %3841  ;;  %v3912_v16 = vsel %vm474_vm2, %v6752_v57, 0.0 }
 0x8a7   :  { %v3839_v44 = vpop.xlane.xlu0 %3838  ;;  %5445 = vpow2.f32 %v3886_v35  ;;  %v3860_v10 = vsub.f32 %v6709_v12, %v3842_v37  ;;  %3913 = vadd.xlane.f32.xlu1 %v3912_v16  ;;  %v3909_v15 = vsel %vm474_vm2, %v6754_v33, 0.0 }
 0x8a8   :  { %v3859_v20 = vsub.f32 %v6703_v7, %v3839_v44  ;;  %5447 = vpow2.f32 %v3884_v51  ;;  %3910 = vadd.xlane.f32.xlu0 %v3909_v15 }
 0x8a9   :  { %v6762_v30 = vpop.eup %5437  ;;  %v3890_v63 = vmul.f32 1.442695, %v3860_v10 }
 0x8aa   :  { %v3888_v26 = vmul.f32 1.442695, %v3859_v20  ;;  %v6764_v58 = vpop.eup %5439  ;;  %v3918_v24 = vsel %vm474_vm2, %v6762_v30, 0.0 }
 0x8ab   :  { %v3845_v40 = vpop.xlane.xlu0 %3844  ;;  %5449 = vpow2.f32 %v3890_v63  ;;  %3919 = vadd.xlane.f32.xlu1 %v3918_v24  ;;  %v3915_v7 = vsel %vm474_vm2, %v6764_v58, 0.0  ;;  %v4627_v63 = vpack.c.bf16 %v6307_v39, %v6307_v39  ;;  %v4628_v24 = vpack.c.bf16 %v6309_v48, %v6309_v48 }
 0x8ac   :  { %v3861_v12 = vsub.f32 %v6711_v46, %v3845_v40  ;;  %5451 = vpow2.f32 %v3888_v26  ;;  %3916 = vadd.xlane.f32.xlu0 %v3915_v7  ;;  %v4629_v26 = vpack.c.bf16 %v6311_v0, %v6311_v0  ;;  %v4630_v40 = vpack.c.bf16 %v6313_v43, %v6313_v43 }
 0x8ad   :  { %v6771_v54 = vpop.eup %5441  ;;  %v4631_v39 = vpack.c.bf16 %v6315_v32, %v6315_v32  ;;  %v4634_v0 = vpack.c.bf16 %v6321_v45, %v6321_v45  ;;  %v4633_v48 = vpack.c.bf16 %v6319_v29, %v6319_v29  ;;  %v4636_v43 = vpack.c.bf16 %v6325_v8, %v6325_v8 }
 0x8ae   :  { %v3892_v1 = vmul.f32 1.442695, %v3861_v12  ;;  %v6773_v61 = vpop.eup %5443  ;;  %v3924_v19 = vsel %vm474_vm2, %v6771_v54, 0.0  ;;  %v4632_v12 = vpack.c.bf16 %v6317_v22, %v6317_v22  ;;  %v4635_v32 = vpack.c.bf16 %v6323_v11, %v6323_v11 }
 0x8af   :  { %3925 = vadd.xlane.f32.xlu1 %v3924_v19  ;;  %v3921_v9 = vsel %vm474_vm2, %v6773_v61, 0.0  ;;  %v4638_v22 = vpack.c.bf16 %v6329_v55, %v6329_v55  ;;  %v4637_v29 = vpack.c.bf16 %v6327_v52, %v6327_v52  ;;  %v4640_v45 = vpack.c.bf16 %v6333_v50, %v6333_v50 }
 0x8b0   :  { %5453 = vpow2.f32 %v3892_v1  ;;  %3922 = vadd.xlane.f32.xlu0 %v3921_v9  ;;  %v4639_v11 = vpack.c.bf16 %v6331_v36, %v6331_v36  ;;  %v4642_v8 = vpack.c.bf16 %v6337_v27, %v6337_v27  ;;  %v4641_v52 = vpack.c.bf16 %v6335_v59, %v6335_v59 }
 0x8b1   :  { %v6779_v46 = vpop.eup %5445  ;;  %v4644_v55 = vpack.c.bf16 %v6625_v49, %v6625_v49  ;;  %v4643_v36 = vpack.c.bf16 %v6623_v3, %v6623_v3  ;;  %v4646_v50 = vpack.c.bf16 %v6629_v53, %v6629_v53  ;;  %v4645_v27 = vpack.c.bf16 %v6627_v14, %v6627_v14 }
 0x8b2   :  { %v6781_v21 = vpop.eup %5447  ;;  %v3930_v35 = vsel %vm474_vm2, %v6779_v46, 0.0  ;;  %v4648_v59 = vpack.c.bf16 %v6633_v6, %v6633_v6  ;;  %v4647_v49 = vpack.c.bf16 %v6631_v38, %v6631_v38  ;;  %v4650_v3 = vpack.c.bf16 %v6637_v17, %v6637_v17 }
 0x8b3   :  { %3931 = vadd.xlane.f32.xlu1 %v3930_v35  ;;  %v3927_v51 = vsel %vm474_vm2, %v6781_v21, 0.0  ;;  %v4649_v53 = vpack.c.bf16 %v6635_v62, %v6635_v62  ;;  %v4652_v14 = vpack.c.bf16 %v6641_v4, %v6641_v4  ;;  %v4651_v6 = vpack.c.bf16 %v6639_v47, %v6639_v47 }
 0x8b4   :  { %3928 = vadd.xlane.f32.xlu0 %v3927_v51  ;;  %v4654_v38 = vpack.c.bf16 %v6645_v13, %v6645_v13  ;;  %v4653_v17 = vpack.c.bf16 %v6643_v18, %v6643_v18  ;;  %v4656_v62 = vpack.c.bf16 %v6649_v5, %v6649_v5  ;;  %v4655_v4 = vpack.c.bf16 %v6647_v56, %v6647_v56 }
 0x8b5   :  { %v6787_v37 = vpop.eup %5449  ;;  %v4658_v47 = vpack.c.bf16 %v6653_v60, %v6653_v60  ;;  %v4657_v13 = vpack.c.bf16 %v6651_v28, %v6651_v28 }
 0x8b6   :  { %v6789_v44 = vpop.eup %5451  ;;  %v3936_v16 = vsel %vm474_vm2, %v6787_v37, 0.0 }
 0x8b7   :  { %3937 = vadd.xlane.f32.xlu1 %v3936_v16  ;;  %v3933_v10 = vsel %vm474_vm2, %v6789_v44, 0.0 }
 0x8b8   :  { %3934 = vadd.xlane.f32.xlu0 %v3933_v10 }
 0x8ba   :  { %v6795_v20 = vpop.eup %5453 }
 0x8bb   :  { %v3939_v15 = vsel %vm474_vm2, %v6795_v20, 0.0 }
 0x8bc   :  { %3940 = vadd.xlane.f32.xlu0 %v3939_v15 }
 0x8c8   :  { %2140 = vrot.lane.b32.xlu1 %v4627_v63, %s5496_s0 }
 0x8cc   :  { %2144 = vrot.lane.b32.xlu1 %v4629_v26, %s5496_s0  ;;  %v7145_v26 = vmov 0.0  }
 0x8d0   :  { %2146 = vrot.lane.b32.xlu1 %v4630_v40, %s5496_s0 }
 0x8d2   :  { %2142 = vrot.lane.b32.xlu0 %v4628_v24, %s5496_s0 }
 0x8d4   :  { %2150 = vrot.lane.b32.xlu1 %v4632_v12, %s5496_s0 }
 0x8d6   :  { %2148 = vrot.lane.b32.xlu0 %v4631_v39, %s5496_s0 }
 0x8d8   :  { %2154 = vrot.lane.b32.xlu1 %v4634_v0, %s5496_s0 }
 0x8da   :  { %2152 = vrot.lane.b32.xlu0 %v4633_v48, %s5496_s0 }
 0x8dc   :  { %2158 = vrot.lane.b32.xlu1 %v4636_v43, %s5496_s0 }
 0x8de   :  { %2156 = vrot.lane.b32.xlu0 %v4635_v32, %s5496_s0 }
 0x8e0   :  { %2162 = vrot.lane.b32.xlu1 %v4638_v22, %s5496_s0 }
 0x8e2   :  { %2160 = vrot.lane.b32.xlu0 %v4637_v29, %s5496_s0 }
 0x8e4   :  { %2166 = vrot.lane.b32.xlu1 %v4640_v45, %s5496_s0 }
 0x8e6   :  { %2164 = vrot.lane.b32.xlu0 %v4639_v11, %s5496_s0 }
 0x8e8   :  { %2170 = vrot.lane.b32.xlu1 %v4642_v8, %s5496_s0 }
 0x8ea   :  { %2168 = vrot.lane.b32.xlu0 %v4641_v52, %s5496_s0  ;;  %v7146_v52 = vld [vmem:[#allocation3_spill] sm:$0xff] }
 0x8ec   :  { %3295 = vrot.lane.b32.xlu1 %v4644_v55, %s5497_s22 }
 0x8ee   :  { %3293 = vrot.lane.b32.xlu0 %v4643_v36, %s5497_s22 }
 0x8f0   :  { %3299 = vrot.lane.b32.xlu1 %v4646_v50, %s5497_s22 }
 0x8f2   :  { %3297 = vrot.lane.b32.xlu0 %v4645_v27, %s5497_s22 }
 0x8f4   :  { %3303 = vrot.lane.b32.xlu1 %v4648_v59, %s5497_s22  ;;  %v7147_v59 = vld [vmem:[#allocation2_spill] sm:$0xff] }
 0x8f6   :  { %3301 = vrot.lane.b32.xlu0 %v4647_v49, %s5497_s22 }
 0x8f8   :  { %3307 = vrot.lane.b32.xlu1 %v4650_v3, %s5497_s22 }
 0x8fa   :  { %3305 = vrot.lane.b32.xlu0 %v4649_v53, %s5497_s22 }
 0x8fc   :  { %3311 = vrot.lane.b32.xlu1 %v4652_v14, %s5497_s22 }
 0x8fe   :  { %3309 = vrot.lane.b32.xlu0 %v4651_v6, %s5497_s22 }
 0x900   :  { %3315 = vrot.lane.b32.xlu1 %v4654_v38, %s5497_s22  ;;  %v7148_v38 = vld [vmem:[#allocation4_spill] sm:$0xff] }
 0x902   :  { %3313 = vrot.lane.b32.xlu0 %v4653_v17, %s5497_s22 }
 0x904   :  { %3319 = vrot.lane.b32.xlu1 %v4656_v62, %s5497_s22 }
 0x906   :  { %3317 = vrot.lane.b32.xlu0 %v4655_v4, %s5497_s22 }
 0x908   :  { %3323 = vrot.lane.b32.xlu1 %v4658_v47, %s5497_s22 }
 0x90a   :  { %3321 = vrot.lane.b32.xlu0 %v4657_v13, %s5497_s22 }
 0x928   :  { %v3896_v7 = vpop.xlane.xlu1 %3895 }
 0x929   :  { %5455 = vrcp.f32 %v3896_v7  ;;  %v7149_v7 = vld [vmem:[#allocation5_spill] sm:$0xff] }
 0x92a   :  { %v3899_v18 = vpop.xlane.xlu0 %3898 }
 0x92b   :  { %5457 = vrcp.f32 %v3899_v18 }
 0x92c   :  { %v3902_v1 = vpop.xlane.xlu1 %3901 }
 0x92d   :  { %5459 = vrcp.f32 %v3902_v1 }
 0x930   :  { %v3908_v5 = vpop.xlane.xlu1 %3907 }
 0x931   :  { %v3905_v19 = vpop.xlane.xlu0 %3904 }
 0x932   :  { %5461 = vrcp.f32 %v3905_v19 }
 0x933   :  { %v5456_v56 = vpop.eup %5455  ;;  %5463 = vrcp.f32 %v3908_v5 }
 0x934   :  { %v3914_v9 = vpop.xlane.xlu1 %3913  ;;  %v3943_v51 = vmul.f32 %v5456_v56, %v6726_v34 }
 0x935   :  { %v5458_v35 = vpop.eup %5457  ;;  %v3911_v60 = vpop.xlane.xlu0 %3910 }
 0x936   :  { %v3945_v28 = vmul.f32 %v5458_v35, %v6730_v31  ;;  %5465 = vrcp.f32 %v3911_v60 }
 0x937   :  { %5467 = vrcp.f32 %v3914_v9  ;;  %v5460_v63 = vpop.eup %5459 }
 0x938   :  { %v3920_v16 = vpop.xlane.xlu1 %3919  ;;  %v3974_v10 = vpack.c.bf16 %v3945_v28, %v3943_v51  ;;  %v3947_v34 = vmul.f32 %v5460_v63, %v6736_v42 }
 0x939   :  { %v3917_v15 = vpop.xlane.xlu0 %3916 }
 0x93a   :  { %5469 = vrcp.f32 %v3917_v15  ;;  %5142 = vmatmul.mubr.msk.bf16.vlgmr.msra.gmra.mrb[112].mxu0 %vm474_vm2, %v3974_v10 }
 0x93b   :  { %5152 = vmatpush3.bf16.msra.mxu0 %v6407_v2  ;;  %5153 = vmatprep.mubr.msk.bf16.mxu0 %vm5488_vm0, %v7145_v26  ;;  %5471 = vrcp.f32 %v3920_v16 }
 0x93c   :  { %v5462_v40 = vpop.eup %5461  ;;  %v3926_v24 = vpop.xlane.xlu1 %3925  ;;  %5163 = vmatprep.subr.bf16.mxu0 %v7145_v26 }
 0x93d   :  { %v3949_v31 = vmul.f32 %v5462_v40, %v6744_v41  ;;  %v3923_v12 = vpop.xlane.xlu0 %3922  ;;  %v5464_v39 = vpop.eup %5463 }
 0x93e   :  { %5473 = vrcp.f32 %v3923_v12  ;;  %v3951_v2 = vmul.f32 %v5464_v39, %v6742_v23 }
 0x93f   :  { %v3975_v0 = vpack.c.bf16 %v3949_v31, %v3947_v34  ;;  %5475 = vrcp.f32 %v3926_v24 }
 0x940   :  { %v5466_v48 = vpop.eup %5465  ;;  %v3932_v43 = vpop.xlane.xlu1 %3931 }
 0x941   :  { %v3953_v32 = vmul.f32 %v5466_v48, %v6754_v33  ;;  %5148 = vmatmul.mubr.msk.bf16.vlgmr.msra.gmra.mrb[112].mxu1 %vm474_vm2, %v3975_v0  ;;  %v3929_v22 = vpop.xlane.xlu0 %3928  ;;  %v5468_v29 = vpop.eup %5467 }
 0x942   :  { %5158 = vmatpush3.bf16.msra.mxu1 %v6409_v25  ;;  %5477 = vrcp.f32 %v3929_v22  ;;  %5159 = vmatprep.mubr.msk.bf16.mxu1 %vm5488_vm0, %v7145_v26  ;;  %v3955_v23 = vmul.f32 %v5468_v29, %v6752_v57 }
 0x943   :  { %v3976_v42 = vpack.c.bf16 %v3953_v32, %v3951_v2  ;;  %5169 = vmatprep.subr.bf16.mxu1 %v7145_v26  ;;  %5479 = vrcp.f32 %v3932_v43 }
 0x944   :  { %v5470_v41 = vpop.eup %5469  ;;  %v3938_v45 = vpop.xlane.xlu1 %3937 }
 0x945   :  { %v3957_v33 = vmul.f32 %v5470_v41, %v6764_v58  ;;  %5154 = vmatmul.mubr.msk.bf16.vlgmr.msra.gmra.mrb[116].mxu0 %vm474_vm2, %v3976_v42  ;;  %v3935_v11 = vpop.xlane.xlu0 %3934  ;;  %v5472_v8 = vpop.eup %5471 }
 0x946   :  { %5164 = vmatpush3.bf16.msra.mxu0 %v7146_v52  ;;  %5481 = vrcp.f32 %v3935_v11  ;;  %5165 = vmatprep.mubr.msk.bf16.mxu0 %vm5488_vm0, %v7145_v26  ;;  %v3959_v57 = vmul.f32 %v5472_v8, %v6762_v30 }
 0x947   :  { %v3977_v25 = vpack.c.bf16 %v3957_v33, %v3955_v23  ;;  %5175 = vmatprep.subr.bf16.mxu0 %v7145_v26  ;;  %5483 = vrcp.f32 %v3938_v45 }
 0x948   :  { %v5474_v55 = vpop.eup %5473  ;;  %v2141_v36 = vpop.permute.xlu1 %2140 }
 0x949   :  { %v3961_v58 = vmul.f32 %v5474_v55, %v6773_v61  ;;  %2189 = vst.msk [vmem:[%s7134_s1] sm:$0xf] %vm2188_vm4, %v2141_v36  ;;  %5160 = vmatmul.mubr.msk.bf16.vlgmr.msra.gmra.mrb[116].mxu1 %vm474_vm2, %v3977_v25  ;;  %v3941_v50 = vpop.xlane.xlu0 %3940  ;;  %v5476_v27 = vpop.eup %5475 }
 0x94a   :  { %5170 = vmatpush3.bf16.msra.mxu1 %v7147_v59  ;;  %5485 = vrcp.f32 %v3941_v50  ;;  %5171 = vmatprep.mubr.msk.bf16.mxu1 %vm5488_vm0, %v7145_v26  ;;  %v3963_v3 = vmul.f32 %v5476_v27, %v6771_v54 }
 0x94b   :  { %v3978_v49 = vpack.c.bf16 %v3961_v58, %v3959_v57  ;;  %5181 = vmatprep.subr.bf16.mxu1 %v7145_v26 }
 0x94c   :  { %v5478_v30 = vpop.eup %5477  ;;  %v2145_v61 = vpop.permute.xlu1 %2144 }
 0x94d   :  { %v3965_v53 = vmul.f32 %v5478_v30, %v6781_v21  ;;  %2191 = vst.msk [vmem:[%s7134_s1 + $0x8] sm:$0xf] %vm2188_vm4, %v2145_v61  ;;  %5166 = vmatmul.mubr.msk.bf16.vlgmr.msra.gmra.mrb[120].mxu0 %vm474_vm2, %v3978_v49  ;;  %v2143_v14 = vpop.permute.xlu0 %2142  ;;  %v5480_v6 = vpop.eup %5479 }
 0x94e   :  { %5176 = vmatpush3.bf16.msra.mxu0 %v7148_v38  ;;  %2190 = vst.msk [vmem:[%s7134_s1 + $0x4] sm:$0xf] %vm2188_vm4, %v2143_v14  ;;  %5177 = vmatprep.mubr.msk.bf16.mxu0 %vm5488_vm0, %v7145_v26  ;;  %v3967_v62 = vmul.f32 %v5480_v6, %v6779_v46 }
 0x94f   :  { %v3979_v54 = vpack.c.bf16 %v3965_v53, %v3963_v3 }
 0x950   :  { %v5482_v21 = vpop.eup %5481  ;;  %v2147_v17 = vpop.permute.xlu1 %2146 }
 0x951   :  { %v3969_v4 = vmul.f32 %v5482_v21, %v6789_v44  ;;  %2192 = vst.msk [vmem:[%s7134_s1 + $0xc] sm:$0xf] %vm2188_vm4, %v2147_v17  ;;  %5172 = vmatmul.mubr.msk.bf16.vlgmr.msra.gmra.mrb[120].mxu1 %vm474_vm2, %v3979_v54  ;;  %v2149_v47 = vpop.permute.xlu0 %2148  ;;  %v5484_v13 = vpop.eup %5483 }
 0x952   :  { %5182 = vmatpush3.bf16.msra.mxu1 %v7149_v7  ;;  %2193 = vst.msk [vmem:[%s7134_s1 + $0x10] sm:$0xf] %vm2188_vm4, %v2149_v47  ;;  %5183 = vmatprep.mubr.msk.bf16.mxu1 %vm5488_vm0, %v7145_v26  ;;  %v3971_v1 = vmul.f32 %v5484_v13, %v6787_v37 }
 0x953   :  { %v3980_v46 = vpack.c.bf16 %v3969_v4, %v3967_v62 }
 0x954   :  { %v5486_v44 = vpop.eup %5485  ;;  %v2151_v18 = vpop.permute.xlu1 %2150 }
 0x955   :  { %v3973_v5 = vmul.f32 %v5486_v44, %v6795_v20  ;;  %2194 = vst.msk [vmem:[%s7134_s1 + $0x14] sm:$0xf] %vm2188_vm4, %v2151_v18  ;;  %5178 = vmatmul.mubr.msk.bf16.vlgmr.msra.gmra.mrb[124].mxu0 %vm474_vm2, %v3980_v46  ;;  %v2153_v19 = vpop.permute.xlu0 %2152 }
 0x956   :  { %2195 = vst.msk [vmem:[%s7134_s1 + $0x18] sm:$0xf] %vm2188_vm4, %v2153_v19 }
 0x957   :  { %v3981_v56 = vpack.c.bf16 %v3973_v5, %v3971_v1 }
 0x958   :  { %v2155_v9 = vpop.permute.xlu1 %2154 }
 0x959   :  { %2196 = vst.msk [vmem:[%s7134_s1 + $0x1c] sm:$0xf] %vm2188_vm4, %v2155_v9  ;;  %5184 = vmatmul.mubr.msk.bf16.vlgmr.msra.gmra.mrb[124].mxu1 %vm474_vm2, %v3981_v56  ;;  %v2157_v37 = vpop.permute.xlu0 %2156 }
 0x95a   :  { %2197 = vst.msk [vmem:[%s7134_s1 + $0x20] sm:$0xf] %vm2188_vm4, %v2157_v37 }
 0x95c   :  { %v2159_v20 = vpop.permute.xlu1 %2158 }
 0x95d   :  { %2198 = vst.msk [vmem:[%s7134_s1 + $0x24] sm:$0xf] %vm2188_vm4, %v2159_v20  ;;  %v2161_v35 = vpop.permute.xlu0 %2160 }
 0x95e   :  { %2199 = vst.msk [vmem:[%s7134_s1 + $0x28] sm:$0xf] %vm2188_vm4, %v2161_v35 }
 0x960   :  { %v2163_v60 = vpop.permute.xlu1 %2162 }
 0x961   :  { %2200 = vst.msk [vmem:[%s7134_s1 + $0x2c] sm:$0xf] %vm2188_vm4, %v2163_v60  ;;  %v2165_v51 = vpop.permute.xlu0 %2164 }
 0x962   :  { %2201 = vst.msk [vmem:[%s7134_s1 + $0x30] sm:$0xf] %vm2188_vm4, %v2165_v51 }
 0x964   :  { %v2167_v28 = vpop.permute.xlu1 %2166 }
 0x965   :  { %2202 = vst.msk [vmem:[%s7134_s1 + $0x34] sm:$0xf] %vm2188_vm4, %v2167_v28  ;;  %v2169_v16 = vpop.permute.xlu0 %2168 }
 0x966   :  { %2203 = vst.msk [vmem:[%s7134_s1 + $0x38] sm:$0xf] %vm2188_vm4, %v2169_v16 }
 0x968   :  { %v2171_v10 = vpop.permute.xlu1 %2170 }
 0x969   :  { %2204 = vst.msk [vmem:[%s7134_s1 + $0x3c] sm:$0xf] %vm2188_vm4, %v2171_v10  ;;  %v3294_v15 = vpop.permute.xlu0 %3293 }
 0x96a   :  { %3342 = vst.msk [vmem:[%s7134_s1] sm:$0xf] %vm3341_vm5, %v3294_v15 }
 0x96c   :  { %v3296_v63 = vpop.permute.xlu1 %3295 }
 0x96d   :  { %3343 = vst.msk [vmem:[%s7134_s1 + $0x4] sm:$0xf] %vm3341_vm5, %v3296_v63  ;;  %v3298_v26 = vpop.permute.xlu0 %3297 }
 0x96e   :  { %3344 = vst.msk [vmem:[%s7134_s1 + $0x8] sm:$0xf] %vm3341_vm5, %v3298_v26 }
 0x970   :  { %v3300_v40 = vpop.permute.xlu1 %3299 }
 0x971   :  { %3345 = vst.msk [vmem:[%s7134_s1 + $0xc] sm:$0xf] %vm3341_vm5, %v3300_v40  ;;  %v3302_v24 = vpop.permute.xlu0 %3301 }
 0x972   :  { %3346 = vst.msk [vmem:[%s7134_s1 + $0x10] sm:$0xf] %vm3341_vm5, %v3302_v24 }
 0x974   :  { %v3304_v34 = vpop.permute.xlu1 %3303 }
 0x975   :  { %3347 = vst.msk [vmem:[%s7134_s1 + $0x14] sm:$0xf] %vm3341_vm5, %v3304_v34  ;;  %v3306_v31 = vpop.permute.xlu0 %3305 }
 0x976   :  { %3348 = vst.msk [vmem:[%s7134_s1 + $0x18] sm:$0xf] %vm3341_vm5, %v3306_v31 }
 0x978   :  { %v3308_v12 = vpop.permute.xlu1 %3307 }
 0x979   :  { %3349 = vst.msk [vmem:[%s7134_s1 + $0x1c] sm:$0xf] %vm3341_vm5, %v3308_v12  ;;  %v3310_v39 = vpop.permute.xlu0 %3309 }
 0x97a   :  { %3350 = vst.msk [vmem:[%s7134_s1 + $0x20] sm:$0xf] %vm3341_vm5, %v3310_v39 }
 0x97c   :  { %v3312_v0 = vpop.permute.xlu1 %3311 }
 0x97d   :  { %3351 = vst.msk [vmem:[%s7134_s1 + $0x24] sm:$0xf] %vm3341_vm5, %v3312_v0  ;;  %v3314_v48 = vpop.permute.xlu0 %3313 }
 0x97e   :  { %3352 = vst.msk [vmem:[%s7134_s1 + $0x28] sm:$0xf] %vm3341_vm5, %v3314_v48 }
 0x980   :  { %v3316_v43 = vpop.permute.xlu1 %3315 }
 0x981   :  { %3353 = vst.msk [vmem:[%s7134_s1 + $0x2c] sm:$0xf] %vm3341_vm5, %v3316_v43  ;;  %v3318_v2 = vpop.permute.xlu0 %3317 }
 0x982   :  { %3354 = vst.msk [vmem:[%s7134_s1 + $0x30] sm:$0xf] %vm3341_vm5, %v3318_v2 }
 0x984   :  { %v3320_v32 = vpop.permute.xlu1 %3319 }
 0x985   :  { %3355 = vst.msk [vmem:[%s7134_s1 + $0x34] sm:$0xf] %vm3341_vm5, %v3320_v32  ;;  %v3322_v22 = vpop.permute.xlu0 %3321 }
 0x986   :  { %3356 = vst.msk [vmem:[%s7134_s1 + $0x38] sm:$0xf] %vm3341_vm5, %v3322_v22 }
 0x988   :  { %v3324_v29 = vpop.permute.xlu1 %3323 }
 0x989   :  { %3357 = vst.msk [vmem:[%s7134_s1 + $0x3c] sm:$0xf] %vm3341_vm5, %v3324_v29 }
 0xa0d   :  { %v4019_v42 = vpop.f32.mrb[112].mxu0 }
 0xa0e   :  { %v4659_v41 = vpack.c.bf16 %v4019_v42, %v4019_v42  ;;  %v5143_v45 = vpop.f32.mrb[113].mxu0 }
 0xa0f   :  { %v4022_v23 = vpop.f32.mrb[114].mxu0 }
 0xa10   :  { %v4660_v33 = vpack.c.bf16 %v4022_v23, %v4022_v23  ;;  %4382 = vrot.lane.b32.xlu0 %v4659_v41, %s5498_s27  ;;  %v5144_v11 = vpop.f32.mrb[115].mxu0 }
 0xa12   :  { %4384 = vrot.lane.b32.xlu1 %v4660_v33, %s5498_s27 }
 0xa14   :  { %v4063_v8 = vpop.f32.mrb[112].mxu1 }
 0xa15   :  { %v4661_v52 = vpack.c.bf16 %v4063_v8, %v4063_v8  ;;  %v5149_v25 = vpop.f32.mrb[113].mxu1 }
 0xa16   :  { %v4066_v55 = vpop.f32.mrb[114].mxu1 }
 0xa17   :  { %v4662_v36 = vpack.c.bf16 %v4066_v55, %v4066_v55  ;;  %4386 = vrot.lane.b32.xlu0 %v4661_v52, %s5498_s27  ;;  %v5150_v57 = vpop.f32.mrb[115].mxu1 }
 0xa18   :  { %v4107_v58 = vpop.f32.mrb[116].mxu0 }
 0xa19   :  { %v4663_v50 = vpack.c.bf16 %v4107_v58, %v4107_v58  ;;  %4388 = vrot.lane.b32.xlu1 %v4662_v36, %s5498_s27  ;;  %v5155_v27 = vpop.f32.mrb[117].mxu0 }
 0xa1a   :  { %v4110_v59 = vpop.f32.mrb[118].mxu0 }
 0xa1b   :  { %v4664_v49 = vpack.c.bf16 %v4110_v59, %v4110_v59  ;;  %4390 = vrot.lane.b32.xlu0 %v4663_v50, %s5498_s27  ;;  %v5156_v30 = vpop.f32.mrb[119].mxu0 }
 0xa1c   :  { %v4151_v61 = vpop.f32.mrb[116].mxu1 }
 0xa1d   :  { %v4665_v3 = vpack.c.bf16 %v4151_v61, %v4151_v61  ;;  %4392 = vrot.lane.b32.xlu1 %v4664_v49, %s5498_s27  ;;  %v5161_v53 = vpop.f32.mrb[117].mxu1 }
 0xa1e   :  { %v4154_v14 = vpop.f32.mrb[118].mxu1 }
 0xa1f   :  { %v4666_v6 = vpack.c.bf16 %v4154_v14, %v4154_v14  ;;  %4394 = vrot.lane.b32.xlu0 %v4665_v3, %s5498_s27  ;;  %v5162_v38 = vpop.f32.mrb[119].mxu1 }
 0xa20   :  { %v4195_v54 = vpop.f32.mrb[120].mxu0 }
 0xa21   :  { %v4667_v21 = vpack.c.bf16 %v4195_v54, %v4195_v54  ;;  %4396 = vrot.lane.b32.xlu1 %v4666_v6, %s5498_s27  ;;  %v5167_v17 = vpop.f32.mrb[121].mxu0 }
 0xa22   :  { %v4198_v62 = vpop.f32.mrb[122].mxu0 }
 0xa23   :  { %v4668_v4 = vpack.c.bf16 %v4198_v62, %v4198_v62  ;;  %4398 = vrot.lane.b32.xlu0 %v4667_v21, %s5498_s27  ;;  %v5168_v47 = vpop.f32.mrb[123].mxu0 }
 0xa24   :  { %v4239_v13 = vpop.f32.mrb[120].mxu1 }
 0xa25   :  { %v4669_v7 = vpack.c.bf16 %v4239_v13, %v4239_v13  ;;  %4400 = vrot.lane.b32.xlu1 %v4668_v4, %s5498_s27  ;;  %v5173_v46 = vpop.f32.mrb[121].mxu1 }
 0xa26   :  { %v4242_v44 = vpop.f32.mrb[122].mxu1 }
 0xa27   :  { %v4670_v18 = vpack.c.bf16 %v4242_v44, %v4242_v44  ;;  %4402 = vrot.lane.b32.xlu0 %v4669_v7, %s5498_s27  ;;  %v5174_v1 = vpop.f32.mrb[123].mxu1 }
 0xa28   :  { %v4283_v5 = vpop.f32.mrb[124].mxu0 }
 0xa29   :  { %v4671_v19 = vpack.c.bf16 %v4283_v5, %v4283_v5  ;;  %4404 = vrot.lane.b32.xlu1 %v4670_v18, %s5498_s27  ;;  %v5179_v56 = vpop.f32.mrb[125].mxu0 }
 0xa2a   :  { %v4286_v9 = vpop.f32.mrb[126].mxu0 }
 0xa2b   :  { %v4672_v37 = vpack.c.bf16 %v4286_v9, %v4286_v9  ;;  %4406 = vrot.lane.b32.xlu0 %v4671_v19, %s5498_s27  ;;  %v5180_v20 = vpop.f32.mrb[127].mxu0 }
 0xa2c   :  { %v4327_v35 = vpop.f32.mrb[124].mxu1 }
 0xa2d   :  { %v4673_v60 = vpack.c.bf16 %v4327_v35, %v4327_v35  ;;  %4408 = vrot.lane.b32.xlu1 %v4672_v37, %s5498_s27  ;;  %v5185_v51 = vpop.f32.mrb[125].mxu1 }
 0xa2e   :  { %v4330_v28 = vpop.f32.mrb[126].mxu1 }
 0xa2f   :  { %v4674_v16 = vpack.c.bf16 %v4330_v28, %v4330_v28  ;;  %4410 = vrot.lane.b32.xlu0 %v4673_v60, %s5498_s27  ;;  %v5186_v10 = vpop.f32.mrb[127].mxu1 }
 0xa31   :  { %4412 = vrot.lane.b32.xlu1 %v4674_v16, %s5498_s27 }
 0xa82   :  { %v4383_v15 = vpop.permute.xlu0 %4382 }
 0xa83   :  { %4431 = vst.msk [vmem:[%s7134_s1] sm:$0xf] %vm4430_vm6, %v4383_v15 }
 0xa84   :  { %v4385_v63 = vpop.permute.xlu1 %4384 }
 0xa85   :  { %4432 = vst.msk [vmem:[%s7134_s1 + $0x4] sm:$0xf] %vm4430_vm6, %v4385_v63 }
 0xa89   :  { %v4387_v26 = vpop.permute.xlu0 %4386 }
 0xa8a   :  { %4433 = vst.msk [vmem:[%s7134_s1 + $0x8] sm:$0xf] %vm4430_vm6, %v4387_v26 }
 0xa8b   :  { %v4389_v40 = vpop.permute.xlu1 %4388 }
 0xa8c   :  { %4434 = vst.msk [vmem:[%s7134_s1 + $0xc] sm:$0xf] %vm4430_vm6, %v4389_v40 }
 0xa8d   :  { %v4391_v24 = vpop.permute.xlu0 %4390 }
 0xa8e   :  { %4435 = vst.msk [vmem:[%s7134_s1 + $0x10] sm:$0xf] %vm4430_vm6, %v4391_v24 }
 0xa8f   :  { %v4393_v34 = vpop.permute.xlu1 %4392 }
 0xa90   :  { %4436 = vst.msk [vmem:[%s7134_s1 + $0x14] sm:$0xf] %vm4430_vm6, %v4393_v34 }
 0xa91   :  { %v4395_v31 = vpop.permute.xlu0 %4394 }
 0xa92   :  { %4437 = vst.msk [vmem:[%s7134_s1 + $0x18] sm:$0xf] %vm4430_vm6, %v4395_v31 }
 0xa93   :  { %v4397_v12 = vpop.permute.xlu1 %4396 }
 0xa94   :  { %4438 = vst.msk [vmem:[%s7134_s1 + $0x1c] sm:$0xf] %vm4430_vm6, %v4397_v12 }
 0xa95   :  { %v4399_v39 = vpop.permute.xlu0 %4398 }
 0xa96   :  { %4439 = vst.msk [vmem:[%s7134_s1 + $0x20] sm:$0xf] %vm4430_vm6, %v4399_v39 }
 0xa97   :  { %v4401_v0 = vpop.permute.xlu1 %4400 }
 0xa98   :  { %4440 = vst.msk [vmem:[%s7134_s1 + $0x24] sm:$0xf] %vm4430_vm6, %v4401_v0 }
 0xa99   :  { %v4403_v48 = vpop.permute.xlu0 %4402 }
 0xa9a   :  { %4441 = vst.msk [vmem:[%s7134_s1 + $0x28] sm:$0xf] %vm4430_vm6, %v4403_v48 }
 0xa9b   :  { %v4405_v43 = vpop.permute.xlu1 %4404 }
 0xa9c   :  { %4442 = vst.msk [vmem:[%s7134_s1 + $0x2c] sm:$0xf] %vm4430_vm6, %v4405_v43 }
 0xa9d   :  { %v4407_v2 = vpop.permute.xlu0 %4406 }
 0xa9e   :  { %4443 = vst.msk [vmem:[%s7134_s1 + $0x30] sm:$0xf] %vm4430_vm6, %v4407_v2 }
 0xa9f   :  { %v4409_v32 = vpop.permute.xlu1 %4408 }
 0xaa0   :  { %4444 = vst.msk [vmem:[%s7134_s1 + $0x34] sm:$0xf] %vm4430_vm6, %v4409_v32 }
 0xaa1   :  { %v4411_v22 = vpop.permute.xlu0 %4410 }
 0xaa2   :  { %4445 = vst.msk [vmem:[%s7134_s1 + $0x38] sm:$0xf] %vm4430_vm6, %v4411_v22 }
 0xaa3   :  { %v4413_v29 = vpop.permute.xlu1 %4412 }
 0xaa4   :  { %4446 = vst.msk [vmem:[%s7134_s1 + $0x3c] sm:$0xf] %vm4430_vm6, %v4413_v29 }

// kernel: model_forward.35
= control target key start
LH: loop header
LB: loop body
LE: loop exit
PB: predicated region body
PF: predicated region fallthrough
CT: control target
= control target key end

     0   :  { %vm72_vm0 = vcmask 261120   ;;  %s1353_s0 = inlined_call_operand.vmem [shape: f32[128,32], index: 0, kind: input, shape index: {}]   ;;  %s1354_s1 = inlined_call_operand.vmem [shape: bf16[32,128], index: 1, kind: input, shape index: {}]   ;;  %s1355_s2 = inlined_call_operand.vmem [shape: f32[1,128], index: 2, kind: input, shape index: {}]   ;;  %s1356_s3 = inlined_call_operand.vmem [shape: bf16[128,32], index: 3, kind: input, shape index: {}]   ;;  %s1357_s4 = inlined_call_operand.vmem [shape: f32[1,32], index: 4, kind: input, shape index: {}]   ;;  %s1358_s5 = inlined_call_operand.vmem [shape: f32[1,32], index: 5, kind: input, shape index: {}]   ;;  %s1359_s6 = inlined_call_operand.hbm [shape: f32[128,32], index: 6, kind: output, shape index: {}]  }
   0x1   :  { %v784_v0 = vld [vmem:[%s1354_s1] sm:$0xff]   ;;  %v785_v1 = vld [vmem:[%s1354_s1 + $0x8] sm:$0xff]   ;;  %v973_v5 = vld [vmem:[%s1353_s0 + $0x10] sm:$0xff] }
   0x2   :  { %713 = vmatprep.subr.bf16.mxu0 %v784_v0  ;;  %v961_v2 = vld [vmem:[%s1353_s0] sm:$0xff]  ;;  %v966_v3 = vld [vmem:[%s1353_s0 + $0x8] sm:$0xff]  ;;  %v978_v6 = vld [vmem:[%s1353_s0 + $0x18] sm:$0xff] }
   0x3   :  { %714 = vmatpush3.bf16.msra.mxu0 %v784_v0  ;;  %v41_v4 = vpack.c.bf16 %v966_v3, %v961_v2  ;;  %v983_v7 = vld [vmem:[%s1353_s0 + $0x20] sm:$0xff]  ;;  %v988_v8 = vld [vmem:[%s1353_s0 + $0x28] sm:$0xff]  ;;  %v42_v9 = vpack.c.bf16 %v978_v6, %v973_v5  ;;  %v998_v11 = vld [vmem:[%s1353_s0 + $0x30] sm:$0xff] }
   0x4   :  { %715 = vmatprep.subr.bf16.mxu0 %v785_v1  ;;  %v43_v10 = vpack.c.bf16 %v988_v8, %v983_v7  ;;  %v1003_v12 = vld [vmem:[%s1353_s0 + $0x38] sm:$0xff]  ;;  %v1009_v13 = vld [vmem:[%s1353_s0 + $0x40] sm:$0xff]  ;;  %v1014_v14 = vld [vmem:[%s1353_s0 + $0x48] sm:$0xff] }
   0x5   :  { %717 = vmatprep.mubr.msk.bf16.mxu0 %vm72_vm0, %v41_v4 }
   0x7   :  { %716 = vmatpush3.bf16.msra.mxu0 %v785_v1 }
   0xa   :  { %718 = vmatmul.mubr.msk.bf16.vlgmr.msra.gmra.mrb[0].mxu0 %vm72_vm0, %v42_v9 }
   0xb   :  { %721 = vmatprep.mubr.msk.bf16.mxu0 %vm72_vm0, %v43_v10 }
   0xc   :  { %11 = vsyncpa [#allocation3], 0  ;;  %v44_v15 = vpack.c.bf16 %v1003_v12, %v998_v11  ;;  %v45_v16 = vpack.c.bf16 %v1014_v14, %v1009_v13  ;;  %v1026_v17 = vld [vmem:[%s1353_s0 + $0x50] sm:$0xff]  ;;  %v1031_v18 = vld [vmem:[%s1353_s0 + $0x58] sm:$0xff] }
   0xd   :  { %v1036_v19 = vld [vmem:[%s1353_s0 + $0x60] sm:$0xff]  ;;  %v1041_v20 = vld [vmem:[%s1353_s0 + $0x68] sm:$0xff]  ;;  %v46_v21 = vpack.c.bf16 %v1031_v18, %v1026_v17  ;;  %v1052_v23 = vld [vmem:[%s1353_s0 + $0x70] sm:$0xff] }
   0xe   :  { %v47_v22 = vpack.c.bf16 %v1041_v20, %v1036_v19  ;;  %v1057_v24 = vld [vmem:[%s1353_s0 + $0x78] sm:$0xff]  ;;  %v786_v26 = vld [vmem:[%s1356_s3] sm:$0xff]   ;;  %v787_v27 = vld [vmem:[%s1356_s3 + $0x8] sm:$0xff]  }
   0xf   :  { %v48_v25 = vpack.c.bf16 %v1057_v24, %v1052_v23  ;;  %733 = vmatprep.subr.bf16.mxu0 %v786_v26  ;;  %765 = vmatprep.subr.bf16.mxu1 %v786_v26  ;;  %v788_v28 = vld [vmem:[%s1356_s3 + $0x10] sm:$0xff]   ;;  %v789_v29 = vld [vmem:[%s1356_s3 + $0x18] sm:$0xff]   ;;  %v790_v30 = vld [vmem:[%s1356_s3 + $0x20] sm:$0xff]  }
  0x10   :  { %734 = vmatpush3.bf16.msra.mxu0 %v786_v26  ;;  %773 = vmatpush3.bf16.msra.mxu1 %v786_v26  ;;  %v791_v31 = vld [vmem:[%s1356_s3 + $0x28] sm:$0xff]   ;;  %v792_v32 = vld [vmem:[%s1356_s3 + $0x30] sm:$0xff]   ;;  %v793_v33 = vld [vmem:[%s1356_s3 + $0x38] sm:$0xff]  }
  0x11   :  { %735 = vmatprep.subr.bf16.mxu0 %v787_v27  ;;  %766 = vmatprep.subr.bf16.mxu1 %v787_v27  ;;  %v1089_v34 = vld [vmem:[%s1355_s2] ss:$0 sm:$0xff] }
  0x12   :  { %722 = vmatmul.mubr.msk.bf16.gmra.mrb[4].mxu0 %vm72_vm0, %v44_v15 }
  0x13   :  { %725 = vmatprep.mubr.msk.bf16.mxu0 %vm72_vm0, %v45_v16 }
  0x14   :  { %736 = vmatpush3.bf16.msra.mxu0 %v787_v27  ;;  %774 = vmatpush3.bf16.msra.mxu1 %v787_v27 }
  0x15   :  { %737 = vmatprep.subr.bf16.mxu0 %v788_v28  ;;  %767 = vmatprep.subr.bf16.mxu1 %v788_v28 }
  0x18   :  { %738 = vmatpush3.bf16.msra.mxu0 %v788_v28  ;;  %775 = vmatpush3.bf16.msra.mxu1 %v788_v28 }
  0x19   :  { %739 = vmatprep.subr.bf16.mxu0 %v789_v29  ;;  %768 = vmatprep.subr.bf16.mxu1 %v789_v29 }
  0x1a   :  { %726 = vmatmul.mubr.msk.bf16.gmra.mrb[8].mxu0 %vm72_vm0, %v46_v21 }
  0x1b   :  { %729 = vmatprep.mubr.msk.bf16.mxu0 %vm72_vm0, %v47_v22 }
  0x1c   :  { %740 = vmatpush3.bf16.msra.mxu0 %v789_v29  ;;  %776 = vmatpush3.bf16.msra.mxu1 %v789_v29 }
  0x1d   :  { %741 = vmatprep.subr.bf16.mxu0 %v790_v30  ;;  %769 = vmatprep.subr.bf16.mxu1 %v790_v30 }
  0x20   :  { %742 = vmatpush3.bf16.msra.mxu0 %v790_v30  ;;  %777 = vmatpush3.bf16.msra.mxu1 %v790_v30 }
  0x21   :  { %743 = vmatprep.subr.bf16.mxu0 %v791_v31  ;;  %770 = vmatprep.subr.bf16.mxu1 %v791_v31 }
  0x22   :  { %730 = vmatmul.mubr.msk.bf16.gmra.mrb[12].mxu0 %vm72_vm0, %v48_v25 }
  0x24   :  { %744 = vmatpush3.bf16.msra.mxu0 %v791_v31  ;;  %778 = vmatpush3.bf16.msra.mxu1 %v791_v31 }
  0x25   :  { %745 = vmatprep.subr.bf16.mxu0 %v792_v32  ;;  %771 = vmatprep.subr.bf16.mxu1 %v792_v32 }
  0x28   :  { %746 = vmatpush3.bf16.msra.mxu0 %v792_v32  ;;  %779 = vmatpush3.bf16.msra.mxu1 %v792_v32 }
  0x29   :  { %747 = vmatprep.subr.bf16.mxu0 %v793_v33  ;;  %772 = vmatprep.subr.bf16.mxu1 %v793_v33 }
  0x2c   :  { %748 = vmatpush3.bf16.msra.mxu0 %v793_v33  ;;  %780 = vmatpush3.bf16.msra.mxu1 %v793_v33 }
  0xdd   :  { %v719_v35 = vpop.f32.mrb[0].mxu0 }
  0xde   :  { %v1092_v36 = vadd.f32 %v719_v35, %v1089_v34  ;;  %v131_v37 = vpop.f32.mrb[1].mxu0 }
  0xdf   :  { %v1095_v38 = vadd.f32 %v1089_v34, %v131_v37  ;;  %v720_v39 = vpop.f32.mrb[2].mxu0 }
  0xe0   :  { %v196_v40 = vsub.f32 0.0, %v1092_v36  ;;  %v1099_v41 = vadd.f32 %v720_v39, %v1089_v34  ;;  %v134_v42 = vpop.f32.mrb[3].mxu0 }
  0xe1   :  { %v194_v43 = vsub.f32 0.0, %v1095_v38  ;;  %v1103_v44 = vadd.f32 %v1089_v34, %v134_v42 }
  0xe2   :  { %v214_v45 = vmul.f32 1.442695, %v196_v40  ;;  %v197_v46 = vsub.f32 0.0, %v1099_v41 }
  0xe3   :  { %v210_v47 = vmul.f32 1.442695, %v194_v43  ;;  %v195_v48 = vsub.f32 0.0, %v1103_v44 }
  0xe4   :  { %794 = vpow2.f32 %v214_v45  ;;  %v216_v49 = vmul.f32 1.442695, %v197_v46 }
  0xe5   :  { %796 = vpow2.f32 %v210_v47  ;;  %v212_v50 = vmul.f32 1.442695, %v195_v48  ;;  %v723_v51 = vpop.f32.mrb[4].mxu0 }
  0xe6   :  { %798 = vpow2.f32 %v216_v49  ;;  %v1108_v52 = vadd.f32 %v723_v51, %v1089_v34  ;;  %v147_v53 = vpop.f32.mrb[5].mxu0 }
  0xe7   :  { %800 = vpow2.f32 %v212_v50  ;;  %v1111_v54 = vadd.f32 %v1089_v34, %v147_v53  ;;  %v724_v55 = vpop.f32.mrb[6].mxu0 }
  0xe8   :  { %v200_v56 = vsub.f32 0.0, %v1108_v52  ;;  %v1115_v57 = vadd.f32 %v724_v55, %v1089_v34  ;;  %v150_v58 = vpop.f32.mrb[7].mxu0 }
  0xe9   :  { %v198_v59 = vsub.f32 0.0, %v1111_v54  ;;  %v1119_v60 = vadd.f32 %v1089_v34, %v150_v58 }
  0xea   :  { %v222_v61 = vmul.f32 1.442695, %v200_v56  ;;  %v201_v62 = vsub.f32 0.0, %v1115_v57 }
  0xeb   :  { %v218_v63 = vmul.f32 1.442695, %v198_v59  ;;  %v199_v0 = vsub.f32 0.0, %v1119_v60 }
  0xec   :  { %802 = vpow2.f32 %v222_v61  ;;  %v224_v1 = vmul.f32 1.442695, %v201_v62 }
  0xed   :  { %804 = vpow2.f32 %v218_v63  ;;  %v220_v4 = vmul.f32 1.442695, %v199_v0  ;;  %v727_v9 = vpop.f32.mrb[8].mxu0 }
  0xee   :  { %v795_v10 = vpop.eup %794  ;;  %806 = vpow2.f32 %v224_v1  ;;  %v1124_v15 = vadd.f32 %v727_v9, %v1089_v34  ;;  %v163_v16 = vpop.f32.mrb[9].mxu0 }
  0xef   :  { %v797_v21 = vpop.eup %796  ;;  %v244_v22 = vadd.f32 1.0, %v795_v10  ;;  %808 = vpow2.f32 %v220_v4  ;;  %v1127_v25 = vadd.f32 %v1089_v34, %v163_v16  ;;  %v728_v26 = vpop.f32.mrb[10].mxu0 }
  0xf0   :  { %v799_v27 = vpop.eup %798  ;;  %v242_v28 = vadd.f32 1.0, %v797_v21  ;;  %v204_v29 = vsub.f32 0.0, %v1124_v15  ;;  %v1131_v30 = vadd.f32 %v728_v26, %v1089_v34  ;;  %v166_v31 = vpop.f32.mrb[11].mxu0 }
  0xf1   :  { %v801_v32 = vpop.eup %800  ;;  %810 = vrcp.f32 %v244_v22  ;;  %v245_v33 = vadd.f32 1.0, %v799_v27  ;;  %v202_v35 = vsub.f32 0.0, %v1127_v25  ;;  %v1135_v37 = vadd.f32 %v1089_v34, %v166_v31 }
  0xf2   :  { %812 = vrcp.f32 %v242_v28  ;;  %v243_v39 = vadd.f32 1.0, %v801_v32  ;;  %v230_v40 = vmul.f32 1.442695, %v204_v29  ;;  %v205_v42 = vsub.f32 0.0, %v1131_v30 }
  0xf3   :  { %814 = vrcp.f32 %v245_v33  ;;  %v226_v43 = vmul.f32 1.442695, %v202_v35  ;;  %v203_v45 = vsub.f32 0.0, %v1135_v37 }
  0xf4   :  { %816 = vrcp.f32 %v243_v39  ;;  %v232_v46 = vmul.f32 1.442695, %v205_v42 }
  0xf5   :  { %818 = vpow2.f32 %v230_v40  ;;  %v228_v47 = vmul.f32 1.442695, %v203_v45  ;;  %v731_v48 = vpop.f32.mrb[12].mxu0 }
  0xf6   :  { %v803_v49 = vpop.eup %802  ;;  %820 = vpow2.f32 %v226_v43  ;;  %v1140_v50 = vadd.f32 %v731_v48, %v1089_v34  ;;  %v179_v51 = vpop.f32.mrb[13].mxu0 }
  0xf7   :  { %v805_v53 = vpop.eup %804  ;;  %v248_v55 = vadd.f32 1.0, %v803_v49  ;;  %822 = vpow2.f32 %v232_v46  ;;  %v1143_v56 = vadd.f32 %v1089_v34, %v179_v51  ;;  %v732_v58 = vpop.f32.mrb[14].mxu0 }
  0xf8   :  { %v807_v59 = vpop.eup %806  ;;  %v246_v61 = vadd.f32 1.0, %v805_v53  ;;  %824 = vpow2.f32 %v228_v47  ;;  %v208_v62 = vsub.f32 0.0, %v1140_v50  ;;  %v1147_v63 = vadd.f32 %v732_v58, %v1089_v34  ;;  %v182_v0 = vpop.f32.mrb[15].mxu0 }
  0xf9   :  { %v809_v1 = vpop.eup %808  ;;  %826 = vrcp.f32 %v248_v55  ;;  %v249_v4 = vadd.f32 1.0, %v807_v59  ;;  %v206_v9 = vsub.f32 0.0, %v1143_v56  ;;  %v1151_v10 = vadd.f32 %v1089_v34, %v182_v0 }
  0xfa   :  { %828 = vrcp.f32 %v246_v61  ;;  %v247_v16 = vadd.f32 1.0, %v809_v1  ;;  %v238_v21 = vmul.f32 1.442695, %v208_v62  ;;  %v209_v22 = vsub.f32 0.0, %v1147_v63 }
  0xfb   :  { %v811_v26 = vpop.eup %810  ;;  %830 = vrcp.f32 %v249_v4  ;;  %v234_v27 = vmul.f32 1.442695, %v206_v9  ;;  %v207_v28 = vsub.f32 0.0, %v1151_v10 }
  0xfc   :  { %v813_v29 = vpop.eup %812  ;;  %832 = vrcp.f32 %v247_v16  ;;  %v240_v31 = vmul.f32 1.442695, %v209_v22  ;;  %v263_v34 = vmul.f32 %v811_v26, %v1092_v36 }
  0xfd   :  { %v815_v32 = vpop.eup %814  ;;  %834 = vpow2.f32 %v238_v21  ;;  %v236_v33 = vmul.f32 1.442695, %v207_v28  ;;  %v259_v42 = vmul.f32 %v813_v29, %v1095_v38 }
  0xfe   :  { %v817_v35 = vpop.eup %816  ;;  %v265_v39 = vmul.f32 %v815_v32, %v1099_v41  ;;  %836 = vpow2.f32 %v234_v27 }
  0xff   :  { %v819_v40 = vpop.eup %818  ;;  %v261_v43 = vmul.f32 %v817_v35, %v1103_v44  ;;  %838 = vpow2.f32 %v240_v31 }
 0x100   :  { %v821_v45 = vpop.eup %820  ;;  %v291_v46 = vpack.c.bf16 %v265_v39, %v263_v34  ;;  %v252_v47 = vadd.f32 1.0, %v819_v40  ;;  %840 = vpow2.f32 %v236_v33 }
 0x101   :  { %v823_v48 = vpop.eup %822  ;;  %v250_v49 = vadd.f32 1.0, %v821_v45  ;;  %v290_v51 = vpack.c.bf16 %v261_v43, %v259_v42 }
 0x102   :  { %v825_v53 = vpop.eup %824  ;;  %842 = vrcp.f32 %v252_v47  ;;  %v253_v55 = vadd.f32 1.0, %v823_v48 }
 0x103   :  { %v827_v36 = vpop.eup %826  ;;  %844 = vrcp.f32 %v250_v49  ;;  %v251_v41 = vadd.f32 1.0, %v825_v53  ;;  %749 = vmatprep.mubr.bf16.mxu0 %v290_v51 }
 0x104   :  { %v829_v58 = vpop.eup %828  ;;  %846 = vrcp.f32 %v253_v55  ;;  %750 = vmatmul.mubr.bf16.vlgmr.msra.gmra.mrb[16].mxu0 %v291_v46  ;;  %v271_v59 = vmul.f32 %v827_v36, %v1108_v52 }
 0x105   :  { %v831_v38 = vpop.eup %830  ;;  %848 = vrcp.f32 %v251_v41  ;;  %v267_v0 = vmul.f32 %v829_v58, %v1111_v54 }
 0x106   :  { %v833_v44 = vpop.eup %832  ;;  %v273_v61 = vmul.f32 %v831_v38, %v1115_v57 }
 0x107   :  { %v835_v62 = vpop.eup %834  ;;  %v269_v1 = vmul.f32 %v833_v44, %v1119_v60 }
 0x108   :  { %v837_v4 = vpop.eup %836  ;;  %v256_v9 = vadd.f32 1.0, %v835_v62  ;;  %v293_v16 = vpack.c.bf16 %v273_v61, %v271_v59 }
 0x109   :  { %v839_v21 = vpop.eup %838  ;;  %v254_v22 = vadd.f32 1.0, %v837_v4  ;;  %v292_v26 = vpack.c.bf16 %v269_v1, %v267_v0 }
 0x10a   :  { %v841_v27 = vpop.eup %840  ;;  %850 = vrcp.f32 %v256_v9  ;;  %v257_v28 = vadd.f32 1.0, %v839_v21 }
 0x10b   :  { %852 = vrcp.f32 %v254_v22  ;;  %v255_v29 = vadd.f32 1.0, %v841_v27  ;;  %753 = vmatprep.mubr.bf16.mxu1 %v292_v26 }
 0x10c   :  { %v843_v52 = vpop.eup %842  ;;  %854 = vrcp.f32 %v257_v28  ;;  %754 = vmatmul.mubr.bf16.vlgmr.msra.gmra.mrb[0].mxu1 %v293_v16 }
 0x10d   :  { %v845_v57 = vpop.eup %844  ;;  %856 = vrcp.f32 %v255_v29  ;;  %v279_v60 = vmul.f32 %v843_v52, %v1124_v15 }
 0x10e   :  { %v847_v54 = vpop.eup %846  ;;  %v275_v33 = vmul.f32 %v845_v57, %v1127_v25 }
 0x10f   :  { %v849_v31 = vpop.eup %848  ;;  %v281_v32 = vmul.f32 %v847_v54, %v1131_v30 }
 0x110   :  { %v277_v35 = vmul.f32 %v849_v31, %v1135_v37  ;;  %v1174_v37 = vld [vmem:[%s1357_s4] ss:$0 sm:$0xff] }
 0x111   :  { %v295_v34 = vpack.c.bf16 %v281_v32, %v279_v60 }
 0x112   :  { %v294_v39 = vpack.c.bf16 %v277_v35, %v275_v33 }
 0x114   :  { %v851_v40 = vpop.eup %850  ;;  %757 = vmatprep.mubr.bf16.mxu1 %v294_v39 }
 0x115   :  { %v853_v42 = vpop.eup %852  ;;  %758 = vmatmul.mubr.bf16.gmra.mrb[4].mxu1 %v295_v34  ;;  %v287_v46 = vmul.f32 %v851_v40, %v1140_v50 }
 0x116   :  { %v855_v43 = vpop.eup %854  ;;  %v283_v15 = vmul.f32 %v853_v42, %v1143_v56 }
 0x117   :  { %v857_v45 = vpop.eup %856  ;;  %v289_v47 = vmul.f32 %v855_v43, %v1147_v63 }
 0x118   :  { %v285_v30 = vmul.f32 %v857_v45, %v1151_v10 }
 0x119   :  { %v297_v48 = vpack.c.bf16 %v289_v47, %v287_v46 }
 0x11a   :  { %v296_v25 = vpack.c.bf16 %v285_v30, %v283_v15 }
 0x11c   :  { %761 = vmatprep.mubr.bf16.mxu1 %v296_v25 }
 0x11d   :  { %762 = vmatmul.mubr.bf16.gmra.mrb[8].mxu1 %v297_v48 }
 0x1d7   :  { %v751_v49 = vpop.f32.mrb[16].mxu0 }
 0x1d8   :  { %v412_v51 = vadd.f32 %v751_v49, %v1174_v37  ;;  %v403_v53 = vpop.f32.mrb[17].mxu0 }
 0x1d9   :  { %v404_v50 = vadd.f32 %v1174_v37, %v403_v53  ;;  %v752_v63 = vpop.f32.mrb[18].mxu0 }
 0x1da   :  { %v1179_v56 = vadd.f32 %v412_v51, %v973_v5  ;;  %v415_v10 = vadd.f32 %v752_v63, %v1174_v37  ;;  %v406_v55 = vpop.f32.mrb[19].mxu0 }
 0x1db   :  { %v1183_v36 = vadd.f32 %v404_v50, %v961_v2  ;;  %v407_v41 = vadd.f32 %v1174_v37, %v406_v55 }
 0x1dc   :  { %v1187_v58 = vadd.f32 %v415_v10, %v978_v6  ;;  %v484_v38 = vmul.f32 %v1179_v56, %v1179_v56 }
 0x1dd   :  { %v1192_v44 = vadd.f32 %v407_v41, %v966_v3  ;;  %v482_v5 = vmul.f32 %v1183_v36, %v1183_v36 }
 0x1de   :  { %v504_v59 = vsel %vm72_vm0, %v484_v38, 0.0  ;;  %v485_v2 = vmul.f32 %v1187_v58, %v1187_v58 }
 0x1df   :  { %v755_v61 = vpop.f32.mrb[0].mxu1  ;;  %505 = vadd.xlane.f32.xlu1 %v504_v59  ;;  %v498_v62 = vsel %vm72_vm0, %v482_v5, 0.0  ;;  %v483_v6 = vmul.f32 %v1192_v44, %v1192_v44 }
 0x1e0   :  { %v428_v0 = vadd.f32 %v755_v61, %v1174_v37  ;;  %v419_v1 = vpop.f32.mrb[1].mxu1  ;;  %499 = vadd.xlane.f32.xlu0 %v498_v62  ;;  %v507_v22 = vsel %vm72_vm0, %v485_v2, 0.0 }
 0x1e1   :  { %v420_v3 = vadd.f32 %v1174_v37, %v419_v1  ;;  %v756_v4 = vpop.f32.mrb[2].mxu1  ;;  %v501_v28 = vsel %vm72_vm0, %v483_v6, 0.0 }
 0x1e2   :  { %v1205_v9 = vadd.f32 %v428_v0, %v998_v11  ;;  %v431_v16 = vadd.f32 %v756_v4, %v1174_v37  ;;  %v422_v21 = vpop.f32.mrb[3].mxu1 }
 0x1e3   :  { %v1210_v26 = vadd.f32 %v420_v3, %v983_v7  ;;  %v423_v27 = vadd.f32 %v1174_v37, %v422_v21  ;;  %508 = vadd.xlane.f32.xlu1 %v507_v22 }
 0x1e4   :  { %v1215_v29 = vadd.f32 %v431_v16, %v1003_v12  ;;  %502 = vadd.xlane.f32.xlu0 %v501_v28  ;;  %v488_v11 = vmul.f32 %v1205_v9, %v1205_v9 }
 0x1e5   :  { %v1220_v52 = vadd.f32 %v423_v27, %v988_v8  ;;  %v486_v54 = vmul.f32 %v1210_v26, %v1210_v26 }
 0x1e6   :  { %v516_v57 = vsel %vm72_vm0, %v488_v11, 0.0  ;;  %v489_v7 = vmul.f32 %v1215_v29, %v1215_v29 }
 0x1e7   :  { %v487_v60 = vmul.f32 %v1220_v52, %v1220_v52  ;;  %v510_v42 = vsel %vm72_vm0, %v486_v54, 0.0 }
 0x1e8   :  { %v759_v31 = vpop.f32.mrb[4].mxu1  ;;  %517 = vadd.xlane.f32.xlu0 %v516_v57  ;;  %v519_v12 = vsel %vm72_vm0, %v489_v7, 0.0 }
 0x1e9   :  { %v444_v32 = vadd.f32 %v759_v31, %v1174_v37  ;;  %v435_v33 = vpop.f32.mrb[5].mxu1  ;;  %520 = vadd.xlane.f32.xlu1 %v519_v12  ;;  %v513_v46 = vsel %vm72_vm0, %v487_v60, 0.0 }
 0x1ea   :  { %v436_v8 = vadd.f32 %v1174_v37, %v435_v33  ;;  %v760_v35 = vpop.f32.mrb[6].mxu1 }
 0x1eb   :  { %v1233_v34 = vadd.f32 %v444_v32, %v1026_v17  ;;  %v447_v39 = vadd.f32 %v760_v35, %v1174_v37  ;;  %v438_v40 = vpop.f32.mrb[7].mxu1 }
 0x1ec   :  { %v1238_v43 = vadd.f32 %v436_v8, %v1009_v13  ;;  %v439_v45 = vadd.f32 %v1174_v37, %v438_v40  ;;  %511 = vadd.xlane.f32.xlu0 %v510_v42 }
 0x1ed   :  { %v1243_v47 = vadd.f32 %v447_v39, %v1031_v18  ;;  %514 = vadd.xlane.f32.xlu1 %v513_v46  ;;  %v492_v17 = vmul.f32 %v1233_v34, %v1233_v34 }
 0x1ee   :  { %v1248_v15 = vadd.f32 %v439_v45, %v1014_v14  ;;  %v490_v48 = vmul.f32 %v1238_v43, %v1238_v43  ;;  %v1291_v45 = vld [vmem:[%s1358_s5] ss:$0 sm:$0xff]  ;;  %s914_s5 = smov [#allocation2]  }
 0x1ef   :  { %v528_v30 = vsel %vm72_vm0, %v492_v17, 0.0  ;;  %v493_v13 = vmul.f32 %v1243_v47, %v1243_v47  ;;  %s655_s25 = sshll.u32 %s914_s5, 4  ;;  %s656_s25 = int_to_ptr.vmem [resolvable:$true] %s655_s25 }
 0x1f0   :  { %v763_v25 = vpop.f32.mrb[8].mxu1  ;;  %529 = vadd.xlane.f32.xlu0 %v528_v30  ;;  %v491_v53 = vmul.f32 %v1248_v15, %v1248_v15  ;;  %v522_v55 = vsel %vm72_vm0, %v490_v48, 0.0  ;;  %s890_s26 = scalar_lea.vmem %s656_s25, 2048  ;;  %p895_p1 = scmp.lt.s32.totalorder %s656_s25, %s656_s25 }
 0x1f1   :  { %v460_v18 = vadd.f32 %v763_v25, %v1174_v37  ;;  %v451_v49 = vpop.f32.mrb[9].mxu1  ;;  %v531_v51 = vsel %vm72_vm0, %v493_v13, 0.0  ;;  %p891_p0 = scmp.ne.s32.totalorder %s656_s25, %s890_s26  ;;  %p896_p2 = scmp.lt.s32.totalorder %s890_s26, %s890_s26 }
 0x1f2   :  { %v452_v14 = vadd.f32 %v1174_v37, %v451_v49  ;;  %v764_v50 = vpop.f32.mrb[10].mxu1  ;;  %532 = vadd.xlane.f32.xlu1 %v531_v51  ;;  %v525_v59 = vsel %vm72_vm0, %v491_v53, 0.0 }
 0x1f3   :  { %v463_v63 = vadd.f32 %v764_v50, %v1174_v37  ;;  %v454_v10 = vpop.f32.mrb[11].mxu1  ;;  %v1263_v41 = vadd.f32 %v460_v18, %v1052_v23  ;;  %p897_p3 = por %p896_p2, %p895_p1 }
 0x1f4   :  { %v1266_v38 = vadd.f32 %v452_v14, %v1036_v19  ;;  %v455_v5 = vadd.f32 %v1174_v37, %v454_v10  ;;  %523 = vadd.xlane.f32.xlu0 %v522_v55 }
 0x1f5   :  { %v1271_v2 = vadd.f32 %v463_v63, %v1057_v24  ;;  %v496_v37 = vmul.f32 %v1263_v41, %v1263_v41  ;;  %p898_p4 = pnand %p897_p3, %p891_p0 }
 0x1f6   :  { %v1274_v61 = vadd.f32 %v455_v5, %v1041_v20  ;;  %526 = vadd.xlane.f32.xlu1 %v525_v59  ;;  %v494_v62 = vmul.f32 %v1266_v38, %v1266_v38 }
 0x1f7   :  { %v497_v24 = vmul.f32 %v1271_v2, %v1271_v2  ;;  %v540_v20 = vsel %vm72_vm0, %v496_v37, 0.0 }
 0x1f8   :  { %v534_v23 = vsel %vm72_vm0, %v494_v62, 0.0  ;;  %v495_v19 = vmul.f32 %v1274_v61, %v1274_v61 }
 0x1f9   :  { %535 = vadd.xlane.f32.xlu0 %v534_v23  ;;  %v543_v0 = vsel %vm72_vm0, %v497_v24, 0.0 }
 0x1fa   :  { %v537_v6 = vsel %vm72_vm0, %v495_v19, 0.0 }
 0x1fb   :  { %538 = vadd.xlane.f32.xlu1 %v537_v6 }
 0x1fd   :  { %541 = vadd.xlane.f32.xlu0 %v540_v20 }
 0x1ff   :  { %544 = vadd.xlane.f32.xlu1 %v543_v0 }
 0x26c   :  { %v506_v1 = vpop.xlane.xlu1 %505 }
 0x26d   :  { %v549_v3 = vmul.f32 0.03125, %v506_v1  ;;  %v500_v4 = vpop.xlane.xlu0 %499 }
 0x26e   :  { %v547_v16 = vmul.f32 0.03125, %v500_v4 }
 0x26f   :  { %v565_v21 = vadd.f32 1e-06, %v549_v3 }
 0x270   :  { %v563_v22 = vadd.f32 1e-06, %v547_v16  ;;  %v509_v27 = vpop.xlane.xlu1 %508 }
 0x271   :  { %858 = vrsqrt.f32 %v565_v21  ;;  %v550_v28 = vmul.f32 0.03125, %v509_v27  ;;  %v503_v11 = vpop.xlane.xlu0 %502 }
 0x272   :  { %860 = vrsqrt.f32 %v563_v22  ;;  %v548_v57 = vmul.f32 0.03125, %v503_v11 }
 0x273   :  { %v566_v7 = vadd.f32 1e-06, %v550_v28 }
 0x274   :  { %v564_v54 = vadd.f32 1e-06, %v548_v57 }
 0x275   :  { %862 = vrsqrt.f32 %v566_v7  ;;  %v518_v31 = vpop.xlane.xlu0 %517 }
 0x276   :  { %864 = vrsqrt.f32 %v564_v54  ;;  %v553_v12 = vmul.f32 0.03125, %v518_v31  ;;  %v521_v60 = vpop.xlane.xlu1 %520 }
 0x277   :  { %v554_v32 = vmul.f32 0.03125, %v521_v60 }
 0x278   :  { %v569_v33 = vadd.f32 1e-06, %v553_v12 }
 0x279   :  { %v570_v8 = vadd.f32 1e-06, %v554_v32  ;;  %v512_v35 = vpop.xlane.xlu0 %511 }
 0x27a   :  { %866 = vrsqrt.f32 %v569_v33  ;;  %v551_v39 = vmul.f32 0.03125, %v512_v35  ;;  %v515_v40 = vpop.xlane.xlu1 %514 }
 0x27b   :  { %v859_v42 = vpop.eup %858  ;;  %868 = vrsqrt.f32 %v570_v8  ;;  %v552_v46 = vmul.f32 0.03125, %v515_v40 }
 0x27c   :  { %v861_v17 = vpop.eup %860  ;;  %v597_v30 = vmul.f32 %v859_v42, %v1179_v56  ;;  %v567_v13 = vadd.f32 1e-06, %v551_v39 }
 0x27d   :  { %v595_v48 = vmul.f32 %v861_v17, %v1183_v36  ;;  %v568_v25 = vadd.f32 1e-06, %v552_v46  ;;  %v530_v18 = vpop.xlane.xlu0 %529 }
 0x27e   :  { %v620_v49 = vmul.f32 %v1291_v45, %v597_v30  ;;  %870 = vrsqrt.f32 %v567_v13  ;;  %v557_v51 = vmul.f32 0.03125, %v530_v18 }
 0x27f   :  { %v863_v53 = vpop.eup %862  ;;  %v618_v14 = vmul.f32 %v1291_v45, %v595_v48  ;;  %872 = vrsqrt.f32 %v568_v25  ;;  %v533_v50 = vpop.xlane.xlu1 %532 }
 0x280   :  { %v865_v63 = vpop.eup %864  ;;  %636 = vst.msk [vmem:[#allocation2 + $0x10] sm:$0xff] %vm72_vm0, %v620_v49  ;;  %v598_v10 = vmul.f32 %v863_v53, %v1187_v58  ;;  %v573_v56 = vadd.f32 1e-06, %v557_v51  ;;  %v558_v55 = vmul.f32 0.03125, %v533_v50 }
 0x281   :  { %634 = vst.msk [vmem:[#allocation2] sm:$0xff] %vm72_vm0, %v618_v14  ;;  %v596_v36 = vmul.f32 %v865_v63, %v1192_v44  ;;  %v524_v5 = vpop.xlane.xlu0 %523 }
 0x282   :  { %v621_v59 = vmul.f32 %v1291_v45, %v598_v10  ;;  %874 = vrsqrt.f32 %v573_v56  ;;  %v574_v62 = vadd.f32 1e-06, %v558_v55  ;;  %v555_v23 = vmul.f32 0.03125, %v524_v5 }
 0x283   :  { %v619_v19 = vmul.f32 %v1291_v45, %v596_v36  ;;  %v527_v37 = vpop.xlane.xlu1 %526 }
 0x284   :  { %v867_v6 = vpop.eup %866  ;;  %637 = vst.msk [vmem:[#allocation2 + $0x18] sm:$0xff] %vm72_vm0, %v621_v59  ;;  %876 = vrsqrt.f32 %v574_v62  ;;  %v571_v58 = vadd.f32 1e-06, %v555_v23  ;;  %v556_v24 = vmul.f32 0.03125, %v527_v37 }
 0x285   :  { %v869_v20 = vpop.eup %868  ;;  %635 = vst.msk [vmem:[#allocation2 + $0x8] sm:$0xff] %vm72_vm0, %v619_v19  ;;  %v601_v44 = vmul.f32 %v867_v6, %v1205_v9 }
 0x286   :  { %v602_v0 = vmul.f32 %v869_v20, %v1215_v29  ;;  %878 = vrsqrt.f32 %v571_v58  ;;  %v572_v1 = vadd.f32 1e-06, %v556_v24  ;;  %v536_v3 = vpop.xlane.xlu0 %535 }
 0x287   :  { %v624_v4 = vmul.f32 %v1291_v45, %v601_v44  ;;  %v559_v16 = vmul.f32 0.03125, %v536_v3 }
 0x288   :  { %v871_v21 = vpop.eup %870  ;;  %v625_v22 = vmul.f32 %v1291_v45, %v602_v0  ;;  %880 = vrsqrt.f32 %v572_v1  ;;  %v539_v27 = vpop.xlane.xlu1 %538 }
 0x289   :  { %v873_v28 = vpop.eup %872  ;;  %640 = vst.msk [vmem:[#allocation2 + $0x30] sm:$0xff] %vm72_vm0, %v624_v4  ;;  %v599_v11 = vmul.f32 %v871_v21, %v1210_v26  ;;  %v575_v57 = vadd.f32 1e-06, %v559_v16  ;;  %v560_v9 = vmul.f32 0.03125, %v539_v27 }
 0x28a   :  { %641 = vst.msk [vmem:[#allocation2 + $0x38] sm:$0xff] %vm72_vm0, %v625_v22  ;;  %v600_v29 = vmul.f32 %v873_v28, %v1220_v52  ;;  %v542_v7 = vpop.xlane.xlu0 %541 }
 0x28b   :  { %v622_v54 = vmul.f32 %v1291_v45, %v599_v11  ;;  %882 = vrsqrt.f32 %v575_v57  ;;  %v576_v31 = vadd.f32 1e-06, %v560_v9  ;;  %v561_v12 = vmul.f32 0.03125, %v542_v7 }
 0x28c   :  { %v875_v60 = vpop.eup %874  ;;  %v623_v32 = vmul.f32 %v1291_v45, %v600_v29  ;;  %v545_v33 = vpop.xlane.xlu1 %544 }
 0x28d   :  { %638 = vst.msk [vmem:[#allocation2 + $0x20] sm:$0xff] %vm72_vm0, %v622_v54  ;;  %v605_v26 = vmul.f32 %v875_v60, %v1233_v34  ;;  %884 = vrsqrt.f32 %v576_v31  ;;  %v577_v8 = vadd.f32 1e-06, %v561_v12  ;;  %v562_v35 = vmul.f32 0.03125, %v545_v33 }
 0x28e   :  { %v877_v39 = vpop.eup %876  ;;  %639 = vst.msk [vmem:[#allocation2 + $0x28] sm:$0xff] %vm72_vm0, %v623_v32 }
 0x28f   :  { %v628_v52 = vmul.f32 %v1291_v45, %v605_v26  ;;  %v606_v40 = vmul.f32 %v877_v39, %v1243_v47  ;;  %886 = vrsqrt.f32 %v577_v8  ;;  %v578_v42 = vadd.f32 1e-06, %v562_v35 }
 0x290   :  { %v879_v46 = vpop.eup %878 }
 0x291   :  { %644 = vst.msk [vmem:[#allocation2 + $0x50] sm:$0xff] %vm72_vm0, %v628_v52  ;;  %v629_v17 = vmul.f32 %v1291_v45, %v606_v40  ;;  %v603_v30 = vmul.f32 %v879_v46, %v1238_v43  ;;  %888 = vrsqrt.f32 %v578_v42 }
 0x292   :  { %v881_v34 = vpop.eup %880 }
 0x293   :  { %645 = vst.msk [vmem:[#allocation2 + $0x58] sm:$0xff] %vm72_vm0, %v629_v17  ;;  %v626_v13 = vmul.f32 %v1291_v45, %v603_v30  ;;  %v604_v48 = vmul.f32 %v881_v34, %v1248_v15 }
 0x295   :  { %v883_v25 = vpop.eup %882  ;;  %642 = vst.msk [vmem:[#allocation2 + $0x40] sm:$0xff] %vm72_vm0, %v626_v13  ;;  %v627_v47 = vmul.f32 %v1291_v45, %v604_v48 }
 0x296   :  { %v607_v18 = vmul.f32 %v883_v25, %v1266_v38 }
 0x297   :  { %v885_v49 = vpop.eup %884  ;;  %643 = vst.msk [vmem:[#allocation2 + $0x48] sm:$0xff] %vm72_vm0, %v627_v47 }
 0x298   :  { %v630_v43 = vmul.f32 %v1291_v45, %v607_v18  ;;  %v608_v51 = vmul.f32 %v885_v49, %v1274_v61 }
 0x299   :  { %v887_v53 = vpop.eup %886 }
 0x29a   :  { %646 = vst.msk [vmem:[#allocation2 + $0x60] sm:$0xff] %vm72_vm0, %v630_v43  ;;  %v631_v14 = vmul.f32 %v1291_v45, %v608_v51  ;;  %v609_v15 = vmul.f32 %v887_v53, %v1263_v41 }
 0x29b   :  { %v889_v50 = vpop.eup %888 }
 0x29c   :  { %647 = vst.msk [vmem:[#allocation2 + $0x68] sm:$0xff] %vm72_vm0, %v631_v14  ;;  %v632_v38 = vmul.f32 %v1291_v45, %v609_v15  ;;  %v610_v63 = vmul.f32 %v889_v50, %v1271_v2 }
 0x29e   :  { %648 = vst.msk [vmem:[#allocation2 + $0x70] sm:$0xff] %vm72_vm0, %v632_v38  ;;  %v633_v61 = vmul.f32 %v1291_v45, %v610_v63 }
 0x2a0   :  { %649 = vst.msk [vmem:[#allocation2 + $0x78] sm:$0xff] %vm72_vm0, %v633_v61 }
 0x2a1   :  { %901 = shalt.err (!%p898_p4)
}
 0x2a2   :  { %s902_s29 = scalar_lea.hbm %s1359_s6, 2048 }
 0x2a3   :  { %p903_p5 = scmp.ne.s32.totalorder %s1359_s6, %s902_s29  ;;  %p906_p6 = scmp.lt.u32.totalorder %s902_s29, %s1359_s6 }
 0x2a5   :  { %p908_p7 = pnand %p906_p6, %p903_p5 }
 0x2a7   :  { %911 = shalt.err (!%p908_p7)
}
 0x2a8   :  { %s915_s9 = smov 128   ;;  %s916_s10 = smov 8  }
 0x2a9   :  { %661 = dma.vmem_to_hbm [thread:$0]  %s656_s25, 2048, %s1359_s6, [#allocation3], %s915_s9, %s915_s9, %s916_s10  }
 0x2aa   :  { %912 = dma.done.wait [#allocation3], 2048  }
 0x2ab   :  { %913 = vsyncadd [#allocation3], 4294965248 }
 0x2ac   :  { %665 = vsyncpa [#allocation3], 1 }

// kernel: model_forward.26
= control target key start
LH: loop header
LB: loop body
LE: loop exit
PB: predicated region body
PF: predicated region fallthrough
CT: control target
= control target key end

     0   :  { %vm71_vm0 = vcmask 261120   ;;  %s1346_s1 = inlined_call_operand.vmem [shape: bf16[32,128], index: 1, kind: input, shape index: {}]   ;;  %s1347_s0 = inlined_call_operand.vmem [shape: f32[128,32], index: 0, kind: input, shape index: {}]   ;;  %s1348_s3 = inlined_call_operand.vmem [shape: bf16[128,32], index: 3, kind: input, shape index: {}]   ;;  %s1349_s2 = inlined_call_operand.vmem [shape: f32[1,128], index: 2, kind: input, shape index: {}]   ;;  %s1350_s4 = inlined_call_operand.vmem [shape: f32[1,32], index: 4, kind: input, shape index: {}]   ;;  %s1351_s5 = inlined_call_operand.vmem [shape: f32[1,32], index: 5, kind: input, shape index: {}]   ;;  %s1352_s6 = inlined_call_operand.vmem [shape: f32[128,32], index: 6, kind: output, shape index: {}]  }
   0x1   :  { %v768_v0 = vld [vmem:[%s1346_s1] sm:$0xff]   ;;  %v769_v1 = vld [vmem:[%s1346_s1 + $0x8] sm:$0xff]   ;;  %v930_v5 = vld [vmem:[%s1347_s0 + $0x10] sm:$0xff] }
   0x2   :  { %700 = vmatprep.subr.bf16.mxu0 %v768_v0  ;;  %v918_v2 = vld [vmem:[%s1347_s0] sm:$0xff]  ;;  %v923_v3 = vld [vmem:[%s1347_s0 + $0x8] sm:$0xff]  ;;  %v935_v6 = vld [vmem:[%s1347_s0 + $0x18] sm:$0xff] }
   0x3   :  { %701 = vmatpush3.bf16.msra.mxu0 %v768_v0  ;;  %v40_v4 = vpack.c.bf16 %v923_v3, %v918_v2  ;;  %v940_v7 = vld [vmem:[%s1347_s0 + $0x20] sm:$0xff]  ;;  %v945_v8 = vld [vmem:[%s1347_s0 + $0x28] sm:$0xff]  ;;  %v41_v9 = vpack.c.bf16 %v935_v6, %v930_v5  ;;  %v957_v11 = vld [vmem:[%s1347_s0 + $0x30] sm:$0xff] }
   0x4   :  { %702 = vmatprep.subr.bf16.mxu0 %v769_v1  ;;  %v42_v10 = vpack.c.bf16 %v945_v8, %v940_v7  ;;  %v962_v12 = vld [vmem:[%s1347_s0 + $0x38] sm:$0xff]  ;;  %v967_v13 = vld [vmem:[%s1347_s0 + $0x40] sm:$0xff]  ;;  %v972_v14 = vld [vmem:[%s1347_s0 + $0x48] sm:$0xff] }
   0x5   :  { %704 = vmatprep.mubr.msk.bf16.mxu0 %vm71_vm0, %v40_v4  ;;  %v43_v15 = vpack.c.bf16 %v962_v12, %v957_v11  ;;  %v44_v16 = vpack.c.bf16 %v972_v14, %v967_v13  ;;  %v983_v17 = vld [vmem:[%s1347_s0 + $0x50] sm:$0xff]  ;;  %v988_v18 = vld [vmem:[%s1347_s0 + $0x58] sm:$0xff]  ;;  %v993_v19 = vld [vmem:[%s1347_s0 + $0x60] sm:$0xff] }
   0x6   :  { %v998_v20 = vld [vmem:[%s1347_s0 + $0x68] sm:$0xff]  ;;  %v45_v21 = vpack.c.bf16 %v988_v18, %v983_v17  ;;  %v1009_v23 = vld [vmem:[%s1347_s0 + $0x70] sm:$0xff]  ;;  %v1014_v24 = vld [vmem:[%s1347_s0 + $0x78] sm:$0xff] }
   0x7   :  { %703 = vmatpush3.bf16.msra.mxu0 %v769_v1  ;;  %v46_v22 = vpack.c.bf16 %v998_v20, %v993_v19  ;;  %v47_v25 = vpack.c.bf16 %v1014_v24, %v1009_v23  ;;  %v770_v26 = vld [vmem:[%s1348_s3] sm:$0xff]   ;;  %v771_v27 = vld [vmem:[%s1348_s3 + $0x8] sm:$0xff]   ;;  %v772_v28 = vld [vmem:[%s1348_s3 + $0x10] sm:$0xff]  }
   0x8   :  { %720 = vmatprep.subr.bf16.mxu0 %v770_v26  ;;  %752 = vmatprep.subr.bf16.mxu1 %v770_v26  ;;  %v773_v29 = vld [vmem:[%s1348_s3 + $0x18] sm:$0xff]   ;;  %v774_v30 = vld [vmem:[%s1348_s3 + $0x20] sm:$0xff]   ;;  %v775_v31 = vld [vmem:[%s1348_s3 + $0x28] sm:$0xff]  }
   0x9   :  { %760 = vmatpush3.bf16.msra.mxu1 %v770_v26  ;;  %v776_v32 = vld [vmem:[%s1348_s3 + $0x30] sm:$0xff]   ;;  %v777_v33 = vld [vmem:[%s1348_s3 + $0x38] sm:$0xff]   ;;  %v1046_v34 = vld [vmem:[%s1349_s2] ss:$0 sm:$0xff] }
   0xa   :  { %705 = vmatmul.mubr.msk.bf16.vlgmr.msra.gmra.mrb[0].mxu0 %vm71_vm0, %v41_v9  ;;  %753 = vmatprep.subr.bf16.mxu1 %v771_v27 }
   0xb   :  { %708 = vmatprep.mubr.msk.bf16.mxu0 %vm71_vm0, %v42_v10  ;;  %721 = vmatpush3.bf16.msra.mxu0 %v770_v26 }
   0xc   :  { %722 = vmatprep.subr.bf16.mxu0 %v771_v27 }
   0xd   :  { %761 = vmatpush3.bf16.msra.mxu1 %v771_v27 }
   0xe   :  { %754 = vmatprep.subr.bf16.mxu1 %v772_v28 }
   0xf   :  { %723 = vmatpush3.bf16.msra.mxu0 %v771_v27 }
  0x10   :  { %724 = vmatprep.subr.bf16.mxu0 %v772_v28 }
  0x11   :  { %762 = vmatpush3.bf16.msra.mxu1 %v772_v28 }
  0x12   :  { %709 = vmatmul.mubr.msk.bf16.gmra.mrb[4].mxu0 %vm71_vm0, %v43_v15  ;;  %755 = vmatprep.subr.bf16.mxu1 %v773_v29 }
  0x13   :  { %712 = vmatprep.mubr.msk.bf16.mxu0 %vm71_vm0, %v44_v16  ;;  %725 = vmatpush3.bf16.msra.mxu0 %v772_v28 }
  0x14   :  { %726 = vmatprep.subr.bf16.mxu0 %v773_v29 }
  0x15   :  { %763 = vmatpush3.bf16.msra.mxu1 %v773_v29 }
  0x16   :  { %756 = vmatprep.subr.bf16.mxu1 %v774_v30 }
  0x17   :  { %727 = vmatpush3.bf16.msra.mxu0 %v773_v29 }
  0x18   :  { %728 = vmatprep.subr.bf16.mxu0 %v774_v30 }
  0x19   :  { %764 = vmatpush3.bf16.msra.mxu1 %v774_v30 }
  0x1a   :  { %713 = vmatmul.mubr.msk.bf16.gmra.mrb[8].mxu0 %vm71_vm0, %v45_v21  ;;  %757 = vmatprep.subr.bf16.mxu1 %v775_v31 }
  0x1b   :  { %716 = vmatprep.mubr.msk.bf16.mxu0 %vm71_vm0, %v46_v22  ;;  %729 = vmatpush3.bf16.msra.mxu0 %v774_v30 }
  0x1c   :  { %730 = vmatprep.subr.bf16.mxu0 %v775_v31 }
  0x1d   :  { %765 = vmatpush3.bf16.msra.mxu1 %v775_v31 }
  0x1e   :  { %758 = vmatprep.subr.bf16.mxu1 %v776_v32 }
  0x1f   :  { %731 = vmatpush3.bf16.msra.mxu0 %v775_v31 }
  0x20   :  { %732 = vmatprep.subr.bf16.mxu0 %v776_v32 }
  0x21   :  { %766 = vmatpush3.bf16.msra.mxu1 %v776_v32 }
  0x22   :  { %717 = vmatmul.mubr.msk.bf16.gmra.mrb[12].mxu0 %vm71_vm0, %v47_v25  ;;  %759 = vmatprep.subr.bf16.mxu1 %v777_v33 }
  0x23   :  { %733 = vmatpush3.bf16.msra.mxu0 %v776_v32 }
  0x24   :  { %734 = vmatprep.subr.bf16.mxu0 %v777_v33 }
  0x25   :  { %767 = vmatpush3.bf16.msra.mxu1 %v777_v33 }
  0x27   :  { %735 = vmatpush3.bf16.msra.mxu0 %v777_v33 }
  0xdd   :  { %v706_v35 = vpop.f32.mrb[0].mxu0 }
  0xde   :  { %v1049_v36 = vadd.f32 %v706_v35, %v1046_v34  ;;  %v130_v37 = vpop.f32.mrb[1].mxu0 }
  0xdf   :  { %v1052_v38 = vadd.f32 %v1046_v34, %v130_v37  ;;  %v707_v39 = vpop.f32.mrb[2].mxu0 }
  0xe0   :  { %v195_v40 = vsub.f32 0.0, %v1049_v36  ;;  %v1056_v41 = vadd.f32 %v707_v39, %v1046_v34  ;;  %v133_v42 = vpop.f32.mrb[3].mxu0 }
  0xe1   :  { %v193_v43 = vsub.f32 0.0, %v1052_v38  ;;  %v1060_v44 = vadd.f32 %v1046_v34, %v133_v42 }
  0xe2   :  { %v213_v45 = vmul.f32 1.442695, %v195_v40  ;;  %v196_v46 = vsub.f32 0.0, %v1056_v41 }
  0xe3   :  { %v209_v47 = vmul.f32 1.442695, %v193_v43  ;;  %v194_v48 = vsub.f32 0.0, %v1060_v44 }
  0xe4   :  { %778 = vpow2.f32 %v213_v45  ;;  %v215_v49 = vmul.f32 1.442695, %v196_v46 }
  0xe5   :  { %780 = vpow2.f32 %v209_v47  ;;  %v211_v50 = vmul.f32 1.442695, %v194_v48  ;;  %v710_v51 = vpop.f32.mrb[4].mxu0 }
  0xe6   :  { %782 = vpow2.f32 %v215_v49  ;;  %v1065_v52 = vadd.f32 %v710_v51, %v1046_v34  ;;  %v146_v53 = vpop.f32.mrb[5].mxu0 }
  0xe7   :  { %784 = vpow2.f32 %v211_v50  ;;  %v1068_v54 = vadd.f32 %v1046_v34, %v146_v53  ;;  %v711_v55 = vpop.f32.mrb[6].mxu0 }
  0xe8   :  { %v199_v56 = vsub.f32 0.0, %v1065_v52  ;;  %v1072_v57 = vadd.f32 %v711_v55, %v1046_v34  ;;  %v149_v58 = vpop.f32.mrb[7].mxu0 }
  0xe9   :  { %v197_v59 = vsub.f32 0.0, %v1068_v54  ;;  %v1076_v60 = vadd.f32 %v1046_v34, %v149_v58 }
  0xea   :  { %v221_v61 = vmul.f32 1.442695, %v199_v56  ;;  %v200_v62 = vsub.f32 0.0, %v1072_v57 }
  0xeb   :  { %v217_v63 = vmul.f32 1.442695, %v197_v59  ;;  %v198_v0 = vsub.f32 0.0, %v1076_v60 }
  0xec   :  { %786 = vpow2.f32 %v221_v61  ;;  %v223_v1 = vmul.f32 1.442695, %v200_v62 }
  0xed   :  { %788 = vpow2.f32 %v217_v63  ;;  %v219_v4 = vmul.f32 1.442695, %v198_v0  ;;  %v714_v9 = vpop.f32.mrb[8].mxu0 }
  0xee   :  { %v779_v10 = vpop.eup %778  ;;  %790 = vpow2.f32 %v223_v1  ;;  %v1081_v15 = vadd.f32 %v714_v9, %v1046_v34  ;;  %v162_v16 = vpop.f32.mrb[9].mxu0 }
  0xef   :  { %v781_v21 = vpop.eup %780  ;;  %v243_v22 = vadd.f32 1.0, %v779_v10  ;;  %792 = vpow2.f32 %v219_v4  ;;  %v1084_v25 = vadd.f32 %v1046_v34, %v162_v16  ;;  %v715_v26 = vpop.f32.mrb[10].mxu0 }
  0xf0   :  { %v783_v27 = vpop.eup %782  ;;  %v241_v28 = vadd.f32 1.0, %v781_v21  ;;  %v203_v29 = vsub.f32 0.0, %v1081_v15  ;;  %v1088_v30 = vadd.f32 %v715_v26, %v1046_v34  ;;  %v165_v31 = vpop.f32.mrb[11].mxu0 }
  0xf1   :  { %v785_v32 = vpop.eup %784  ;;  %794 = vrcp.f32 %v243_v22  ;;  %v244_v33 = vadd.f32 1.0, %v783_v27  ;;  %v201_v35 = vsub.f32 0.0, %v1084_v25  ;;  %v1092_v37 = vadd.f32 %v1046_v34, %v165_v31 }
  0xf2   :  { %796 = vrcp.f32 %v241_v28  ;;  %v242_v39 = vadd.f32 1.0, %v785_v32  ;;  %v229_v40 = vmul.f32 1.442695, %v203_v29  ;;  %v204_v42 = vsub.f32 0.0, %v1088_v30 }
  0xf3   :  { %798 = vrcp.f32 %v244_v33  ;;  %v225_v43 = vmul.f32 1.442695, %v201_v35  ;;  %v202_v45 = vsub.f32 0.0, %v1092_v37 }
  0xf4   :  { %800 = vrcp.f32 %v242_v39  ;;  %v231_v46 = vmul.f32 1.442695, %v204_v42 }
  0xf5   :  { %802 = vpow2.f32 %v229_v40  ;;  %v227_v47 = vmul.f32 1.442695, %v202_v45  ;;  %v718_v48 = vpop.f32.mrb[12].mxu0 }
  0xf6   :  { %v787_v49 = vpop.eup %786  ;;  %804 = vpow2.f32 %v225_v43  ;;  %v1097_v50 = vadd.f32 %v718_v48, %v1046_v34  ;;  %v178_v51 = vpop.f32.mrb[13].mxu0 }
  0xf7   :  { %v789_v53 = vpop.eup %788  ;;  %v247_v55 = vadd.f32 1.0, %v787_v49  ;;  %806 = vpow2.f32 %v231_v46  ;;  %v1100_v56 = vadd.f32 %v1046_v34, %v178_v51  ;;  %v719_v58 = vpop.f32.mrb[14].mxu0 }
  0xf8   :  { %v791_v59 = vpop.eup %790  ;;  %v245_v61 = vadd.f32 1.0, %v789_v53  ;;  %808 = vpow2.f32 %v227_v47  ;;  %v207_v62 = vsub.f32 0.0, %v1097_v50  ;;  %v1104_v63 = vadd.f32 %v719_v58, %v1046_v34  ;;  %v181_v0 = vpop.f32.mrb[15].mxu0 }
  0xf9   :  { %v793_v1 = vpop.eup %792  ;;  %810 = vrcp.f32 %v247_v55  ;;  %v248_v4 = vadd.f32 1.0, %v791_v59  ;;  %v205_v9 = vsub.f32 0.0, %v1100_v56  ;;  %v1108_v10 = vadd.f32 %v1046_v34, %v181_v0 }
  0xfa   :  { %812 = vrcp.f32 %v245_v61  ;;  %v246_v16 = vadd.f32 1.0, %v793_v1  ;;  %v237_v21 = vmul.f32 1.442695, %v207_v62  ;;  %v208_v22 = vsub.f32 0.0, %v1104_v63 }
  0xfb   :  { %v795_v26 = vpop.eup %794  ;;  %814 = vrcp.f32 %v248_v4  ;;  %v233_v27 = vmul.f32 1.442695, %v205_v9  ;;  %v206_v28 = vsub.f32 0.0, %v1108_v10 }
  0xfc   :  { %v797_v29 = vpop.eup %796  ;;  %816 = vrcp.f32 %v246_v16  ;;  %v239_v31 = vmul.f32 1.442695, %v208_v22  ;;  %v262_v34 = vmul.f32 %v795_v26, %v1049_v36 }
  0xfd   :  { %v799_v32 = vpop.eup %798  ;;  %818 = vpow2.f32 %v237_v21  ;;  %v235_v33 = vmul.f32 1.442695, %v206_v28  ;;  %v258_v42 = vmul.f32 %v797_v29, %v1052_v38 }
  0xfe   :  { %v801_v35 = vpop.eup %800  ;;  %v264_v39 = vmul.f32 %v799_v32, %v1056_v41  ;;  %820 = vpow2.f32 %v233_v27 }
  0xff   :  { %v803_v40 = vpop.eup %802  ;;  %v260_v43 = vmul.f32 %v801_v35, %v1060_v44  ;;  %822 = vpow2.f32 %v239_v31 }
 0x100   :  { %v805_v45 = vpop.eup %804  ;;  %v290_v46 = vpack.c.bf16 %v264_v39, %v262_v34  ;;  %v251_v47 = vadd.f32 1.0, %v803_v40  ;;  %824 = vpow2.f32 %v235_v33 }
 0x101   :  { %v807_v48 = vpop.eup %806  ;;  %v249_v49 = vadd.f32 1.0, %v805_v45  ;;  %v289_v51 = vpack.c.bf16 %v260_v43, %v258_v42 }
 0x102   :  { %v809_v53 = vpop.eup %808  ;;  %826 = vrcp.f32 %v251_v47  ;;  %v252_v55 = vadd.f32 1.0, %v807_v48 }
 0x103   :  { %v811_v36 = vpop.eup %810  ;;  %828 = vrcp.f32 %v249_v49  ;;  %v250_v41 = vadd.f32 1.0, %v809_v53  ;;  %736 = vmatprep.mubr.bf16.mxu0 %v289_v51 }
 0x104   :  { %v813_v58 = vpop.eup %812  ;;  %830 = vrcp.f32 %v252_v55  ;;  %737 = vmatmul.mubr.bf16.vlgmr.msra.gmra.mrb[16].mxu0 %v290_v46  ;;  %v270_v59 = vmul.f32 %v811_v36, %v1065_v52 }
 0x105   :  { %v815_v38 = vpop.eup %814  ;;  %832 = vrcp.f32 %v250_v41  ;;  %v266_v0 = vmul.f32 %v813_v58, %v1068_v54 }
 0x106   :  { %v817_v44 = vpop.eup %816  ;;  %v272_v61 = vmul.f32 %v815_v38, %v1072_v57 }
 0x107   :  { %v819_v62 = vpop.eup %818  ;;  %v268_v1 = vmul.f32 %v817_v44, %v1076_v60 }
 0x108   :  { %v821_v4 = vpop.eup %820  ;;  %v255_v9 = vadd.f32 1.0, %v819_v62  ;;  %v292_v16 = vpack.c.bf16 %v272_v61, %v270_v59 }
 0x109   :  { %v823_v21 = vpop.eup %822  ;;  %v253_v22 = vadd.f32 1.0, %v821_v4  ;;  %v291_v26 = vpack.c.bf16 %v268_v1, %v266_v0 }
 0x10a   :  { %v825_v27 = vpop.eup %824  ;;  %834 = vrcp.f32 %v255_v9  ;;  %v256_v28 = vadd.f32 1.0, %v823_v21 }
 0x10b   :  { %836 = vrcp.f32 %v253_v22  ;;  %v254_v29 = vadd.f32 1.0, %v825_v27  ;;  %740 = vmatprep.mubr.bf16.mxu1 %v291_v26 }
 0x10c   :  { %v827_v52 = vpop.eup %826  ;;  %838 = vrcp.f32 %v256_v28  ;;  %741 = vmatmul.mubr.bf16.vlgmr.msra.gmra.mrb[0].mxu1 %v292_v16 }
 0x10d   :  { %v829_v57 = vpop.eup %828  ;;  %840 = vrcp.f32 %v254_v29  ;;  %v278_v60 = vmul.f32 %v827_v52, %v1081_v15 }
 0x10e   :  { %v831_v54 = vpop.eup %830  ;;  %v274_v33 = vmul.f32 %v829_v57, %v1084_v25 }
 0x10f   :  { %v833_v31 = vpop.eup %832  ;;  %v280_v32 = vmul.f32 %v831_v54, %v1088_v30 }
 0x110   :  { %v276_v35 = vmul.f32 %v833_v31, %v1092_v37  ;;  %v1131_v37 = vld [vmem:[%s1350_s4] ss:$0 sm:$0xff] }
 0x111   :  { %v294_v34 = vpack.c.bf16 %v280_v32, %v278_v60 }
 0x112   :  { %v293_v39 = vpack.c.bf16 %v276_v35, %v274_v33 }
 0x114   :  { %v835_v40 = vpop.eup %834  ;;  %744 = vmatprep.mubr.bf16.mxu1 %v293_v39 }
 0x115   :  { %v837_v42 = vpop.eup %836  ;;  %745 = vmatmul.mubr.bf16.gmra.mrb[4].mxu1 %v294_v34  ;;  %v286_v46 = vmul.f32 %v835_v40, %v1097_v50 }
 0x116   :  { %v839_v43 = vpop.eup %838  ;;  %v282_v15 = vmul.f32 %v837_v42, %v1100_v56 }
 0x117   :  { %v841_v45 = vpop.eup %840  ;;  %v288_v47 = vmul.f32 %v839_v43, %v1104_v63 }
 0x118   :  { %v284_v30 = vmul.f32 %v841_v45, %v1108_v10 }
 0x119   :  { %v296_v48 = vpack.c.bf16 %v288_v47, %v286_v46 }
 0x11a   :  { %v295_v25 = vpack.c.bf16 %v284_v30, %v282_v15 }
 0x11c   :  { %748 = vmatprep.mubr.bf16.mxu1 %v295_v25 }
 0x11d   :  { %749 = vmatmul.mubr.bf16.gmra.mrb[8].mxu1 %v296_v48 }
 0x1d7   :  { %v738_v49 = vpop.f32.mrb[16].mxu0 }
 0x1d8   :  { %v411_v51 = vadd.f32 %v738_v49, %v1131_v37  ;;  %v402_v53 = vpop.f32.mrb[17].mxu0 }
 0x1d9   :  { %v403_v50 = vadd.f32 %v1131_v37, %v402_v53  ;;  %v739_v63 = vpop.f32.mrb[18].mxu0 }
 0x1da   :  { %v1136_v56 = vadd.f32 %v411_v51, %v930_v5  ;;  %v414_v10 = vadd.f32 %v739_v63, %v1131_v37  ;;  %v405_v55 = vpop.f32.mrb[19].mxu0 }
 0x1db   :  { %v1140_v36 = vadd.f32 %v403_v50, %v918_v2  ;;  %v406_v41 = vadd.f32 %v1131_v37, %v405_v55 }
 0x1dc   :  { %v1144_v58 = vadd.f32 %v414_v10, %v935_v6  ;;  %v483_v38 = vmul.f32 %v1136_v56, %v1136_v56 }
 0x1dd   :  { %v1149_v44 = vadd.f32 %v406_v41, %v923_v3  ;;  %v481_v5 = vmul.f32 %v1140_v36, %v1140_v36 }
 0x1de   :  { %v503_v59 = vsel %vm71_vm0, %v483_v38, 0.0  ;;  %v484_v2 = vmul.f32 %v1144_v58, %v1144_v58 }
 0x1df   :  { %v742_v61 = vpop.f32.mrb[0].mxu1  ;;  %504 = vadd.xlane.f32.xlu1 %v503_v59  ;;  %v497_v62 = vsel %vm71_vm0, %v481_v5, 0.0  ;;  %v482_v6 = vmul.f32 %v1149_v44, %v1149_v44 }
 0x1e0   :  { %v427_v0 = vadd.f32 %v742_v61, %v1131_v37  ;;  %v418_v1 = vpop.f32.mrb[1].mxu1  ;;  %498 = vadd.xlane.f32.xlu0 %v497_v62  ;;  %v506_v22 = vsel %vm71_vm0, %v484_v2, 0.0 }
 0x1e1   :  { %v419_v3 = vadd.f32 %v1131_v37, %v418_v1  ;;  %v743_v4 = vpop.f32.mrb[2].mxu1  ;;  %v500_v28 = vsel %vm71_vm0, %v482_v6, 0.0 }
 0x1e2   :  { %v1162_v9 = vadd.f32 %v427_v0, %v957_v11  ;;  %v430_v16 = vadd.f32 %v743_v4, %v1131_v37  ;;  %v421_v21 = vpop.f32.mrb[3].mxu1 }
 0x1e3   :  { %v1167_v26 = vadd.f32 %v419_v3, %v940_v7  ;;  %v422_v27 = vadd.f32 %v1131_v37, %v421_v21  ;;  %507 = vadd.xlane.f32.xlu1 %v506_v22 }
 0x1e4   :  { %v1172_v29 = vadd.f32 %v430_v16, %v962_v12  ;;  %501 = vadd.xlane.f32.xlu0 %v500_v28  ;;  %v487_v11 = vmul.f32 %v1162_v9, %v1162_v9 }
 0x1e5   :  { %v1177_v52 = vadd.f32 %v422_v27, %v945_v8  ;;  %v485_v54 = vmul.f32 %v1167_v26, %v1167_v26 }
 0x1e6   :  { %v515_v57 = vsel %vm71_vm0, %v487_v11, 0.0  ;;  %v488_v7 = vmul.f32 %v1172_v29, %v1172_v29 }
 0x1e7   :  { %v486_v60 = vmul.f32 %v1177_v52, %v1177_v52  ;;  %v509_v42 = vsel %vm71_vm0, %v485_v54, 0.0 }
 0x1e8   :  { %v746_v31 = vpop.f32.mrb[4].mxu1  ;;  %516 = vadd.xlane.f32.xlu0 %v515_v57  ;;  %v518_v12 = vsel %vm71_vm0, %v488_v7, 0.0 }
 0x1e9   :  { %v443_v32 = vadd.f32 %v746_v31, %v1131_v37  ;;  %v434_v33 = vpop.f32.mrb[5].mxu1  ;;  %519 = vadd.xlane.f32.xlu1 %v518_v12  ;;  %v512_v46 = vsel %vm71_vm0, %v486_v60, 0.0 }
 0x1ea   :  { %v435_v8 = vadd.f32 %v1131_v37, %v434_v33  ;;  %v747_v35 = vpop.f32.mrb[6].mxu1 }
 0x1eb   :  { %v1190_v34 = vadd.f32 %v443_v32, %v983_v17  ;;  %v446_v39 = vadd.f32 %v747_v35, %v1131_v37  ;;  %v437_v40 = vpop.f32.mrb[7].mxu1 }
 0x1ec   :  { %v1195_v43 = vadd.f32 %v435_v8, %v967_v13  ;;  %v438_v45 = vadd.f32 %v1131_v37, %v437_v40  ;;  %510 = vadd.xlane.f32.xlu0 %v509_v42 }
 0x1ed   :  { %v1200_v47 = vadd.f32 %v446_v39, %v988_v18  ;;  %513 = vadd.xlane.f32.xlu1 %v512_v46  ;;  %v491_v17 = vmul.f32 %v1190_v34, %v1190_v34 }
 0x1ee   :  { %v1205_v15 = vadd.f32 %v438_v45, %v972_v14  ;;  %v489_v48 = vmul.f32 %v1195_v43, %v1195_v43  ;;  %v1248_v45 = vld [vmem:[%s1351_s5] ss:$0 sm:$0xff] }
 0x1ef   :  { %v527_v30 = vsel %vm71_vm0, %v491_v17, 0.0  ;;  %v492_v13 = vmul.f32 %v1200_v47, %v1200_v47 }
 0x1f0   :  { %v750_v25 = vpop.f32.mrb[8].mxu1  ;;  %528 = vadd.xlane.f32.xlu0 %v527_v30  ;;  %v490_v53 = vmul.f32 %v1205_v15, %v1205_v15  ;;  %v521_v55 = vsel %vm71_vm0, %v489_v48, 0.0 }
 0x1f1   :  { %v459_v18 = vadd.f32 %v750_v25, %v1131_v37  ;;  %v450_v49 = vpop.f32.mrb[9].mxu1  ;;  %v530_v51 = vsel %vm71_vm0, %v492_v13, 0.0 }
 0x1f2   :  { %v451_v14 = vadd.f32 %v1131_v37, %v450_v49  ;;  %v751_v50 = vpop.f32.mrb[10].mxu1  ;;  %531 = vadd.xlane.f32.xlu1 %v530_v51  ;;  %v524_v59 = vsel %vm71_vm0, %v490_v53, 0.0 }
 0x1f3   :  { %v462_v63 = vadd.f32 %v751_v50, %v1131_v37  ;;  %v453_v10 = vpop.f32.mrb[11].mxu1  ;;  %v1220_v41 = vadd.f32 %v459_v18, %v1009_v23 }
 0x1f4   :  { %v1223_v38 = vadd.f32 %v451_v14, %v993_v19  ;;  %v454_v5 = vadd.f32 %v1131_v37, %v453_v10  ;;  %522 = vadd.xlane.f32.xlu0 %v521_v55 }
 0x1f5   :  { %v1228_v2 = vadd.f32 %v462_v63, %v1014_v24  ;;  %v495_v37 = vmul.f32 %v1220_v41, %v1220_v41 }
 0x1f6   :  { %v1231_v61 = vadd.f32 %v454_v5, %v998_v20  ;;  %525 = vadd.xlane.f32.xlu1 %v524_v59  ;;  %v493_v62 = vmul.f32 %v1223_v38, %v1223_v38 }
 0x1f7   :  { %v496_v24 = vmul.f32 %v1228_v2, %v1228_v2  ;;  %v539_v20 = vsel %vm71_vm0, %v495_v37, 0.0 }
 0x1f8   :  { %v533_v23 = vsel %vm71_vm0, %v493_v62, 0.0  ;;  %v494_v19 = vmul.f32 %v1231_v61, %v1231_v61 }
 0x1f9   :  { %534 = vadd.xlane.f32.xlu0 %v533_v23  ;;  %v542_v0 = vsel %vm71_vm0, %v496_v24, 0.0 }
 0x1fa   :  { %v536_v6 = vsel %vm71_vm0, %v494_v19, 0.0 }
 0x1fb   :  { %537 = vadd.xlane.f32.xlu1 %v536_v6 }
 0x1fd   :  { %540 = vadd.xlane.f32.xlu0 %v539_v20 }
 0x1ff   :  { %543 = vadd.xlane.f32.xlu1 %v542_v0 }
 0x26c   :  { %v505_v1 = vpop.xlane.xlu1 %504 }
 0x26d   :  { %v548_v3 = vmul.f32 0.03125, %v505_v1  ;;  %v499_v4 = vpop.xlane.xlu0 %498 }
 0x26e   :  { %v546_v16 = vmul.f32 0.03125, %v499_v4 }
 0x26f   :  { %v564_v21 = vadd.f32 1e-06, %v548_v3 }
 0x270   :  { %v562_v22 = vadd.f32 1e-06, %v546_v16  ;;  %v508_v27 = vpop.xlane.xlu1 %507 }
 0x271   :  { %842 = vrsqrt.f32 %v564_v21  ;;  %v549_v28 = vmul.f32 0.03125, %v508_v27  ;;  %v502_v11 = vpop.xlane.xlu0 %501 }
 0x272   :  { %844 = vrsqrt.f32 %v562_v22  ;;  %v547_v57 = vmul.f32 0.03125, %v502_v11 }
 0x273   :  { %v565_v7 = vadd.f32 1e-06, %v549_v28 }
 0x274   :  { %v563_v54 = vadd.f32 1e-06, %v547_v57 }
 0x275   :  { %846 = vrsqrt.f32 %v565_v7  ;;  %v517_v31 = vpop.xlane.xlu0 %516 }
 0x276   :  { %848 = vrsqrt.f32 %v563_v54  ;;  %v552_v12 = vmul.f32 0.03125, %v517_v31  ;;  %v520_v60 = vpop.xlane.xlu1 %519 }
 0x277   :  { %v553_v32 = vmul.f32 0.03125, %v520_v60 }
 0x278   :  { %v568_v33 = vadd.f32 1e-06, %v552_v12 }
 0x279   :  { %v569_v8 = vadd.f32 1e-06, %v553_v32  ;;  %v511_v35 = vpop.xlane.xlu0 %510 }
 0x27a   :  { %850 = vrsqrt.f32 %v568_v33  ;;  %v550_v39 = vmul.f32 0.03125, %v511_v35  ;;  %v514_v40 = vpop.xlane.xlu1 %513 }
 0x27b   :  { %v843_v42 = vpop.eup %842  ;;  %852 = vrsqrt.f32 %v569_v8  ;;  %v551_v46 = vmul.f32 0.03125, %v514_v40 }
 0x27c   :  { %v845_v17 = vpop.eup %844  ;;  %v596_v30 = vmul.f32 %v843_v42, %v1136_v56  ;;  %v566_v13 = vadd.f32 1e-06, %v550_v39 }
 0x27d   :  { %v594_v48 = vmul.f32 %v845_v17, %v1140_v36  ;;  %v567_v25 = vadd.f32 1e-06, %v551_v46  ;;  %v529_v18 = vpop.xlane.xlu0 %528 }
 0x27e   :  { %v619_v49 = vmul.f32 %v1248_v45, %v596_v30  ;;  %854 = vrsqrt.f32 %v566_v13  ;;  %v556_v51 = vmul.f32 0.03125, %v529_v18 }
 0x27f   :  { %v847_v53 = vpop.eup %846  ;;  %v617_v14 = vmul.f32 %v1248_v45, %v594_v48  ;;  %856 = vrsqrt.f32 %v567_v25  ;;  %v532_v50 = vpop.xlane.xlu1 %531 }
 0x280   :  { %v849_v63 = vpop.eup %848  ;;  %635 = vst.msk [vmem:[%s1352_s6 + $0x10] sm:$0xff] %vm71_vm0, %v619_v49  ;;  %v597_v56 = vmul.f32 %v847_v53, %v1144_v58  ;;  %v572_v36 = vadd.f32 1e-06, %v556_v51  ;;  %v557_v10 = vmul.f32 0.03125, %v532_v50 }
 0x281   :  { %633 = vst.msk [vmem:[%s1352_s6] sm:$0xff] %vm71_vm0, %v617_v14  ;;  %v595_v55 = vmul.f32 %v849_v63, %v1149_v44  ;;  %v523_v5 = vpop.xlane.xlu0 %522 }
 0x282   :  { %v620_v59 = vmul.f32 %v1248_v45, %v597_v56  ;;  %858 = vrsqrt.f32 %v572_v36  ;;  %v573_v62 = vadd.f32 1e-06, %v557_v10  ;;  %v554_v23 = vmul.f32 0.03125, %v523_v5 }
 0x283   :  { %v618_v19 = vmul.f32 %v1248_v45, %v595_v55  ;;  %v526_v37 = vpop.xlane.xlu1 %525 }
 0x284   :  { %v851_v6 = vpop.eup %850  ;;  %636 = vst.msk [vmem:[%s1352_s6 + $0x18] sm:$0xff] %vm71_vm0, %v620_v59  ;;  %860 = vrsqrt.f32 %v573_v62  ;;  %v570_v58 = vadd.f32 1e-06, %v554_v23  ;;  %v555_v24 = vmul.f32 0.03125, %v526_v37 }
 0x285   :  { %v853_v20 = vpop.eup %852  ;;  %634 = vst.msk [vmem:[%s1352_s6 + $0x8] sm:$0xff] %vm71_vm0, %v618_v19  ;;  %v600_v44 = vmul.f32 %v851_v6, %v1162_v9 }
 0x286   :  { %v601_v0 = vmul.f32 %v853_v20, %v1172_v29  ;;  %862 = vrsqrt.f32 %v570_v58  ;;  %v571_v1 = vadd.f32 1e-06, %v555_v24  ;;  %v535_v3 = vpop.xlane.xlu0 %534 }
 0x287   :  { %v623_v4 = vmul.f32 %v1248_v45, %v600_v44  ;;  %v558_v16 = vmul.f32 0.03125, %v535_v3 }
 0x288   :  { %v855_v21 = vpop.eup %854  ;;  %v624_v22 = vmul.f32 %v1248_v45, %v601_v0  ;;  %864 = vrsqrt.f32 %v571_v1  ;;  %v538_v27 = vpop.xlane.xlu1 %537 }
 0x289   :  { %v857_v28 = vpop.eup %856  ;;  %639 = vst.msk [vmem:[%s1352_s6 + $0x30] sm:$0xff] %vm71_vm0, %v623_v4  ;;  %v598_v9 = vmul.f32 %v855_v21, %v1167_v26  ;;  %v574_v29 = vadd.f32 1e-06, %v558_v16  ;;  %v559_v11 = vmul.f32 0.03125, %v538_v27 }
 0x28a   :  { %640 = vst.msk [vmem:[%s1352_s6 + $0x38] sm:$0xff] %vm71_vm0, %v624_v22  ;;  %v599_v57 = vmul.f32 %v857_v28, %v1177_v52  ;;  %v541_v7 = vpop.xlane.xlu0 %540 }
 0x28b   :  { %v621_v54 = vmul.f32 %v1248_v45, %v598_v9  ;;  %866 = vrsqrt.f32 %v574_v29  ;;  %v575_v31 = vadd.f32 1e-06, %v559_v11  ;;  %v560_v12 = vmul.f32 0.03125, %v541_v7 }
 0x28c   :  { %v859_v60 = vpop.eup %858  ;;  %v622_v32 = vmul.f32 %v1248_v45, %v599_v57  ;;  %v544_v33 = vpop.xlane.xlu1 %543 }
 0x28d   :  { %637 = vst.msk [vmem:[%s1352_s6 + $0x20] sm:$0xff] %vm71_vm0, %v621_v54  ;;  %v604_v26 = vmul.f32 %v859_v60, %v1190_v34  ;;  %868 = vrsqrt.f32 %v575_v31  ;;  %v576_v8 = vadd.f32 1e-06, %v560_v12  ;;  %v561_v52 = vmul.f32 0.03125, %v544_v33 }
 0x28e   :  { %v861_v35 = vpop.eup %860  ;;  %638 = vst.msk [vmem:[%s1352_s6 + $0x28] sm:$0xff] %vm71_vm0, %v622_v32 }
 0x28f   :  { %v627_v39 = vmul.f32 %v1248_v45, %v604_v26  ;;  %v605_v40 = vmul.f32 %v861_v35, %v1200_v47  ;;  %870 = vrsqrt.f32 %v576_v8  ;;  %v577_v42 = vadd.f32 1e-06, %v561_v52 }
 0x290   :  { %v863_v46 = vpop.eup %862 }
 0x291   :  { %643 = vst.msk [vmem:[%s1352_s6 + $0x50] sm:$0xff] %vm71_vm0, %v627_v39  ;;  %v628_v34 = vmul.f32 %v1248_v45, %v605_v40  ;;  %v602_v17 = vmul.f32 %v863_v46, %v1195_v43  ;;  %872 = vrsqrt.f32 %v577_v42 }
 0x292   :  { %v865_v30 = vpop.eup %864 }
 0x293   :  { %644 = vst.msk [vmem:[%s1352_s6 + $0x58] sm:$0xff] %vm71_vm0, %v628_v34  ;;  %v625_v47 = vmul.f32 %v1248_v45, %v602_v17  ;;  %v603_v13 = vmul.f32 %v865_v30, %v1205_v15 }
 0x295   :  { %v867_v48 = vpop.eup %866  ;;  %641 = vst.msk [vmem:[%s1352_s6 + $0x40] sm:$0xff] %vm71_vm0, %v625_v47  ;;  %v626_v25 = vmul.f32 %v1248_v45, %v603_v13 }
 0x296   :  { %v606_v43 = vmul.f32 %v867_v48, %v1223_v38 }
 0x297   :  { %v869_v18 = vpop.eup %868  ;;  %642 = vst.msk [vmem:[%s1352_s6 + $0x48] sm:$0xff] %vm71_vm0, %v626_v25 }
 0x298   :  { %v629_v49 = vmul.f32 %v1248_v45, %v606_v43  ;;  %v607_v15 = vmul.f32 %v869_v18, %v1231_v61 }
 0x299   :  { %v871_v51 = vpop.eup %870 }
 0x29a   :  { %645 = vst.msk [vmem:[%s1352_s6 + $0x60] sm:$0xff] %vm71_vm0, %v629_v49  ;;  %v630_v53 = vmul.f32 %v1248_v45, %v607_v15  ;;  %v608_v38 = vmul.f32 %v871_v51, %v1220_v41 }
 0x29b   :  { %v873_v14 = vpop.eup %872 }
 0x29c   :  { %646 = vst.msk [vmem:[%s1352_s6 + $0x68] sm:$0xff] %vm71_vm0, %v630_v53  ;;  %v631_v50 = vmul.f32 %v1248_v45, %v608_v38  ;;  %v609_v61 = vmul.f32 %v873_v14, %v1228_v2 }
 0x29e   :  { %647 = vst.msk [vmem:[%s1352_s6 + $0x70] sm:$0xff] %vm71_vm0, %v631_v50  ;;  %v632_v63 = vmul.f32 %v1248_v45, %v609_v61 }
 0x2a0   :  { %648 = vst.msk [vmem:[%s1352_s6 + $0x78] sm:$0xff] %vm71_vm0, %v632_v63 }

</bundles_post_ra>
